<compile_context>
chip_gen: v7x
topology: tpu7x:2x2x1
jax: 0.10.0
libtpu: 0.0.40
codegen_flags: <defaults>
</compile_context>

<pallas_src>
import functools

import numpy as np
import jax
import jax.numpy as jnp
from jax.experimental import pallas as pl
from jax.experimental.pallas import tpu as pltpu

LEAKY_SLOPE = 0.05


# ----------------------------------------------------------------------------
# In-kernel building blocks (operate on VMEM values, one batch element each)
# ----------------------------------------------------------------------------
def _deconv_up2(x, w_ref, b_ref, act):
    """ConvTranspose2d(Cin, Cout, 4, stride=2, pad=1) (+ activation) on NHWC x.

    x     : (1, H, W, Cin) f32 value (one batch element)
    w_ref : (2, 2, 4*Cin, Cout) packed weights; w_ref[py, px] holds this parity's
            4 taps stacked along the contraction axis -> one K=4*Cin matmul per
            output parity instead of four tiny ones.
    b_ref : (1, Cout)
    Returns {(py, px): (1, H, W, Cout)} parity outputs (activation applied).
    """
    _, H, W, Cin = x.shape
    Cout = w_ref.shape[-1]

    # Zero-pad H and W by 1 in VMEM via concatenation (no HBM pad pass).
    zc = jnp.zeros((1, H, 1, Cin), jnp.float32)
    xw = jnp.concatenate([zc, x, zc], axis=2)
    zr = jnp.zeros((1, 1, W + 2, Cin), jnp.float32)
    xp = jnp.concatenate([zr, xw, zr], axis=1)            # (1, H+2, W+2, Cin)

    b = b_ref[...]
    outs = {}
    for py in range(2):
        for px in range(2):
            # Fused im2col: the 4 taps of this parity stacked on the lane axis.
            cols = jnp.concatenate(
                [xp[:, py + dy:py + dy + H, px + dx:px + dx + W, :]
                 for dy in (0, 1) for dx in (0, 1)],
                axis=-1,
            ).reshape(H * W, 4 * Cin)
            # Default precision: bf16 MXU passes with f32 accumulation.
            o = jnp.dot(cols, w_ref[py, px],
                        preferred_element_type=jnp.float32) + b
            if act == "leaky":
                o = jnp.where(o >= 0, o, LEAKY_SLOPE * o)
            elif act == "tanh":
                o = jnp.tanh(o)
            outs[(py, px)] = o.reshape(1, H, W, Cout)
    return outs


def _interleave_2x2(outs):
    """Depth-to-space in VMEM: 4 parity maps (1,H,W,C) -> (1, 2H, 2W, C)."""
    o00, o01, o10, o11 = outs[(0, 0)], outs[(0, 1)], outs[(1, 0)], outs[(1, 1)]
    _, H, W, C = o00.shape
    r0 = jnp.concatenate([o00[:, :, :, None, :], o01[:, :, :, None, :]],
                         axis=3).reshape(1, H, 2 * W, C)
    r1 = jnp.concatenate([o10[:, :, :, None, :], o11[:, :, :, None, :]],
                         axis=3).reshape(1, H, 2 * W, C)
    return jnp.concatenate([r0[:, :, None, :, :], r1[:, :, None, :, :]],
                           axis=2).reshape(1, 2 * H, 2 * W, C)


def _generator_kernel(z_ref, wfc_ref, bfc_ref, w1_ref, b1_ref, w2_ref, b2_ref,
                      w3_ref, b3_ref, w4_ref, b4_ref, o_ref, *, k_fc):
    """Whole Generator forward for one batch element; intermediates stay in VMEM."""
    z = z_ref[0]                                   # (1, z_dim)
    c8 = wfc_ref.shape[-1]
    bfc = bfc_ref[...]

    # fc: ConvTranspose2d(z_dim, c8, k_fc, stride=1, pad=0) on a 1x1 input
    #     == an independent (z_dim -> c8) linear map per output pixel.
    rows = []
    for i in range(k_fc):
        cells = [
            (jnp.dot(z, wfc_ref[i * k_fc + j],
                     preferred_element_type=jnp.float32) + bfc
             ).reshape(1, 1, 1, c8)
            for j in range(k_fc)
        ]
        rows.append(jnp.concatenate(cells, axis=2))
    x = jnp.concatenate(rows, axis=1)              # (1, k_fc, k_fc, c8) NHWC

    # layer1..3: deconv(k4,s2,p1) + LeakyReLU(0.05); parity interleave in VMEM.
    x = _interleave_2x2(_deconv_up2(x, w1_ref, b1_ref, "leaky"))
    x = _interleave_2x2(_deconv_up2(x, w2_ref, b2_ref, "leaky"))
    x = _interleave_2x2(_deconv_up2(x, w3_ref, b3_ref, "leaky"))

    # layer4: deconv + tanh; store lane-packed parities: (1, H, W, 2*2*3).
    outs = _deconv_up2(x, w4_ref, b4_ref, "tanh")
    o_ref[...] = jnp.concatenate(
        [outs[(0, 0)], outs[(0, 1)], outs[(1, 0)], outs[(1, 1)]], axis=-1)


# ----------------------------------------------------------------------------
# Glue: weight packing (done once) and the pallas_call wrapper
# ----------------------------------------------------------------------------
def _pack_deconv_weight(w_torch):
    """(Cin, Cout, 4, 4) torch layout -> (2, 2, 4*Cin, Cout) parity/tap packed."""
    w = jnp.transpose(w_torch, (2, 3, 0, 1))       # (ky, kx, Cin, Cout)
    par_rows = []
    for py in range(2):
        par_cols = []
        for px in range(2):
            taps = [w[3 - py - 2 * dy, 3 - px - 2 * dx]
                    for dy in (0, 1) for dx in (0, 1)]
            par_cols.append(jnp.concatenate(taps, axis=0))   # (4*Cin, Cout)
        par_rows.append(jnp.stack(par_cols, axis=0))
    return jnp.stack(par_rows, axis=0)


def pack_params(params, image_size):
    fc_w, fc_b = params[0]
    k = image_size // 16
    z_dim, c8 = fc_w.shape[0], fc_w.shape[1]
    packed = [jnp.transpose(fc_w, (2, 3, 0, 1)).reshape(k * k, z_dim, c8),
              fc_b.reshape(1, c8)]
    for w, b in params[1:]:
        packed.append(_pack_deconv_weight(w))
        packed.append(b.reshape(1, b.shape[0]))
    return tuple(packed)


@functools.partial(jax.jit, static_argnames=("image_size",))
def generator_forward(z, packed, *, image_size):
    B, z_dim = z.shape
    k_fc = image_size // 16
    h4 = image_size // 2                           # spatial size of layer4's input
    z3 = z.reshape(B, 1, z_dim)                    # (8,128)-rule friendly layout

    def full_spec(arr):
        zeros = (0,) * arr.ndim
        return pl.BlockSpec(arr.shape, lambda b: zeros)

    out_packed = pl.pallas_call(
        functools.partial(_generator_kernel, k_fc=k_fc),
        out_shape=jax.ShapeDtypeStruct((B, h4, h4, 12), jnp.float32),
        grid=(B,),
        in_specs=[pl.BlockSpec((1, 1, z_dim), lambda b: (b, 0, 0))]
                 + [full_spec(p) for p in packed],
        out_specs=pl.BlockSpec((1, h4, h4, 12), lambda b: (b, 0, 0, 0)),
        compiler_params=pltpu.CompilerParams(
            dimension_semantics=("parallel",),
            vmem_limit_bytes=32 * 1024 * 1024),
    )(z3, *packed)

    # Depth-to-space of the last layer's parities + NHWC -> NCHW (one tiny XLA op).
    out = out_packed.reshape(B, h4, h4, 2, 2, 3)
    out = jnp.transpose(out, (0, 5, 1, 3, 2, 4)).reshape(B, 3, image_size, image_size)
    return out


# ----------------------------------------------------------------------------
# Deterministic parameter init (PyTorch-style uniform bounds, PRNGKey based)
# ----------------------------------------------------------------------------
def init_params(key, z_dim, image_size, conv_dim):
    k_fc = image_size // 16
    layer_defs = [
        (z_dim, conv_dim * 8, k_fc),      # fc
        (conv_dim * 8, conv_dim * 4, 4),  # layer1
        (conv_dim * 4, conv_dim * 2, 4),  # layer2
        (conv_dim * 2, conv_dim, 4),      # layer3
        (conv_dim, 3, 4),                 # layer4
    ]
    params = []
    for cin, cout, k in layer_defs:
        key, kw, kb = jax.random.split(key, 3)
        bound = float(1.0 / np.sqrt(cin * k * k))
        w = jax.random.uniform(kw, (cin, cout, k, k), jnp.float32, -bound, bound)
        b = jax.random.uniform(kb, (cout,), jnp.float32, -bound, bound)
        params.append((w, b))
    return params


# ----------------------------------------------------------------------------
# NumPy reference (exact ConvTranspose2d semantics) for verification
# ----------------------------------------------------------------------------
def ref_conv_transpose(x, w, b, stride, pad):
    x = np.asarray(x, np.float64)
    w = np.asarray(w, np.float64)
    B, Cin, H, W = x.shape
    _, Cout, kh, kw = w.shape
    Hf = (H - 1) * stride + kh
    Wf = (W - 1) * stride + kw
    out = np.zeros((B, Cout, Hf, Wf), np.float64)
    for iy in range(H):
        for ix in range(W):
            contrib = np.einsum("bc,cokl->bokl", x[:, :, iy, ix], w)
            out[:, :, iy * stride:iy * stride + kh,
                ix * stride:ix * stride + kw] += contrib
    out = out[:, :, pad:Hf - pad, pad:Wf - pad]
    return out + np.asarray(b, np.float64).reshape(1, Cout, 1, 1)


def ref_forward(z, params):
    x = np.asarray(z, np.float64).reshape(z.shape[0], z.shape[1], 1, 1)
    x = ref_conv_transpose(x, params[0][0], params[0][1], stride=1, pad=0)
    for i in (1, 2, 3):
        x = ref_conv_transpose(x, params[i][0], params[i][1], stride=2, pad=1)
        x = np.where(x >= 0, x, LEAKY_SLOPE * x)
    x = np.tanh(ref_conv_transpose(x, params[4][0], params[4][1], stride=2, pad=1))
    return x


# ----------------------------------------------------------------------------
if __name__ == "__main__":
    B, Z_DIM, IMAGE_SIZE, CONV_DIM = 2, 32, 32, 8

    key = jax.random.PRNGKey(0)
    kz, kp = jax.random.split(key)
    z = jax.random.normal(kz, (B, Z_DIM), jnp.float32)
    params = init_params(kp, Z_DIM, IMAGE_SIZE, CONV_DIM)
    packed = pack_params(params, IMAGE_SIZE)

    out = jax.block_until_ready(generator_forward(z, packed, image_size=IMAGE_SIZE))

    assert out.shape == (B, 3, IMAGE_SIZE, IMAGE_SIZE), out.shape
    ref = ref_forward(z, params)
    # Matmuls now run at the MXU's native bf16 rate (default precision) with f32
    # accumulation, so the tolerance absorbs bf16 rounding across the 5 layers.
    np.testing.assert_allclose(np.asarray(out), ref, rtol=5e-2, atol=2e-4)

    print("KERNEL_OK")
</pallas_src>

<mosaic_0001>
module attributes {stable_mosaic.version = 11 : i64} {
  func.func @_generator_kernel(%arg0: i32, %arg1: memref<1x1x32xf32, #tpu.memory_space<vmem>>, %arg2: memref<4x32x64xf32, #tpu.memory_space<vmem>>, %arg3: memref<1x64xf32, #tpu.memory_space<vmem>>, %arg4: memref<2x2x256x32xf32, #tpu.memory_space<vmem>>, %arg5: memref<1x32xf32, #tpu.memory_space<vmem>>, %arg6: memref<2x2x128x16xf32, #tpu.memory_space<vmem>>, %arg7: memref<1x16xf32, #tpu.memory_space<vmem>>, %arg8: memref<2x2x64x8xf32, #tpu.memory_space<vmem>>, %arg9: memref<1x8xf32, #tpu.memory_space<vmem>>, %arg10: memref<2x2x32x3xf32, #tpu.memory_space<vmem>>, %arg11: memref<1x3xf32, #tpu.memory_space<vmem>>, %arg12: memref<1x16x16x12xf32, #tpu.memory_space<vmem>>) attributes {dimension_semantics = [#tpu.dimension_semantics<parallel>], iteration_bounds = array<i64: 2>, scalar_prefetch = 0 : i64, scratch_operands = 0 : i64, tpu.core_type = #tpu.core_type<tc>, window_params = [{transform_indices = @transform_0, window_bounds = array<i64: 1, 1, 32>}, {pipeline_mode = #tpu.pipeline_mode<synchronous>, transform_indices = @transform_1, window_bounds = array<i64: 4, 32, 64>}, {pipeline_mode = #tpu.pipeline_mode<synchronous>, transform_indices = @transform_2, window_bounds = array<i64: 1, 64>}, {pipeline_mode = #tpu.pipeline_mode<synchronous>, transform_indices = @transform_3, window_bounds = array<i64: 2, 2, 256, 32>}, {pipeline_mode = #tpu.pipeline_mode<synchronous>, transform_indices = @transform_4, window_bounds = array<i64: 1, 32>}, {pipeline_mode = #tpu.pipeline_mode<synchronous>, transform_indices = @transform_5, window_bounds = array<i64: 2, 2, 128, 16>}, {pipeline_mode = #tpu.pipeline_mode<synchronous>, transform_indices = @transform_6, window_bounds = array<i64: 1, 16>}, {pipeline_mode = #tpu.pipeline_mode<synchronous>, transform_indices = @transform_7, window_bounds = array<i64: 2, 2, 64, 8>}, {pipeline_mode = #tpu.pipeline_mode<synchronous>, transform_indices = @transform_8, window_bounds = array<i64: 1, 8>}, {pipeline_mode = #tpu.pipeline_mode<synchronous>, transform_indices = @transform_9, window_bounds = array<i64: 2, 2, 32, 3>}, {pipeline_mode = #tpu.pipeline_mode<synchronous>, transform_indices = @transform_10, window_bounds = array<i64: 1, 3>}, {transform_indices = @transform_11, window_bounds = array<i64: 1, 16, 16, 12>}]} {
    %c0 = arith.constant 0 : index
    %c0_0 = arith.constant 0 : index
    %c0_1 = arith.constant 0 : index
    %0 = vector.load %arg1[%c0, %c0_0, %c0_1] : memref<1x1x32xf32, #tpu.memory_space<vmem>>, vector<1x1x32xf32>
    %1 = vector.shape_cast %0 : vector<1x1x32xf32> to vector<1x32xf32>
    %c0_2 = arith.constant 0 : index
    %c0_3 = arith.constant 0 : index
    %2 = vector.load %arg3[%c0_2, %c0_3] : memref<1x64xf32, #tpu.memory_space<vmem>>, vector<1x64xf32>
    %c0_4 = arith.constant 0 : index
    %c0_5 = arith.constant 0 : index
    %c0_6 = arith.constant 0 : index
    %3 = vector.load %arg2[%c0_4, %c0_5, %c0_6] : memref<4x32x64xf32, #tpu.memory_space<vmem>>, vector<1x32x64xf32>
    %4 = vector.shape_cast %3 : vector<1x32x64xf32> to vector<32x64xf32>
    %cst = arith.constant dense<0.000000e+00> : vector<1x64xf32>
    %5 = tpu.matmul %1, %4, %cst {dimension_numbers = #tpu.dot_dimension_numbers<[1], [0], [0], [1], [0, 0, 1, 1], [], []>} : vector<1x32xf32>, vector<32x64xf32>, vector<1x64xf32> -> vector<1x64xf32>
    %6 = arith.addf %5, %2 : vector<1x64xf32>
    %7 = vector.shape_cast %6 : vector<1x64xf32> to vector<1x1x1x64xf32>
    %c1 = arith.constant 1 : index
    %c0_7 = arith.constant 0 : index
    %c0_8 = arith.constant 0 : index
    %8 = vector.load %arg2[%c1, %c0_7, %c0_8] : memref<4x32x64xf32, #tpu.memory_space<vmem>>, vector<1x32x64xf32>
    %9 = vector.shape_cast %8 : vector<1x32x64xf32> to vector<32x64xf32>
    %cst_9 = arith.constant dense<0.000000e+00> : vector<1x64xf32>
    %10 = tpu.matmul %1, %9, %cst_9 {dimension_numbers = #tpu.dot_dimension_numbers<[1], [0], [0], [1], [0, 0, 1, 1], [], []>} : vector<1x32xf32>, vector<32x64xf32>, vector<1x64xf32> -> vector<1x64xf32>
    %11 = arith.addf %10, %2 : vector<1x64xf32>
    %12 = vector.shape_cast %11 : vector<1x64xf32> to vector<1x1x1x64xf32>
    %13 = tpu.concatenate %7, %12 in 2 : vector<1x1x1x64xf32>, vector<1x1x1x64xf32> -> vector<1x1x2x64xf32>
    %c2 = arith.constant 2 : index
    %c0_10 = arith.constant 0 : index
    %c0_11 = arith.constant 0 : index
    %14 = vector.load %arg2[%c2, %c0_10, %c0_11] : memref<4x32x64xf32, #tpu.memory_space<vmem>>, vector<1x32x64xf32>
    %15 = vector.shape_cast %14 : vector<1x32x64xf32> to vector<32x64xf32>
    %cst_12 = arith.constant dense<0.000000e+00> : vector<1x64xf32>
    %16 = tpu.matmul %1, %15, %cst_12 {dimension_numbers = #tpu.dot_dimension_numbers<[1], [0], [0], [1], [0, 0, 1, 1], [], []>} : vector<1x32xf32>, vector<32x64xf32>, vector<1x64xf32> -> vector<1x64xf32>
    %17 = arith.addf %16, %2 : vector<1x64xf32>
    %18 = vector.shape_cast %17 : vector<1x64xf32> to vector<1x1x1x64xf32>
    %c3 = arith.constant 3 : index
    %c0_13 = arith.constant 0 : index
    %c0_14 = arith.constant 0 : index
    %19 = vector.load %arg2[%c3, %c0_13, %c0_14] : memref<4x32x64xf32, #tpu.memory_space<vmem>>, vector<1x32x64xf32>
    %20 = vector.shape_cast %19 : vector<1x32x64xf32> to vector<32x64xf32>
    %cst_15 = arith.constant dense<0.000000e+00> : vector<1x64xf32>
    %21 = tpu.matmul %1, %20, %cst_15 {dimension_numbers = #tpu.dot_dimension_numbers<[1], [0], [0], [1], [0, 0, 1, 1], [], []>} : vector<1x32xf32>, vector<32x64xf32>, vector<1x64xf32> -> vector<1x64xf32>
    %22 = arith.addf %21, %2 : vector<1x64xf32>
    %23 = vector.shape_cast %22 : vector<1x64xf32> to vector<1x1x1x64xf32>
    %24 = tpu.concatenate %18, %23 in 2 : vector<1x1x1x64xf32>, vector<1x1x1x64xf32> -> vector<1x1x2x64xf32>
    %25 = tpu.concatenate %13, %24 in 1 : vector<1x1x2x64xf32>, vector<1x1x2x64xf32> -> vector<1x2x2x64xf32>
    %cst_16 = arith.constant 0.000000e+00 : f32
    %26 = vector.broadcast %cst_16 : f32 to vector<1x2x1x64xf32>
    %27 = tpu.concatenate %26, %25, %26 in 2 : vector<1x2x1x64xf32>, vector<1x2x2x64xf32>, vector<1x2x1x64xf32> -> vector<1x2x4x64xf32>
    %cst_17 = arith.constant 0.000000e+00 : f32
    %28 = vector.broadcast %cst_17 : f32 to vector<1x1x4x64xf32>
    %29 = tpu.concatenate %28, %27, %28 in 1 : vector<1x1x4x64xf32>, vector<1x2x4x64xf32>, vector<1x1x4x64xf32> -> vector<1x4x4x64xf32>
    %c0_18 = arith.constant 0 : index
    %c0_19 = arith.constant 0 : index
    %30 = vector.load %arg5[%c0_18, %c0_19] : memref<1x32xf32, #tpu.memory_space<vmem>>, vector<1x32xf32>
    %31 = vector.extract_strided_slice %29 {offsets = [0, 0, 0, 0], sizes = [1, 2, 2, 64], strides = [1, 1, 1, 1]} : vector<1x4x4x64xf32> to vector<1x2x2x64xf32>
    %32 = vector.extract_strided_slice %29 {offsets = [0, 0, 1, 0], sizes = [1, 2, 2, 64], strides = [1, 1, 1, 1]} : vector<1x4x4x64xf32> to vector<1x2x2x64xf32>
    %33 = vector.extract_strided_slice %29 {offsets = [0, 1, 0, 0], sizes = [1, 2, 2, 64], strides = [1, 1, 1, 1]} : vector<1x4x4x64xf32> to vector<1x2x2x64xf32>
    %34 = vector.extract_strided_slice %29 {offsets = [0, 1, 1, 0], sizes = [1, 2, 2, 64], strides = [1, 1, 1, 1]} : vector<1x4x4x64xf32> to vector<1x2x2x64xf32>
    %35 = tpu.concatenate %31, %32, %33, %34 in 3 : vector<1x2x2x64xf32>, vector<1x2x2x64xf32>, vector<1x2x2x64xf32>, vector<1x2x2x64xf32> -> vector<1x2x2x256xf32>
    %36 = vector.shape_cast %35 : vector<1x2x2x256xf32> to vector<4x256xf32>
    %c0_20 = arith.constant 0 : index
    %c0_21 = arith.constant 0 : index
    %c0_22 = arith.constant 0 : index
    %c0_23 = arith.constant 0 : index
    %37 = vector.load %arg4[%c0_20, %c0_21, %c0_22, %c0_23] : memref<2x2x256x32xf32, #tpu.memory_space<vmem>>, vector<1x1x256x32xf32>
    %38 = vector.shape_cast %37 : vector<1x1x256x32xf32> to vector<256x32xf32>
    %cst_24 = arith.constant dense<0.000000e+00> : vector<4x32xf32>
    %39 = tpu.matmul %36, %38, %cst_24 {dimension_numbers = #tpu.dot_dimension_numbers<[1], [0], [0], [1], [0, 0, 1, 1], [], []>} : vector<4x256xf32>, vector<256x32xf32>, vector<4x32xf32> -> vector<4x32xf32>
    %40 = vector.broadcast %30 : vector<1x32xf32> to vector<4x32xf32>
    %41 = arith.addf %39, %40 : vector<4x32xf32>
    %cst_25 = arith.constant 0.000000e+00 : f32
    %42 = vector.broadcast %cst_25 : f32 to vector<4x32xf32>
    %43 = arith.cmpf oge, %41, %42 : vector<4x32xf32>
    %cst_26 = arith.constant 5.000000e-02 : f32
    %44 = vector.broadcast %cst_26 : f32 to vector<4x32xf32>
    %45 = arith.mulf %44, %41 : vector<4x32xf32>
    %46 = arith.select %43, %41, %45 : vector<4x32xi1>, vector<4x32xf32>
    %47 = vector.shape_cast %46 : vector<4x32xf32> to vector<1x2x2x32xf32>
    %48 = vector.extract_strided_slice %29 {offsets = [0, 0, 1, 0], sizes = [1, 2, 2, 64], strides = [1, 1, 1, 1]} : vector<1x4x4x64xf32> to vector<1x2x2x64xf32>
    %49 = vector.extract_strided_slice %29 {offsets = [0, 0, 2, 0], sizes = [1, 2, 2, 64], strides = [1, 1, 1, 1]} : vector<1x4x4x64xf32> to vector<1x2x2x64xf32>
    %50 = vector.extract_strided_slice %29 {offsets = [0, 1, 1, 0], sizes = [1, 2, 2, 64], strides = [1, 1, 1, 1]} : vector<1x4x4x64xf32> to vector<1x2x2x64xf32>
    %51 = vector.extract_strided_slice %29 {offsets = [0, 1, 2, 0], sizes = [1, 2, 2, 64], strides = [1, 1, 1, 1]} : vector<1x4x4x64xf32> to vector<1x2x2x64xf32>
    %52 = tpu.concatenate %48, %49, %50, %51 in 3 : vector<1x2x2x64xf32>, vector<1x2x2x64xf32>, vector<1x2x2x64xf32>, vector<1x2x2x64xf32> -> vector<1x2x2x256xf32>
    %53 = vector.shape_cast %52 : vector<1x2x2x256xf32> to vector<4x256xf32>
    %c0_27 = arith.constant 0 : index
    %c1_28 = arith.constant 1 : index
    %c0_29 = arith.constant 0 : index
    %c0_30 = arith.constant 0 : index
    %54 = vector.load %arg4[%c0_27, %c1_28, %c0_29, %c0_30] : memref<2x2x256x32xf32, #tpu.memory_space<vmem>>, vector<1x1x256x32xf32>
    %55 = vector.shape_cast %54 : vector<1x1x256x32xf32> to vector<256x32xf32>
    %cst_31 = arith.constant dense<0.000000e+00> : vector<4x32xf32>
    %56 = tpu.matmul %53, %55, %cst_31 {dimension_numbers = #tpu.dot_dimension_numbers<[1], [0], [0], [1], [0, 0, 1, 1], [], []>} : vector<4x256xf32>, vector<256x32xf32>, vector<4x32xf32> -> vector<4x32xf32>
    %57 = vector.broadcast %30 : vector<1x32xf32> to vector<4x32xf32>
    %58 = arith.addf %56, %57 : vector<4x32xf32>
    %cst_32 = arith.constant 0.000000e+00 : f32
    %59 = vector.broadcast %cst_32 : f32 to vector<4x32xf32>
    %60 = arith.cmpf oge, %58, %59 : vector<4x32xf32>
    %cst_33 = arith.constant 5.000000e-02 : f32
    %61 = vector.broadcast %cst_33 : f32 to vector<4x32xf32>
    %62 = arith.mulf %61, %58 : vector<4x32xf32>
    %63 = arith.select %60, %58, %62 : vector<4x32xi1>, vector<4x32xf32>
    %64 = vector.shape_cast %63 : vector<4x32xf32> to vector<1x2x2x32xf32>
    %65 = vector.extract_strided_slice %29 {offsets = [0, 1, 0, 0], sizes = [1, 2, 2, 64], strides = [1, 1, 1, 1]} : vector<1x4x4x64xf32> to vector<1x2x2x64xf32>
    %66 = vector.extract_strided_slice %29 {offsets = [0, 1, 1, 0], sizes = [1, 2, 2, 64], strides = [1, 1, 1, 1]} : vector<1x4x4x64xf32> to vector<1x2x2x64xf32>
    %67 = vector.extract_strided_slice %29 {offsets = [0, 2, 0, 0], sizes = [1, 2, 2, 64], strides = [1, 1, 1, 1]} : vector<1x4x4x64xf32> to vector<1x2x2x64xf32>
    %68 = vector.extract_strided_slice %29 {offsets = [0, 2, 1, 0], sizes = [1, 2, 2, 64], strides = [1, 1, 1, 1]} : vector<1x4x4x64xf32> to vector<1x2x2x64xf32>
    %69 = tpu.concatenate %65, %66, %67, %68 in 3 : vector<1x2x2x64xf32>, vector<1x2x2x64xf32>, vector<1x2x2x64xf32>, vector<1x2x2x64xf32> -> vector<1x2x2x256xf32>
    %70 = vector.shape_cast %69 : vector<1x2x2x256xf32> to vector<4x256xf32>
    %c1_34 = arith.constant 1 : index
    %c0_35 = arith.constant 0 : index
    %c0_36 = arith.constant 0 : index
    %c0_37 = arith.constant 0 : index
    %71 = vector.load %arg4[%c1_34, %c0_35, %c0_36, %c0_37] : memref<2x2x256x32xf32, #tpu.memory_space<vmem>>, vector<1x1x256x32xf32>
    %72 = vector.shape_cast %71 : vector<1x1x256x32xf32> to vector<256x32xf32>
    %cst_38 = arith.constant dense<0.000000e+00> : vector<4x32xf32>
    %73 = tpu.matmul %70, %72, %cst_38 {dimension_numbers = #tpu.dot_dimension_numbers<[1], [0], [0], [1], [0, 0, 1, 1], [], []>} : vector<4x256xf32>, vector<256x32xf32>, vector<4x32xf32> -> vector<4x32xf32>
    %74 = vector.broadcast %30 : vector<1x32xf32> to vector<4x32xf32>
    %75 = arith.addf %73, %74 : vector<4x32xf32>
    %cst_39 = arith.constant 0.000000e+00 : f32
    %76 = vector.broadcast %cst_39 : f32 to vector<4x32xf32>
    %77 = arith.cmpf oge, %75, %76 : vector<4x32xf32>
    %cst_40 = arith.constant 5.000000e-02 : f32
    %78 = vector.broadcast %cst_40 : f32 to vector<4x32xf32>
    %79 = arith.mulf %78, %75 : vector<4x32xf32>
    %80 = arith.select %77, %75, %79 : vector<4x32xi1>, vector<4x32xf32>
    %81 = vector.shape_cast %80 : vector<4x32xf32> to vector<1x2x2x32xf32>
    %82 = vector.extract_strided_slice %29 {offsets = [0, 1, 1, 0], sizes = [1, 2, 2, 64], strides = [1, 1, 1, 1]} : vector<1x4x4x64xf32> to vector<1x2x2x64xf32>
    %83 = vector.extract_strided_slice %29 {offsets = [0, 1, 2, 0], sizes = [1, 2, 2, 64], strides = [1, 1, 1, 1]} : vector<1x4x4x64xf32> to vector<1x2x2x64xf32>
    %84 = vector.extract_strided_slice %29 {offsets = [0, 2, 1, 0], sizes = [1, 2, 2, 64], strides = [1, 1, 1, 1]} : vector<1x4x4x64xf32> to vector<1x2x2x64xf32>
    %85 = vector.extract_strided_slice %29 {offsets = [0, 2, 2, 0], sizes = [1, 2, 2, 64], strides = [1, 1, 1, 1]} : vector<1x4x4x64xf32> to vector<1x2x2x64xf32>
    %86 = tpu.concatenate %82, %83, %84, %85 in 3 : vector<1x2x2x64xf32>, vector<1x2x2x64xf32>, vector<1x2x2x64xf32>, vector<1x2x2x64xf32> -> vector<1x2x2x256xf32>
    %87 = vector.shape_cast %86 : vector<1x2x2x256xf32> to vector<4x256xf32>
    %c1_41 = arith.constant 1 : index
    %c1_42 = arith.constant 1 : index
    %c0_43 = arith.constant 0 : index
    %c0_44 = arith.constant 0 : index
    %88 = vector.load %arg4[%c1_41, %c1_42, %c0_43, %c0_44] : memref<2x2x256x32xf32, #tpu.memory_space<vmem>>, vector<1x1x256x32xf32>
    %89 = vector.shape_cast %88 : vector<1x1x256x32xf32> to vector<256x32xf32>
    %cst_45 = arith.constant dense<0.000000e+00> : vector<4x32xf32>
    %90 = tpu.matmul %87, %89, %cst_45 {dimension_numbers = #tpu.dot_dimension_numbers<[1], [0], [0], [1], [0, 0, 1, 1], [], []>} : vector<4x256xf32>, vector<256x32xf32>, vector<4x32xf32> -> vector<4x32xf32>
    %91 = vector.broadcast %30 : vector<1x32xf32> to vector<4x32xf32>
    %92 = arith.addf %90, %91 : vector<4x32xf32>
    %cst_46 = arith.constant 0.000000e+00 : f32
    %93 = vector.broadcast %cst_46 : f32 to vector<4x32xf32>
    %94 = arith.cmpf oge, %92, %93 : vector<4x32xf32>
    %cst_47 = arith.constant 5.000000e-02 : f32
    %95 = vector.broadcast %cst_47 : f32 to vector<4x32xf32>
    %96 = arith.mulf %95, %92 : vector<4x32xf32>
    %97 = arith.select %94, %92, %96 : vector<4x32xi1>, vector<4x32xf32>
    %98 = vector.shape_cast %97 : vector<4x32xf32> to vector<1x2x2x32xf32>
    %99 = vector.shape_cast %47 : vector<1x2x2x32xf32> to vector<1x2x2x1x32xf32>
    %100 = vector.shape_cast %64 : vector<1x2x2x32xf32> to vector<1x2x2x1x32xf32>
    %101 = tpu.concatenate %99, %100 in 3 : vector<1x2x2x1x32xf32>, vector<1x2x2x1x32xf32> -> vector<1x2x2x2x32xf32>
    %102 = vector.shape_cast %101 : vector<1x2x2x2x32xf32> to vector<1x2x4x32xf32>
    %103 = vector.shape_cast %81 : vector<1x2x2x32xf32> to vector<1x2x2x1x32xf32>
    %104 = vector.shape_cast %98 : vector<1x2x2x32xf32> to vector<1x2x2x1x32xf32>
    %105 = tpu.concatenate %103, %104 in 3 : vector<1x2x2x1x32xf32>, vector<1x2x2x1x32xf32> -> vector<1x2x2x2x32xf32>
    %106 = vector.shape_cast %105 : vector<1x2x2x2x32xf32> to vector<1x2x4x32xf32>
    %107 = vector.shape_cast %102 : vector<1x2x4x32xf32> to vector<1x2x1x4x32xf32>
    %108 = vector.shape_cast %106 : vector<1x2x4x32xf32> to vector<1x2x1x4x32xf32>
    %109 = tpu.concatenate %107, %108 in 2 : vector<1x2x1x4x32xf32>, vector<1x2x1x4x32xf32> -> vector<1x2x2x4x32xf32>
    %110 = vector.shape_cast %109 : vector<1x2x2x4x32xf32> to vector<1x4x4x32xf32>
    %cst_48 = arith.constant 0.000000e+00 : f32
    %111 = vector.broadcast %cst_48 : f32 to vector<1x4x1x32xf32>
    %112 = tpu.concatenate %111, %110, %111 in 2 : vector<1x4x1x32xf32>, vector<1x4x4x32xf32>, vector<1x4x1x32xf32> -> vector<1x4x6x32xf32>
    %cst_49 = arith.constant 0.000000e+00 : f32
    %113 = vector.broadcast %cst_49 : f32 to vector<1x1x6x32xf32>
    %114 = tpu.concatenate %113, %112, %113 in 1 : vector<1x1x6x32xf32>, vector<1x4x6x32xf32>, vector<1x1x6x32xf32> -> vector<1x6x6x32xf32>
    %c0_50 = arith.constant 0 : index
    %c0_51 = arith.constant 0 : index
    %115 = vector.load %arg7[%c0_50, %c0_51] : memref<1x16xf32, #tpu.memory_space<vmem>>, vector<1x16xf32>
    %116 = vector.extract_strided_slice %114 {offsets = [0, 0, 0, 0], sizes = [1, 4, 4, 32], strides = [1, 1, 1, 1]} : vector<1x6x6x32xf32> to vector<1x4x4x32xf32>
    %117 = vector.extract_strided_slice %114 {offsets = [0, 0, 1, 0], sizes = [1, 4, 4, 32], strides = [1, 1, 1, 1]} : vector<1x6x6x32xf32> to vector<1x4x4x32xf32>
    %118 = vector.extract_strided_slice %114 {offsets = [0, 1, 0, 0], sizes = [1, 4, 4, 32], strides = [1, 1, 1, 1]} : vector<1x6x6x32xf32> to vector<1x4x4x32xf32>
    %119 = vector.extract_strided_slice %114 {offsets = [0, 1, 1, 0], sizes = [1, 4, 4, 32], strides = [1, 1, 1, 1]} : vector<1x6x6x32xf32> to vector<1x4x4x32xf32>
    %120 = tpu.concatenate %116, %117, %118, %119 in 3 : vector<1x4x4x32xf32>, vector<1x4x4x32xf32>, vector<1x4x4x32xf32>, vector<1x4x4x32xf32> -> vector<1x4x4x128xf32>
    %121 = vector.shape_cast %120 : vector<1x4x4x128xf32> to vector<16x128xf32>
    %c0_52 = arith.constant 0 : index
    %c0_53 = arith.constant 0 : index
    %c0_54 = arith.constant 0 : index
    %c0_55 = arith.constant 0 : index
    %122 = vector.load %arg6[%c0_52, %c0_53, %c0_54, %c0_55] : memref<2x2x128x16xf32, #tpu.memory_space<vmem>>, vector<1x1x128x16xf32>
    %123 = vector.shape_cast %122 : vector<1x1x128x16xf32> to vector<128x16xf32>
    %cst_56 = arith.constant dense<0.000000e+00> : vector<16x16xf32>
    %124 = tpu.matmul %121, %123, %cst_56 {dimension_numbers = #tpu.dot_dimension_numbers<[1], [0], [0], [1], [0, 0, 1, 1], [], []>} : vector<16x128xf32>, vector<128x16xf32>, vector<16x16xf32> -> vector<16x16xf32>
    %125 = vector.broadcast %115 : vector<1x16xf32> to vector<16x16xf32>
    %126 = arith.addf %124, %125 : vector<16x16xf32>
    %cst_57 = arith.constant 0.000000e+00 : f32
    %127 = vector.broadcast %cst_57 : f32 to vector<16x16xf32>
    %128 = arith.cmpf oge, %126, %127 : vector<16x16xf32>
    %cst_58 = arith.constant 5.000000e-02 : f32
    %129 = vector.broadcast %cst_58 : f32 to vector<16x16xf32>
    %130 = arith.mulf %129, %126 : vector<16x16xf32>
    %131 = arith.select %128, %126, %130 : vector<16x16xi1>, vector<16x16xf32>
    %132 = vector.shape_cast %131 : vector<16x16xf32> to vector<1x4x4x16xf32>
    %133 = vector.extract_strided_slice %114 {offsets = [0, 0, 1, 0], sizes = [1, 4, 4, 32], strides = [1, 1, 1, 1]} : vector<1x6x6x32xf32> to vector<1x4x4x32xf32>
    %134 = vector.extract_strided_slice %114 {offsets = [0, 0, 2, 0], sizes = [1, 4, 4, 32], strides = [1, 1, 1, 1]} : vector<1x6x6x32xf32> to vector<1x4x4x32xf32>
    %135 = vector.extract_strided_slice %114 {offsets = [0, 1, 1, 0], sizes = [1, 4, 4, 32], strides = [1, 1, 1, 1]} : vector<1x6x6x32xf32> to vector<1x4x4x32xf32>
    %136 = vector.extract_strided_slice %114 {offsets = [0, 1, 2, 0], sizes = [1, 4, 4, 32], strides = [1, 1, 1, 1]} : vector<1x6x6x32xf32> to vector<1x4x4x32xf32>
    %137 = tpu.concatenate %133, %134, %135, %136 in 3 : vector<1x4x4x32xf32>, vector<1x4x4x32xf32>, vector<1x4x4x32xf32>, vector<1x4x4x32xf32> -> vector<1x4x4x128xf32>
    %138 = vector.shape_cast %137 : vector<1x4x4x128xf32> to vector<16x128xf32>
    %c0_59 = arith.constant 0 : index
    %c1_60 = arith.constant 1 : index
    %c0_61 = arith.constant 0 : index
    %c0_62 = arith.constant 0 : index
    %139 = vector.load %arg6[%c0_59, %c1_60, %c0_61, %c0_62] : memref<2x2x128x16xf32, #tpu.memory_space<vmem>>, vector<1x1x128x16xf32>
    %140 = vector.shape_cast %139 : vector<1x1x128x16xf32> to vector<128x16xf32>
    %cst_63 = arith.constant dense<0.000000e+00> : vector<16x16xf32>
    %141 = tpu.matmul %138, %140, %cst_63 {dimension_numbers = #tpu.dot_dimension_numbers<[1], [0], [0], [1], [0, 0, 1, 1], [], []>} : vector<16x128xf32>, vector<128x16xf32>, vector<16x16xf32> -> vector<16x16xf32>
    %142 = vector.broadcast %115 : vector<1x16xf32> to vector<16x16xf32>
    %143 = arith.addf %141, %142 : vector<16x16xf32>
    %cst_64 = arith.constant 0.000000e+00 : f32
    %144 = vector.broadcast %cst_64 : f32 to vector<16x16xf32>
    %145 = arith.cmpf oge, %143, %144 : vector<16x16xf32>
    %cst_65 = arith.constant 5.000000e-02 : f32
    %146 = vector.broadcast %cst_65 : f32 to vector<16x16xf32>
    %147 = arith.mulf %146, %143 : vector<16x16xf32>
    %148 = arith.select %145, %143, %147 : vector<16x16xi1>, vector<16x16xf32>
    %149 = vector.shape_cast %148 : vector<16x16xf32> to vector<1x4x4x16xf32>
    %150 = vector.extract_strided_slice %114 {offsets = [0, 1, 0, 0], sizes = [1, 4, 4, 32], strides = [1, 1, 1, 1]} : vector<1x6x6x32xf32> to vector<1x4x4x32xf32>
    %151 = vector.extract_strided_slice %114 {offsets = [0, 1, 1, 0], sizes = [1, 4, 4, 32], strides = [1, 1, 1, 1]} : vector<1x6x6x32xf32> to vector<1x4x4x32xf32>
    %152 = vector.extract_strided_slice %114 {offsets = [0, 2, 0, 0], sizes = [1, 4, 4, 32], strides = [1, 1, 1, 1]} : vector<1x6x6x32xf32> to vector<1x4x4x32xf32>
    %153 = vector.extract_strided_slice %114 {offsets = [0, 2, 1, 0], sizes = [1, 4, 4, 32], strides = [1, 1, 1, 1]} : vector<1x6x6x32xf32> to vector<1x4x4x32xf32>
    %154 = tpu.concatenate %150, %151, %152, %153 in 3 : vector<1x4x4x32xf32>, vector<1x4x4x32xf32>, vector<1x4x4x32xf32>, vector<1x4x4x32xf32> -> vector<1x4x4x128xf32>
    %155 = vector.shape_cast %154 : vector<1x4x4x128xf32> to vector<16x128xf32>
    %c1_66 = arith.constant 1 : index
    %c0_67 = arith.constant 0 : index
    %c0_68 = arith.constant 0 : index
    %c0_69 = arith.constant 0 : index
    %156 = vector.load %arg6[%c1_66, %c0_67, %c0_68, %c0_69] : memref<2x2x128x16xf32, #tpu.memory_space<vmem>>, vector<1x1x128x16xf32>
    %157 = vector.shape_cast %156 : vector<1x1x128x16xf32> to vector<128x16xf32>
    %cst_70 = arith.constant dense<0.000000e+00> : vector<16x16xf32>
    %158 = tpu.matmul %155, %157, %cst_70 {dimension_numbers = #tpu.dot_dimension_numbers<[1], [0], [0], [1], [0, 0, 1, 1], [], []>} : vector<16x128xf32>, vector<128x16xf32>, vector<16x16xf32> -> vector<16x16xf32>
    %159 = vector.broadcast %115 : vector<1x16xf32> to vector<16x16xf32>
    %160 = arith.addf %158, %159 : vector<16x16xf32>
    %cst_71 = arith.constant 0.000000e+00 : f32
    %161 = vector.broadcast %cst_71 : f32 to vector<16x16xf32>
    %162 = arith.cmpf oge, %160, %161 : vector<16x16xf32>
    %cst_72 = arith.constant 5.000000e-02 : f32
    %163 = vector.broadcast %cst_72 : f32 to vector<16x16xf32>
    %164 = arith.mulf %163, %160 : vector<16x16xf32>
    %165 = arith.select %162, %160, %164 : vector<16x16xi1>, vector<16x16xf32>
    %166 = vector.shape_cast %165 : vector<16x16xf32> to vector<1x4x4x16xf32>
    %167 = vector.extract_strided_slice %114 {offsets = [0, 1, 1, 0], sizes = [1, 4, 4, 32], strides = [1, 1, 1, 1]} : vector<1x6x6x32xf32> to vector<1x4x4x32xf32>
    %168 = vector.extract_strided_slice %114 {offsets = [0, 1, 2, 0], sizes = [1, 4, 4, 32], strides = [1, 1, 1, 1]} : vector<1x6x6x32xf32> to vector<1x4x4x32xf32>
    %169 = vector.extract_strided_slice %114 {offsets = [0, 2, 1, 0], sizes = [1, 4, 4, 32], strides = [1, 1, 1, 1]} : vector<1x6x6x32xf32> to vector<1x4x4x32xf32>
    %170 = vector.extract_strided_slice %114 {offsets = [0, 2, 2, 0], sizes = [1, 4, 4, 32], strides = [1, 1, 1, 1]} : vector<1x6x6x32xf32> to vector<1x4x4x32xf32>
    %171 = tpu.concatenate %167, %168, %169, %170 in 3 : vector<1x4x4x32xf32>, vector<1x4x4x32xf32>, vector<1x4x4x32xf32>, vector<1x4x4x32xf32> -> vector<1x4x4x128xf32>
    %172 = vector.shape_cast %171 : vector<1x4x4x128xf32> to vector<16x128xf32>
    %c1_73 = arith.constant 1 : index
    %c1_74 = arith.constant 1 : index
    %c0_75 = arith.constant 0 : index
    %c0_76 = arith.constant 0 : index
    %173 = vector.load %arg6[%c1_73, %c1_74, %c0_75, %c0_76] : memref<2x2x128x16xf32, #tpu.memory_space<vmem>>, vector<1x1x128x16xf32>
    %174 = vector.shape_cast %173 : vector<1x1x128x16xf32> to vector<128x16xf32>
    %cst_77 = arith.constant dense<0.000000e+00> : vector<16x16xf32>
    %175 = tpu.matmul %172, %174, %cst_77 {dimension_numbers = #tpu.dot_dimension_numbers<[1], [0], [0], [1], [0, 0, 1, 1], [], []>} : vector<16x128xf32>, vector<128x16xf32>, vector<16x16xf32> -> vector<16x16xf32>
    %176 = vector.broadcast %115 : vector<1x16xf32> to vector<16x16xf32>
    %177 = arith.addf %175, %176 : vector<16x16xf32>
    %cst_78 = arith.constant 0.000000e+00 : f32
    %178 = vector.broadcast %cst_78 : f32 to vector<16x16xf32>
    %179 = arith.cmpf oge, %177, %178 : vector<16x16xf32>
    %cst_79 = arith.constant 5.000000e-02 : f32
    %180 = vector.broadcast %cst_79 : f32 to vector<16x16xf32>
    %181 = arith.mulf %180, %177 : vector<16x16xf32>
    %182 = arith.select %179, %177, %181 : vector<16x16xi1>, vector<16x16xf32>
    %183 = vector.shape_cast %182 : vector<16x16xf32> to vector<1x4x4x16xf32>
    %184 = vector.shape_cast %132 : vector<1x4x4x16xf32> to vector<1x4x4x1x16xf32>
    %185 = vector.shape_cast %149 : vector<1x4x4x16xf32> to vector<1x4x4x1x16xf32>
    %186 = tpu.concatenate %184, %185 in 3 : vector<1x4x4x1x16xf32>, vector<1x4x4x1x16xf32> -> vector<1x4x4x2x16xf32>
    %187 = vector.shape_cast %186 : vector<1x4x4x2x16xf32> to vector<1x4x8x16xf32>
    %188 = vector.shape_cast %166 : vector<1x4x4x16xf32> to vector<1x4x4x1x16xf32>
    %189 = vector.shape_cast %183 : vector<1x4x4x16xf32> to vector<1x4x4x1x16xf32>
    %190 = tpu.concatenate %188, %189 in 3 : vector<1x4x4x1x16xf32>, vector<1x4x4x1x16xf32> -> vector<1x4x4x2x16xf32>
    %191 = vector.shape_cast %190 : vector<1x4x4x2x16xf32> to vector<1x4x8x16xf32>
    %192 = vector.shape_cast %187 : vector<1x4x8x16xf32> to vector<1x4x1x8x16xf32>
    %193 = vector.shape_cast %191 : vector<1x4x8x16xf32> to vector<1x4x1x8x16xf32>
    %194 = tpu.concatenate %192, %193 in 2 : vector<1x4x1x8x16xf32>, vector<1x4x1x8x16xf32> -> vector<1x4x2x8x16xf32>
    %195 = vector.shape_cast %194 : vector<1x4x2x8x16xf32> to vector<1x8x8x16xf32>
    %cst_80 = arith.constant 0.000000e+00 : f32
    %196 = vector.broadcast %cst_80 : f32 to vector<1x8x1x16xf32>
    %197 = tpu.concatenate %196, %195, %196 in 2 : vector<1x8x1x16xf32>, vector<1x8x8x16xf32>, vector<1x8x1x16xf32> -> vector<1x8x10x16xf32>
    %cst_81 = arith.constant 0.000000e+00 : f32
    %198 = vector.broadcast %cst_81 : f32 to vector<1x1x10x16xf32>
    %199 = tpu.concatenate %198, %197, %198 in 1 : vector<1x1x10x16xf32>, vector<1x8x10x16xf32>, vector<1x1x10x16xf32> -> vector<1x10x10x16xf32>
    %c0_82 = arith.constant 0 : index
    %c0_83 = arith.constant 0 : index
    %200 = vector.load %arg9[%c0_82, %c0_83] : memref<1x8xf32, #tpu.memory_space<vmem>>, vector<1x8xf32>
    %201 = vector.extract_strided_slice %199 {offsets = [0, 0, 0, 0], sizes = [1, 8, 8, 16], strides = [1, 1, 1, 1]} : vector<1x10x10x16xf32> to vector<1x8x8x16xf32>
    %202 = vector.extract_strided_slice %199 {offsets = [0, 0, 1, 0], sizes = [1, 8, 8, 16], strides = [1, 1, 1, 1]} : vector<1x10x10x16xf32> to vector<1x8x8x16xf32>
    %203 = vector.extract_strided_slice %199 {offsets = [0, 1, 0, 0], sizes = [1, 8, 8, 16], strides = [1, 1, 1, 1]} : vector<1x10x10x16xf32> to vector<1x8x8x16xf32>
    %204 = vector.extract_strided_slice %199 {offsets = [0, 1, 1, 0], sizes = [1, 8, 8, 16], strides = [1, 1, 1, 1]} : vector<1x10x10x16xf32> to vector<1x8x8x16xf32>
    %205 = tpu.concatenate %201, %202, %203, %204 in 3 : vector<1x8x8x16xf32>, vector<1x8x8x16xf32>, vector<1x8x8x16xf32>, vector<1x8x8x16xf32> -> vector<1x8x8x64xf32>
    %206 = vector.shape_cast %205 : vector<1x8x8x64xf32> to vector<64x64xf32>
    %c0_84 = arith.constant 0 : index
    %c0_85 = arith.constant 0 : index
    %c0_86 = arith.constant 0 : index
    %c0_87 = arith.constant 0 : index
    %207 = vector.load %arg8[%c0_84, %c0_85, %c0_86, %c0_87] : memref<2x2x64x8xf32, #tpu.memory_space<vmem>>, vector<1x1x64x8xf32>
    %208 = vector.shape_cast %207 : vector<1x1x64x8xf32> to vector<64x8xf32>
    %cst_88 = arith.constant dense<0.000000e+00> : vector<64x8xf32>
    %209 = tpu.matmul %206, %208, %cst_88 {dimension_numbers = #tpu.dot_dimension_numbers<[1], [0], [0], [1], [0, 0, 1, 1], [], []>} : vector<64x64xf32>, vector<64x8xf32>, vector<64x8xf32> -> vector<64x8xf32>
    %210 = vector.broadcast %200 : vector<1x8xf32> to vector<64x8xf32>
    %211 = arith.addf %209, %210 : vector<64x8xf32>
    %cst_89 = arith.constant 0.000000e+00 : f32
    %212 = vector.broadcast %cst_89 : f32 to vector<64x8xf32>
    %213 = arith.cmpf oge, %211, %212 : vector<64x8xf32>
    %cst_90 = arith.constant 5.000000e-02 : f32
    %214 = vector.broadcast %cst_90 : f32 to vector<64x8xf32>
    %215 = arith.mulf %214, %211 : vector<64x8xf32>
    %216 = arith.select %213, %211, %215 : vector<64x8xi1>, vector<64x8xf32>
    %217 = vector.shape_cast %216 : vector<64x8xf32> to vector<1x8x8x8xf32>
    %218 = vector.extract_strided_slice %199 {offsets = [0, 0, 1, 0], sizes = [1, 8, 8, 16], strides = [1, 1, 1, 1]} : vector<1x10x10x16xf32> to vector<1x8x8x16xf32>
    %219 = vector.extract_strided_slice %199 {offsets = [0, 0, 2, 0], sizes = [1, 8, 8, 16], strides = [1, 1, 1, 1]} : vector<1x10x10x16xf32> to vector<1x8x8x16xf32>
    %220 = vector.extract_strided_slice %199 {offsets = [0, 1, 1, 0], sizes = [1, 8, 8, 16], strides = [1, 1, 1, 1]} : vector<1x10x10x16xf32> to vector<1x8x8x16xf32>
    %221 = vector.extract_strided_slice %199 {offsets = [0, 1, 2, 0], sizes = [1, 8, 8, 16], strides = [1, 1, 1, 1]} : vector<1x10x10x16xf32> to vector<1x8x8x16xf32>
    %222 = tpu.concatenate %218, %219, %220, %221 in 3 : vector<1x8x8x16xf32>, vector<1x8x8x16xf32>, vector<1x8x8x16xf32>, vector<1x8x8x16xf32> -> vector<1x8x8x64xf32>
    %223 = vector.shape_cast %222 : vector<1x8x8x64xf32> to vector<64x64xf32>
    %c0_91 = arith.constant 0 : index
    %c1_92 = arith.constant 1 : index
    %c0_93 = arith.constant 0 : index
    %c0_94 = arith.constant 0 : index
    %224 = vector.load %arg8[%c0_91, %c1_92, %c0_93, %c0_94] : memref<2x2x64x8xf32, #tpu.memory_space<vmem>>, vector<1x1x64x8xf32>
    %225 = vector.shape_cast %224 : vector<1x1x64x8xf32> to vector<64x8xf32>
    %cst_95 = arith.constant dense<0.000000e+00> : vector<64x8xf32>
    %226 = tpu.matmul %223, %225, %cst_95 {dimension_numbers = #tpu.dot_dimension_numbers<[1], [0], [0], [1], [0, 0, 1, 1], [], []>} : vector<64x64xf32>, vector<64x8xf32>, vector<64x8xf32> -> vector<64x8xf32>
    %227 = vector.broadcast %200 : vector<1x8xf32> to vector<64x8xf32>
    %228 = arith.addf %226, %227 : vector<64x8xf32>
    %cst_96 = arith.constant 0.000000e+00 : f32
    %229 = vector.broadcast %cst_96 : f32 to vector<64x8xf32>
    %230 = arith.cmpf oge, %228, %229 : vector<64x8xf32>
    %cst_97 = arith.constant 5.000000e-02 : f32
    %231 = vector.broadcast %cst_97 : f32 to vector<64x8xf32>
    %232 = arith.mulf %231, %228 : vector<64x8xf32>
    %233 = arith.select %230, %228, %232 : vector<64x8xi1>, vector<64x8xf32>
    %234 = vector.shape_cast %233 : vector<64x8xf32> to vector<1x8x8x8xf32>
    %235 = vector.extract_strided_slice %199 {offsets = [0, 1, 0, 0], sizes = [1, 8, 8, 16], strides = [1, 1, 1, 1]} : vector<1x10x10x16xf32> to vector<1x8x8x16xf32>
    %236 = vector.extract_strided_slice %199 {offsets = [0, 1, 1, 0], sizes = [1, 8, 8, 16], strides = [1, 1, 1, 1]} : vector<1x10x10x16xf32> to vector<1x8x8x16xf32>
    %237 = vector.extract_strided_slice %199 {offsets = [0, 2, 0, 0], sizes = [1, 8, 8, 16], strides = [1, 1, 1, 1]} : vector<1x10x10x16xf32> to vector<1x8x8x16xf32>
    %238 = vector.extract_strided_slice %199 {offsets = [0, 2, 1, 0], sizes = [1, 8, 8, 16], strides = [1, 1, 1, 1]} : vector<1x10x10x16xf32> to vector<1x8x8x16xf32>
    %239 = tpu.concatenate %235, %236, %237, %238 in 3 : vector<1x8x8x16xf32>, vector<1x8x8x16xf32>, vector<1x8x8x16xf32>, vector<1x8x8x16xf32> -> vector<1x8x8x64xf32>
    %240 = vector.shape_cast %239 : vector<1x8x8x64xf32> to vector<64x64xf32>
    %c1_98 = arith.constant 1 : index
    %c0_99 = arith.constant 0 : index
    %c0_100 = arith.constant 0 : index
    %c0_101 = arith.constant 0 : index
    %241 = vector.load %arg8[%c1_98, %c0_99, %c0_100, %c0_101] : memref<2x2x64x8xf32, #tpu.memory_space<vmem>>, vector<1x1x64x8xf32>
    %242 = vector.shape_cast %241 : vector<1x1x64x8xf32> to vector<64x8xf32>
    %cst_102 = arith.constant dense<0.000000e+00> : vector<64x8xf32>
    %243 = tpu.matmul %240, %242, %cst_102 {dimension_numbers = #tpu.dot_dimension_numbers<[1], [0], [0], [1], [0, 0, 1, 1], [], []>} : vector<64x64xf32>, vector<64x8xf32>, vector<64x8xf32> -> vector<64x8xf32>
    %244 = vector.broadcast %200 : vector<1x8xf32> to vector<64x8xf32>
    %245 = arith.addf %243, %244 : vector<64x8xf32>
    %cst_103 = arith.constant 0.000000e+00 : f32
    %246 = vector.broadcast %cst_103 : f32 to vector<64x8xf32>
    %247 = arith.cmpf oge, %245, %246 : vector<64x8xf32>
    %cst_104 = arith.constant 5.000000e-02 : f32
    %248 = vector.broadcast %cst_104 : f32 to vector<64x8xf32>
    %249 = arith.mulf %248, %245 : vector<64x8xf32>
    %250 = arith.select %247, %245, %249 : vector<64x8xi1>, vector<64x8xf32>
    %251 = vector.shape_cast %250 : vector<64x8xf32> to vector<1x8x8x8xf32>
    %252 = vector.extract_strided_slice %199 {offsets = [0, 1, 1, 0], sizes = [1, 8, 8, 16], strides = [1, 1, 1, 1]} : vector<1x10x10x16xf32> to vector<1x8x8x16xf32>
    %253 = vector.extract_strided_slice %199 {offsets = [0, 1, 2, 0], sizes = [1, 8, 8, 16], strides = [1, 1, 1, 1]} : vector<1x10x10x16xf32> to vector<1x8x8x16xf32>
    %254 = vector.extract_strided_slice %199 {offsets = [0, 2, 1, 0], sizes = [1, 8, 8, 16], strides = [1, 1, 1, 1]} : vector<1x10x10x16xf32> to vector<1x8x8x16xf32>
    %255 = vector.extract_strided_slice %199 {offsets = [0, 2, 2, 0], sizes = [1, 8, 8, 16], strides = [1, 1, 1, 1]} : vector<1x10x10x16xf32> to vector<1x8x8x16xf32>
    %256 = tpu.concatenate %252, %253, %254, %255 in 3 : vector<1x8x8x16xf32>, vector<1x8x8x16xf32>, vector<1x8x8x16xf32>, vector<1x8x8x16xf32> -> vector<1x8x8x64xf32>
    %257 = vector.shape_cast %256 : vector<1x8x8x64xf32> to vector<64x64xf32>
    %c1_105 = arith.constant 1 : index
    %c1_106 = arith.constant 1 : index
    %c0_107 = arith.constant 0 : index
    %c0_108 = arith.constant 0 : index
    %258 = vector.load %arg8[%c1_105, %c1_106, %c0_107, %c0_108] : memref<2x2x64x8xf32, #tpu.memory_space<vmem>>, vector<1x1x64x8xf32>
    %259 = vector.shape_cast %258 : vector<1x1x64x8xf32> to vector<64x8xf32>
    %cst_109 = arith.constant dense<0.000000e+00> : vector<64x8xf32>
    %260 = tpu.matmul %257, %259, %cst_109 {dimension_numbers = #tpu.dot_dimension_numbers<[1], [0], [0], [1], [0, 0, 1, 1], [], []>} : vector<64x64xf32>, vector<64x8xf32>, vector<64x8xf32> -> vector<64x8xf32>
    %261 = vector.broadcast %200 : vector<1x8xf32> to vector<64x8xf32>
    %262 = arith.addf %260, %261 : vector<64x8xf32>
    %cst_110 = arith.constant 0.000000e+00 : f32
    %263 = vector.broadcast %cst_110 : f32 to vector<64x8xf32>
    %264 = arith.cmpf oge, %262, %263 : vector<64x8xf32>
    %cst_111 = arith.constant 5.000000e-02 : f32
    %265 = vector.broadcast %cst_111 : f32 to vector<64x8xf32>
    %266 = arith.mulf %265, %262 : vector<64x8xf32>
    %267 = arith.select %264, %262, %266 : vector<64x8xi1>, vector<64x8xf32>
    %268 = vector.shape_cast %267 : vector<64x8xf32> to vector<1x8x8x8xf32>
    %269 = vector.shape_cast %217 : vector<1x8x8x8xf32> to vector<1x8x8x1x8xf32>
    %270 = vector.shape_cast %234 : vector<1x8x8x8xf32> to vector<1x8x8x1x8xf32>
    %271 = tpu.concatenate %269, %270 in 3 : vector<1x8x8x1x8xf32>, vector<1x8x8x1x8xf32> -> vector<1x8x8x2x8xf32>
    %272 = vector.shape_cast %271 : vector<1x8x8x2x8xf32> to vector<1x8x16x8xf32>
    %273 = vector.shape_cast %251 : vector<1x8x8x8xf32> to vector<1x8x8x1x8xf32>
    %274 = vector.shape_cast %268 : vector<1x8x8x8xf32> to vector<1x8x8x1x8xf32>
    %275 = tpu.concatenate %273, %274 in 3 : vector<1x8x8x1x8xf32>, vector<1x8x8x1x8xf32> -> vector<1x8x8x2x8xf32>
    %276 = vector.shape_cast %275 : vector<1x8x8x2x8xf32> to vector<1x8x16x8xf32>
    %277 = vector.shape_cast %272 : vector<1x8x16x8xf32> to vector<1x8x1x16x8xf32>
    %278 = vector.shape_cast %276 : vector<1x8x16x8xf32> to vector<1x8x1x16x8xf32>
    %279 = tpu.concatenate %277, %278 in 2 : vector<1x8x1x16x8xf32>, vector<1x8x1x16x8xf32> -> vector<1x8x2x16x8xf32>
    %280 = vector.shape_cast %279 : vector<1x8x2x16x8xf32> to vector<1x16x16x8xf32>
    %cst_112 = arith.constant 0.000000e+00 : f32
    %281 = vector.broadcast %cst_112 : f32 to vector<1x16x1x8xf32>
    %282 = tpu.concatenate %281, %280, %281 in 2 : vector<1x16x1x8xf32>, vector<1x16x16x8xf32>, vector<1x16x1x8xf32> -> vector<1x16x18x8xf32>
    %cst_113 = arith.constant 0.000000e+00 : f32
    %283 = vector.broadcast %cst_113 : f32 to vector<1x1x18x8xf32>
    %284 = tpu.concatenate %283, %282, %283 in 1 : vector<1x1x18x8xf32>, vector<1x16x18x8xf32>, vector<1x1x18x8xf32> -> vector<1x18x18x8xf32>
    %c0_114 = arith.constant 0 : index
    %c0_115 = arith.constant 0 : index
    %285 = vector.load %arg11[%c0_114, %c0_115] : memref<1x3xf32, #tpu.memory_space<vmem>>, vector<1x3xf32>
    %286 = vector.extract_strided_slice %284 {offsets = [0, 0, 0, 0], sizes = [1, 16, 16, 8], strides = [1, 1, 1, 1]} : vector<1x18x18x8xf32> to vector<1x16x16x8xf32>
    %287 = vector.extract_strided_slice %284 {offsets = [0, 0, 1, 0], sizes = [1, 16, 16, 8], strides = [1, 1, 1, 1]} : vector<1x18x18x8xf32> to vector<1x16x16x8xf32>
    %288 = vector.extract_strided_slice %284 {offsets = [0, 1, 0, 0], sizes = [1, 16, 16, 8], strides = [1, 1, 1, 1]} : vector<1x18x18x8xf32> to vector<1x16x16x8xf32>
    %289 = vector.extract_strided_slice %284 {offsets = [0, 1, 1, 0], sizes = [1, 16, 16, 8], strides = [1, 1, 1, 1]} : vector<1x18x18x8xf32> to vector<1x16x16x8xf32>
    %290 = tpu.concatenate %286, %287, %288, %289 in 3 : vector<1x16x16x8xf32>, vector<1x16x16x8xf32>, vector<1x16x16x8xf32>, vector<1x16x16x8xf32> -> vector<1x16x16x32xf32>
    %291 = vector.shape_cast %290 : vector<1x16x16x32xf32> to vector<256x32xf32>
    %c0_116 = arith.constant 0 : index
    %c0_117 = arith.constant 0 : index
    %c0_118 = arith.constant 0 : index
    %c0_119 = arith.constant 0 : index
    %292 = vector.load %arg10[%c0_116, %c0_117, %c0_118, %c0_119] : memref<2x2x32x3xf32, #tpu.memory_space<vmem>>, vector<1x1x32x3xf32>
    %293 = vector.shape_cast %292 : vector<1x1x32x3xf32> to vector<32x3xf32>
    %cst_120 = arith.constant dense<0.000000e+00> : vector<256x3xf32>
    %294 = tpu.matmul %291, %293, %cst_120 {dimension_numbers = #tpu.dot_dimension_numbers<[1], [0], [0], [1], [0, 0, 1, 1], [], []>} : vector<256x32xf32>, vector<32x3xf32>, vector<256x3xf32> -> vector<256x3xf32>
    %295 = vector.broadcast %285 : vector<1x3xf32> to vector<256x3xf32>
    %296 = arith.addf %294, %295 : vector<256x3xf32>
    %297 = math.tanh %296 : vector<256x3xf32>
    %298 = vector.shape_cast %297 : vector<256x3xf32> to vector<1x16x16x3xf32>
    %299 = vector.extract_strided_slice %284 {offsets = [0, 0, 1, 0], sizes = [1, 16, 16, 8], strides = [1, 1, 1, 1]} : vector<1x18x18x8xf32> to vector<1x16x16x8xf32>
    %300 = vector.extract_strided_slice %284 {offsets = [0, 0, 2, 0], sizes = [1, 16, 16, 8], strides = [1, 1, 1, 1]} : vector<1x18x18x8xf32> to vector<1x16x16x8xf32>
    %301 = vector.extract_strided_slice %284 {offsets = [0, 1, 1, 0], sizes = [1, 16, 16, 8], strides = [1, 1, 1, 1]} : vector<1x18x18x8xf32> to vector<1x16x16x8xf32>
    %302 = vector.extract_strided_slice %284 {offsets = [0, 1, 2, 0], sizes = [1, 16, 16, 8], strides = [1, 1, 1, 1]} : vector<1x18x18x8xf32> to vector<1x16x16x8xf32>
    %303 = tpu.concatenate %299, %300, %301, %302 in 3 : vector<1x16x16x8xf32>, vector<1x16x16x8xf32>, vector<1x16x16x8xf32>, vector<1x16x16x8xf32> -> vector<1x16x16x32xf32>
    %304 = vector.shape_cast %303 : vector<1x16x16x32xf32> to vector<256x32xf32>
    %c0_121 = arith.constant 0 : index
    %c1_122 = arith.constant 1 : index
    %c0_123 = arith.constant 0 : index
    %c0_124 = arith.constant 0 : index
    %305 = vector.load %arg10[%c0_121, %c1_122, %c0_123, %c0_124] : memref<2x2x32x3xf32, #tpu.memory_space<vmem>>, vector<1x1x32x3xf32>
    %306 = vector.shape_cast %305 : vector<1x1x32x3xf32> to vector<32x3xf32>
    %cst_125 = arith.constant dense<0.000000e+00> : vector<256x3xf32>
    %307 = tpu.matmul %304, %306, %cst_125 {dimension_numbers = #tpu.dot_dimension_numbers<[1], [0], [0], [1], [0, 0, 1, 1], [], []>} : vector<256x32xf32>, vector<32x3xf32>, vector<256x3xf32> -> vector<256x3xf32>
    %308 = vector.broadcast %285 : vector<1x3xf32> to vector<256x3xf32>
    %309 = arith.addf %307, %308 : vector<256x3xf32>
    %310 = math.tanh %309 : vector<256x3xf32>
    %311 = vector.shape_cast %310 : vector<256x3xf32> to vector<1x16x16x3xf32>
    %312 = vector.extract_strided_slice %284 {offsets = [0, 1, 0, 0], sizes = [1, 16, 16, 8], strides = [1, 1, 1, 1]} : vector<1x18x18x8xf32> to vector<1x16x16x8xf32>
    %313 = vector.extract_strided_slice %284 {offsets = [0, 1, 1, 0], sizes = [1, 16, 16, 8], strides = [1, 1, 1, 1]} : vector<1x18x18x8xf32> to vector<1x16x16x8xf32>
    %314 = vector.extract_strided_slice %284 {offsets = [0, 2, 0, 0], sizes = [1, 16, 16, 8], strides = [1, 1, 1, 1]} : vector<1x18x18x8xf32> to vector<1x16x16x8xf32>
    %315 = vector.extract_strided_slice %284 {offsets = [0, 2, 1, 0], sizes = [1, 16, 16, 8], strides = [1, 1, 1, 1]} : vector<1x18x18x8xf32> to vector<1x16x16x8xf32>
    %316 = tpu.concatenate %312, %313, %314, %315 in 3 : vector<1x16x16x8xf32>, vector<1x16x16x8xf32>, vector<1x16x16x8xf32>, vector<1x16x16x8xf32> -> vector<1x16x16x32xf32>
    %317 = vector.shape_cast %316 : vector<1x16x16x32xf32> to vector<256x32xf32>
    %c1_126 = arith.constant 1 : index
    %c0_127 = arith.constant 0 : index
    %c0_128 = arith.constant 0 : index
    %c0_129 = arith.constant 0 : index
    %318 = vector.load %arg10[%c1_126, %c0_127, %c0_128, %c0_129] : memref<2x2x32x3xf32, #tpu.memory_space<vmem>>, vector<1x1x32x3xf32>
    %319 = vector.shape_cast %318 : vector<1x1x32x3xf32> to vector<32x3xf32>
    %cst_130 = arith.constant dense<0.000000e+00> : vector<256x3xf32>
    %320 = tpu.matmul %317, %319, %cst_130 {dimension_numbers = #tpu.dot_dimension_numbers<[1], [0], [0], [1], [0, 0, 1, 1], [], []>} : vector<256x32xf32>, vector<32x3xf32>, vector<256x3xf32> -> vector<256x3xf32>
    %321 = vector.broadcast %285 : vector<1x3xf32> to vector<256x3xf32>
    %322 = arith.addf %320, %321 : vector<256x3xf32>
    %323 = math.tanh %322 : vector<256x3xf32>
    %324 = vector.shape_cast %323 : vector<256x3xf32> to vector<1x16x16x3xf32>
    %325 = vector.extract_strided_slice %284 {offsets = [0, 1, 1, 0], sizes = [1, 16, 16, 8], strides = [1, 1, 1, 1]} : vector<1x18x18x8xf32> to vector<1x16x16x8xf32>
    %326 = vector.extract_strided_slice %284 {offsets = [0, 1, 2, 0], sizes = [1, 16, 16, 8], strides = [1, 1, 1, 1]} : vector<1x18x18x8xf32> to vector<1x16x16x8xf32>
    %327 = vector.extract_strided_slice %284 {offsets = [0, 2, 1, 0], sizes = [1, 16, 16, 8], strides = [1, 1, 1, 1]} : vector<1x18x18x8xf32> to vector<1x16x16x8xf32>
    %328 = vector.extract_strided_slice %284 {offsets = [0, 2, 2, 0], sizes = [1, 16, 16, 8], strides = [1, 1, 1, 1]} : vector<1x18x18x8xf32> to vector<1x16x16x8xf32>
    %329 = tpu.concatenate %325, %326, %327, %328 in 3 : vector<1x16x16x8xf32>, vector<1x16x16x8xf32>, vector<1x16x16x8xf32>, vector<1x16x16x8xf32> -> vector<1x16x16x32xf32>
    %330 = vector.shape_cast %329 : vector<1x16x16x32xf32> to vector<256x32xf32>
    %c1_131 = arith.constant 1 : index
    %c1_132 = arith.constant 1 : index
    %c0_133 = arith.constant 0 : index
    %c0_134 = arith.constant 0 : index
    %331 = vector.load %arg10[%c1_131, %c1_132, %c0_133, %c0_134] : memref<2x2x32x3xf32, #tpu.memory_space<vmem>>, vector<1x1x32x3xf32>
    %332 = vector.shape_cast %331 : vector<1x1x32x3xf32> to vector<32x3xf32>
    %cst_135 = arith.constant dense<0.000000e+00> : vector<256x3xf32>
    %333 = tpu.matmul %330, %332, %cst_135 {dimension_numbers = #tpu.dot_dimension_numbers<[1], [0], [0], [1], [0, 0, 1, 1], [], []>} : vector<256x32xf32>, vector<32x3xf32>, vector<256x3xf32> -> vector<256x3xf32>
    %334 = vector.broadcast %285 : vector<1x3xf32> to vector<256x3xf32>
    %335 = arith.addf %333, %334 : vector<256x3xf32>
    %336 = math.tanh %335 : vector<256x3xf32>
    %337 = vector.shape_cast %336 : vector<256x3xf32> to vector<1x16x16x3xf32>
    %338 = tpu.concatenate %298, %311, %324, %337 in 3 : vector<1x16x16x3xf32>, vector<1x16x16x3xf32>, vector<1x16x16x3xf32>, vector<1x16x16x3xf32> -> vector<1x16x16x12xf32>
    %c0_136 = arith.constant 0 : index
    %c0_137 = arith.constant 0 : index
    %c0_138 = arith.constant 0 : index
    %c0_139 = arith.constant 0 : index
    %339 = vector.load %arg12[%c0_136, %c0_137, %c0_138, %c0_139] : memref<1x16x16x12xf32, #tpu.memory_space<vmem>>, vector<1x16x16x12xf32>
    tpu.vector_store %arg12[%c0_136, %c0_137, %c0_138, %c0_139], %338 {strides = array<i32>} : memref<1x16x16x12xf32, #tpu.memory_space<vmem>>, vector<1x16x16x12xf32>,
    return
  }
  func.func @transform_0(%arg0: i32) -> (i32, i32, i32) {
    %c0_i32 = arith.constant 0 : i32
    %c0_i32_0 = arith.constant 0 : i32
    %c0_i32_1 = arith.constant 0 : i32
    return %arg0, %c0_i32, %c0_i32_0 : i32, i32, i32
  }
  func.func @transform_1(%arg0: i32) -> (i32, i32, i32) {
    %c0_i32 = arith.constant 0 : i32
    %c0_i32_0 = arith.constant 0 : i32
    %c0_i32_1 = arith.constant 0 : i32
    %c0_i32_2 = arith.constant 0 : i32
    return %c0_i32, %c0_i32_0, %c0_i32_1 : i32, i32, i32
  }
  func.func @transform_2(%arg0: i32) -> (i32, i32) {
    %c0_i32 = arith.constant 0 : i32
    %c0_i32_0 = arith.constant 0 : i32
    %c0_i32_1 = arith.constant 0 : i32
    return %c0_i32, %c0_i32_0 : i32, i32
  }
  func.func @transform_3(%arg0: i32) -> (i32, i32, i32, i32) {
    %c0_i32 = arith.constant 0 : i32
    %c0_i32_0 = arith.constant 0 : i32
    %c0_i32_1 = arith.constant 0 : i32
    %c0_i32_2 = arith.constant 0 : i32
    %c0_i32_3 = arith.constant 0 : i32
    return %c0_i32, %c0_i32_0, %c0_i32_1, %c0_i32_2 : i32, i32, i32, i32
  }
  func.func @transform_4(%arg0: i32) -> (i32, i32) {
    %c0_i32 = arith.constant 0 : i32
    %c0_i32_0 = arith.constant 0 : i32
    %c0_i32_1 = arith.constant 0 : i32
    return %c0_i32, %c0_i32_0 : i32, i32
  }
  func.func @transform_5(%arg0: i32) -> (i32, i32, i32, i32) {
    %c0_i32 = arith.constant 0 : i32
    %c0_i32_0 = arith.constant 0 : i32
    %c0_i32_1 = arith.constant 0 : i32
    %c0_i32_2 = arith.constant 0 : i32
    %c0_i32_3 = arith.constant 0 : i32
    return %c0_i32, %c0_i32_0, %c0_i32_1, %c0_i32_2 : i32, i32, i32, i32
  }
  func.func @transform_6(%arg0: i32) -> (i32, i32) {
    %c0_i32 = arith.constant 0 : i32
    %c0_i32_0 = arith.constant 0 : i32
    %c0_i32_1 = arith.constant 0 : i32
    return %c0_i32, %c0_i32_0 : i32, i32
  }
  func.func @transform_7(%arg0: i32) -> (i32, i32, i32, i32) {
    %c0_i32 = arith.constant 0 : i32
    %c0_i32_0 = arith.constant 0 : i32
    %c0_i32_1 = arith.constant 0 : i32
    %c0_i32_2 = arith.constant 0 : i32
    %c0_i32_3 = arith.constant 0 : i32
    return %c0_i32, %c0_i32_0, %c0_i32_1, %c0_i32_2 : i32, i32, i32, i32
  }
  func.func @transform_8(%arg0: i32) -> (i32, i32) {
    %c0_i32 = arith.constant 0 : i32
    %c0_i32_0 = arith.constant 0 : i32
    %c0_i32_1 = arith.constant 0 : i32
    return %c0_i32, %c0_i32_0 : i32, i32
  }
  func.func @transform_9(%arg0: i32) -> (i32, i32, i32, i32) {
    %c0_i32 = arith.constant 0 : i32
    %c0_i32_0 = arith.constant 0 : i32
    %c0_i32_1 = arith.constant 0 : i32
    %c0_i32_2 = arith.constant 0 : i32
    %c0_i32_3 = arith.constant 0 : i32
    return %c0_i32, %c0_i32_0, %c0_i32_1, %c0_i32_2 : i32, i32, i32, i32
  }
  func.func @transform_10(%arg0: i32) -> (i32, i32) {
    %c0_i32 = arith.constant 0 : i32
    %c0_i32_0 = arith.constant 0 : i32
    %c0_i32_1 = arith.constant 0 : i32
    return %c0_i32, %c0_i32_0 : i32, i32
  }
  func.func @transform_11(%arg0: i32) -> (i32, i32, i32, i32) {
    %c0_i32 = arith.constant 0 : i32
    %c0_i32_0 = arith.constant 0 : i32
    %c0_i32_1 = arith.constant 0 : i32
    %c0_i32_2 = arith.constant 0 : i32
    return %arg0, %c0_i32, %c0_i32_0, %c0_i32_1 : i32, i32, i32, i32
  }
}

</mosaic_0001>

<bundles_post_ra>
// kernel: generator_forward.1
= control target key start
LH: loop header
LB: loop body
LE: loop exit
PB: predicated region body
PF: predicated region fallthrough
CT: control target
= control target key end

     0   :  { %s18147_s0 = inlined_call_operand.hbm [shape: f32[2,1,32], index: 0, kind: input, shape index: {}]   ;;  %s18148_s1 = inlined_call_operand.hbm [shape: f32[4,32,64], index: 1, kind: input, shape index: {}]   ;;  %s18149_s2 = inlined_call_operand.hbm [shape: f32[1,64], index: 2, kind: input, shape index: {}]   ;;  %s18150_s3 = inlined_call_operand.vmem [shape: f32[2,2,256,32], index: 3, kind: input, shape index: {}]   ;;  %s18151_s4 = inlined_call_operand.hbm [shape: f32[1,32], index: 4, kind: input, shape index: {}]   ;;  %s18152_s5 = inlined_call_operand.vmem [shape: f32[2,2,128,16], index: 5, kind: input, shape index: {}]   ;;  %s18153_s6 = inlined_call_operand.hbm [shape: f32[1,16], index: 6, kind: input, shape index: {}]   ;;  %s18154_s7 = inlined_call_operand.vmem [shape: f32[2,2,64,8], index: 7, kind: input, shape index: {}]   ;;  %s18155_s8 = inlined_call_operand.hbm [shape: f32[1,8], index: 8, kind: input, shape index: {}]   ;;  %s18156_s9 = inlined_call_operand.vmem [shape: f32[2,2,32,3], index: 9, kind: input, shape index: {}]   ;;  %s18157_s10 = inlined_call_operand.hbm [shape: f32[1,3], index: 10, kind: input, shape index: {}]   ;;  %s18158_s11 = inlined_call_operand.vmem [shape: f32[2,16,16,12], index: 11, kind: output, shape index: {}]  }
   0x1   :  { %18348 = sst [smem:[#allocation136_spill]] %s18154_s7 }
   0x2   :  { %18349 = sst [smem:[#allocation137_spill]] %s18156_s9 }
   0x3   :  { %18350 = sst [smem:[#allocation138_spill]] %s18158_s11 }
   0x4   :  { %16 = vsyncpa [#allocation3], 0 }
   0x5   :  { %18 = vsyncpa [#allocation3 + $0x1], 0 }
   0x6   :  { %19 = vsyncpa [#allocation5], 0 }
   0x7   :  { %20 = vsyncpa [#allocation8], 0 }
   0x8   :  { %21 = vsyncpa [#allocation11], 0  ;;  %s12203_s17 = smov 0   ;;  %s12205_s18 = smov 0  }
   0x9   :  { %s12207_s19 = smov 0   ;;  %s12209_s20 = smov 0  }
   0xa LB: > { %s12119_s21 = smov [#allocation4]   ;;  %s12224_s23 = sadd.s32 4294967295, %s12117_s20   ;;  %s12117_s20 = sphi %s12209_s20, %s18962_s20   ;;  %s12113_s19 = sphi %s12207_s19, %s18961_s19   ;;  %s12109_s18 = sphi %s12205_s18, %s18960_s18   ;;  %s12105_s17 = sphi %s12203_s17, %s18959_s17  }
   0xb   : > { %s306_s22 = sshll.u32 %s12119_s21, 4  ;;  %p9765_p0 = scmp.ge.s32.totalorder %s12117_s20, 1  ;;  %s12229_s22 = int_to_ptr.vmem [resolvable:$true] %s306_s22 }
   0xc   : > { %p18161_p1 = scmp.eq.s32.totalorder %s12224_s23, 0  ;;  %p294_p2 = scmp.lt.s32.totalorder %s12117_s20, 3 }
   0xd   : > { %s12120_s25 = smov [#allocation7]   ;;  %s12121_s28 = smov [#allocation10]  }
   0xe   : > { %p12231_p3 = pnand %p9765_p0, %p294_p2  ;;  %s334_s26 = sshll.u32 %s12120_s25, 4  ;;  %s12243_s26 = int_to_ptr.vmem [resolvable:$true] %s334_s26 }
   0xf   : > { %s362_s29 = sshll.u32 %s12121_s28, 4  ;;  %s11873_s13 = scalar_lea.hbm %s18148_s1, 2048  ;;  %s12245_s29 = int_to_ptr.vmem [resolvable:$true] %s362_s29 }
  0x10   : > { %s18351_s24 = scalar_select %p12231_p3, 1, 0 }
  0x11   : > { %p11504_p4 = pneg %p12231_p3  ;;  %p11874_p6 = scmp.ne.s32.totalorder %s18148_s1, %s11873_s13 }
  0x12   : > { %p11880_p10 = scmp.lt.u32.totalorder %s11873_s13, %s18148_s1 }
  0x13   : > { %p12239_p5 = pnand %p11504_p4, %p18161_p1 }
  0x15   : > { %p12255_p7 = pneg %p12239_p5 }
  0x17   : > { %p11876_p8 = pnand %p12255_p7, %p11874_p6 }
  0x19   : > { %p11877_p9 = pneg %p11876_p8 }
  0x1b   : > { %p11882_p11 = pnand %p11880_p10, %p11877_p9 }
  0x1d   : > { %11885 = shalt.err (!%p11882_p11)
}
  0x1e   : > { %s11886_s28 = scalar_lea.vmem %s12229_s22, 2048  ;;  %p11894_p2 = scmp.lt.s32.totalorder %s12229_s22, %s12229_s22 }
  0x1f   : > { %p11887_p12 = scmp.ne.s32.totalorder %s12229_s22, %s11886_s28  ;;  %p11895_p4 = scmp.lt.s32.totalorder %s11886_s28, %s11886_s28 }
  0x21   : > { %p11889_p13 = pnand %p11887_p12, %p12255_p7  ;;  %p11896_p6 = por %p11895_p4, %p11894_p2 }
  0x23   : > { %p11890_p0 = pneg %p11889_p13 }
  0x25   : > { %p11897_p8 = pnand %p11896_p6, %p11890_p0 }
  0x27   : > { %11900 = shalt.err (!%p11897_p8)
}
  0x28   : > { %s12122_s30 = smov 128   ;;  %s12123_s12 = smov 8  }
  0x29   : > { %11507 = dma.hbm_to_vmem [thread:$0]  (!%p12239_p5), %s18148_s1, 2048, %s12229_s22, [#allocation5], %s12122_s30, %s12122_s30, %s12123_s12  }
  0x2a   : > { %s11901_s25 = scalar_lea.hbm %s18151_s4, 16 }
  0x2b   : > { %p11902_p9 = scmp.ne.s32.totalorder %s18151_s4, %s11901_s25  ;;  %p11908_p12 = scmp.lt.u32.totalorder %s11901_s25, %s18151_s4 }
  0x2d   : > { %p11904_p10 = pnand %p11902_p9, %p12255_p7 }
  0x2f   : > { %p11905_p11 = pneg %p11904_p10 }
  0x31   : > { %p11910_p13 = pnand %p11908_p12, %p11905_p11 }
  0x33   : > { %11913 = shalt.err (!%p11910_p13)
}
  0x34   : > { %s11914_s22 = scalar_lea.vmem %s12243_s26, 16  ;;  %s11921_s9 = scalar_lea.vmem %s12243_s26, 32 }
  0x35   : > { %p11915_p0 = scmp.ne.s32.totalorder %s12243_s26, %s11914_s22  ;;  %p11922_p6 = scmp.lt.s32.totalorder %s12243_s26, %s12243_s26 }
  0x36   : > { %p11923_p8 = scmp.lt.s32.totalorder %s11921_s9, %s11914_s22 }
  0x37   : > { %p11917_p2 = pnand %p11915_p0, %p12255_p7 }
  0x38   : > { %p11924_p9 = por %p11923_p8, %p11922_p6 }
  0x39   : > { %p11918_p4 = pneg %p11917_p2 }
  0x3b   : > { %p11925_p10 = pnand %p11924_p9, %p11918_p4 }
  0x3d   : > { %11928 = shalt.err (!%p11925_p10)
}
  0x3e   : > { %11513 = dma.hbm_to_vmem [thread:$0]  (!%p12239_p5), %s18151_s4, 16, %s12243_s26, [#allocation8]  }
  0x3f   : > { %s11929_s13 = scalar_lea.hbm %s18155_s8, 16 }
  0x40   : > { %p11930_p11 = scmp.ne.s32.totalorder %s18155_s8, %s11929_s13  ;;  %p11936_p0 = scmp.lt.u32.totalorder %s11929_s13, %s18155_s8 }
  0x42   : > { %p11932_p12 = pnand %p11930_p11, %p12255_p7 }
  0x44   : > { %p11933_p13 = pneg %p11932_p12 }
  0x46   : > { %p11938_p2 = pnand %p11936_p0, %p11933_p13 }
  0x48   : > { %11941 = shalt.err (!%p11938_p2)
}
  0x49   : > { %s11942_s26 = scalar_lea.vmem %s12245_s29, 16  ;;  %s11949_s28 = scalar_lea.vmem %s12245_s29, 32 }
  0x4a   : > { %p11943_p4 = scmp.ne.s32.totalorder %s12245_s29, %s11942_s26  ;;  %p11950_p9 = scmp.lt.s32.totalorder %s12245_s29, %s12245_s29 }
  0x4b   : > { %p11951_p10 = scmp.lt.s32.totalorder %s11949_s28, %s11942_s26 }
  0x4c   : > { %p11945_p6 = pnand %p11943_p4, %p12255_p7 }
  0x4d   : > { %p11952_p11 = por %p11951_p10, %p11950_p9 }
  0x4e   : > { %p11946_p8 = pneg %p11945_p6 }
  0x50   : > { %p11953_p12 = pnand %p11952_p11, %p11946_p8 }
  0x52   : > { %11956 = shalt.err (!%p11953_p12)
}
  0x53   : > { %11519 = dma.hbm_to_vmem [thread:$0]  (!%p12239_p5), %s18155_s8, 16, %s12245_s29, [#allocation11]  }
  0x54   : > { %s12124_s7 = smov [#allocation6]   ;;  %s12125_s30 = smov [#allocation9]  }
  0x55   : > { %s320_s11 = sshll.u32 %s12124_s7, 4  ;;  %s348_s12 = sshll.u32 %s12125_s30, 4  ;;  %s321_s11 = int_to_ptr.vmem [resolvable:$true] %s320_s11  ;;  %s349_s12 = int_to_ptr.vmem [resolvable:$true] %s348_s12 }
  0x56   : > { %s11957_s15 = scalar_lea.hbm %s18149_s2, 16 }
  0x57   : > { %p11958_p13 = scmp.ne.s32.totalorder %s18149_s2, %s11957_s15  ;;  %p11964_p4 = scmp.lt.u32.totalorder %s11957_s15, %s18149_s2 }
  0x59   : > { %p11960_p0 = pnand %p11958_p13, %p12255_p7 }
  0x5b   : > { %p11961_p2 = pneg %p11960_p0 }
  0x5d   : > { %p11966_p6 = pnand %p11964_p4, %p11961_p2 }
  0x5f   : > { %11969 = shalt.err (!%p11966_p6)
}
  0x60   : > { %s11970_s29 = scalar_lea.vmem %s321_s11, 16  ;;  %s11977_s22 = scalar_lea.vmem %s321_s11, 32 }
  0x61   : > { %p11971_p8 = scmp.ne.s32.totalorder %s321_s11, %s11970_s29  ;;  %p11978_p11 = scmp.lt.s32.totalorder %s321_s11, %s321_s11 }
  0x62   : > { %p11979_p12 = scmp.lt.s32.totalorder %s11977_s22, %s11970_s29 }
  0x63   : > { %p11973_p9 = pnand %p11971_p8, %p12255_p7 }
  0x64   : > { %p11980_p1 = por %p11979_p12, %p11978_p11 }
  0x65   : > { %p11974_p10 = pneg %p11973_p9 }
  0x67   : > { %p11981_p3 = pnand %p11980_p1, %p11974_p10 }
  0x69   : > { %11984 = shalt.err (!%p11981_p3)
}
  0x6a   : > { %11510 = dma.hbm_to_vmem [thread:$0]  (!%p12239_p5), %s18149_s2, 16, %s321_s11, [#allocation5]  }
  0x6b   : > { %s11985_s14 = scalar_lea.hbm %s18153_s6, 16 }
  0x6c   : > { %p11986_p13 = scmp.ne.s32.totalorder %s18153_s6, %s11985_s14  ;;  %p11992_p3 = scmp.lt.u32.totalorder %s11985_s14, %s18153_s6 }
  0x6e   : > { %p11988_p0 = pnand %p11986_p13, %p12255_p7 }
  0x70   : > { %p11989_p1 = pneg %p11988_p0 }
  0x72   : > { %p11994_p2 = pnand %p11992_p3, %p11989_p1 }
  0x74   : > { %11997 = shalt.err (!%p11994_p2)
}
  0x75   : > { %s11998_s28 = scalar_lea.vmem %s349_s12, 16  ;;  %s12005_s11 = scalar_lea.vmem %s349_s12, 32 }
  0x76   : > { %p11999_p4 = scmp.ne.s32.totalorder %s349_s12, %s11998_s28  ;;  %p12006_p9 = scmp.lt.s32.totalorder %s349_s12, %s349_s12 }
  0x77   : > { %p12007_p10 = scmp.lt.s32.totalorder %s12005_s11, %s11998_s28 }
  0x78   : > { %p12001_p6 = pnand %p11999_p4, %p12255_p7 }
  0x79   : > { %p12008_p11 = por %p12007_p10, %p12006_p9 }
  0x7a   : > { %p12002_p8 = pneg %p12001_p6 }
  0x7c   : > { %p12009_p12 = pnand %p12008_p11, %p12002_p8 }
  0x7e   : > { %12012 = shalt.err (!%p12009_p12)
}
  0x7f   : > { %11516 = dma.hbm_to_vmem [thread:$0]  (!%p12239_p5), %s18153_s6, 16, %s349_s12, [#allocation8]  }
  0x80   : > { %s12126_s9 = smov [#allocation12]   ;;  %s12013_s14 = scalar_lea.hbm %s18157_s10, 16 }
  0x81   : > { %s376_s7 = sshll.u32 %s12126_s9, 4  ;;  %p12014_p13 = scmp.ne.s32.totalorder %s18157_s10, %s12013_s14  ;;  %s377_s7 = int_to_ptr.vmem [resolvable:$true] %s376_s7 }
  0x82   : > { %p12020_p3 = scmp.lt.u32.totalorder %s12013_s14, %s18157_s10 }
  0x83   : > { %p12016_p0 = pnand %p12014_p13, %p12255_p7 }
  0x85   : > { %p12017_p1 = pneg %p12016_p0 }
  0x87   : > { %p12022_p2 = pnand %p12020_p3, %p12017_p1 }
  0x89   : > { %12025 = shalt.err (!%p12022_p2)
}
  0x8a   : > { %s12026_s12 = scalar_lea.vmem %s377_s7, 16  ;;  %s12033_s28 = scalar_lea.vmem %s377_s7, 32 }
  0x8b   : > { %p12027_p4 = scmp.ne.s32.totalorder %s377_s7, %s12026_s12  ;;  %p12034_p9 = scmp.lt.s32.totalorder %s377_s7, %s377_s7 }
  0x8c   : > { %p12035_p10 = scmp.lt.s32.totalorder %s12033_s28, %s12026_s12 }
  0x8d   : > { %p12029_p6 = pnand %p12027_p4, %p12255_p7 }
  0x8e   : > { %p12036_p11 = por %p12035_p10, %p12034_p9 }
  0x8f   : > { %p12030_p8 = pneg %p12029_p6 }
  0x91   : > { %p12037_p12 = pnand %p12036_p11, %p12030_p8 }
  0x93   : > { %12040 = shalt.err (!%p12037_p12)
}
  0x94   : > { %11522 = dma.hbm_to_vmem [thread:$0]  (!%p12239_p5), %s18157_s10, 16, %s377_s7, [#allocation11]  }
  0x95   : > { %s12379_s16 = sadd.s32 1, %s12117_s20   ;;  %s34_s27 = sadd.s32 1, %s12113_s19 }
  0x96   : > { %s31_s22 = ssub.s32 %s12117_s20, %s12379_s16  ;;  %p41_p7 = scmp.ne.s32.totalorder %s12113_s19, %s12109_s18 }
  0x97   : > { %p32_p13 = scmp.eq.s32.totalorder %s31_s22, 0  ;;  %p42_p0 = scmp.eq.s32.totalorder %s12117_s20, 0 }
  0x98   : > { %p47_p1 = scmp.ne.s32.totalorder %s12109_s18, %s12105_s17  ;;  %p11533_p3 = scmp.lt.s32.totalorder %s12117_s20, 2 }
  0x99   : > { %s12391_s9 = scalar_select %p32_p13, %s12113_s19, %s34_s27  }
  0x9a   : > { %p43_p2 = por %p42_p0, %p41_p7  ;;  %p18354_p4 = scmp.eq.s32.totalorder %s12224_s23, 0 }
  0x9b   : > { %s387_s13 = sand.u32 1, %s12113_s19   ;;  %s9773_s7 = sshll.u32 %s12117_s20, 4 }
  0x9c   : > { %p12395_p6 = por %p18354_p4, %p47_p1  ;;  %s12404_s21 = scalar_lea.hbm %s18147_s0, %s9773_s7 }
  0x9d   : > { %s390_s17 = scalar_lea.vmem [#allocation2], %s387_s13  ;;  %p12408_p5 = pnand %p11533_p3, %p43_p2 }
  0x9e   : > { %s397_s25 = sshll.u32 %s390_s17, 4  ;;  %s388_s20 = scalar_lea.sflag [#allocation3], %s387_s13  ;;  %s12406_s25 = int_to_ptr.vmem [resolvable:$true] %s397_s25 }
  0x9f   : > { %s12041_s12 = scalar_lea.hbm %s12404_s21, 16  ;;  %p12043_p9 = pneg %p12408_p5 }
  0xa0   : > { %p12042_p8 = scmp.ne.s32.totalorder %s12404_s21, %s12041_s12  ;;  %s12046_s29 = scalar_lea.hbm %s18147_s0, 32 }
  0xa1   : > { %p12047_p12 = scmp.lt.u32.totalorder %s12404_s21, %s18147_s0  ;;  %p12048_p7 = scmp.lt.u32.totalorder %s12046_s29, %s12041_s12 }
  0xa2   : > { %p12044_p10 = pnand %p12043_p9, %p12042_p8  ;;  %p12050_p0 = scmp.lt.u32.totalorder %s12041_s12, %s12404_s21 }
  0xa3   : > { %p12049_p13 = por %p12048_p7, %p12047_p12 }
  0xa4   : > { %p12045_p11 = pneg %p12044_p10 }
  0xa5   : > { %p12051_p1 = por %p12050_p0, %p12049_p13 }
  0xa7   : > { %p12052_p3 = pnand %p12051_p1, %p12045_p11 }
  0xa9   : > { %12055 = shalt.err (!%p12052_p3)
}
  0xaa   : > { %s12056_s13 = scalar_lea.vmem %s12406_s25, 16  ;;  %s12127_s7 = smov [#allocation2]  }
  0xab   : > { %p12057_p2 = scmp.ne.s32.totalorder %s12406_s25, %s12056_s13  ;;  %s12061_s14 = sshll.u32 %s12127_s7, 4  ;;  %s12062_s14 = int_to_ptr.vmem [resolvable:$false] %s12061_s14 }
  0xac   : > { %s12063_s15 = scalar_lea.vmem %s12062_s14, 32  ;;  %p12064_p10 = scmp.lt.s32.totalorder %s12406_s25, %s12062_s14 }
  0xad   : > { %p12059_p4 = pnand %p12057_p2, %p12043_p9  ;;  %p12065_p12 = scmp.lt.s32.totalorder %s12063_s15, %s12056_s13 }
  0xaf   : > { %p12060_p8 = pneg %p12059_p4  ;;  %p12066_p7 = por %p12065_p12, %p12064_p10 }
  0xb1   : > { %p12067_p13 = pnand %p12066_p7, %p12060_p8 }
  0xb3   : > { %12070 = shalt.err (!%p12067_p13)
}
  0xb4   : > { %11526 = dma.hbm_to_vmem [thread:$0]  (!%p12408_p5), %s12404_s21, 16, %s12406_s25, %s388_s20  }
  0xb5   : > { %p18357_p11 = scmp.ne.s32.totalorder %s18351_s24, 0 }
  0xb7   : > { %406 = sbr.rel (%p18357_p11) target bundleno = 2672 (0xa70), region = 64 }
  0xbe   : > { %s408_s17 = sand.u32 1, %s12109_s18  }
  0xbf   : > { %s409_s12 = scalar_lea.sflag [#allocation3], %s408_s17  ;;  %s12440_s28 = scalar_lea.vmem [#allocation2], %s408_s17 }
  0xc0   : > { %12088 = dma.done.wait (%p12395_p6), %s409_s12, 16  }
  0xc1   : > { %12090 = vsyncadd (%p12395_p6), %s409_s12, 4294967280  ;;  %p18358_p9 = scmp.eq.s32.totalorder %s12224_s23, 0 }
  0xc3   : > { %12092 = dma.done.wait (%p18358_p9), [#allocation5], 2064   ;;  %p18359_p0 = pmov %p18358_p9 }
  0xc5   : > { %12094 = vsyncadd (%p18359_p0), [#allocation5], 4294965232  ;;  %p18360_p5 = pmov %p18359_p0 }
  0xc6   : > { %p18361_p1 = pmov %p18359_p0 }
  0xc7   : > { %12096 = dma.done.wait (%p18360_p5), [#allocation8], 32  }
  0xc8   : > { %12098 = vsyncadd (%p18361_p1), [#allocation8], 4294967264  ;;  %p18362_p3 = pmov %p18359_p0 }
  0xc9   : > { %p18363_p2 = pmov %p18359_p0 }
  0xca   : > { %12100 = dma.done.wait (%p18362_p3), [#allocation11], 32  }
  0xcb   : > { %12102 = vsyncadd (%p18363_p2), [#allocation11], 4294967264  ;;  %v12128_v0 = vmov 0.0|0.0   ;;  %vm12129_vm0 = vmmov 0   ;;  %v18163_v1 = vmov 0.0   ;;  %v559_v2 = vld [vmem:[#allocation4 + $0x20] sm:$0xff] }
  0xcc   : > { %11108 = vmatprep.subr.bf16.mxu1 %v12128_v0  ;;  %11102 = vmatprep.subr.bf16.mxu0 %v12128_v0  ;;  %v560_v3 = vld [vmem:[#allocation4 + $0x28] sm:$0xff]  ;;  %v480_v4 = vld [vmem:[#allocation4] sm:$0xff]  ;;  %v561_v7 = vld [vmem:[#allocation4 + $0x30] sm:$0xff]  ;;  %vm484_vm1 = vcmask 261120   ;;  %v12472_v27 = vrot.slane %v18163_v1, 1  ;;  %s12131_s24 = smov 64  }
  0xcd   : > { %10601 = vmatprep.mubr.msk.f32.mxu1 %vm12129_vm0, %v18163_v1  ;;  %10590 = vmatprep.mubr.msk.f32.mxu0 %vm12129_vm0, %v18163_v1  ;;  %v11109_v5 = vpack.c.bf16 %v560_v3, %v559_v2  ;;  %v481_v6 = vld [vmem:[#allocation4 + $0x8] sm:$0xff]  ;;  %v562_v8 = vld [vmem:[#allocation4 + $0x38] sm:$0xff]  ;;  %v482_v10 = vld [vmem:[#allocation4 + $0x10] sm:$0xff]  ;;  %vm636_vm2 = vcmask 1040384   ;;  %vm800_vm3 = vcmask 1042432   ;;  %vm819_vm4 = vcmask 523264  }
  0xce   : > { %v11103_v9 = vpack.c.bf16 %v481_v6, %v480_v4  ;;  %v483_v11 = vld [vmem:[#allocation4 + $0x18] sm:$0xff]  ;;  %v11112_v12 = vpack.c.bf16 %v562_v8, %v561_v7  ;;  %v714_v14 = vld [vmem:[#allocation4 + $0x60] sm:$0xff]  ;;  %v715_v15 = vld [vmem:[#allocation4 + $0x68] sm:$0xff]  ;;  %808 = vrot.lane.b32.xlu0 %v12472_v27, %s12131_s24  ;;  %vm966_vm5 = vcmask 1042434   ;;  %vm968_vm7 = vcmask 1044484   ;;  %s12133_s30 = smov 32  }
  0xcf   : > { %11110 = vmatpush3.bf16.msra.mxu1 %v11109_v5  ;;  %v11106_v13 = vpack.c.bf16 %v483_v11, %v482_v10  ;;  %v639_v16 = vld [vmem:[#allocation4 + $0x40] sm:$0xff]  ;;  %v640_v17 = vld [vmem:[#allocation4 + $0x48] sm:$0xff]  ;;  %v478_v18 = vld [vmem:[%s12440_s28] sm:$0x1]  ;;  %v11121_v19 = vpack.c.bf16 %v715_v15, %v714_v14  ;;  %vm970_vm9 = vcmask 1046534   ;;  %vm1552_vm13 = vcmask 1044480  }
  0xd0   : > { %11104 = vmatpush3.bf16.msra.mxu0 %v11103_v9  ;;  %11111 = vmatprep.subr.bf16.mxu1 %v12128_v0  ;;  %v11115_v20 = vpack.c.bf16 %v640_v17, %v639_v16  ;;  %v716_v21 = vld [vmem:[#allocation4 + $0x70] sm:$0xff]  ;;  %v717_v22 = vld [vmem:[#allocation4 + $0x78] sm:$0xff]  ;;  %v859_v29 = vld [vmem:[%s18150_s3 + $0x88] sm:$0xff]  ;;  %s12135_s26 = smov 96   ;;  %s12136_s22 = smov 16  }
  0xd1   : > { %11105 = vmatprep.subr.bf16.mxu0 %v12128_v0  ;;  %v641_v23 = vld [vmem:[#allocation4 + $0x50] sm:$0xff]  ;;  %v642_v24 = vld [vmem:[#allocation4 + $0x58] sm:$0xff]  ;;  %v11124_v25 = vpack.c.bf16 %v717_v22, %v716_v21  ;;  %v843_v32 = vld [vmem:[%s18150_s3 + $0x8] sm:$0xff]  ;;  %s12137_s13 = smov 48   ;;  %s18367_s15 = sld [smem:[#allocation136_spill]] }
  0xd2   : > { %v11118_v26 = vpack.c.bf16 %v642_v24, %v641_v23  ;;  %v858_v28 = vld [vmem:[%s18150_s3 + $0x80] sm:$0xff]  ;;  %v860_v33 = vld [vmem:[%s18150_s3 + $0x90] sm:$0xff]  ;;  %v861_v34 = vld [vmem:[%s18150_s3 + $0x98] sm:$0xff]  ;;  %s12138_s25 = smov 8   ;;  %s12139_s20 = smov 24  }
  0xd3   : > { %11113 = vmatpush3.bf16.msra.mxu1 %v11112_v12  ;;  %v842_v30 = vld [vmem:[%s18150_s3] sm:$0xff]  ;;  %v11126_v31 = vpack.c.bf16 %v859_v29, %v858_v28  ;;  %v11130_v36 = vpack.c.bf16 %v861_v34, %v860_v33  ;;  %v844_v37 = vld [vmem:[%s18150_s3 + $0x10] sm:$0xff]  ;;  %v845_v38 = vld [vmem:[%s18150_s3 + $0x18] sm:$0xff]  ;;  %s18666_s27 = sld [smem:[#allocation137_spill]]  ;;  %p473_p6 = scmp.lt.s32.totalorder %s12224_s23, 1 }
  0xd4   : > { %11107 = vmatpush3.bf16.msra.mxu0 %v11106_v13  ;;  %11120 = vmatprep.subr.bf16.mxu1 %v12128_v0  ;;  %v11128_v35 = vpack.c.bf16 %v843_v32, %v842_v30  ;;  %v9806_v39 = vld [vmem:[%s18150_s3 + $0x180] sm:$0xff]  ;;  %v9807_v40 = vld [vmem:[%s18150_s3 + $0x188] sm:$0xff]  ;;  %v11132_v43 = vpack.c.bf16 %v845_v38, %v844_v37  ;;  %v9808_v51 = vld [vmem:[%s18150_s3 + $0x190] sm:$0xff]  ;;  %s18949_s21 = sld [smem:[#allocation138_spill]] }
  0xd5   : > { %11114 = vmatprep.subr.bf16.mxu0 %v12128_v0  ;;  %v9790_v41 = vld [vmem:[%s18150_s3 + $0x100] sm:$0xff]  ;;  %v9791_v42 = vld [vmem:[%s18150_s3 + $0x108] sm:$0xff]  ;;  %v11158_v44 = vpack.c.bf16 %v9807_v40, %v9806_v39  ;;  %v9809_v52 = vld [vmem:[%s18150_s3 + $0x198] sm:$0xff]  ;;  %s18964_s23 = smov (!%p473_p6, %s12224_s23), 1 }
  0xd6   : > { %10602 = vmatmul.mubr.msk.f32.vlgmr.msra.gmra.mrb[0].mxu1 %vm484_vm1, %v478_v18  ;;  %v11160_v45 = vpack.c.bf16 %v9791_v42, %v9790_v41  ;;  %v862_v46 = vld [vmem:[%s18150_s3 + $0xa0] sm:$0xff]  ;;  %v863_v47 = vld [vmem:[%s18150_s3 + $0xa8] sm:$0xff]  ;;  %v11162_v53 = vpack.c.bf16 %v9809_v52, %v9808_v51  ;;  %v9792_v54 = vld [vmem:[%s18150_s3 + $0x110] sm:$0xff]  ;;  %s10141_s28 = sshll.u32 %s18964_s23, 8 }
  0xd7   : > { %11122 = vmatpush3.bf16.msra.mxu1 %v11121_v19  ;;  %10591 = vmatmul.mubr.msk.f32.vlgmr.msra.gmra.mrb[0].mxu0 %vm484_vm1, %v478_v18  ;;  %v846_v48 = vld [vmem:[%s18150_s3 + $0x20] sm:$0xff]  ;;  %v11134_v49 = vpack.c.bf16 %v863_v47, %v862_v46  ;;  %v847_v50 = vld [vmem:[%s18150_s3 + $0x28] sm:$0xff]  ;;  %v9793_v55 = vld [vmem:[%s18150_s3 + $0x118] sm:$0xff] }
  0xd8   : > { %11116 = vmatpush3.bf16.msra.mxu0 %v11115_v20  ;;  %11123 = vmatprep.subr.bf16.mxu1 %v12128_v0  ;;  %v864_v56 = vld [vmem:[%s18150_s3 + $0xb0] sm:$0xff]  ;;  %v11164_v57 = vpack.c.bf16 %v9793_v55, %v9792_v54  ;;  %v865_v58 = vld [vmem:[%s18150_s3 + $0xb8] sm:$0xff]  ;;  %v11136_v59 = vpack.c.bf16 %v847_v50, %v846_v48  ;;  %v9810_v63 = vld [vmem:[%s18150_s3 + $0x1a0] sm:$0xff] }
  0xd9   : > { %11117 = vmatprep.subr.bf16.mxu0 %v12128_v0  ;;  %10623 = vmatprep.mubr.msk.f32.mxu1 %vm12129_vm0, %v18163_v1  ;;  %v11138_v60 = vpack.c.bf16 %v865_v58, %v864_v56  ;;  %v848_v61 = vld [vmem:[%s18150_s3 + $0x30] sm:$0xff]  ;;  %v849_v62 = vld [vmem:[%s18150_s3 + $0x38] sm:$0xff]  ;;  %v9811_v2 = vld [vmem:[%s18150_s3 + $0x1a8] sm:$0xff] }
  0xda   : > { %10612 = vmatprep.mubr.msk.f32.mxu0 %vm12129_vm0, %v18163_v1  ;;  %v11140_v0 = vpack.c.bf16 %v849_v62, %v848_v61  ;;  %v9794_v3 = vld [vmem:[%s18150_s3 + $0x120] sm:$0xff]  ;;  %v9795_v4 = vld [vmem:[%s18150_s3 + $0x128] sm:$0xff]  ;;  %v11166_v6 = vpack.c.bf16 %v9811_v2, %v9810_v63  ;;  %v9812_v14 = vld [vmem:[%s18150_s3 + $0x1b0] sm:$0xff]  ;;  %vm1610_vm0 = vcmask 785408   ;;  %s17967_s11 = scalar_lea.vmem %s18949_s21, %s10141_s28 }
  0xdb   : > { %11125 = vmatpush3.bf16.msra.mxu1 %v11124_v25  ;;  %v12560_v5 = vld [vmem:[#allocation6] sm:$0x1]  ;;  %v11168_v7 = vpack.c.bf16 %v9795_v4, %v9794_v3  ;;  %v867_v9 = vld [vmem:[%s18150_s3 + $0xc8] sm:$0xff]  ;;  %v9813_v19 = vld [vmem:[%s18150_s3 + $0x1b8] sm:$0xff] }
  0xdc   : > { %11119 = vmatpush3.bf16.msra.mxu0 %v11118_v26  ;;  %11159 = vmatprep.subr.bf16.mxu1 %v11158_v44  ;;  %v866_v8 = vld [vmem:[%s18150_s3 + $0xc0] sm:$0xff]  ;;  %v851_v13 = vld [vmem:[%s18150_s3 + $0x48] sm:$0xff]  ;;  %v9796_v20 = vld [vmem:[%s18150_s3 + $0x130] sm:$0xff]  ;;  %v11170_v24 = vpack.c.bf16 %v9813_v19, %v9812_v14 }
  0xdd   : > { %11127 = vmatprep.subr.bf16.mxu0 %v11126_v31  ;;  %v11142_v11 = vpack.c.bf16 %v867_v9, %v866_v8  ;;  %v850_v12 = vld [vmem:[%s18150_s3 + $0x40] sm:$0xff]  ;;  %v9797_v21 = vld [vmem:[%s18150_s3 + $0x138] sm:$0xff]  ;;  %v868_v28 = vld [vmem:[%s18150_s3 + $0xd0] sm:$0xff] }
  0xde   : > { %10624 = vmatmul.mubr.msk.f32.vlgmr.msra.gmra.mrb[2].mxu1 %vm484_vm1, %v478_v18  ;;  %v11172_v25 = vpack.c.bf16 %v9797_v21, %v9796_v20  ;;  %v869_v29 = vld [vmem:[%s18150_s3 + $0xd8] sm:$0xff]  ;;  %v852_v31 = vld [vmem:[%s18150_s3 + $0x50] sm:$0xff]  ;;  %v9814_v33 = vld [vmem:[%s18150_s3 + $0x1c0] sm:$0xff] }
  0xdf   : > { %10613 = vmatmul.mubr.msk.f32.vlgmr.msra.gmra.mrb[2].mxu0 %vm484_vm1, %v478_v18  ;;  %11161 = vmatpush3.bf16.msra.mxu1 %v11160_v45  ;;  %v11144_v18 = vpack.c.bf16 %v851_v13, %v850_v12  ;;  %v11146_v30 = vpack.c.bf16 %v869_v29, %v868_v28  ;;  %v853_v32 = vld [vmem:[%s18150_s3 + $0x58] sm:$0xff]  ;;  %v9798_v37 = vld [vmem:[%s18150_s3 + $0x140] sm:$0xff]  ;;  %v9799_v38 = vld [vmem:[%s18150_s3 + $0x148] sm:$0xff] }
  0xe0   : > { %11129 = vmatpush3.bf16.msra.mxu0 %v11128_v35  ;;  %11163 = vmatprep.subr.bf16.mxu1 %v11162_v53  ;;  %v11148_v35 = vpack.c.bf16 %v853_v32, %v852_v31  ;;  %v11176_v41 = vpack.c.bf16 %v9799_v38, %v9798_v37  ;;  %v870_v42 = vld [vmem:[%s18150_s3 + $0xe0] sm:$0xff]  ;;  %v855_v48 = vld [vmem:[%s18150_s3 + $0x68] sm:$0xff]  ;;  %v9817_v55 = vld [vmem:[%s18150_s3 + $0x1d8] sm:$0xff]  ;;  %v12132_v32 = vmov 1983009808  }
  0xe1   : > { %11131 = vmatprep.subr.bf16.mxu0 %v11130_v36  ;;  %v9815_v36 = vld [vmem:[%s18150_s3 + $0x1c8] sm:$0xff]  ;;  %v854_v47 = vld [vmem:[%s18150_s3 + $0x60] sm:$0xff]  ;;  %v9800_v56 = vld [vmem:[%s18150_s3 + $0x150] sm:$0xff] }
  0xe2   : > { %v11174_v40 = vpack.c.bf16 %v9815_v36, %v9814_v33  ;;  %v11152_v54 = vpack.c.bf16 %v855_v48, %v854_v47  ;;  %v873_v2 = vld [vmem:[%s18150_s3 + $0xf8] sm:$0xff]  ;;  %v856_v4 = vld [vmem:[%s18150_s3 + $0x70] sm:$0xff]  ;;  %v9819_v9 = vld [vmem:[%s18150_s3 + $0x1e8] sm:$0xff]  ;;  %v828_v33 = vunpack.c.l.s4 %v12132_v32 }
  0xe3   : > { %11165 = vmatpush3.bf16.msra.mxu1 %v11164_v57  ;;  %v9801_v57 = vld [vmem:[%s18150_s3 + $0x158] sm:$0xff]  ;;  %v9820_v20 = vld [vmem:[%s18150_s3 + $0x1f0] sm:$0xff]  ;;  %v9871_v28 = vld [vmem:[%s18150_s3 + $0x380] sm:$0xff] }
  0xe4   : > { %11133 = vmatpush3.bf16.msra.mxu0 %v11132_v43  ;;  %11167 = vmatprep.subr.bf16.mxu1 %v11166_v6  ;;  %v871_v43 = vld [vmem:[%s18150_s3 + $0xe8] sm:$0xff]  ;;  %v11180_v62 = vpack.c.bf16 %v9801_v57, %v9800_v56  ;;  %v9818_v6 = vld [vmem:[%s18150_s3 + $0x1e0] sm:$0xff]  ;;  %v9821_v21 = vld [vmem:[%s18150_s3 + $0x1f8] sm:$0xff] }
  0xe5   : > { %11135 = vmatprep.subr.bf16.mxu0 %v11134_v49  ;;  %v11150_v46 = vpack.c.bf16 %v871_v43, %v870_v42  ;;  %v9816_v49 = vld [vmem:[%s18150_s3 + $0x1d0] sm:$0xff]  ;;  %v11182_v13 = vpack.c.bf16 %v9819_v9, %v9818_v6  ;;  %v9872_v29 = vld [vmem:[%s18150_s3 + $0x388] sm:$0xff]  ;;  %vm967_vm6 = vmor %vm636_vm2, %vm966_vm5  ;;  %vm1730_vm5 = vcmask 1046532  }
  0xe6   : > { %v11178_v61 = vpack.c.bf16 %v9817_v55, %v9816_v49  ;;  %vm969_vm8 = vmor %vm967_vm6, %vm968_vm7  ;;  %v9824_v9 = vld [vmem:[%s18150_s3 + $0x210] sm:$0xff] }
  0xe7   : > { %11169 = vmatpush3.bf16.msra.mxu1 %v11168_v7  ;;  %vm971_vm10 = vmor %vm969_vm8, %vm970_vm9 }
  0xe8   : > { %11137 = vmatpush3.bf16.msra.mxu0 %v11136_v59  ;;  %11171 = vmatprep.subr.bf16.mxu1 %v11170_v24  ;;  %v9804_v24 = vld [vmem:[%s18150_s3 + $0x170] sm:$0xff]  ;;  %vm13115_vm6 = vmor %vm800_vm3, %vm1730_vm5 }
  0xe9   : > { %11139 = vmatprep.subr.bf16.mxu0 %v11138_v60 }
  0xeb   : > { %11173 = vmatpush3.bf16.msra.mxu1 %v11172_v25  ;;  %v9805_v25 = vld [vmem:[%s18150_s3 + $0x178] sm:$0xff] }
  0xec   : > { %11141 = vmatpush3.bf16.msra.mxu0 %v11140_v0  ;;  %11175 = vmatprep.subr.bf16.mxu1 %v11174_v40  ;;  %v872_v0 = vld [vmem:[%s18150_s3 + $0xf0] sm:$0xff] }
  0xed   : > { %11143 = vmatprep.subr.bf16.mxu0 %v11142_v11  ;;  %v11154_v3 = vpack.c.bf16 %v873_v2, %v872_v0  ;;  %v9803_v11 = vld [vmem:[%s18150_s3 + $0x168] sm:$0xff]  ;;  %v9840_v0 = vld [vmem:[%s18150_s3 + $0x290] sm:$0xff]  ;;  %v9841_v2 = vld [vmem:[%s18150_s3 + $0x298] sm:$0xff] }
  0xef   : > { %11177 = vmatpush3.bf16.msra.mxu1 %v11176_v41 }
  0xf0   : > { %11145 = vmatpush3.bf16.msra.mxu0 %v11144_v18  ;;  %11179 = vmatprep.subr.bf16.mxu1 %v11178_v61  ;;  %v9823_v61 = vld [vmem:[%s18150_s3 + $0x208] sm:$0xff] }
  0xf1   : > { %11147 = vmatprep.subr.bf16.mxu0 %v11146_v30  ;;  %v11222_v30 = vpack.c.bf16 %v9872_v29, %v9871_v28  ;;  %v9857_v29 = vld [vmem:[%s18150_s3 + $0x310] sm:$0xff] }
  0xf3   : > { %11181 = vmatpush3.bf16.msra.mxu1 %v11180_v62 }
  0xf4   : > { %11149 = vmatpush3.bf16.msra.mxu0 %v11148_v35  ;;  %11183 = vmatprep.subr.bf16.mxu1 %v11182_v13  ;;  %v829_v35 = vunpack.c.0.s8 %v828_v33  ;;  %v9855_v13 = vld [vmem:[%s18150_s3 + $0x300] sm:$0xff]  ;;  %v9845_v33 = vld [vmem:[%s18150_s3 + $0x2b8] sm:$0xff] }
  0xf5   : > { %11151 = vmatprep.subr.bf16.mxu0 %v11150_v46 }
  0xf8   : > { %11153 = vmatpush3.bf16.msra.mxu0 %v11152_v54 }
  0xf9   : > { %11155 = vmatprep.subr.bf16.mxu0 %v11154_v3 }
 0x140   : > { %v809_v31 = vpop.permute.xlu0 %808 }
 0x141   : > { %v820_v37 = vsel %vm819_vm4, 0.0, %v809_v31  ;;  %v9844_v31 = vld [vmem:[%s18150_s3 + $0x2b0] sm:$0xff] }
 0x1a9   : > { %v629_v10 = vpop.f32.mrb[0].mxu1 }
 0x1aa   : > { %v630_v15 = vadd.f32 %v629_v10, %v12560_v5  ;;  %v10603_v16 = vpop.f32.mrb[1].mxu1  ;;  %v554_v17 = vpop.f32.mrb[0].mxu0  ;;  %v9802_v10 = vld [vmem:[%s18150_s3 + $0x160] sm:$0xff] }
 0x1ab   : > { %v555_v22 = vadd.f32 %v554_v17, %v12560_v5  ;;  %v10592_v23 = vpop.f32.mrb[1].mxu0  ;;  %v11184_v14 = vpack.c.bf16 %v9803_v11, %v9802_v10  ;;  %v9838_v16 = vld [vmem:[%s18150_s3 + $0x280] sm:$0xff]  ;;  %v9839_v17 = vld [vmem:[%s18150_s3 + $0x288] sm:$0xff]  ;;  %v11194_v11 = vpack.c.bf16 %v9841_v2, %v9840_v0 }
 0x1ac   : > { %v634_v26 = vrot.slane %v630_v15, 7  ;;  %v11190_v19 = vpack.c.bf16 %v9839_v17, %v9838_v16  ;;  %v11186_v23 = vpack.c.bf16 %v9821_v21, %v9820_v20  ;;  %v9842_v17 = vld [vmem:[%s18150_s3 + $0x2a0] sm:$0xff]  ;;  %v9873_v20 = vld [vmem:[%s18150_s3 + $0x390] sm:$0xff]  ;;  %v9874_v21 = vld [vmem:[%s18150_s3 + $0x398] sm:$0xff] }
 0x1ad   : > { %11185 = vmatpush3.bf16.msra.mxu1 %v11184_v14  ;;  %v9856_v14 = vld [vmem:[%s18150_s3 + $0x308] sm:$0xff]  ;;  %v11226_v32 = vpack.c.bf16 %v9874_v21, %v9873_v20  ;;  %v9865_v20 = vld [vmem:[%s18150_s3 + $0x350] sm:$0xff]  ;;  %v9866_v21 = vld [vmem:[%s18150_s3 + $0x358] sm:$0xff] }
 0x1ae   : > { %v637_v34 = vsel %vm636_vm2, %v555_v22, %v634_v26  ;;  %11187 = vmatprep.subr.bf16.mxu1 %v11186_v23  ;;  %v11188_v26 = vpack.c.bf16 %v9805_v25, %v9804_v24  ;;  %v11224_v24 = vpack.c.bf16 %v9856_v14, %v9855_v13  ;;  %v9826_v25 = vld [vmem:[%s18150_s3 + $0x220] sm:$0xff] }
 0x1af   : > { %v794_v39 = vrot.slane %v637_v34, 7  ;;  %v830_v34 = vlaneseq }
 0x1b1   : > { %v784_v44 = vpop.f32.mrb[2].mxu1  ;;  %v798_v45 = vsel %vm636_vm2, 0.0, %v794_v39  ;;  %11189 = vmatpush3.bf16.msra.mxu1 %v11188_v26  ;;  %v12697_v36 = vshrl.u32 %v830_v34, 7  ;;  %v9827_v26 = vld [vmem:[%s18150_s3 + $0x228] sm:$0xff]  ;;  %v9875_v34 = vld [vmem:[%s18150_s3 + $0x3a0] sm:$0xff] }
 0x1b2   : > { %v785_v50 = vadd.f32 %v784_v44, %v12560_v5  ;;  %v709_v51 = vpop.f32.mrb[2].mxu0  ;;  %v10625_v52 = vpop.f32.mrb[3].mxu1  ;;  %v12631_v53 = vsel %vm800_vm3, %v798_v45, 0.0  ;;  %11223 = vmatprep.subr.bf16.mxu1 %v11222_v30  ;;  %v9858_v30 = vld [vmem:[%s18150_s3 + $0x318] sm:$0xff] }
 0x1b3   : > { %v710_v58 = vadd.f32 %v709_v51, %v12560_v5  ;;  %v10614_v59 = vpop.f32.mrb[3].mxu0  ;;  %v807_v60 = vrot.slane %v12631_v53, 1  ;;  %v857_v5 = vld [vmem:[%s18150_s3 + $0x78] sm:$0xff]  ;;  %v12703_v40 = vsub.s32 %v829_v35, %v12697_v36  ;;  %v9876_v35 = vld [vmem:[%s18150_s3 + $0x3a8] sm:$0xff] }
 0x1b4   : > { %v789_v63 = vrot.slane %v785_v50, 7  ;;  %v11156_v8 = vpack.c.bf16 %v857_v5, %v856_v4 }
 0x1b5   : > { %810 = vrot.lane.b32.xlu0 %v807_v60, %s12131_s24  ;;  %v9822_v60 = vld [vmem:[%s18150_s3 + $0x200] sm:$0xff] }
 0x1b6   : > { %v791_v7 = vsel %vm636_vm2, %v710_v58, %v789_v63  ;;  %11157 = vmatpush3.bf16.msra.mxu0 %v11156_v8 }
 0x1b7   : > { %v795_v12 = vrot.slane %v791_v7, 7  ;;  %11191 = vmatprep.subr.bf16.mxu0 %v11190_v19  ;;  %v11192_v7 = vpack.c.bf16 %v9823_v61, %v9822_v60  ;;  %v9849_v60 = vld [vmem:[%s18150_s3 + $0x2d8] sm:$0xff]  ;;  %v9879_v61 = vld [vmem:[%s18150_s3 + $0x3c0] sm:$0xff] }
 0x1b9   : > { %v799_v15 = vsel %vm636_vm2, 0.0, %v795_v12  ;;  %v9825_v12 = vld [vmem:[%s18150_s3 + $0x218] sm:$0xff] }
 0x1ba   : > { %v802_v18 = vsel %vm800_vm3, %v799_v15, 0.0  ;;  %v11196_v23 = vpack.c.bf16 %v9825_v12, %v9824_v9  ;;  %v9850_v9 = vld [vmem:[%s18150_s3 + $0x2e0] sm:$0xff]  ;;  %v9882_v12 = vld [vmem:[%s18150_s3 + $0x3d8] sm:$0xff] }
 0x1bb   : > { %v815_v22 = vrot.slane %v802_v18, 1 }
 0x1bd   : > { %816 = vrot.lane.b32.xlu1 %v815_v22, %s12131_s24 }
 0x1c1   : > { %1564 = vrot.lane.b32.xlu1 %v12472_v27, %s12133_s30 }
 0x227   : > { %v811_v38 = vpop.permute.xlu0 %810 }
 0x228   : > { %v821_v39 = vsel %vm819_vm4, %v12631_v53, %v811_v38  ;;  %v11200_v38 = vpack.c.bf16 %v9827_v26, %v9826_v25  ;;  %v9884_v25 = vld [vmem:[%s18150_s3 + $0x3e8] sm:$0xff] }
 0x229   : > { %v826_v41 = vcombine.low %v820_v37, %v821_v39 }
 0x22b   : > { %v833_v42 = vrot.slane %v826_v41, %v12703_v40  ;;  %v9828_v41 = vld [vmem:[%s18150_s3 + $0x230] sm:$0xff] }
 0x22d   : > { %v964_v45 = vcombine.high %v833_v42, %v833_v42  ;;  %v9788_v53 = vrot.slane %v833_v42, 9 }
 0x22f   : > { %v817_v43 = vpop.permute.xlu1 %816  ;;  %v974_v50 = vrot.slane %v964_v45, 7  ;;  %v9859_v45 = vld [vmem:[%s18150_s3 + $0x320] sm:$0xff] }
 0x230   : > { %v822_v44 = vsel %vm819_vm4, %v802_v18, %v817_v43  ;;  %v9843_v18 = vld [vmem:[%s18150_s3 + $0x2a8] sm:$0xff]  ;;  %v11202_v43 = vpack.c.bf16 %v9845_v33, %v9844_v31  ;;  %v9837_v31 = vld [vmem:[%s18150_s3 + $0x278] sm:$0xff]  ;;  %v9867_v33 = vld [vmem:[%s18150_s3 + $0x360] sm:$0xff] }
 0x231   : > { %v834_v46 = vcombine.low %v821_v39, %v822_v44  ;;  %v1097_v47 = vcombine.low %v822_v44, %v820_v37  ;;  %v975_v3 = vsel %vm971_vm10, %v9788_v53, %v974_v50  ;;  %v11198_v28 = vpack.c.bf16 %v9843_v18, %v9842_v17  ;;  %v9878_v50 = vld [vmem:[%s18150_s3 + $0x3b8] sm:$0xff]  ;;  %v9830_v53 = vld [vmem:[%s18150_s3 + $0x240] sm:$0xff] }
 0x232   : > { %v11228_v39 = vpack.c.bf16 %v9858_v30, %v9857_v29  ;;  %v11230_v44 = vpack.c.bf16 %v9876_v35, %v9875_v34  ;;  %v9836_v29 = vld [vmem:[%s18150_s3 + $0x270] sm:$0xff]  ;;  %v9868_v34 = vld [vmem:[%s18150_s3 + $0x368] sm:$0xff] }
 0x233   : > { %v841_v48 = vrot.slane %v834_v46, %v12703_v40  ;;  %v1104_v49 = vrot.slane %v1097_v47, %v12703_v40  ;;  %v9860_v46 = vld [vmem:[%s18150_s3 + $0x328] sm:$0xff]  ;;  %v9846_v47 = vld [vmem:[%s18150_s3 + $0x2c0] sm:$0xff]  ;;  %v9885_v35 = vld [vmem:[%s18150_s3 + $0x3f0] sm:$0xff] }
 0x235   : > { %v965_v51 = vcombine.high %v841_v48, %v841_v48  ;;  %v1222_v52 = vcombine.high %v1104_v49, %v1104_v49  ;;  %v880_v54 = vcombine.low %v833_v42, %v841_v48  ;;  %v1138_v55 = vcombine.low %v841_v48, %v1104_v49  ;;  %v9829_v42 = vld [vmem:[%s18150_s3 + $0x238] sm:$0xff] }
 0x236   : > { %v9789_v56 = vrot.slane %v841_v48, 9  ;;  %v9854_v58 = vrot.slane %v1104_v49, 9  ;;  %v9847_v48 = vld [vmem:[%s18150_s3 + $0x2c8] sm:$0xff]  ;;  %v9877_v49 = vld [vmem:[%s18150_s3 + $0x3b0] sm:$0xff] }
 0x237   : > { %v978_v57 = vrot.slane %v965_v51, 7  ;;  %v1225_v59 = vrot.slane %v1222_v52, 7  ;;  %v887_v62 = vrot.slane %v880_v54, %v12703_v40  ;;  %v12718_v63 = vrot.slane %v1138_v55, %v12703_v40  ;;  %v9831_v54 = vld [vmem:[%s18150_s3 + $0x248] sm:$0xff] }
 0x238   : > { %v11204_v51 = vpack.c.bf16 %v9829_v42, %v9828_v41  ;;  %v11232_v52 = vpack.c.bf16 %v9860_v46, %v9859_v45  ;;  %v11206_v55 = vpack.c.bf16 %v9847_v48, %v9846_v47  ;;  %v11208_v0 = vpack.c.bf16 %v9831_v54, %v9830_v53  ;;  %v9869_v42 = vld [vmem:[%s18150_s3 + $0x370] sm:$0xff] }
 0x239   : > { %v979_v4 = vsel %vm971_vm10, %v9789_v56, %v978_v57  ;;  %v1226_v5 = vsel %vm971_vm10, %v9854_v58, %v1225_v59  ;;  %v888_v6 = vcombine.high %v887_v62, %v887_v62  ;;  %v1146_v15 = vcombine.high %v12718_v63, %v12718_v63  ;;  %v9861_v57 = vld [vmem:[%s18150_s3 + $0x330] sm:$0xff]  ;;  %v9862_v58 = vld [vmem:[%s18150_s3 + $0x338] sm:$0xff] }
 0x23a   : > { %v1013_v8 = vcombine.low %v975_v3, %v979_v4  ;;  %v1260_v10 = vcombine.low %v979_v4, %v1226_v5  ;;  %v11234_v56 = vpack.c.bf16 %v9878_v50, %v9877_v49  ;;  %v9848_v59 = vld [vmem:[%s18150_s3 + $0x2d0] sm:$0xff]  ;;  %v11236_v2 = vpack.c.bf16 %v9862_v58, %v9861_v57  ;;  %v9833_v4 = vld [vmem:[%s18150_s3 + $0x258] sm:$0xff]  ;;  %v12906_v49 = vld [vmem:[#allocation7] ss:$0 sm:$0xff] }
 0x23b   : > { %955 = vmatprep.mubr.f32.mxu0 %v888_v6  ;;  %v9832_v3 = vld [vmem:[%s18150_s3 + $0x250] sm:$0xff]  ;;  %v11210_v5 = vpack.c.bf16 %v9849_v60, %v9848_v59  ;;  %v12134_v45 = vmov 1966171168  }
 0x23c   : > { %v1020_v16 = vrot.slane %v1013_v8, %v12703_v40  ;;  %956 = vmatmul.mubr.f32.vlgmr.msra.gmra.mrb[4].mxu0 %v887_v62  ;;  %v12748_v19 = vrot.slane %v1260_v10, %v12703_v40  ;;  %v9880_v62 = vld [vmem:[%s18150_s3 + $0x3c8] sm:$0xff]  ;;  %v11212_v13 = vpack.c.bf16 %v9833_v4, %v9832_v3  ;;  %v1346_v46 = vunpack.c.l.s4 %v12134_v45  ;;  %v9895_v45 = vld [vmem:[%s18152_s5 + $0x98] sm:$0xff] }
 0x23d   : > { %11193 = vmatpush3.bf16.msra.mxu0 %v11192_v7  ;;  %1213 = vmatprep.mubr.f32.mxu0 %v1146_v15  ;;  %v11238_v6 = vpack.c.bf16 %v9880_v62, %v9879_v61  ;;  %v9863_v7 = vld [vmem:[%s18150_s3 + $0x340] sm:$0xff]  ;;  %v9864_v8 = vld [vmem:[%s18150_s3 + $0x348] sm:$0xff]  ;;  %v12915_v61 = vsub.s32 0, %v12697_v36 }
 0x23e   : > { %v1021_v22 = vcombine.high %v1020_v16, %v1020_v16  ;;  %11195 = vmatprep.subr.bf16.mxu0 %v11194_v11  ;;  %v1268_v37 = vcombine.high %v12748_v19, %v12748_v19  ;;  %v9851_v10 = vld [vmem:[%s18150_s3 + $0x2e8] sm:$0xff]  ;;  %v9881_v11 = vld [vmem:[%s18150_s3 + $0x3d0] sm:$0xff]  ;;  %v11240_v14 = vpack.c.bf16 %v9864_v8, %v9863_v7  ;;  %v9834_v15 = vld [vmem:[%s18150_s3 + $0x260] sm:$0xff]  ;;  %v1347_v48 = vunpack.c.0.s8 %v1346_v46 }
 0x23f   : > { %v11214_v17 = vpack.c.bf16 %v9851_v10, %v9850_v9  ;;  %v11242_v18 = vpack.c.bf16 %v9882_v12, %v9881_v11 }
 0x240   : > { %1088 = vmatprep.mubr.f32.mxu1 %v1021_v22  ;;  %v9852_v22 = vld [vmem:[%s18150_s3 + $0x2f0] sm:$0xff] }
 0x241   : > { %1089 = vmatmul.mubr.f32.vlgmr.msra.gmra.mrb[4].mxu1 %v1020_v16  ;;  %11197 = vmatpush3.bf16.msra.mxu0 %v11196_v23  ;;  %v9835_v16 = vld [vmem:[%s18150_s3 + $0x268] sm:$0xff]  ;;  %v9853_v23 = vld [vmem:[%s18150_s3 + $0x2f8] sm:$0xff] }
 0x242   : > { %11225 = vmatpush3.bf16.msra.mxu1 %v11224_v24  ;;  %1335 = vmatprep.mubr.f32.mxu1 %v1268_v37  ;;  %v9883_v24 = vld [vmem:[%s18150_s3 + $0x3e0] sm:$0xff]  ;;  %v11216_v26 = vpack.c.bf16 %v9835_v16, %v9834_v15  ;;  %v11218_v30 = vpack.c.bf16 %v9853_v23, %v9852_v22  ;;  %v9886_v37 = vld [vmem:[%s18150_s3 + $0x3f8] sm:$0xff] }
 0x243   : > { %11199 = vmatprep.subr.bf16.mxu0 %v11198_v28  ;;  %11227 = vmatprep.subr.bf16.mxu1 %v11226_v32  ;;  %v11244_v28 = vpack.c.bf16 %v9866_v21, %v9865_v20  ;;  %v11246_v32 = vpack.c.bf16 %v9884_v25, %v9883_v24  ;;  %v11250_v41 = vpack.c.bf16 %v9886_v37, %v9885_v35 }
 0x245   : > { %11201 = vmatpush3.bf16.msra.mxu0 %v11200_v38  ;;  %v11220_v38 = vpack.c.bf16 %v9837_v31, %v9836_v29  ;;  %v1617_v29 = vld [vmem:[%s18152_s5 + $0x10] sm:$0xff] }
 0x246   : > { %11229 = vmatpush3.bf16.msra.mxu1 %v11228_v39  ;;  %11203 = vmatprep.subr.bf16.mxu0 %v11202_v43  ;;  %v11248_v39 = vpack.c.bf16 %v9868_v34, %v9867_v33  ;;  %v9870_v43 = vld [vmem:[%s18150_s3 + $0x378] sm:$0xff]  ;;  %v9892_v33 = vld [vmem:[%s18152_s5 + $0x80] sm:$0xff]  ;;  %v9893_v34 = vld [vmem:[%s18152_s5 + $0x88] sm:$0xff] }
 0x247   : > { %11231 = vmatprep.subr.bf16.mxu1 %v11230_v44  ;;  %v11252_v44 = vpack.c.bf16 %v9870_v43, %v9869_v42  ;;  %v1620_v42 = vld [vmem:[%s18152_s5 + $0x28] sm:$0xff]  ;;  %v9894_v43 = vld [vmem:[%s18152_s5 + $0x90] sm:$0xff] }
 0x249   : > { %11205 = vmatpush3.bf16.msra.mxu0 %v11204_v51 }
 0x24a   : > { %11233 = vmatpush3.bf16.msra.mxu1 %v11232_v52  ;;  %11207 = vmatprep.subr.bf16.mxu0 %v11206_v55 }
 0x24b   : > { %11235 = vmatprep.subr.bf16.mxu1 %v11234_v56 }
 0x24d   : > { %11209 = vmatpush3.bf16.msra.mxu0 %v11208_v0 }
 0x24e   : > { %11237 = vmatpush3.bf16.msra.mxu1 %v11236_v2  ;;  %11211 = vmatprep.subr.bf16.mxu0 %v11210_v5 }
 0x24f   : > { %11239 = vmatprep.subr.bf16.mxu1 %v11238_v6 }
 0x251   : > { %11213 = vmatpush3.bf16.msra.mxu0 %v11212_v13 }
 0x252   : > { %11241 = vmatpush3.bf16.msra.mxu1 %v11240_v14  ;;  %11215 = vmatprep.subr.bf16.mxu0 %v11214_v17 }
 0x253   : > { %11243 = vmatprep.subr.bf16.mxu1 %v11242_v18 }
 0x255   : > { %11217 = vmatpush3.bf16.msra.mxu0 %v11216_v26  ;;  %v1615_v26 = vld [vmem:[%s18152_s5] sm:$0xff] }
 0x256   : > { %11245 = vmatpush3.bf16.msra.mxu1 %v11244_v28  ;;  %11219 = vmatprep.subr.bf16.mxu0 %v11218_v30  ;;  %v1616_v28 = vld [vmem:[%s18152_s5 + $0x8] sm:$0xff] }
 0x257   : > { %11247 = vmatprep.subr.bf16.mxu1 %v11246_v32  ;;  %v11254_v31 = vpack.c.bf16 %v1616_v28, %v1615_v26  ;;  %v1618_v32 = vld [vmem:[%s18152_s5 + $0x18] sm:$0xff]  ;;  %v9901_v26 = vld [vmem:[%s18152_s5 + $0xc8] sm:$0xff] }
 0x259   : > { %11221 = vmatpush3.bf16.msra.mxu0 %v11220_v38  ;;  %v11258_v38 = vpack.c.bf16 %v1618_v32, %v1617_v29 }
 0x25a   : > { %11249 = vmatpush3.bf16.msra.mxu1 %v11248_v39  ;;  %v11286_v39 = vpack.c.bf16 %v9893_v34, %v9892_v33  ;;  %11255 = vmatprep.subr.bf16.mxu0 %v11254_v31 }
 0x25b   : > { %11251 = vmatprep.subr.bf16.mxu1 %v11250_v41  ;;  %v1619_v41 = vld [vmem:[%s18152_s5 + $0x20] sm:$0xff] }
 0x25c   : > { %1214 = vmatmul.mubr.f32.vlgmr.msra.gmra.mrb[6].mxu0 %v12718_v63  ;;  %v12910_v63 = vsub.s32 %v1347_v48, %v12697_v36  ;;  %v9896_v48 = vld [vmem:[%s18152_s5 + $0xa0] sm:$0xff] }
 0x25d   : > { %11257 = vmatpush3.bf16.msra.mxu0 %v11254_v31 }
 0x25e   : > { %11253 = vmatpush3.bf16.msra.mxu1 %v11252_v44  ;;  %11259 = vmatprep.subr.bf16.mxu0 %v11258_v38 }
 0x25f   : > { %11287 = vmatprep.subr.bf16.mxu1 %v11286_v39 }
 0x261   : > { %1336 = vmatmul.mubr.f32.vlgmr.msra.gmra.mrb[6].mxu1 %v12748_v19  ;;  %11261 = vmatpush3.bf16.msra.mxu0 %v11258_v38 }
 0x262   : > { %11289 = vmatpush3.bf16.msra.mxu1 %v11286_v39  ;;  %v1627_v39 = vld [vmem:[%s18152_s5 + $0x60] sm:$0xff] }
 0x30f   : > { %v10194_v47 = vpop.f32.mrb[4].mxu0 }
 0x310   : > { %v10195_v50 = vpop.f32.mrb[5].mxu0 }
 0x311   : > { %v10196_v51 = vadd.f32 %v10195_v50, %v10194_v47  ;;  %v11290_v47 = vpack.c.bf16 %v9895_v45, %v9894_v43  ;;  %v9897_v50 = vld [vmem:[%s18152_s5 + $0xa8] sm:$0xff]  ;;  %v9902_v45 = vld [vmem:[%s18152_s5 + $0xd0] sm:$0xff] }
 0x313   : > { %v958_v52 = vadd.f32 %v10196_v51, %v12906_v49  ;;  %11291 = vmatprep.subr.bf16.mxu1 %v11290_v47 }
 0x314   : > { %v10229_v53 = vpop.f32.mrb[4].mxu1  ;;  %11293 = vmatpush3.bf16.msra.mxu1 %v11290_v47 }
 0x315   : > { %v10230_v54 = vpop.f32.mrb[5].mxu1  ;;  %vm961_vm11 = vcmp.ge.f32.partialorder %v958_v52, 0.0  ;;  %v962_v19 = vmul.f32 0.05, %v958_v52 }
 0x316   : > { %v10231_v55 = vadd.f32 %v10230_v54, %v10229_v53 }
 0x317   : > { %v963_v56 = vsel %vm961_vm11, %v958_v52, %v962_v19  ;;  %v11262_v52 = vpack.c.bf16 %v1620_v42, %v1619_v41  ;;  %v1621_v19 = vld [vmem:[%s18152_s5 + $0x30] sm:$0xff]  ;;  %v1628_v41 = vld [vmem:[%s18152_s5 + $0x68] sm:$0xff] }
 0x318   : > { %v1091_v57 = vadd.f32 %v10231_v55, %v12906_v49  ;;  %v1351_v58 = vrot.slane %v963_v56, %v12910_v63  ;;  %v1622_v55 = vld [vmem:[%s18152_s5 + $0x38] sm:$0xff]  ;;  %v11294_v56 = vpack.c.bf16 %v9897_v50, %v9896_v48  ;;  %v11278_v43 = vpack.c.bf16 %v1628_v41, %v1627_v39 }
 0x319   : > { %11263 = vmatprep.subr.bf16.mxu0 %v11262_v52 }
 0x31a   : > { %vm1094_vm12 = vcmp.ge.f32.partialorder %v1091_v57, 0.0  ;;  %v1095_v59 = vmul.f32 0.05, %v1091_v57  ;;  %v1352_v62 = vcombine.high %v1351_v58, %v1351_v58  ;;  %v1359_v2 = vrot.slane %v1351_v58, %v12910_v63  ;;  %11295 = vmatprep.subr.bf16.mxu1 %v11294_v56  ;;  %11265 = vmatpush3.bf16.msra.mxu0 %v11262_v52  ;;  %v1629_v52 = vld [vmem:[%s18152_s5 + $0x70] sm:$0xff] }
 0x31b   : > { %11297 = vmatpush3.bf16.msra.mxu1 %v11294_v56 }
 0x31c   : > { %v1096_v60 = vsel %vm1094_vm12, %v1091_v57, %v1095_v59  ;;  %v1366_v5 = vrot.slane %v1352_v62, %v12910_v63  ;;  %v1367_v9 = vcombine.high %v1359_v2, %v1359_v2  ;;  %v9898_v59 = vld [vmem:[%s18152_s5 + $0xb0] sm:$0xff] }
 0x31d   : > { %v1380_v0 = vrot.slane %v1096_v60, %v12910_v63  ;;  %v9899_v60 = vld [vmem:[%s18152_s5 + $0xb8] sm:$0xff] }
 0x31e   : > { %v1368_v14 = vcombine.high %v1366_v5, %v1366_v5 }
 0x31f   : > { %v1381_v3 = vcombine.high %v1380_v0, %v1380_v0  ;;  %v1388_v4 = vrot.slane %v1380_v0, %v12910_v63  ;;  %v11266_v0 = vpack.c.bf16 %v1622_v55, %v1621_v19 }
 0x321   : > { %v1395_v6 = vrot.slane %v1381_v3, %v12910_v63  ;;  %v1396_v7 = vcombine.high %v1388_v4, %v1388_v4  ;;  %v1401_v8 = vrot.slane %v1388_v4, %v12915_v61  ;;  %v1623_v4 = vld [vmem:[%s18152_s5 + $0x40] sm:$0xff]  ;;  %11267 = vmatprep.subr.bf16.mxu0 %v11266_v0 }
 0x322   : > { %11269 = vmatpush3.bf16.msra.mxu0 %v11266_v0 }
 0x323   : > { %v1397_v10 = vcombine.high %v1395_v6, %v1395_v6  ;;  %v1405_v36 = vrot.slane %v1395_v6, %v12915_v61  ;;  %v1418_v11 = vsel %vm636_vm2, %v1359_v2, %v1401_v8  ;;  %v1409_v12 = vrot.slane %v1396_v7, %v12915_v61 }
 0x324   : > { %v11298_v6 = vpack.c.bf16 %v9899_v60, %v9898_v59 }
 0x325   : > { %v1419_v13 = vsel %vm636_vm2, %v1366_v5, %v1405_v36  ;;  %v1413_v15 = vrot.slane %v1397_v10, %v12915_v61  ;;  %v1420_v16 = vsel %vm636_vm2, %v1367_v9, %v1409_v12  ;;  %v1624_v5 = vld [vmem:[%s18152_s5 + $0x48] sm:$0xff] }
 0x326   : > { %v1508_v17 = vcombine.low %v1418_v11, %v1419_v13  ;;  %v11270_v10 = vpack.c.bf16 %v1624_v5, %v1623_v4  ;;  %11299 = vmatprep.subr.bf16.mxu1 %v11298_v6 }
 0x327   : > { %v1421_v18 = vsel %vm636_vm2, %v1368_v14, %v1413_v15  ;;  %11301 = vmatpush3.bf16.msra.mxu1 %v11298_v6 }
 0x328   : > { %v1515_v20 = vrot.slane %v1508_v17, %v12703_v40  ;;  %v1524_v21 = vcombine.low %v1420_v16, %v1421_v18  ;;  %11271 = vmatprep.subr.bf16.mxu0 %v11270_v10 }
 0x329   : > { %11273 = vmatpush3.bf16.msra.mxu0 %v11270_v10 }
 0x32a   : > { %v1540_v22 = vrot.slane %v1515_v20, 7  ;;  %v1531_v23 = vrot.slane %v1524_v21, %v12703_v40  ;;  %v1625_v21 = vld [vmem:[%s18152_s5 + $0x50] sm:$0xff] }
 0x32c   : > { %v1548_v24 = vsel %vm636_vm2, 0.0, %v1540_v22  ;;  %v1542_v25 = vrot.slane %v1531_v23, 7  ;;  %v1626_v22 = vld [vmem:[%s18152_s5 + $0x58] sm:$0xff] }
 0x32d   : > { %v12943_v30 = vsel %vm1552_vm13, %v1548_v24, 0.0  ;;  %v11274_v24 = vpack.c.bf16 %v1626_v22, %v1625_v21 }
 0x32e   : > { %1577 = vrot.lane.b32.xlu1 %v12943_v30, %s12131_s24  ;;  %v1561_v35 = vrot.slane %v12943_v30, 1  ;;  %v1550_v37 = vsel %vm636_vm2, 0.0, %v1542_v25  ;;  %v9900_v25 = vld [vmem:[%s18152_s5 + $0xc0] sm:$0xff] }
 0x32f   : > { %v12968_v44 = vsel %vm1552_vm13, %v1550_v37, 0.0  ;;  %v10264_v46 = vpop.f32.mrb[6].mxu0  ;;  %11275 = vmatprep.subr.bf16.mxu0 %v11274_v24  ;;  %v11302_v33 = vpack.c.bf16 %v9901_v26, %v9900_v25 }
 0x330   : > { %1566 = vrot.lane.b32.xlu0 %v1561_v35, %s12133_s30  ;;  %v10265_v51 = vpop.f32.mrb[7].mxu0  ;;  %v1563_v54 = vrot.slane %v12968_v44, 1  ;;  %11277 = vmatpush3.bf16.msra.mxu0 %v11274_v24 }
 0x331   : > { %v10266_v53 = vadd.f32 %v10265_v51, %v10264_v46  ;;  %11303 = vmatprep.subr.bf16.mxu1 %v11302_v33  ;;  %v9903_v46 = vld [vmem:[%s18152_s5 + $0xd8] sm:$0xff]  ;;  %11279 = vmatprep.subr.bf16.mxu0 %v11278_v43 }
 0x332   : > { %1581 = vrot.lane.b32.xlu1 %v12968_v44, %s12131_s24  ;;  %11305 = vmatpush3.bf16.msra.mxu1 %v11302_v33  ;;  %v11306_v48 = vpack.c.bf16 %v9903_v46, %v9902_v45 }
 0x333   : > { %v1216_v57 = vadd.f32 %v10266_v53, %v12906_v49  ;;  %v1630_v53 = vld [vmem:[%s18152_s5 + $0x78] sm:$0xff] }
 0x334   : > { %v10299_v58 = vpop.f32.mrb[6].mxu1  ;;  %1570 = vrot.lane.b32.xlu0 %v1563_v54, %s12133_s30  ;;  %11281 = vmatpush3.bf16.msra.mxu0 %v11278_v43  ;;  %v11282_v56 = vpack.c.bf16 %v1630_v53, %v1629_v52  ;;  %v9911_v43 = vld [vmem:[%s18152_s5 + $0x118] sm:$0xff] }
 0x335   : > { %v10300_v62 = vpop.f32.mrb[7].mxu1  ;;  %vm1219_vm14 = vcmp.ge.f32.partialorder %v1216_v57, 0.0  ;;  %v1220_v2 = vmul.f32 0.05, %v1216_v57  ;;  %11307 = vmatprep.subr.bf16.mxu1 %v11306_v48 }
 0x336   : > { %v10301_v3 = vadd.f32 %v10300_v62, %v10299_v58  ;;  %1590 = vrot.lane.b32.xlu1 %v1561_v35, %s12135_s26  ;;  %v9905_v58 = vld [vmem:[%s18152_s5 + $0xe8] sm:$0xff]  ;;  %11309 = vmatpush3.bf16.msra.mxu1 %v11306_v48 }
 0x337   : > { %v1221_v7 = vsel %vm1219_vm14, %v1216_v57, %v1220_v2  ;;  %v9904_v57 = vld [vmem:[%s18152_s5 + $0xe0] sm:$0xff]  ;;  %11283 = vmatprep.subr.bf16.mxu0 %v11282_v56 }
 0x338   : > { %v1338_v8 = vadd.f32 %v10301_v3, %v12906_v49  ;;  %v1429_v9 = vrot.slane %v1221_v7, %v12910_v63  ;;  %v11310_v59 = vpack.c.bf16 %v9905_v58, %v9904_v57  ;;  %11285 = vmatpush3.bf16.msra.mxu0 %v11282_v56  ;;  %v9908_v2 = vld [vmem:[%s18152_s5 + $0x100] sm:$0xff]  ;;  %v9909_v3 = vld [vmem:[%s18152_s5 + $0x108] sm:$0xff]  ;;  %v9906_v7 = vld [vmem:[%s18152_s5 + $0xf0] sm:$0xff] }
 0x339   : > { %v13069_v6 = vpack.c.bf16 %v9909_v3, %v9908_v2  ;;  %v9913_v3 = vld [vmem:[%s18152_s5 + $0x128] sm:$0xff] }
 0x33a   : > { %vm1341_vm15 = vcmp.ge.f32.partialorder %v1338_v8, 0.0  ;;  %v1342_v36 = vmul.f32 0.05, %v1338_v8  ;;  %v1430_v12 = vcombine.high %v1429_v9, %v1429_v9  ;;  %v1437_v14 = vrot.slane %v1429_v9, %v12910_v63  ;;  %11311 = vmatprep.subr.bf16.mxu1 %v11310_v59 }
 0x33b   : > { %11313 = vmatpush3.bf16.msra.mxu1 %v11310_v59  ;;  %11319 = vmatprep.subr.bf16.mxu0 %v13069_v6  ;;  %v9912_v59 = vld [vmem:[%s18152_s5 + $0x120] sm:$0xff] }
 0x33c   : > { %v1343_v11 = vsel %vm1341_vm15, %v1338_v8, %v1342_v36  ;;  %v1444_v16 = vrot.slane %v1430_v12, %v12910_v63  ;;  %v1445_v23 = vcombine.high %v1437_v14, %v1437_v14  ;;  %v9907_v8 = vld [vmem:[%s18152_s5 + $0xf8] sm:$0xff]  ;;  %v9925_v36 = vld [vmem:[%s18152_s5 + $0x180] sm:$0xff]  ;;  %vm3011_vm15 = vcmask 130048  }
 0x33d   : > { %v1458_v13 = vrot.slane %v1343_v11, %v12910_v63  ;;  %v11314_v9 = vpack.c.bf16 %v9907_v8, %v9906_v7  ;;  %v9926_v11 = vld [vmem:[%s18152_s5 + $0x188] sm:$0xff] }
 0x33e   : > { %v1446_v35 = vcombine.high %v1444_v16, %v1444_v16  ;;  %v13090_v12 = vpack.c.bf16 %v9926_v11, %v9925_v36  ;;  %v11326_v36 = vpack.c.bf16 %v9913_v3, %v9912_v59 }
 0x33f   : > { %v1459_v15 = vcombine.high %v1458_v13, %v1458_v13  ;;  %v1466_v49 = vrot.slane %v1458_v13, %v12910_v63  ;;  %11315 = vmatprep.subr.bf16.mxu1 %v11314_v9 }
 0x340   : > { %11317 = vmatpush3.bf16.msra.mxu1 %v11314_v9 }
 0x341   : > { %v1473_v17 = vrot.slane %v1459_v15, %v12910_v63  ;;  %v1474_v18 = vcombine.high %v1466_v49, %v1466_v49  ;;  %v1479_v20 = vrot.slane %v1466_v49, %v12915_v61  ;;  %11351 = vmatprep.subr.bf16.mxu1 %v13090_v12 }
 0x343   : > { %v1475_v28 = vcombine.high %v1473_v17, %v1473_v17  ;;  %v1483_v29 = vrot.slane %v1473_v17, %v12915_v61  ;;  %v1496_v31 = vsel %vm636_vm2, %v1437_v14, %v1479_v20  ;;  %v1487_v32 = vrot.slane %v1474_v18, %v12915_v61  ;;  %v1565_v14 = vpop.permute.xlu1 %1564 }
 0x344   : > { %v1602_v17 = vsel %vm484_vm1, 0.0, %v1565_v14 }
 0x345   : > { %v1497_v34 = vsel %vm636_vm2, %v1444_v16, %v1483_v29  ;;  %v1491_v37 = vrot.slane %v1475_v28, %v12915_v61  ;;  %v1498_v38 = vsel %vm636_vm2, %v1445_v23, %v1487_v32 }
 0x346   : > { %v1516_v42 = vcombine.low %v1496_v31, %v1497_v34 }
 0x347   : > { %v1499_v47 = vsel %vm636_vm2, %v1446_v35, %v1491_v37 }
 0x348   : > { %v1523_v50 = vrot.slane %v1516_v42, %v12703_v40  ;;  %v1532_v51 = vcombine.low %v1498_v38, %v1499_v47 }
 0x34a   : > { %v1541_v19 = vrot.slane %v1523_v50, 7  ;;  %v1539_v55 = vrot.slane %v1532_v51, %v12703_v40 }
 0x34c   : > { %v1549_v60 = vsel %vm636_vm2, 0.0, %v1541_v19  ;;  %v1543_v62 = vrot.slane %v1539_v55, 7 }
 0x34d   : > { %v1554_v0 = vsel %vm1552_vm13, %v1549_v60, 0.0 }
 0x34e   : > { %1579 = vrot.lane.b32.xlu0 %v1554_v0, %s12131_s24  ;;  %v1562_v4 = vrot.slane %v1554_v0, 1  ;;  %v1551_v5 = vsel %vm636_vm2, 0.0, %v1543_v62 }
 0x34f   : > { %v13080_v10 = vsel %vm1552_vm13, %v1551_v5, 0.0  ;;  %v9928_v5 = vld [vmem:[%s18152_s5 + $0x198] sm:$0xff]  ;;  %vm2911_vm13 = vcmask 1046528  }
 0x350   : > { %1568 = vrot.lane.b32.xlu1 %v1562_v4, %s12133_s30  ;;  %v1589_v13 = vrot.slane %v13080_v10, 1 }
 0x352   : > { %1583 = vrot.lane.b32.xlu0 %v13080_v10, %s12131_s24 }
 0x354   : > { %1594 = vrot.lane.b32.xlu1 %v1563_v54, %s12135_s26 }
 0x356   : > { %1592 = vrot.lane.b32.xlu0 %v1562_v4, %s12135_s26  ;;  %v9927_v4 = vld [vmem:[%s18152_s5 + $0x190] sm:$0xff] }
 0x357   : > { %v11354_v11 = vpack.c.bf16 %v9928_v5, %v9927_v4 }
 0x358   : > { %1850 = vrot.lane.b32.xlu1 %v1589_v13, %s12133_s30 }
 0x35a   : > { %1596 = vrot.lane.b32.xlu0 %v1589_v13, %s12135_s26  ;;  %v9914_v13 = vld [vmem:[%s18152_s5 + $0x130] sm:$0xff] }
 0x35c   : > { %1856 = vrot.lane.b32.xlu1 %v12472_v27, %s12135_s26 }
 0x35e   : > { %1853 = vrot.lane.b32.xlu0 %v18163_v1, %s12131_s24 }
 0x3a0   : > { %v1578_v15 = vpop.permute.xlu1 %1577 }
 0x3a1   : > { %v1606_v21 = vsel %vm819_vm4, %v1602_v17, %v1578_v15  ;;  %v9929_v15 = vld [vmem:[%s18152_s5 + $0x1a0] sm:$0xff] }
 0x3a2   : > { %v1567_v49 = vpop.permute.xlu0 %1566  ;;  %v9916_v17 = vld [vmem:[%s18152_s5 + $0x140] sm:$0xff] }
 0x3a3   : > { %v1603_v31 = vsel %vm484_vm1, %v12943_v30, %v1567_v49  ;;  %v9910_v30 = vld [vmem:[%s18152_s5 + $0x110] sm:$0xff]  ;;  %v9930_v49 = vld [vmem:[%s18152_s5 + $0x1a8] sm:$0xff] }
 0x3a4   : > { %v1582_v54 = vpop.permute.xlu1 %1581  ;;  %v11322_v19 = vpack.c.bf16 %v9911_v43, %v9910_v30 }
 0x3a6   : > { %v1571_v16 = vpop.permute.xlu0 %1570 }
 0x3a7   : > { %v1605_v45 = vsel %vm484_vm1, %v12968_v44, %v1571_v16  ;;  %v11358_v16 = vpack.c.bf16 %v9930_v49, %v9929_v15 }
 0x3a8   : > { %v1591_v18 = vpop.permute.xlu1 %1590 }
 0x3a9   : > { %v1611_v22 = vsel %vm1610_vm0, %v1606_v21, %v1591_v18  ;;  %v9917_v18 = vld [vmem:[%s18152_s5 + $0x148] sm:$0xff] }
 0x3aa   : > { %v1726_v26 = vcombine.high %v1611_v22, %v1611_v22  ;;  %v9888_v46 = vrot.slane %v1611_v22, 9  ;;  %v11334_v21 = vpack.c.bf16 %v9917_v18, %v9916_v17 }
 0x3ac   : > { %v1734_v35 = vrot.slane %v1726_v26, 5  ;;  %v9934_v26 = vld [vmem:[%s18152_s5 + $0x1c8] sm:$0xff] }
 0x3ae   : > { %v1735_v53 = vsel %vm13115_vm6, %v9888_v46, %v1734_v35  ;;  %v9935_v35 = vld [vmem:[%s18152_s5 + $0x1d0] sm:$0xff]  ;;  %v9923_v46 = vld [vmem:[%s18152_s5 + $0x178] sm:$0xff] }
 0x3c0   : > { %v1580_v20 = vpop.permute.xlu0 %1579 }
 0x3c1   : > { %v1607_v33 = vsel %vm819_vm4, %v1603_v31, %v1580_v20  ;;  %v9931_v20 = vld [vmem:[%s18152_s5 + $0x1b0] sm:$0xff] }
 0x3c2   : > { %v1569_v23 = vpop.permute.xlu1 %1568 }
 0x3c3   : > { %v1604_v24 = vsel %vm484_vm1, %v1554_v0, %v1569_v23  ;;  %v9918_v23 = vld [vmem:[%s18152_s5 + $0x150] sm:$0xff] }
 0x3c4   : > { %v1584_v25 = vpop.permute.xlu0 %1583  ;;  %v1608_v28 = vsel %vm819_vm4, %v1604_v24, %v1582_v54  ;;  %v9919_v24 = vld [vmem:[%s18152_s5 + $0x158] sm:$0xff] }
 0x3c5   : > { %v1609_v47 = vsel %vm819_vm4, %v1605_v45, %v1584_v25  ;;  %v9933_v25 = vld [vmem:[%s18152_s5 + $0x1c0] sm:$0xff]  ;;  %v9922_v45 = vld [vmem:[%s18152_s5 + $0x170] sm:$0xff] }
 0x3c6   : > { %v1595_v29 = vpop.permute.xlu1 %1594 }
 0x3c7   : > { %v1613_v32 = vsel %vm1610_vm0, %v1608_v28, %v1595_v29  ;;  %v11338_v29 = vpack.c.bf16 %v9919_v24, %v9918_v23 }
 0x3c8   : > { %v1593_v34 = vpop.permute.xlu0 %1592  ;;  %v1728_v39 = vcombine.high %v1613_v32, %v1613_v32  ;;  %v9890_v60 = vrot.slane %v1613_v32, 9 }
 0x3c9   : > { %v1612_v37 = vsel %vm1610_vm0, %v1607_v33, %v1593_v34  ;;  %v9920_v33 = vld [vmem:[%s18152_s5 + $0x160] sm:$0xff]  ;;  %v9921_v34 = vld [vmem:[%s18152_s5 + $0x168] sm:$0xff] }
 0x3ca   : > { %v1727_v41 = vcombine.high %v1612_v37, %v1612_v37  ;;  %v1641_v42 = vcombine.low %v1611_v22, %v1612_v37  ;;  %v9889_v48 = vrot.slane %v1612_v37, 9  ;;  %v1742_v55 = vrot.slane %v1728_v39, 5  ;;  %v1851_v28 = vpop.permute.xlu1 %1850 }
 0x3cb   : > { %v1880_v2 = vcombine.low %v1612_v37, %v1613_v32  ;;  %v9936_v37 = vld [vmem:[%s18152_s5 + $0x1d8] sm:$0xff]  ;;  %v1859_v39 = vsel %vm484_vm1, %v13080_v10, %v1851_v28  ;;  %v11342_v30 = vpack.c.bf16 %v9921_v34, %v9920_v33  ;;  %v9937_v10 = vld [vmem:[%s18152_s5 + $0x1e0] sm:$0xff] }
 0x3cc   : > { %v1738_v50 = vrot.slane %v1727_v41, 5  ;;  %10658 = vmatprep.mubr.f32.mxu0 %v1641_v42  ;;  %v1597_v51 = vpop.permute.xlu0 %1596  ;;  %v1743_v7 = vsel %vm13115_vm6, %v9890_v60, %v1742_v55  ;;  %v11370_v43 = vpack.c.bf16 %v9936_v37, %v9935_v35  ;;  %v9940_v55 = vld [vmem:[%s18152_s5 + $0x1f8] sm:$0xff] }
 0x3cd   : > { %v13129_v52 = vsel %vm1610_vm0, %v1609_v47, %v1597_v51  ;;  %v9938_v47 = vld [vmem:[%s18152_s5 + $0x1e8] sm:$0xff] }
 0x3ce   : > { %v1642_v56 = vcombine.low %v1613_v32, %v13129_v52  ;;  %v1729_v44 = vcombine.high %v13129_v52, %v13129_v52  ;;  %v1739_v57 = vsel %vm13115_vm6, %v9889_v48, %v1738_v50  ;;  %v9891_v62 = vrot.slane %v13129_v52, 9  ;;  %v1857_v42 = vpop.permute.xlu1 %1856 }
 0x3cf   : > { %v1765_v58 = vcombine.low %v1735_v53, %v1739_v57  ;;  %v1987_v14 = vcombine.low %v1739_v57, %v1743_v7  ;;  %v11366_v32 = vpack.c.bf16 %v9934_v26, %v9933_v25  ;;  %v11346_v50 = vpack.c.bf16 %v9923_v46, %v9922_v45 }
 0x3d0   : > { %v1746_v0 = vrot.slane %v1729_v44, 5  ;;  %10659 = vmatmul.mubr.f32.vlgmr.msra.gmra.mrb[8].mxu0 %v1642_v56  ;;  %v1854_v31 = vpop.permute.xlu0 %1853  ;;  %v11374_v51 = vpack.c.bf16 %v9938_v47, %v9937_v10 }
 0x3d1   : > { %11321 = vmatpush3.bf16.msra.mxu0 %v13069_v6  ;;  %10693 = vmatprep.mubr.f32.mxu1 %v1765_v58  ;;  %v9915_v6 = vld [vmem:[%s18152_s5 + $0x138] sm:$0xff]  ;;  %v1860_v41 = vsel %vm819_vm4, %v1859_v39, %v1854_v31 }
 0x3d2   : > { %10728 = vmatprep.mubr.f32.mxu0 %v1880_v2  ;;  %11323 = vmatprep.subr.bf16.mxu0 %v11322_v19  ;;  %v13156_v8 = vsel %vm13115_vm6, %v9891_v62, %v1746_v0  ;;  %v11330_v54 = vpack.c.bf16 %v9915_v6, %v9914_v13  ;;  %v1861_v48 = vsel %vm1610_vm0, %v1860_v41, %v1857_v42  ;;  %vm3028_vm0 = vcmask 392192  }
 0x3d3   : > { %v1766_v9 = vcombine.low %v1743_v7, %v13156_v8  ;;  %v1965_v53 = vcombine.high %v1861_v48, %v1861_v48  ;;  %v1881_v57 = vcombine.low %v13129_v52, %v1861_v48  ;;  %v9924_v58 = vrot.slane %v1861_v48, 9  ;;  %v13240_v52 = vld [vmem:[#allocation9] ss:$0 sm:$0xff] }
 0x3d4   : > { %v13236_v62 = vpack.i.bf16 %v12472_v27, %v12472_v27 }
 0x3d5   : > { %11325 = vmatpush3.bf16.msra.mxu0 %v11322_v19  ;;  %10694 = vmatmul.mubr.f32.vlgmr.msra.gmra.mrb[8].mxu1 %v1766_v9  ;;  %v9939_v19 = vld [vmem:[%s18152_s5 + $0x1f0] sm:$0xff]  ;;  %v1968_v44 = vrot.slane %v1965_v53, 5 }
 0x3d6   : > { %11353 = vmatpush3.bf16.msra.mxu1 %v13090_v12  ;;  %10763 = vmatprep.mubr.f32.mxu1 %v1987_v14  ;;  %v9932_v12 = vld [vmem:[%s18152_s5 + $0x1b8] sm:$0xff]  ;;  %v11378_v56 = vpack.c.bf16 %v9940_v55, %v9939_v19  ;;  %18366 = vst [vmem:[#allocation17_spill] sm:$0xff] %v13236_v62 }
 0x3d7   : > { %11327 = vmatprep.subr.bf16.mxu0 %v11326_v36  ;;  %11355 = vmatprep.subr.bf16.mxu1 %v11354_v11  ;;  %v11362_v22 = vpack.c.bf16 %v9932_v12, %v9931_v20  ;;  %v1969_v59 = vsel %vm13115_vm6, %v9924_v58, %v1968_v44 }
 0x3d8   : > { %v1988_v60 = vcombine.low %v13156_v8, %v1969_v59  ;;  %11596 = vrot.lane.b32.xlu0 %v13236_v62, %s12136_s22 }
 0x3d9   : > { %11329 = vmatpush3.bf16.msra.mxu0 %v11326_v36 }
 0x3da   : > { %11357 = vmatpush3.bf16.msra.mxu1 %v11354_v11  ;;  %11331 = vmatprep.subr.bf16.mxu0 %v11330_v54 }
 0x3db   : > { %11359 = vmatprep.subr.bf16.mxu1 %v11358_v16 }
 0x3dd   : > { %11333 = vmatpush3.bf16.msra.mxu0 %v11330_v54 }
 0x3de   : > { %11361 = vmatpush3.bf16.msra.mxu1 %v11358_v16  ;;  %11335 = vmatprep.subr.bf16.mxu0 %v11334_v21 }
 0x3df   : > { %11363 = vmatprep.subr.bf16.mxu1 %v11362_v22 }
 0x3e1   : > { %11337 = vmatpush3.bf16.msra.mxu0 %v11334_v21 }
 0x3e2   : > { %11365 = vmatpush3.bf16.msra.mxu1 %v11362_v22  ;;  %11339 = vmatprep.subr.bf16.mxu0 %v11338_v29 }
 0x3e3   : > { %11367 = vmatprep.subr.bf16.mxu1 %v11366_v32 }
 0x3e5   : > { %11341 = vmatpush3.bf16.msra.mxu0 %v11338_v29 }
 0x3e6   : > { %11369 = vmatpush3.bf16.msra.mxu1 %v11366_v32  ;;  %11343 = vmatprep.subr.bf16.mxu0 %v11342_v30 }
 0x3e7   : > { %11371 = vmatprep.subr.bf16.mxu1 %v11370_v43 }
 0x3e9   : > { %11345 = vmatpush3.bf16.msra.mxu0 %v11342_v30 }
 0x3ea   : > { %11373 = vmatpush3.bf16.msra.mxu1 %v11370_v43  ;;  %11347 = vmatprep.subr.bf16.mxu0 %v11346_v50 }
 0x3eb   : > { %11375 = vmatprep.subr.bf16.mxu1 %v11374_v51 }
 0x3ed   : > { %11349 = vmatpush3.bf16.msra.mxu0 %v11346_v50 }
 0x3ee   : > { %11377 = vmatpush3.bf16.msra.mxu1 %v11374_v51 }
 0x3ef   : > { %11379 = vmatprep.subr.bf16.mxu1 %v11378_v56 }
 0x3f0   : > { %10729 = vmatmul.mubr.f32.vlgmr.msra.gmra.mrb[10].mxu0 %v1881_v57 }
 0x3f2   : > { %11381 = vmatpush3.bf16.msra.mxu1 %v11378_v56 }
 0x3f5   : > { %10764 = vmatmul.mubr.f32.vlgmr.msra.gmra.mrb[10].mxu1 %v1988_v60 }
 0x4a3   : > { %v10660_v0 = vpop.f32.mrb[8].mxu0 }
 0x4a4   : > { %v1717_v2 = vadd.f32 %v10660_v0, %v13240_v52  ;;  %v1711_v3 = vpop.f32.mrb[9].mxu0 }
 0x4a5   : > { %v1712_v38 = vadd.f32 %v13240_v52, %v1711_v3 }
 0x4a6   : > { %vm1721_vm3 = vcmp.ge.f32.partialorder %v1717_v2, 0.0  ;;  %v1723_v4 = vmul.f32 0.05, %v1717_v2 }
 0x4a7   : > { %vm1720_vm7 = vcmp.ge.f32.partialorder %v1712_v38, 0.0  ;;  %v1722_v5 = vmul.f32 0.05, %v1712_v38 }
 0x4a8   : > { %v1725_v7 = vsel %vm1721_vm3, %v1717_v2, %v1723_v4  ;;  %v10695_v8 = vpop.f32.mrb[8].mxu1 }
 0x4a9   : > { %v2123_v27 = vcombine.high %v1725_v7, %v1725_v7  ;;  %v2130_v9 = vrot.slane %v1725_v7, %v12910_v63  ;;  %v1724_v36 = vsel %vm1720_vm7, %v1712_v38, %v1722_v5  ;;  %v1841_v11 = vadd.f32 %v10695_v8, %v13240_v52  ;;  %v1835_v13 = vpop.f32.mrb[9].mxu1 }
 0x4aa   : > { %v2074_v6 = vcombine.high %v1724_v36, %v1724_v36  ;;  %v2081_v14 = vrot.slane %v1724_v36, %v12910_v63  ;;  %v1836_v22 = vadd.f32 %v13240_v52, %v1835_v13 }
 0x4ab   : > { %v2137_v15 = vrot.slane %v2123_v27, %v12910_v63  ;;  %v2138_v49 = vcombine.high %v2130_v9, %v2130_v9  ;;  %v13249_v54 = vrot.slane %v2130_v9, %v12910_v63  ;;  %vm1845_vm8 = vcmp.ge.f32.partialorder %v1841_v11, 0.0 }
 0x4ac   : > { %v2088_v16 = vrot.slane %v2074_v6, %v12910_v63  ;;  %v2089_v17 = vcombine.high %v2081_v14, %v2081_v14  ;;  %v13253_v18 = vrot.slane %v2081_v14, %v12910_v63  ;;  %v1847_v20 = vmul.f32 0.05, %v1841_v11 }
 0x4ad   : > { %v2139_v12 = vcombine.high %v2137_v15, %v2137_v15  ;;  %v13256_v21 = vrot.slane %v2137_v15, %v12910_v63  ;;  %v13260_v23 = vrot.slane %v2138_v49, %v12910_v63  ;;  %v2168_v31 = vcombine.high %v13249_v54, %v13249_v54 }
 0x4ae   : > { %v2090_v24 = vcombine.high %v2088_v16, %v2088_v16  ;;  %v13263_v25 = vrot.slane %v2088_v16, %v12910_v63  ;;  %v13266_v26 = vrot.slane %v2089_v17, %v12910_v63  ;;  %v1849_v29 = vsel %vm1845_vm8, %v1841_v11, %v1847_v20 }
 0x4af   : > { %v13269_v28 = vrot.slane %v2139_v12, %v12910_v63  ;;  %v2169_v32 = vcombine.high %v13256_v21, %v13256_v21  ;;  %v2119_v33 = vcombine.high %v13253_v18, %v13253_v18  ;;  %v2239_v34 = vcombine.high %v1849_v29, %v1849_v29 }
 0x4b0   : > { %v13278_v35 = vrot.slane %v2090_v24, %v12910_v63  ;;  %v2246_v37 = vrot.slane %v1849_v29, %v12910_v63  ;;  %vm1844_vm9 = vcmp.ge.f32.partialorder %v1836_v22, 0.0  ;;  %v1846_v39 = vmul.f32 0.05, %v1836_v22 }
 0x4b1   : > { %v2170_v41 = vcombine.high %v13260_v23, %v13260_v23  ;;  %v2120_v42 = vcombine.high %v13263_v25, %v13263_v25  ;;  %v2121_v30 = vcombine.high %v13266_v26, %v13266_v26  ;;  %v2253_v43 = vrot.slane %v2239_v34, %v12910_v63 }
 0x4b2   : > { %v2171_v45 = vcombine.high %v13269_v28, %v13269_v28  ;;  %v2254_v46 = vcombine.high %v2246_v37, %v2246_v37  ;;  %v2262_v10 = vrot.slane %v2246_v37, %v12910_v63  ;;  %v1848_v47 = vsel %vm1844_vm9, %v1836_v22, %v1846_v39 }
 0x4b3   : > { %v2255_v48 = vcombine.high %v2253_v43, %v2253_v43  ;;  %v2269_v50 = vrot.slane %v2253_v43, %v12910_v63  ;;  %v2190_v51 = vcombine.high %v1848_v47, %v1848_v47  ;;  %v2197_v53 = vrot.slane %v1848_v47, %v12910_v63 }
 0x4b4   : > { %v2122_v19 = vcombine.high %v13278_v35, %v13278_v35  ;;  %v2276_v55 = vrot.slane %v2254_v46, %v12910_v63  ;;  %v2284_v56 = vcombine.high %v2262_v10, %v2262_v10  ;;  %v2323_v44 = vrot.slane %v2262_v10, %v12915_v61 }
 0x4b5   : > { %v2283_v57 = vrot.slane %v2255_v48, %v12910_v63  ;;  %v2285_v58 = vcombine.high %v2269_v50, %v2269_v50  ;;  %v2339_v59 = vrot.slane %v2269_v50, %v12915_v61  ;;  %v2204_v60 = vrot.slane %v2190_v51, %v12910_v63 }
 0x4b6   : > { %v2286_v0 = vcombine.high %v2276_v55, %v2276_v55  ;;  %v2327_v2 = vrot.slane %v2276_v55, %v12915_v61  ;;  %v2331_v3 = vrot.slane %v2284_v56, %v12915_v61  ;;  %v2205_v38 = vcombine.high %v2197_v53, %v2197_v53 }
 0x4b7   : > { %v2287_v4 = vcombine.high %v2283_v57, %v2283_v57  ;;  %v2343_v5 = vrot.slane %v2283_v57, %v12915_v61  ;;  %v2347_v7 = vrot.slane %v2285_v58, %v12915_v61  ;;  %v2206_v8 = vcombine.high %v2204_v60, %v2204_v60 }
 0x4b8   : > { %v2213_v27 = vrot.slane %v2197_v53, %v12910_v63  ;;  %v2220_v9 = vrot.slane %v2204_v60, %v12910_v63  ;;  %v2227_v36 = vrot.slane %v2205_v38, %v12910_v63  ;;  %v2335_v11 = vrot.slane %v2286_v0, %v12915_v61 }
 0x4b9   : > { %v2351_v13 = vrot.slane %v2287_v4, %v12915_v61  ;;  %v2234_v6 = vrot.slane %v2206_v8, %v12910_v63  ;;  %v2376_v14 = vsel %vm636_vm2, %v13249_v54, %v2323_v44  ;;  %v2377_v15 = vsel %vm636_vm2, %v13260_v23, %v2327_v2 }
 0x4ba   : > { %v2235_v49 = vcombine.high %v2213_v27, %v2213_v27  ;;  %v2236_v16 = vcombine.high %v2220_v9, %v2220_v9  ;;  %v2237_v17 = vcombine.high %v2227_v36, %v2227_v36  ;;  %v2291_v20 = vrot.slane %v2213_v27, %v12915_v61 }
 0x4bb   : > { %v2238_v12 = vcombine.high %v2234_v6, %v2234_v6  ;;  %v2295_v22 = vrot.slane %v2227_v36, %v12915_v61  ;;  %v2307_v24 = vrot.slane %v2220_v9, %v12915_v61  ;;  %v2311_v29 = vrot.slane %v2234_v6, %v12915_v61 }
 0x4bc   : > { %v2299_v34 = vrot.slane %v2235_v49, %v12915_v61  ;;  %v2303_v37 = vrot.slane %v2237_v17, %v12915_v61  ;;  %v2315_v54 = vrot.slane %v2236_v16, %v12915_v61  ;;  %v2378_v23 = vsel %vm636_vm2, %v2168_v31, %v2331_v3 }
 0x4bd   : > { %v2319_v39 = vrot.slane %v2238_v12, %v12915_v61  ;;  %v2379_v43 = vsel %vm636_vm2, %v2170_v41, %v2335_v11  ;;  %v2796_v46 = vcombine.low %v2376_v14, %v2377_v15  ;;  %v2368_v10 = vsel %vm636_vm2, %v13253_v18, %v2291_v20 }
 0x4be   : > { %v2797_v47 = vcombine.low %v2378_v23, %v2379_v43  ;;  %v2369_v48 = vsel %vm636_vm2, %v13266_v26, %v2295_v22  ;;  %v2370_v50 = vsel %vm636_vm2, %v2119_v33, %v2299_v34  ;;  %v2371_v51 = vsel %vm636_vm2, %v2121_v30, %v2303_v37 }
 0x4bf   : > { %v2804_v53 = vrot.slane %v2796_v46, %v12703_v40  ;;  %v2728_v55 = vcombine.low %v2368_v10, %v2369_v48  ;;  %v2729_v31 = vcombine.low %v2370_v50, %v2371_v51  ;;  %v2380_v56 = vsel %vm636_vm2, %v13256_v21, %v2339_v59 }
 0x4c0   : > { %v2811_v41 = vrot.slane %v2797_v47, %v12703_v40  ;;  %v2381_v18 = vsel %vm636_vm2, %v13269_v28, %v2343_v5  ;;  %v2382_v26 = vsel %vm636_vm2, %v2169_v32, %v2347_v7  ;;  %v2383_v33 = vsel %vm636_vm2, %v2171_v45, %v2351_v13 }
 0x4c1   : > { %v2736_v30 = vrot.slane %v2728_v55, %v12703_v40  ;;  %v2743_v44 = vrot.slane %v2729_v31, %v12703_v40  ;;  %v2830_v57 = vcombine.low %v2380_v56, %v2381_v18  ;;  %v2831_v58 = vcombine.low %v2382_v26, %v2383_v33 }
 0x4c2   : > { %v2812_v60 = vcombine.low %v2804_v53, %v2811_v41  ;;  %v13345_v0 = vsel %vm636_vm2, %v13263_v25, %v2307_v24  ;;  %v13349_v28 = vsel %vm636_vm2, %v13278_v35, %v2311_v29  ;;  %v13355_v21 = vsel %vm636_vm2, %v2120_v42, %v2315_v54 }
 0x4c3   : > { %v10730_v59 = vpop.f32.mrb[10].mxu0  ;;  %v2744_v2 = vcombine.low %v2736_v30, %v2743_v44  ;;  %v13359_v3 = vrot.slane %v2830_v57, %v12703_v40  ;;  %v13362_v38 = vrot.slane %v2831_v58, %v12703_v40  ;;  %v13369_v25 = vsel %vm636_vm2, %v2122_v19, %v2319_v39 }
 0x4c4   : > { %v1956_v32 = vadd.f32 %v10730_v59, %v13240_v52  ;;  %v1950_v45 = vpop.f32.mrb[11].mxu0  ;;  %v2868_v4 = vrot.slane %v2812_v60, 7  ;;  %v2762_v42 = vcombine.low %v13345_v0, %v13349_v28 }
 0x4c5   : > { %v1951_v5 = vadd.f32 %v13240_v52, %v1950_v45  ;;  %v2864_v8 = vrot.slane %v2744_v2, 7  ;;  %v2846_v27 = vcombine.low %v13359_v3, %v13362_v38  ;;  %v2763_v2 = vcombine.low %v13355_v21, %v13369_v25 }
 0x4c6   : > { %vm1960_vm10 = vcmp.ge.f32.partialorder %v1956_v32, 0.0  ;;  %v1962_v7 = vmul.f32 0.05, %v1956_v32  ;;  %v13376_v9 = vsel %vm636_vm2, 0.0, %v2868_v4  ;;  %v13379_v36 = vsel %vm636_vm2, %v2868_v4, 0.0 }
 0x4c7   : > { %vm1959_vm11 = vcmp.ge.f32.partialorder %v1951_v5, 0.0  ;;  %v1961_v35 = vmul.f32 0.05, %v1951_v5  ;;  %2967 = vrot.lane.b32.xlu0 %v13376_v9, %s12133_s30  ;;  %v13384_v11 = vrot.slane %v13379_v36, 1  ;;  %v13387_v6 = vsel %vm636_vm2, %v2864_v8, 0.0 }
 0x4c8   : > { %v1964_v19 = vsel %vm1960_vm10, %v1956_v32, %v1962_v7  ;;  %v10765_v13 = vpop.f32.mrb[10].mxu1  ;;  %v13395_v22 = vrot.slane %v13387_v6, 1  ;;  %v2925_v47 = vrot.slane %v13376_v9, 1  ;;  %v13435_v30 = vsel %vm636_vm2, 0.0, %v2864_v8 }
 0x4c9   : > { %v2435_v14 = vcombine.high %v1964_v19, %v1964_v19  ;;  %v2442_v15 = vrot.slane %v1964_v19, %v12910_v63  ;;  %v1963_v49 = vsel %vm1959_vm11, %v1951_v5, %v1961_v35  ;;  %v2063_v16 = vadd.f32 %v10765_v13, %v13240_v52  ;;  %v2057_v17 = vpop.f32.mrb[11].mxu1  ;;  %3214 = vrot.lane.b32.xlu1 %v13384_v11, %s12136_s22 }
 0x4ca   : > { %v2386_v20 = vcombine.high %v1963_v49, %v1963_v49  ;;  %v2393_v12 = vrot.slane %v1963_v49, %v12910_v63  ;;  %v2058_v10 = vadd.f32 %v13240_v52, %v2057_v17  ;;  %v2913_v58 = vrot.slane %v13435_v30, 1 }
 0x4cb   : > { %v2449_v24 = vrot.slane %v2435_v14, %v12910_v63  ;;  %v2450_v29 = vcombine.high %v2442_v15, %v2442_v15  ;;  %v13399_v34 = vrot.slane %v2442_v15, %v12910_v63  ;;  %vm2067_vm12 = vcmp.ge.f32.partialorder %v2063_v16, 0.0  ;;  %3236 = vrot.lane.b32.xlu0 %v13379_v36, %s12133_s30 }
 0x4cc   : > { %v2400_v37 = vrot.slane %v2386_v20, %v12910_v63  ;;  %v2401_v54 = vcombine.high %v2393_v12, %v2393_v12  ;;  %v13403_v23 = vrot.slane %v2393_v12, %v12910_v63  ;;  %v2069_v39 = vmul.f32 0.05, %v2063_v16 }
 0x4cd   : > { %v2451_v43 = vcombine.high %v2449_v24, %v2449_v24  ;;  %v13408_v46 = vrot.slane %v2449_v24, %v12910_v63  ;;  %v13413_v48 = vrot.slane %v2450_v29, %v12910_v63  ;;  %v2480_v50 = vcombine.high %v13399_v34, %v13399_v34  ;;  %3206 = vrot.lane.b32.xlu1 %v13395_v22, %s12136_s22 }
 0x4ce   : > { %v2402_v51 = vcombine.high %v2400_v37, %v2400_v37  ;;  %v13420_v53 = vrot.slane %v2400_v37, %v12910_v63  ;;  %v13423_v55 = vrot.slane %v2401_v54, %v12910_v63  ;;  %v2071_v52 = vsel %vm2067_vm12, %v2063_v16, %v2069_v39 }
 0x4cf   : > { %v13427_v31 = vrot.slane %v2451_v43, %v12910_v63  ;;  %v2481_v56 = vcombine.high %v13408_v46, %v13408_v46  ;;  %v2431_v41 = vcombine.high %v13403_v23, %v13403_v23  ;;  %v2551_v18 = vcombine.high %v2071_v52, %v2071_v52  ;;  %2959 = vrot.lane.b32.xlu0 %v13435_v30, %s12133_s30 }
 0x4d0   : > { %v2558_v26 = vrot.slane %v2071_v52, %v12910_v63  ;;  %vm2066_vm14 = vcmp.ge.f32.partialorder %v2058_v10, 0.0  ;;  %v2068_v33 = vmul.f32 0.05, %v2058_v10  ;;  %v2482_v44 = vcombine.high %v13413_v48, %v13413_v48 }
 0x4d1   : > { %v2565_v57 = vrot.slane %v2551_v18, %v12910_v63  ;;  %v13445_v60 = vsel %vm2911_vm13, %v2925_v47, %v13384_v11  ;;  %v13457_v35 = vrot.slane %v2402_v51, %v12910_v63  ;;  %v2870_v14 = vrot.slane %v2846_v27, 7 }
 0x4d2   : > { %v2566_v59 = vcombine.high %v2558_v26, %v2558_v26  ;;  %v2574_v32 = vrot.slane %v2558_v26, %v12910_v63  ;;  %v2070_v45 = vsel %vm2066_vm14, %v2058_v10, %v2068_v33  ;;  %2944 = vrot.lane.b32.xlu1 %v13445_v60, %s12136_s22  ;;  %v2433_v21 = vcombine.high %v13423_v55, %v13423_v55 }
 0x4d3   : > { %v2567_v4 = vcombine.high %v2565_v57, %v2565_v57  ;;  %v13453_v5 = vrot.slane %v2565_v57, %v12910_v63  ;;  %v2502_v7 = vcombine.high %v2070_v45, %v2070_v45  ;;  %v2509_v8 = vrot.slane %v2070_v45, %v12910_v63  ;;  %3228 = vrot.lane.b32.xlu0 %v13387_v6, %s12133_s30 }
 0x4d4   : > { %v2588_v19 = vrot.slane %v2566_v59, %v12910_v63  ;;  %v2596_v13 = vcombine.high %v2574_v32, %v2574_v32  ;;  %v13473_v49 = vsel %vm2911_vm13, %v2913_v58, %v13395_v22  ;;  %v2635_v3 = vrot.slane %v2574_v32, %v12915_v61 }
 0x4d5   : > { %v13466_v25 = vrot.slane %v2567_v4, %v12910_v63  ;;  %v2516_v15 = vrot.slane %v2502_v7, %v12910_v63  ;;  %v2597_v16 = vcombine.high %v13453_v5, %v13453_v5  ;;  %v2651_v38 = vrot.slane %v13453_v5, %v12915_v61 }
 0x4d6   : > { %v2517_v27 = vcombine.high %v2509_v8, %v2509_v8  ;;  %2936 = vrot.lane.b32.xlu1 %v13473_v49, %s12136_s22  ;;  %v2598_v17 = vcombine.high %v2588_v19, %v2588_v19  ;;  %v2525_v12 = vrot.slane %v2509_v8, %v12910_v63  ;;  %v2639_v29 = vrot.slane %v2588_v19, %v12915_v61 }
 0x4d7   : > { %v2518_v20 = vcombine.high %v2516_v15, %v2516_v15  ;;  %v13484_v24 = vrot.slane %v2516_v15, %v12910_v63  ;;  %v2643_v37 = vrot.slane %v2596_v13, %v12915_v61  ;;  %v13490_v39 = vsel %vm636_vm2, %v2870_v14, 0.0  ;;  %3260 = vrot.lane.b32.xlu0 %v13384_v11, %s12137_s13 }
 0x4d8   : > { %v2539_v54 = vrot.slane %v2517_v27, %v12910_v63  ;;  %v2599_v43 = vcombine.high %v13466_v25, %v13466_v25  ;;  %v2547_v10 = vcombine.high %v2525_v12, %v2525_v12  ;;  %v13497_v47 = vsel %vm636_vm2, 0.0, %v2870_v14 }
 0x4d9   : > { %v2770_v51 = vrot.slane %v2762_v42, %v12703_v40  ;;  %v2603_v18 = vrot.slane %v2525_v12, %v12915_v61  ;;  %v13506_v33 = vrot.slane %v13490_v39, 1  ;;  %v2546_v57 = vrot.slane %v2518_v20, %v12910_v63 }
 0x4da   : > { %v2549_v52 = vcombine.high %v2539_v54, %v2539_v54  ;;  %v2607_v26 = vrot.slane %v2539_v54, %v12915_v61  ;;  %v2548_v11 = vcombine.high %v13484_v24, %v13484_v24  ;;  %v2611_v58 = vrot.slane %v2547_v10, %v12915_v61 }
 0x4db   : > { %v2777_v59 = vrot.slane %v2763_v2, %v12703_v40  ;;  %3218 = vrot.lane.b32.xlu1 %v13506_v33, %s12136_s22  ;;  %v2647_v0 = vrot.slane %v2598_v17, %v12915_v61  ;;  %v2688_v28 = vsel %vm636_vm2, %v13399_v34, %v2635_v3  ;;  %v2689_v42 = vsel %vm636_vm2, %v13413_v48, %v2639_v29 }
 0x4dc   : > { %v2690_v32 = vsel %vm636_vm2, %v2480_v50, %v2643_v37  ;;  %v2619_v45 = vrot.slane %v13484_v24, %v12915_v61  ;;  %2971 = vrot.lane.b32.xlu0 %v13497_v47, %s12133_s30  ;;  %v2813_v4 = vcombine.low %v2688_v28, %v2689_v42  ;;  %v2615_v5 = vrot.slane %v2549_v52, %v12915_v61 }
 0x4dd   : > { %v2778_v2 = vcombine.low %v2770_v51, %v2777_v59  ;;  %v2691_v7 = vsel %vm636_vm2, %v2482_v44, %v2647_v0  ;;  %v2680_v48 = vsel %vm636_vm2, %v13403_v23, %v2603_v18  ;;  %v2681_v34 = vsel %vm636_vm2, %v13423_v55, %v2607_v26 }
 0x4de   : > { %v2682_v50 = vsel %vm636_vm2, %v2431_v41, %v2611_v58  ;;  %v2550_v8 = vcombine.high %v2546_v57, %v2546_v57  ;;  %v2814_v13 = vcombine.low %v2690_v32, %v2691_v7  ;;  %v2683_v14 = vsel %vm636_vm2, %v2433_v21, %v2615_v5 }
 0x4df   : > { %v2866_v19 = vrot.slane %v2778_v2, 7  ;;  %v2931_v15 = vrot.slane %v13497_v47, 1  ;;  %v2745_v3 = vcombine.low %v2680_v48, %v2681_v34  ;;  %v2746_v44 = vcombine.low %v2682_v50, %v2683_v14 }
 0x4e0   : > { %v2655_v27 = vrot.slane %v13466_v25, %v12915_v61  ;;  %3240 = vrot.lane.b32.xlu0 %v13490_v39, %s12133_s30  ;;  %v2821_v23 = vrot.slane %v2813_v4, %v12703_v40  ;;  %v2828_v55 = vrot.slane %v2814_v13, %v12703_v40  ;;  %v2659_v41 = vrot.slane %v2597_v16, %v12915_v61 }
 0x4e1   : > { %v13543_v17 = vsel %vm636_vm2, %v2866_v19, 0.0  ;;  %v2753_v20 = vrot.slane %v2745_v3, %v12703_v40  ;;  %v2760_v12 = vrot.slane %v2746_v44, %v12703_v40  ;;  %v2483_v25 = vcombine.high %v13427_v31, %v13427_v31  ;;  %v9951_v3 = vld [vmem:[%s18367_s15 + $0x48] sm:$0xff]  ;;  %v3039_v44 = vld [vmem:[%s18367_s15 + $0x10] sm:$0xff] }
 0x4e2   : > { %v2920_v21 = vrot.slane %v13543_v17, 1  ;;  %v2829_v24 = vcombine.low %v2821_v23, %v2828_v55  ;;  %v2663_v29 = vrot.slane %v2599_v43, %v12915_v61  ;;  %v2692_v37 = vsel %vm636_vm2, %v13408_v46, %v2651_v38  ;;  %v3040_v23 = vld [vmem:[%s18367_s15 + $0x18] sm:$0xff] }
 0x4e3   : > { %v2693_v54 = vsel %vm636_vm2, %v13427_v31, %v2655_v27  ;;  %v13562_v16 = vsel %vm636_vm2, 0.0, %v2866_v19  ;;  %v2761_v10 = vcombine.low %v2753_v20, %v2760_v12  ;;  %v2694_v51 = vsel %vm636_vm2, %v2481_v56, %v2659_v41  ;;  %v3037_v19 = vld [vmem:[%s18367_s15] sm:$0xff]  ;;  %v9952_v20 = vld [vmem:[%s18367_s15 + $0x50] sm:$0xff]  ;;  %v9953_v12 = vld [vmem:[%s18367_s15 + $0x58] sm:$0xff] }
 0x4e4   : > { %3210 = vrot.lane.b32.xlu1 %v2920_v21, %s12136_s22  ;;  %v2847_v52 = vcombine.low %v2692_v37, %v2693_v54  ;;  %3252 = vrot.lane.b32.xlu0 %v13395_v22, %s12137_s13  ;;  %v2695_v38 = vsel %vm636_vm2, %v2483_v25, %v2663_v29  ;;  %v2623_v43 = vrot.slane %v2546_v57, %v12915_v61  ;;  %v2919_v46 = vrot.slane %v13562_v16, 1  ;;  %v3041_v25 = vld [vmem:[%s18367_s15 + $0x20] sm:$0xff]  ;;  %v3042_v29 = vld [vmem:[%s18367_s15 + $0x28] sm:$0xff] }
 0x4e5   : > { %v2432_v31 = vcombine.high %v13420_v53, %v13420_v53  ;;  %v2933_v18 = vsel %vm2911_vm13, %v2931_v15, %v13506_v33  ;;  %v2848_v26 = vcombine.low %v2694_v51, %v2695_v38  ;;  %v2627_v58 = vrot.slane %v2548_v11, %v12915_v61  ;;  %v9950_v15 = vld [vmem:[%s18367_s15 + $0x40] sm:$0xff]  ;;  %v3043_v38 = vld [vmem:[%s18367_s15 + $0x30] sm:$0xff] }
 0x4e6   : > { %v2434_v56 = vcombine.high %v13457_v35, %v13457_v35  ;;  %v2631_v22 = vrot.slane %v2550_v8, %v12915_v61  ;;  %v2684_v59 = vsel %vm636_vm2, %v13420_v53, %v2619_v45  ;;  %v2855_v57 = vrot.slane %v2847_v52, %v12703_v40  ;;  %v9954_v51 = vld [vmem:[%s18367_s15 + $0x60] sm:$0xff]  ;;  %v9955_v52 = vld [vmem:[%s18367_s15 + $0x68] sm:$0xff] }
 0x4e7   : > { %v2862_v0 = vrot.slane %v2848_v26, %v12703_v40  ;;  %v2685_v11 = vsel %vm636_vm2, %v13457_v35, %v2623_v43  ;;  %v2686_v28 = vsel %vm636_vm2, %v2432_v31, %v2627_v58  ;;  %v2921_v53 = vsel %vm2911_vm13, %v2919_v46, %v2920_v21  ;;  %v3044_v31 = vld [vmem:[%s18367_s15 + $0x38] sm:$0xff]  ;;  %v9956_v46 = vld [vmem:[%s18367_s15 + $0x70] sm:$0xff] }
 0x4e8   : > { %2948 = vrot.lane.b32.xlu1 %v2933_v18, %s12136_s22  ;;  %2963 = vrot.lane.b32.xlu0 %v13562_v16, %s12133_s30  ;;  %v2687_v42 = vsel %vm636_vm2, %v2434_v56, %v2631_v22  ;;  %v2779_v2 = vcombine.low %v2684_v59, %v2685_v11  ;;  %v2869_v45 = vrot.slane %v2829_v24, 7  ;;  %v2865_v50 = vrot.slane %v2761_v10, 7  ;;  %v9957_v56 = vld [vmem:[%s18367_s15 + $0x78] sm:$0xff]  ;;  %v9966_v11 = vld [vmem:[%s18367_s15 + $0x80] sm:$0xff] }
 0x4e9   : > { %v2863_v32 = vcombine.low %v2855_v57, %v2862_v0  ;;  %v2780_v4 = vcombine.low %v2686_v28, %v2687_v42  ;;  %v11398_v27 = vpack.c.bf16 %v9951_v3, %v9950_v15  ;;  %v11386_v55 = vpack.c.bf16 %v3040_v23, %v3039_v44  ;;  %v9967_v28 = vld [vmem:[%s18367_s15 + $0x88] sm:$0xff] }
 0x4ea   : > { %v2787_v5 = vrot.slane %v2779_v2, %v12703_v40  ;;  %v13599_v48 = vsel %vm636_vm2, 0.0, %v2869_v45  ;;  %v13606_v34 = vsel %vm636_vm2, %v2869_v45, 0.0  ;;  %v13613_v8 = vsel %vm636_vm2, 0.0, %v2865_v50 }
 0x4eb   : > { %v2794_v7 = vrot.slane %v2780_v4, %v12703_v40  ;;  %v13627_v14 = vrot.slane %v2863_v32, 7  ;;  %11399 = vmatprep.subr.bf16.mxu1 %v11398_v27  ;;  %v11402_v24 = vpack.c.bf16 %v9953_v12, %v9952_v20  ;;  %v11390_v37 = vpack.c.bf16 %v3042_v29, %v3041_v25  ;;  %v9982_v4 = vld [vmem:[%s18367_s15 + $0xc0] sm:$0xff] }
 0x4ec   : > { %2940 = vrot.lane.b32.xlu1 %v2921_v53, %s12136_s22  ;;  %3232 = vrot.lane.b32.xlu0 %v13543_v17, %s12133_s30  ;;  %v2929_v10 = vrot.slane %v13606_v34, 1  ;;  %v11406_v43 = vpack.c.bf16 %v9955_v52, %v9954_v51  ;;  %v2928_v26 = vrot.slane %v13599_v48, 1  ;;  %v11410_v22 = vpack.c.bf16 %v9957_v56, %v9956_v46 }
 0x4ed   : > { %v2795_v35 = vcombine.low %v2787_v5, %v2794_v7  ;;  %v13646_v41 = vsel %vm636_vm2, 0.0, %v13627_v14  ;;  %11401 = vmatpush3.bf16.msra.mxu1 %v11398_v27  ;;  %v2916_v0 = vrot.slane %v13613_v8, 1  ;;  %v13708_v42 = vpack.c.bf16 %v9967_v28, %v9966_v11 }
 0x4ee   : > { %11403 = vmatprep.subr.bf16.mxu1 %v11402_v24  ;;  %v2930_v59 = vsel %vm2911_vm13, %v2928_v26, %v2929_v10 }
 0x4f0   : > { %2969 = vrot.lane.b32.xlu1 %v13599_v48, %s12133_s30  ;;  %2995 = vrot.lane.b32.xlu0 %v13445_v60, %s12137_s13  ;;  %v3038_v60 = vld [vmem:[%s18367_s15 + $0x8] sm:$0xff] }
 0x4f1   : > { %v11382_v13 = vpack.c.bf16 %v3038_v60, %v3037_v19  ;;  %11405 = vmatpush3.bf16.msra.mxu1 %v11402_v24  ;;  %v2984_v19 = vrot.slane %v13646_v41, 1 }
 0x4f2   : > { %11407 = vmatprep.subr.bf16.mxu1 %v11406_v43 }
 0x4f3   : > { %11383 = vmatprep.subr.bf16.mxu0 %v11382_v13 }
 0x4f4   : > { %3238 = vrot.lane.b32.xlu1 %v13606_v34, %s12133_s30  ;;  %2987 = vrot.lane.b32.xlu0 %v13473_v49, %s12137_s13  ;;  %v13625_v49 = vsel %vm636_vm2, %v2865_v50, 0.0 }
 0x4f5   : > { %11385 = vmatpush3.bf16.msra.mxu0 %v11382_v13  ;;  %11409 = vmatpush3.bf16.msra.mxu1 %v11406_v43  ;;  %v2917_v57 = vrot.slane %v13625_v49, 1 }
 0x4f6   : > { %11387 = vmatprep.subr.bf16.mxu0 %v11386_v55  ;;  %11411 = vmatprep.subr.bf16.mxu1 %v11410_v22 }
 0x4f7   : > { %v2918_v32 = vsel %vm2911_vm13, %v2916_v0, %v2917_v57 }
 0x4f8   : > { %2961 = vrot.lane.b32.xlu1 %v13613_v8, %s12133_s30  ;;  %3256 = vrot.lane.b32.xlu0 %v2920_v21, %s12137_s13  ;;  %v2867_v21 = vrot.slane %v2795_v35, 7  ;;  %v13731_v35 = vsel %vm636_vm2, %v13627_v14, 0.0 }
 0x4f9   : > { %11389 = vmatpush3.bf16.msra.mxu0 %v11386_v55  ;;  %11413 = vmatpush3.bf16.msra.mxu1 %v11410_v22  ;;  %v2985_v50 = vrot.slane %v13731_v35, 1 }
 0x4fa   : > { %v13664_v54 = vsel %vm636_vm2, 0.0, %v2867_v21  ;;  %11391 = vmatprep.subr.bf16.mxu0 %v11390_v37  ;;  %v13684_v58 = vsel %vm636_vm2, %v2867_v21, 0.0 }
 0x4fb   : > { %v2923_v2 = vrot.slane %v13684_v58, 1  ;;  %v2922_v5 = vrot.slane %v13664_v54, 1  ;;  %v2986_v60 = vsel %vm2911_vm13, %v2984_v19, %v2985_v50 }
 0x4fc   : > { %3230 = vrot.lane.b32.xlu1 %v13625_v49, %s12133_s30  ;;  %2999 = vrot.lane.b32.xlu0 %v2933_v18, %s12137_s13  ;;  %v11394_v18 = vpack.c.bf16 %v3044_v31, %v3043_v38 }
 0x4fd   : > { %11393 = vmatpush3.bf16.msra.mxu0 %v11390_v37  ;;  %v2924_v7 = vsel %vm2911_vm13, %v2922_v5, %v2923_v2 }
 0x4fe   : > { %11395 = vmatprep.subr.bf16.mxu0 %v11394_v18 }
 0x500   : > { %2973 = vrot.lane.b32.xlu1 %v13646_v41, %s12133_s30  ;;  %2991 = vrot.lane.b32.xlu0 %v2921_v53, %s12137_s13  ;;  %v9983_v53 = vld [vmem:[%s18367_s15 + $0xc8] sm:$0xff] }
 0x501   : > { %11397 = vmatpush3.bf16.msra.mxu0 %v11394_v18  ;;  %v13721_v45 = vpack.c.bf16 %v9983_v53, %v9982_v4 }
 0x502   : > { %11415 = vmatprep.subr.bf16.mxu0 %v13708_v42 }
 0x503   : > { %11431 = vmatprep.subr.bf16.mxu1 %v13721_v45 }
 0x504   : > { %2965 = vrot.lane.b32.xlu1 %v13664_v54, %s12133_s30  ;;  %3262 = vrot.lane.b32.xlu0 %v2929_v10, %s12137_s13 }
 0x508   : > { %3234 = vrot.lane.b32.xlu1 %v13684_v58, %s12133_s30  ;;  %3216 = vrot.lane.b32.xlu0 %v2929_v10, %s12136_s22 }
 0x50c   : > { %2997 = vrot.lane.b32.xlu1 %v2930_v59, %s12137_s13  ;;  %3254 = vrot.lane.b32.xlu0 %v2917_v57, %s12137_s13 }
 0x510   : > { %2946 = vrot.lane.b32.xlu1 %v2930_v59, %s12136_s22  ;;  %3208 = vrot.lane.b32.xlu0 %v2917_v57, %s12136_s22 }
 0x514   : > { %2989 = vrot.lane.b32.xlu1 %v2918_v32, %s12137_s13  ;;  %3258 = vrot.lane.b32.xlu0 %v2923_v2, %s12137_s13 }
 0x518   : > { %2938 = vrot.lane.b32.xlu1 %v2918_v32, %s12136_s22  ;;  %3212 = vrot.lane.b32.xlu0 %v2923_v2, %s12136_s22 }
 0x51c   : > { %2993 = vrot.lane.b32.xlu1 %v2924_v7, %s12137_s13  ;;  %3264 = vrot.lane.b32.xlu0 %v13506_v33, %s12137_s13  ;;  %v11597_v33 = vpop.permute.xlu0 %11596 }
 0x51d   : > { %v11599_v38 = vunpack.i.h.bf16 %v11597_v33  ;;  %v11598_v43 = vunpack.i.l.bf16 %v11597_v33 }
 0x51f   : > { %v3276_v26 = vsel %vm3011_vm15, 0.0, %v11599_v38  ;;  %v3012_v56 = vsel %vm3011_vm15, 0.0, %v11598_v43 }
 0x520   : > { %2942 = vrot.lane.b32.xlu1 %v2924_v7, %s12136_s22  ;;  %3266 = vrot.lane.b32.xlu0 %v2985_v50, %s12137_s13 }
 0x524   : > { %3242 = vrot.lane.b32.xlu1 %v13731_v35, %s12133_s30  ;;  %3639 = vrot.lane.b32.xlu0 %v2985_v50, %s12136_s22 }
 0x528   : > { %3001 = vrot.lane.b32.xlu1 %v2986_v60, %s12137_s13  ;;  %11601 = vrot.lane.b32.xlu0 %v13236_v62, %s12137_s13 }
 0x52c   : > { %3486 = vrot.lane.b32.xlu1 %v2986_v60, %s12136_s22 }
 0x530   : > { %3489 = vrot.lane.b32.xlu1 %v18163_v1, %s12133_s30 }
 0x534   : > { %11606 = vrot.lane.b32.xlu1 %v13236_v62, %s12138_s25 }
 0x539   : > { %v13749_v13 = vpop.permute.xlu0 %2967 }
 0x53b   : > { %v13751_v14 = vpop.permute.xlu1 %3214 }
 0x53d   : > { %v13753_v15 = vpop.permute.xlu0 %3236 }
 0x53f   : > { %v3207_v3 = vpop.permute.xlu1 %3206 }
 0x541   : > { %v2960_v44 = vpop.permute.xlu0 %2959 }
 0x542   : > { %v3020_v57 = vsel %vm484_vm1, %v3012_v56, %v2960_v44  ;;  %v9968_v56 = vld [vmem:[%s18367_s15 + $0x90] sm:$0xff] }
 0x544   : > { %v13755_v27 = vpop.permute.xlu1 %2944 }
 0x545   : > { %v3229_v23 = vpop.permute.xlu0 %3228 }
 0x546   : > { %v3284_v46 = vsel %vm484_vm1, %v3276_v26, %v3229_v23  ;;  %v3277_v26 = vsel %vm3011_vm15, %v13387_v6, %v3207_v3 }
 0x548   : > { %v2937_v55 = vpop.permute.xlu1 %2936 }
 0x549   : > { %v13757_v21 = vpop.permute.xlu0 %3260 }
 0x54d   : > { %v13761_v12 = vpop.permute.xlu1 %3218 }
 0x54e   : > { %v13759_v20 = vpop.permute.xlu0 %2971 }
 0x552   : > { %v13763_v25 = vpop.permute.xlu0 %3240 }
 0x556   : > { %v13765_v24 = vpop.permute.xlu1 %3210  ;;  %v3253_v29 = vpop.permute.xlu0 %3252 }
 0x557   : > { %v3292_v22 = vsel %vm3028_vm0, %v3284_v46, %v3253_v29 }
 0x558   : > { %v3309_v28 = vrot.slane %v3292_v22, 1  ;;  %v9969_v22 = vld [vmem:[%s18367_s15 + $0x98] sm:$0xff] }
 0x55a   : > { %v13767_v37 = vpop.permute.xlu1 %2948  ;;  %v13769_v10 = vpop.permute.xlu0 %2963 }
 0x55e   : > { %v13771_v51 = vpop.permute.xlu1 %2940  ;;  %v3233_v52 = vpop.permute.xlu0 %3232 }
 0x562   : > { %v13773_v31 = vpop.permute.xlu1 %2969  ;;  %v13775_v18 = vpop.permute.xlu0 %2995 }
 0x566   : > { %v13781_v59 = vpop.permute.xlu1 %3238  ;;  %v2988_v0 = vpop.permute.xlu0 %2987 }
 0x567   : > { %v3029_v11 = vsel %vm3028_vm0, %v3020_v57, %v2988_v0  ;;  %v3013_v0 = vsel %vm3011_vm15, %v13435_v30, %v2937_v55  ;;  %v9971_v55 = vld [vmem:[%s18367_s15 + $0xa8] sm:$0xff] }
 0x568   : > { %v3308_v32 = vrot.slane %v3029_v11, 1  ;;  %10782 = vmatprep.mubr.msk.f32.mxu0 %vm819_vm4, %v3029_v11 }
 0x56a   : > { %v2962_v2 = vpop.permute.xlu1 %2961  ;;  %v3257_v4 = vpop.permute.xlu0 %3256  ;;  %v3310_v53 = vsel %vm2911_vm13, %v3308_v32, %v3309_v28  ;;  %v11418_v32 = vpack.c.bf16 %v9969_v22, %v9968_v56  ;;  %v9986_v56 = vld [vmem:[%s18367_s15 + $0xe0] sm:$0xff]  ;;  %v9987_v22 = vld [vmem:[%s18367_s15 + $0xe8] sm:$0xff] }
 0x56b   : > { %10810 = vmatprep.mubr.msk.f32.mxu1 %vm819_vm4, %v3310_v53  ;;  %v3021_v6 = vsel %vm484_vm1, %v3013_v0, %v2962_v2  ;;  %v9984_v53 = vld [vmem:[%s18367_s15 + $0xd0] sm:$0xff]  ;;  %v11438_v1 = vpack.c.bf16 %v9987_v22, %v9986_v56 }
 0x56c   : > { %v9972_v0 = vld [vmem:[%s18367_s15 + $0xb0] sm:$0xff] }
 0x56e   : > { %v3231_v5 = vpop.permute.xlu1 %3230  ;;  %v13788_v7 = vpop.permute.xlu0 %2999 }
 0x56f   : > { %v3285_v57 = vsel %vm484_vm1, %v3277_v26, %v3231_v5  ;;  %v9985_v5 = vld [vmem:[%s18367_s15 + $0xd8] sm:$0xff] }
 0x572   : > { %v13790_v50 = vpop.permute.xlu1 %2973  ;;  %v2992_v19 = vpop.permute.xlu0 %2991 }
 0x576   : > { %v2966_v60 = vpop.permute.xlu1 %2965  ;;  %v13792_v33 = vpop.permute.xlu0 %3262 }
 0x57a   : > { %v3235_v44 = vpop.permute.xlu1 %3234  ;;  %v3217_v23 = vpop.permute.xlu0 %3216 }
 0x57e   : > { %v13794_v29 = vpop.permute.xlu1 %2997  ;;  %v3255_v38 = vpop.permute.xlu0 %3254 }
 0x57f   : > { %v3293_v11 = vsel %vm3028_vm0, %v3285_v57, %v3255_v38  ;;  %v11434_v57 = vpack.c.bf16 %v9985_v5, %v9984_v53 }
 0x580   : > { %v3312_v2 = vrot.slane %v3293_v11, 1 }
 0x582   : > { %v2947_v43 = vpop.permute.xlu1 %2946  ;;  %v3209_v46 = vpop.permute.xlu0 %3208 }
 0x583   : > { %v3278_v28 = vsel %vm3011_vm15, %v13625_v49, %v3209_v46  ;;  %v9970_v49 = vld [vmem:[%s18367_s15 + $0xa0] sm:$0xff] }
 0x584   : > { %v3286_v46 = vsel %vm484_vm1, %v3278_v28, %v3233_v52  ;;  %v9973_v52 = vld [vmem:[%s18367_s15 + $0xb8] sm:$0xff] }
 0x586   : > { %v2990_v3 = vpop.permute.xlu1 %2989  ;;  %v3259_v30 = vpop.permute.xlu0 %3258 }
 0x587   : > { %v13818_v26 = vsel %vm3028_vm0, %v3021_v6, %v2990_v3  ;;  %v11422_v6 = vpack.c.bf16 %v9971_v55, %v9970_v49  ;;  %v3279_v3 = vsel %vm3011_vm15, %v13543_v17, %v13765_v24  ;;  %v11426_v17 = vpack.c.bf16 %v9973_v52, %v9972_v0  ;;  %v9989_v24 = vld [vmem:[%s18367_s15 + $0xf8] sm:$0xff] }
 0x588   : > { %v3311_v38 = vrot.slane %v13818_v26, 1  ;;  %10783 = vmatmul.mubr.msk.f32.vlgmr.msra.gmra.mrb[12].mxu0 %vm819_vm4, %v13818_v26  ;;  %v3287_v49 = vsel %vm484_vm1, %v3279_v3, %v3235_v44 }
 0x589   : > { %11417 = vmatpush3.bf16.msra.mxu0 %v13708_v42  ;;  %v3294_v42 = vsel %vm3028_vm0, %v3286_v46, %v3257_v4  ;;  %v3295_v4 = vsel %vm3028_vm0, %v3287_v49, %v3259_v30 }
 0x58a   : > { %v2939_v11 = vpop.permute.xlu1 %2938  ;;  %v13844_v28 = vsel %vm2911_vm13, %v3311_v38, %v3312_v2  ;;  %11419 = vmatprep.subr.bf16.mxu0 %v11418_v32  ;;  %v3213_v5 = vpop.permute.xlu0 %3212  ;;  %v3015_v2 = vsel %vm3011_vm15, %v13562_v16, %v13771_v51  ;;  %v3315_v44 = vrot.slane %v3294_v42, 1 }
 0x58b   : > { %v3014_v53 = vsel %vm3011_vm15, %v13613_v8, %v2939_v11  ;;  %10811 = vmatmul.mubr.msk.f32.vlgmr.msra.gmra.mrb[12].mxu1 %vm819_vm4, %v13844_v28  ;;  %v9988_v8 = vld [vmem:[%s18367_s15 + $0xf0] sm:$0xff]  ;;  %v3280_v51 = vsel %vm3011_vm15, %v13684_v58, %v3213_v5  ;;  %v3018_v58 = vsel %vm3011_vm15, %v13599_v48, %v2947_v43  ;;  %v3283_v11 = vsel %vm3011_vm15, %v13490_v39, %v13761_v12 }
 0x58c   : > { %v3022_v55 = vsel %vm484_vm1, %v3014_v53, %v13769_v10  ;;  %11433 = vmatpush3.bf16.msra.mxu1 %v13721_v45  ;;  %v3023_v45 = vsel %vm484_vm1, %v3015_v2, %v2966_v60  ;;  %v3282_v10 = vsel %vm3011_vm15, %v13606_v34, %v3217_v23  ;;  %v11442_v34 = vpack.c.bf16 %v9989_v24, %v9988_v8 }
 0x58d   : > { %v13869_v16 = vsel %vm3028_vm0, %v3022_v55, %v2992_v19  ;;  %11421 = vmatpush3.bf16.msra.mxu0 %v11418_v32  ;;  %11435 = vmatprep.subr.bf16.mxu1 %v11434_v57  ;;  %v3017_v19 = vsel %vm3011_vm15, %v13376_v9, %v13755_v27  ;;  %v3318_v23 = vrot.slane %v3295_v4, 1  ;;  %v3288_v56 = vsel %vm484_vm1, %v3280_v51, %v13753_v15 }
 0x58e   : > { %v2994_v38 = vpop.permute.xlu1 %2993  ;;  %10785 = vmatprep.mubr.msk.f32.mxu0 %vm819_vm4, %v13869_v16  ;;  %v3314_v30 = vrot.slane %v13869_v16, 1  ;;  %11423 = vmatprep.subr.bf16.mxu0 %v11422_v6  ;;  %v3265_v32 = vpop.permute.xlu0 %3264  ;;  %v3281_v9 = vsel %vm3011_vm15, %v13379_v36, %v13751_v14  ;;  %v3025_v48 = vsel %vm484_vm1, %v3017_v19, %v13773_v31  ;;  %v3290_v15 = vsel %vm484_vm1, %v3282_v10, %v13763_v25 }
 0x58f   : > { %v13885_v60 = vsel %vm3028_vm0, %v3023_v45, %v2994_v38  ;;  %v13906_v27 = vsel %vm3028_vm0, %v3025_v48, %v13794_v29  ;;  %v3026_v43 = vsel %vm484_vm1, %v3018_v58, %v13759_v20  ;;  %v3289_v14 = vsel %vm484_vm1, %v3281_v9, %v13781_v59  ;;  %v13985_v58 = vld [vmem:[#allocation10] ss:$0 sm:$0xff] }
 0x590   : > { %v3317_v46 = vrot.slane %v13885_v60, 1  ;;  %10786 = vmatmul.mubr.msk.f32.gmra.mrb[14].mxu0 %vm819_vm4, %v13885_v60  ;;  %v13893_v22 = vsel %vm2911_vm13, %v3314_v30, %v3315_v44  ;;  %11437 = vmatpush3.bf16.msra.mxu1 %v11434_v57  ;;  %v3296_v31 = vsel %vm3028_vm0, %v3288_v56, %v13757_v21  ;;  %v3298_v29 = vsel %vm3028_vm0, %v3290_v15, %v3265_v32 }
 0x591   : > { %10813 = vmatprep.mubr.msk.f32.mxu1 %vm819_vm4, %v13893_v22  ;;  %11425 = vmatpush3.bf16.msra.mxu0 %v11422_v6  ;;  %v3297_v20 = vsel %vm3028_vm0, %v3289_v14, %v13792_v33  ;;  %v3323_v59 = vrot.slane %v13906_v27, 1  ;;  %v3321_v33 = vrot.slane %v3296_v31, 1  ;;  %v3327_v6 = vrot.slane %v3298_v29, 1 }
 0x592   : > { %v2943_v57 = vpop.permute.xlu1 %2942  ;;  %v3319_v36 = vsel %vm2911_vm13, %v3317_v46, %v3318_v23  ;;  %11439 = vmatprep.subr.bf16.mxu1 %v11438_v1  ;;  %11427 = vmatprep.subr.bf16.mxu0 %v11426_v17  ;;  %v3267_v52 = vpop.permute.xlu0 %3266  ;;  %v3019_v39 = vsel %vm3011_vm15, %v13497_v47, %v13767_v37 }
 0x593   : > { %v3016_v25 = vsel %vm3011_vm15, %v13664_v54, %v2943_v57  ;;  %10814 = vmatmul.mubr.msk.f32.gmra.mrb[14].mxu1 %vm819_vm4, %v3319_v36  ;;  %v3035_v54 = vsel %vm3028_vm0, %v3026_v43, %v13788_v7  ;;  %v3027_v5 = vsel %vm484_vm1, %v3019_v39, %v13790_v50 }
 0x594   : > { %v3024_v0 = vsel %vm484_vm1, %v3016_v25, %v13749_v13  ;;  %11441 = vmatpush3.bf16.msra.mxu1 %v11438_v1  ;;  %v3324_v13 = vrot.slane %v3297_v20, 1 }
 0x595   : > { %v3033_v21 = vsel %vm3028_vm0, %v3024_v0, %v13775_v18  ;;  %11429 = vmatpush3.bf16.msra.mxu0 %v11426_v17  ;;  %11443 = vmatprep.subr.bf16.mxu1 %v11442_v34  ;;  %v3326_v18 = vrot.slane %v3035_v54, 1 }
 0x596   : > { %v3243_v3 = vpop.permute.xlu1 %3242  ;;  %10788 = vmatprep.mubr.msk.f32.mxu0 %vm819_vm4, %v3033_v21  ;;  %v3320_v1 = vrot.slane %v3033_v21, 1  ;;  %v3325_v53 = vsel %vm2911_vm13, %v3323_v59, %v3324_v13  ;;  %v3640_v55 = vpop.permute.xlu0 %3639 }
 0x597   : > { %v3291_v42 = vsel %vm484_vm1, %v3283_v11, %v3243_v3  ;;  %10789 = vmatmul.mubr.msk.f32.gmra.mrb[16].mxu0 %vm819_vm4, %v13906_v27  ;;  %v3328_v49 = vsel %vm2911_vm13, %v3326_v18, %v3327_v6  ;;  %v3645_v51 = vsel %vm3011_vm15, %v13731_v35, %v3640_v55 }
 0x598   : > { %10791 = vmatprep.mubr.msk.f32.mxu0 %vm819_vm4, %v3035_v54  ;;  %v3322_v7 = vsel %vm2911_vm13, %v3320_v1, %v3321_v33  ;;  %11445 = vmatpush3.bf16.msra.mxu1 %v11442_v34  ;;  %v3299_v12 = vsel %vm3028_vm0, %v3291_v42, %v3267_v52 }
 0x599   : > { %10816 = vmatprep.mubr.msk.f32.mxu1 %vm819_vm4, %v3322_v7  ;;  %v3330_v47 = vrot.slane %v3299_v12, 1 }
 0x59a   : > { %v3002_v2 = vpop.permute.xlu1 %3001  ;;  %10817 = vmatmul.mubr.msk.f32.gmra.mrb[16].mxu1 %vm819_vm4, %v3325_v53  ;;  %v11602_v24 = vpop.permute.xlu0 %11601 }
 0x59b   : > { %v3036_v17 = vsel %vm3028_vm0, %v3027_v5, %v3002_v2  ;;  %10819 = vmatprep.mubr.msk.f32.mxu1 %vm819_vm4, %v3328_v49  ;;  %v11604_v45 = vunpack.i.h.bf16 %v11602_v24  ;;  %v11603_v10 = vunpack.i.l.bf16 %v11602_v24 }
 0x59c   : > { %v3329_v37 = vrot.slane %v3036_v17, 1  ;;  %10792 = vmatmul.mubr.msk.f32.gmra.mrb[18].mxu0 %vm819_vm4, %v3036_v17 }
 0x59d   : > { %10838 = vmatprep.mubr.msk.f32.mxu0 %vm819_vm4, %v13818_v26 }
 0x59e   : > { %v3487_v8 = vpop.permute.xlu1 %3486  ;;  %v3331_v50 = vsel %vm2911_vm13, %v3329_v37, %v3330_v47 }
 0x59f   : > { %10820 = vmatmul.mubr.msk.f32.gmra.mrb[18].mxu1 %vm819_vm4, %v3331_v50  ;;  %v3495_v26 = vsel %vm3011_vm15, %v13646_v41, %v3487_v8 }
 0x5a0   : > { %10839 = vmatmul.mubr.msk.f32.vlgmr.msra.gmra.mrb[20].mxu0 %vm819_vm4, %v13869_v16  ;;  %10866 = vmatprep.mubr.msk.f32.mxu1 %vm819_vm4, %v13844_v28 }
 0x5a1   : > { %10841 = vmatprep.mubr.msk.f32.mxu0 %vm819_vm4, %v13885_v60 }
 0x5a2   : > { %v3490_v4 = vpop.permute.xlu1 %3489 }
 0x5a3   : > { %10867 = vmatmul.mubr.msk.f32.vlgmr.msra.gmra.mrb[20].mxu1 %vm819_vm4, %v13893_v22  ;;  %v3496_v16 = vsel %vm484_vm1, %v3495_v26, %v3490_v4  ;;  %v3646_v28 = vsel %vm484_vm1, %v3645_v51, %v3490_v4 }
 0x5a4   : > { %10842 = vmatmul.mubr.msk.f32.gmra.mrb[22].mxu0 %vm819_vm4, %v3033_v21  ;;  %10869 = vmatprep.mubr.msk.f32.mxu1 %vm819_vm4, %v3319_v36  ;;  %v3647_v35 = vsel %vm3028_vm0, %v3646_v28, %v11604_v45  ;;  %v3497_v41 = vsel %vm3028_vm0, %v3496_v16, %v11603_v10 }
 0x5a5   : > { %10844 = vmatprep.mubr.msk.f32.mxu0 %vm819_vm4, %v13906_v27  ;;  %v3650_v44 = vrot.slane %v3647_v35, 1  ;;  %v3649_v38 = vrot.slane %v3497_v41, 1 }
 0x5a7   : > { %10870 = vmatmul.mubr.msk.f32.gmra.mrb[22].mxu1 %vm819_vm4, %v3322_v7  ;;  %v3651_v30 = vsel %vm2911_vm13, %v3649_v38, %v3650_v44 }
 0x5a8   : > { %10845 = vmatmul.mubr.msk.f32.gmra.mrb[24].mxu0 %vm819_vm4, %v3035_v54  ;;  %10872 = vmatprep.mubr.msk.f32.mxu1 %vm819_vm4, %v3325_v53 }
 0x5a9   : > { %10847 = vmatprep.mubr.msk.f32.mxu0 %vm819_vm4, %v3036_v17 }
 0x5ab   : > { %10873 = vmatmul.mubr.msk.f32.gmra.mrb[24].mxu1 %vm819_vm4, %v3328_v49 }
 0x5ac   : > { %10848 = vmatmul.mubr.msk.f32.gmra.mrb[26].mxu0 %vm819_vm4, %v3497_v41  ;;  %10875 = vmatprep.mubr.msk.f32.mxu1 %vm819_vm4, %v3331_v50 }
 0x5af   : > { %10876 = vmatmul.mubr.msk.f32.gmra.mrb[26].mxu1 %vm819_vm4, %v3651_v30 }
 0x65b   : > { %v10784_v19 = vpop.f32.mrb[12].mxu0 }
 0x65c   : > { %v3141_v60 = vpop.f32.mrb[13].mxu0  ;;  %v3147_v34 = vadd.f32 %v10784_v19, %v13985_v58 }
 0x65d   : > { %v3142_v23 = vadd.f32 %v13985_v58, %v3141_v60 }
 0x65e   : > { %v10812_v32 = vpop.f32.mrb[12].mxu1  ;;  %v3189_v22 = vmul.f32 0.05, %v3147_v34  ;;  %vm3181_vm4 = vcmp.ge.f32.partialorder %v3147_v34, 0.0 }
 0x65f   : > { %v3423_v46 = vpop.f32.mrb[13].mxu1  ;;  %v3429_v56 = vadd.f32 %v10812_v32, %v13985_v58  ;;  %v3188_v9 = vmul.f32 0.05, %v3142_v23  ;;  %vm3180_vm5 = vcmp.ge.f32.partialorder %v3142_v23, 0.0 }
 0x660   : > { %v3197_v57 = vsel %vm3181_vm4, %v3147_v34, %v3189_v22  ;;  %v3424_v31 = vadd.f32 %v13985_v58, %v3423_v46 }
 0x661   : > { %v3471_v27 = vmul.f32 0.05, %v3429_v56  ;;  %v3196_v36 = vsel %vm3180_vm5, %v3142_v23, %v3188_v9  ;;  %vm3463_vm6 = vcmp.ge.f32.partialorder %v3429_v56, 0.0  ;;  %v3849_v25 = vcombine.high %v3197_v57, %v3197_v57 }
 0x662   : > { %v3800_v29 = vcombine.high %v3196_v36, %v3196_v36  ;;  %v3856_v59 = vrot.slane %v3197_v57, %v12910_v63  ;;  %v3470_v21 = vmul.f32 0.05, %v3424_v31  ;;  %vm3462_vm3 = vcmp.ge.f32.partialorder %v3424_v31, 0.0 }
 0x663   : > { %v10787_v48 = vpop.f32.mrb[14].mxu0  ;;  %v3479_v20 = vsel %vm3463_vm6, %v3429_v56, %v3471_v27  ;;  %v3863_v33 = vrot.slane %v3849_v25, %v12910_v63  ;;  %v3807_v6 = vrot.slane %v3196_v36, %v12910_v63 }
 0x664   : > { %v3151_v15 = vpop.f32.mrb[15].mxu0  ;;  %v4313_v54 = vcombine.high %v3479_v20, %v3479_v20  ;;  %v3814_v3 = vrot.slane %v3800_v29, %v12910_v63  ;;  %v3864_v42 = vcombine.high %v3856_v59, %v3856_v59  ;;  %v14010_v18 = vrot.slane %v3856_v59, %v12910_v63 }
 0x665   : > { %v3478_v7 = vsel %vm3462_vm3, %v3424_v31, %v3470_v21  ;;  %v3157_v39 = vadd.f32 %v10787_v48, %v13985_v58  ;;  %v4320_v53 = vrot.slane %v3479_v20, %v12910_v63  ;;  %v3865_v2 = vcombine.high %v3863_v33, %v3863_v33 }
 0x666   : > { %v13990_v43 = vpop.f32.mrb[14].mxu1  ;;  %v4327_v5 = vrot.slane %v4313_v54, %v12910_v63  ;;  %v3815_v49 = vcombine.high %v3807_v6, %v3807_v6  ;;  %v3816_v55 = vcombine.high %v3814_v3, %v3814_v3  ;;  %v14020_v47 = vrot.slane %v3863_v33, %v12910_v63 }
 0x667   : > { %v13992_v14 = vpop.f32.mrb[15].mxu1  ;;  %v14023_v37 = vrot.slane %v3807_v6, %v12910_v63  ;;  %v4264_v8 = vcombine.high %v3478_v7, %v3478_v7  ;;  %v14030_v4 = vrot.slane %v3864_v42, %v12910_v63  ;;  %v3191_v26 = vmul.f32 0.05, %v3157_v39 }
 0x668   : > { %v14037_v10 = vrot.slane %v3814_v3, %v12910_v63  ;;  %v4328_v16 = vcombine.high %v4320_v53, %v4320_v53  ;;  %v4329_v28 = vcombine.high %v4327_v5, %v4327_v5  ;;  %vm3183_vm7 = vcmp.ge.f32.partialorder %v3157_v39, 0.0 }
 0x669   : > { %v14040_v35 = vrot.slane %v3865_v2, %v12910_v63  ;;  %v14043_v41 = vrot.slane %v3815_v49, %v12910_v63  ;;  %v14046_v44 = vrot.slane %v3816_v55, %v12910_v63  ;;  %v4271_v38 = vrot.slane %v3478_v7, %v12910_v63 }
 0x66a   : > { %v13995_v0 = vpop.f32.mrb[16].mxu0  ;;  %v14056_v32 = vrot.slane %v4320_v53, %v12910_v63  ;;  %v4278_v34 = vrot.slane %v4264_v8, %v12910_v63  ;;  %v14066_v22 = vrot.slane %v4327_v5, %v12910_v63  ;;  %v3199_v9 = vsel %vm3183_vm7, %v3157_v39, %v3191_v26 }
 0x66b   : > { %v13997_v52 = vpop.f32.mrb[17].mxu0  ;;  %18368 = vst [vmem:[#allocation18_spill] sm:$0xff] %v14040_v35  ;;  %v3152_v48 = vadd.f32 %v13985_v58, %v3151_v15  ;;  %v14074_v36 = vrot.slane %v4328_v16, %v12910_v63  ;;  %v14077_v31 = vrot.slane %v4329_v28, %v12910_v63  ;;  %v3439_v25 = vadd.f32 %v13990_v43, %v13985_v58 }
 0x66c   : > { %v4279_v59 = vcombine.high %v4271_v38, %v4271_v38  ;;  %v4358_v54 = vcombine.high %v14056_v32, %v14056_v32  ;;  %v4280_v6 = vcombine.high %v4278_v34, %v4278_v34  ;;  %v3947_v43 = vcombine.high %v3199_v9, %v3199_v9 }
 0x66d   : > { %v14000_v11 = vpop.f32.mrb[16].mxu1  ;;  %18369 = vst [vmem:[#allocation19_spill] sm:$0xff] %v14077_v31  ;;  %v4359_v7 = vcombine.high %v14066_v22, %v14066_v22  ;;  %v14102_v53 = vrot.slane %v4271_v38, %v12910_v63  ;;  %v3190_v5 = vmul.f32 0.05, %v3152_v48  ;;  %v4361_v55 = vcombine.high %v14077_v31, %v14077_v31 }
 0x66e   : > { %v14005_v1 = vpop.f32.mrb[17].mxu1  ;;  %vm3182_vm8 = vcmp.ge.f32.partialorder %v3152_v48, 0.0  ;;  %v3473_v8 = vmul.f32 0.05, %v3439_v25  ;;  %v14111_v26 = vrot.slane %v4278_v34, %v12910_v63  ;;  %v14114_v16 = vrot.slane %v4279_v59, %v12910_v63 }
 0x66f   : > { %v14007_v13 = vpop.f32.mrb[18].mxu0  ;;  %v3954_v28 = vrot.slane %v3199_v9, %v12910_v63  ;;  %vm3465_vm9 = vcmp.ge.f32.partialorder %v3439_v25, 0.0  ;;  %v14122_v19 = vrot.slane %v4358_v54, %v12915_v61  ;;  %v14125_v39 = vrot.slane %v4280_v6, %v12910_v63 }
 0x670   : > { %v14013_v12 = vpop.f32.mrb[19].mxu0  ;;  %v3961_v34 = vrot.slane %v3947_v43, %v12910_v63  ;;  %v4309_v9 = vcombine.high %v14102_v53, %v14102_v53  ;;  %v3198_v20 = vsel %vm3182_vm8, %v3152_v48, %v3190_v5  ;;  %v3434_v57 = vadd.f32 %v13985_v58, %v13992_v14 }
 0x671   : > { %v14139_v54 = vrot.slane %v4359_v7, %v12915_v61  ;;  %v14142_v6 = vrot.slane %v4361_v55, %v12915_v61  ;;  %v3481_v59 = vsel %vm3465_vm9, %v3439_v25, %v3473_v8  ;;  %v4310_v48 = vcombine.high %v14111_v26, %v14111_v26 }
 0x672   : > { %v14017_v17 = vpop.f32.mrb[18].mxu1  ;;  %v3962_v5 = vcombine.high %v3954_v28, %v3954_v28  ;;  %v3167_v7 = vadd.f32 %v13995_v0, %v13985_v58  ;;  %v4312_v55 = vcombine.high %v14125_v39, %v14125_v39  ;;  %v3963_v43 = vcombine.high %v3961_v34, %v3961_v34 }
 0x673   : > { %v14025_v50 = vpop.f32.mrb[19].mxu1  ;;  %v14027_v24 = vpop.f32.mrb[20].mxu0  ;;  %18373 = vst [vmem:[#allocation23_spill] sm:$0xff] %v14139_v54  ;;  %18374 = vst [vmem:[#allocation24_spill] sm:$0xff] %v14142_v6  ;;  %v3898_v25 = vcombine.high %v3198_v20, %v3198_v20  ;;  %v14159_v8 = vrot.slane %v4309_v9, %v12915_v61  ;;  %v3905_v29 = vrot.slane %v3198_v20, %v12910_v63  ;;  %v3472_v49 = vmul.f32 0.05, %v3434_v57 }
 0x674   : > { %v14034_v45 = vpop.f32.mrb[21].mxu0  ;;  %v4411_v33 = vcombine.high %v3481_v59, %v3481_v59  ;;  %v14165_v0 = vrot.slane %v3954_v28, %v12910_v63  ;;  %v14168_v62 = vrot.slane %v3961_v34, %v12910_v63  ;;  %vm3464_vm10 = vcmp.ge.f32.partialorder %v3434_v57, 0.0 }
 0x675   : > { %v14173_v9 = vrot.slane %v3962_v5, %v12910_v63  ;;  %v3449_v20 = vadd.f32 %v14000_v11, %v13985_v58  ;;  %v14181_v28 = vrot.slane %v3963_v43, %v12910_v63  ;;  %v3912_v34 = vrot.slane %v3898_v25, %v12910_v63 }
 0x676   : > { %v14049_v30 = vpop.f32.mrb[20].mxu1  ;;  %18376 = vst [vmem:[#allocation26_spill] sm:$0xff] %v14165_v0  ;;  %18377 = vst [vmem:[#allocation27_spill] sm:$0xff] %v14168_v62  ;;  %vm3185_vm11 = vcmp.ge.f32.partialorder %v3167_v7, 0.0  ;;  %v14185_v14 = vrot.slane %v4312_v55, %v12915_v61  ;;  %v3913_v51 = vcombine.high %v3905_v29, %v3905_v29  ;;  %v4425_v5 = vrot.slane %v4411_v33, %v12910_v63 }
 0x677   : > { %v14059_v23 = vpop.f32.mrb[22].mxu0  ;;  %v14061_v46 = vpop.f32.mrb[21].mxu1  ;;  %18378 = vst [vmem:[#allocation28_spill] sm:$0xff] %v14173_v9  ;;  %18379 = vst [vmem:[#allocation29_spill] sm:$0xff] %v14181_v28  ;;  %v3162_v43 = vadd.f32 %v13985_v58, %v13997_v52  ;;  %v14200_v6 = vrot.slane %v3905_v29, %v12910_v63  ;;  %vm3467_vm12 = vcmp.ge.f32.partialorder %v3449_v20, 0.0  ;;  %v3444_v55 = vadd.f32 %v13985_v58, %v14005_v1 }
 0x678   : > { %v14069_v27 = vpop.f32.mrb[23].mxu0  ;;  %v14208_v52 = vrot.slane %v3913_v51, %v12910_v63  ;;  %v4427_v62 = vcombine.high %v4425_v5, %v4425_v5 }
 0x679   : > { %18381 = vst [vmem:[#allocation31_spill] sm:$0xff] %v14200_v6  ;;  %v3192_v9 = vmul.f32 0.05, %v3162_v43  ;;  %vm3184_vm14 = vcmp.ge.f32.partialorder %v3162_v43, 0.0  ;;  %vm3466_vm0 = vcmp.ge.f32.partialorder %v3444_v55, 0.0 }
 0x67a   : > { %v14087_v21 = vpop.f32.mrb[22].mxu1  ;;  %18383 = vst [vmem:[#allocation33_spill] sm:$0xff] %v14208_v52 }
 0x67b   : > { %v14093_v3 = vpop.f32.mrb[24].mxu0  ;;  %v14095_v42 = vpop.f32.mrb[23].mxu1 }
 0x67c   : > { %v14104_v2 = vpop.f32.mrb[25].mxu0 }
 0x67e   : > { %v14117_v38 = vpop.f32.mrb[24].mxu1 }
 0x67f   : > { %18370 = vst [vmem:[#allocation20_spill] sm:$0xff] %v14117_v38  ;;  %v14134_v15 = vpop.f32.mrb[26].mxu0  ;;  %v14136_v60 = vpop.f32.mrb[25].mxu1  ;;  %v3475_v38 = vmul.f32 0.05, %v3449_v20 }
 0x680   : > { %18371 = vst [vmem:[#allocation21_spill] sm:$0xff] %v14134_v15  ;;  %18372 = vst [vmem:[#allocation22_spill] sm:$0xff] %v14136_v60  ;;  %v14146_v56 = vpop.f32.mrb[27].mxu0  ;;  %v14178_v60 = vrot.slane %v4310_v48, %v12915_v61  ;;  %v3480_v15 = vsel %vm3464_vm10, %v3434_v57, %v3472_v49  ;;  %v4418_v48 = vrot.slane %v3481_v59, %v12910_v63 }
 0x681   : > { %18375 = vst [vmem:[#allocation25_spill] sm:$0xff] %v14146_v56  ;;  %v3193_v56 = vmul.f32 0.05, %v3167_v7  ;;  %v3914_v49 = vcombine.high %v3912_v34, %v3912_v34  ;;  %v4362_v11 = vcombine.high %v3480_v15, %v3480_v15  ;;  %v14205_v59 = vrot.slane %v3912_v34, %v12910_v63 }
 0x682   : > { %v14195_v25 = vpop.f32.mrb[26].mxu1  ;;  %v14214_v0 = vsel %vm3467_vm12, %v3449_v20, %v3475_v38  ;;  %v14217_v33 = vrot.slane %v4418_v48, %v12910_v63  ;;  %v14220_v34 = vrot.slane %v4425_v5, %v12910_v63  ;;  %v14232_v20 = vrot.slane %v4427_v62, %v12910_v63 }
 0x683   : > { %18380 = vst [vmem:[#allocation30_spill] sm:$0xff] %v14195_v25  ;;  %v3201_v57 = vsel %vm3185_vm11, %v3167_v7, %v3193_v56  ;;  %18382 = vst [vmem:[#allocation32_spill] sm:$0xff] %v14205_v59  ;;  %v14212_v29 = vpop.f32.mrb[27].mxu1  ;;  %v4426_v56 = vcombine.high %v4418_v48, %v4418_v48  ;;  %v4509_v51 = vcombine.high %v14214_v0, %v14214_v0  ;;  %v3474_v48 = vmul.f32 0.05, %v3444_v55 }
 0x684   : > { %18384 = vst [vmem:[#allocation34_spill] sm:$0xff] %v14212_v29  ;;  %v4045_v7 = vcombine.high %v3201_v57, %v3201_v57  ;;  %18385 = vst [vmem:[#allocation35_spill] sm:$0xff] %v14217_v33  ;;  %v14225_v28 = vrot.slane %v3914_v49, %v12910_v63  ;;  %v4369_v29 = vrot.slane %v3480_v15, %v12910_v63 }
 0x685   : > { %18386 = vst [vmem:[#allocation36_spill] sm:$0xff] %v14220_v34  ;;  %v4376_v38 = vrot.slane %v4362_v11, %v12910_v63  ;;  %18388 = vst [vmem:[#allocation38_spill] sm:$0xff] %v14232_v20  ;;  %v14235_v5 = vrot.slane %v4509_v51, %v12910_v63  ;;  %v3200_v15 = vsel %vm3184_vm14, %v3162_v43, %v3192_v9 }
 0x686   : > { %18387 = vst [vmem:[#allocation37_spill] sm:$0xff] %v14225_v28  ;;  %v14242_v1 = vrot.slane %v4045_v7, %v12910_v63  ;;  %v14245_v11 = vrot.slane %v4426_v56, %v12910_v63  ;;  %v4456_v62 = vcombine.high %v14217_v33, %v14217_v33  ;;  %v4457_v51 = vcombine.high %v14220_v34, %v14220_v34 }
 0x687   : > { %v14253_v6 = vrot.slane %v14235_v5, %v12910_v63  ;;  %v4377_v49 = vcombine.high %v4369_v29, %v4369_v29  ;;  %v4378_v7 = vcombine.high %v4376_v38, %v4376_v38  ;;  %v14257_v59 = vsel %vm3466_vm0, %v3444_v55, %v3474_v48 }
 0x688   : > { %18389 = vst [vmem:[#allocation39_spill] sm:$0xff] %v14245_v11  ;;  %v4459_v9 = vcombine.high %v14232_v20, %v14232_v20  ;;  %v3996_v52 = vcombine.high %v3200_v15, %v3200_v15  ;;  %v14266_v54 = vrot.slane %v4369_v29, %v12910_v63  ;;  %v14270_v25 = vrot.slane %v14242_v1, %v12910_v63 }
 0x689   : > { %v4835_v55 = vrot.slane %v14253_v6, %v12915_v61  ;;  %v4460_v48 = vcombine.high %v14257_v59, %v14257_v59  ;;  %v14281_v28 = vrot.slane %v4376_v38, %v12910_v63  ;;  %v3177_v29 = vadd.f32 %v14007_v13, %v13985_v58 }
 0x68a   : > { %18390 = vst [vmem:[#allocation40_spill] sm:$0xff] %v14266_v54  ;;  %18391 = vst [vmem:[#allocation41_spill] sm:$0xff] %v14270_v25  ;;  %v14286_v34 = vrot.slane %v4456_v62, %v12915_v61  ;;  %v14289_v33 = vrot.slane %v4377_v49, %v12910_v63  ;;  %v14292_v35 = vrot.slane %v4378_v7, %v12910_v63 }
 0x68b   : > { %18392 = vst [vmem:[#allocation42_spill] sm:$0xff] %v14281_v28  ;;  %v14296_v43 = vsel %vm636_vm2, %v14270_v25, %v4835_v55  ;;  %v4052_v56 = vrot.slane %v3201_v57, %v12910_v63  ;;  %v4010_v13 = vrot.slane %v3996_v52, %v12910_v63  ;;  %v14303_v62 = vrot.slane %v4460_v48, %v12910_v63 }
 0x68c   : > { %18393 = vst [vmem:[#allocation43_spill] sm:$0xff] %v14286_v34  ;;  %18394 = vst [vmem:[#allocation44_spill] sm:$0xff] %v14289_v33  ;;  %v14306_v49 = vrot.slane %v4457_v51, %v12915_v61  ;;  %v14309_v7 = vrot.slane %v4459_v9, %v12915_v61  ;;  %v4407_v55 = vcombine.high %v14266_v54, %v14266_v54  ;;  %v3195_v51 = vmul.f32 0.05, %v3177_v29 }
 0x68d   : > { %18395 = vst [vmem:[#allocation45_spill] sm:$0xff] %v14292_v35  ;;  %18396 = vst [vmem:[#allocation46_spill] sm:$0xff] %v14296_v43  ;;  %v4408_v57 = vcombine.high %v14281_v28, %v14281_v28  ;;  %v4003_v52 = vrot.slane %v3200_v15, %v12910_v63  ;;  %v14320_v48 = vrot.slane %v14303_v62, %v12910_v63  ;;  %vm3187_vm4 = vcmp.ge.f32.partialorder %v3177_v29, 0.0 }
 0x68e   : > { %18397 = vst [vmem:[#allocation47_spill] sm:$0xff] %v14306_v49  ;;  %18398 = vst [vmem:[#allocation48_spill] sm:$0xff] %v14309_v7  ;;  %v4410_v38 = vcombine.high %v14292_v35, %v14292_v35  ;;  %v4060_v43 = vcombine.high %v4052_v56, %v4052_v56  ;;  %v14329_v49 = vrot.slane %v4010_v13, %v12910_v63 }
 0x68f   : > { %v4803_v15 = vrot.slane %v14320_v48, %v12915_v61  ;;  %v3172_v20 = vadd.f32 %v13985_v58, %v14013_v12  ;;  %v14336_v54 = vrot.slane %v4407_v55, %v12915_v61  ;;  %v14341_v34 = vrot.slane %v4052_v56, %v12910_v63 }
 0x690   : > { %18399 = vst [vmem:[#allocation49_spill] sm:$0xff] %v14329_v49  ;;  %v3459_v7 = vadd.f32 %v14017_v17, %v13985_v58  ;;  %v4061_v33 = vcombine.high %v14242_v1, %v14242_v1  ;;  %v4011_v11 = vcombine.high %v4003_v52, %v4003_v52  ;;  %v14351_v12 = vsel %vm3187_vm4, %v3177_v29, %v3195_v51 }
 0x691   : > { %18400 = vst [vmem:[#allocation50_spill] sm:$0xff] %v14341_v34  ;;  %v14349_v31 = vsel %vm636_vm2, %v14329_v49, %v4803_v15  ;;  %v14356_v9 = vrot.slane %v4408_v57, %v12915_v61  ;;  %v4516_v56 = vrot.slane %v14214_v0, %v12910_v63  ;;  %v3454_v17 = vadd.f32 %v13985_v58, %v14025_v50 }
 0x692   : > { %18401 = vst [vmem:[#allocation51_spill] sm:$0xff] %v14349_v31  ;;  %v14363_v1 = vrot.slane %v4410_v38, %v12915_v61  ;;  %v14366_v15 = vrot.slane %v4060_v43, %v12910_v63  ;;  %vm3186_vm5 = vcmp.ge.f32.partialorder %v3172_v20, 0.0  ;;  %v3194_v29 = vmul.f32 0.05, %v3172_v20 }
 0x693   : > { %18402 = vst [vmem:[#allocation52_spill] sm:$0xff] %v14356_v9  ;;  %v4012_v55 = vcombine.high %v4010_v13, %v4010_v13  ;;  %v4143_v57 = vcombine.high %v14351_v12, %v14351_v12  ;;  %vm3469_vm6 = vcmp.ge.f32.partialorder %v3459_v7, 0.0  ;;  %v14373_v0 = vrot.slane %v4061_v33, %v12910_v63 }
 0x694   : > { %18403 = vst [vmem:[#allocation53_spill] sm:$0xff] %v14363_v1  ;;  %18404 = vst [vmem:[#allocation54_spill] sm:$0xff] %v14366_v15  ;;  %v14376_v50 = vrot.slane %v4003_v52, %v12910_v63  ;;  %v14379_v38 = vrot.slane %v4011_v11, %v12910_v63  ;;  %v3477_v43 = vmul.f32 0.05, %v3459_v7  ;;  %v4524_v31 = vcombine.high %v4516_v56, %v4516_v56 }
 0x695   : > { %18405 = vst [vmem:[#allocation55_spill] sm:$0xff] %v14373_v0  ;;  %v4525_v1 = vcombine.high %v14235_v5, %v14235_v5  ;;  %v14383_v51 = vsel %vm3186_vm5, %v3172_v20, %v3194_v29  ;;  %vm3468_vm3 = vcmp.ge.f32.partialorder %v3454_v17, 0.0  ;;  %v14388_v33 = vrot.slane %v4516_v56, %v12910_v63 }
 0x696   : > { %18406 = vst [vmem:[#allocation56_spill] sm:$0xff] %v14376_v50  ;;  %18407 = vst [vmem:[#allocation57_spill] sm:$0xff] %v14379_v38  ;;  %v3485_v9 = vsel %vm3469_vm6, %v3459_v7, %v3477_v43  ;;  %v3476_v52 = vmul.f32 0.05, %v3454_v17  ;;  %v14393_v35 = vrot.slane %v4012_v55, %v12910_v63  ;;  %v4157_v28 = vrot.slane %v4143_v57, %v12910_v63 }
 0x697   : > { %v4607_v5 = vcombine.high %v3485_v9, %v3485_v9  ;;  %v4094_v56 = vcombine.high %v14383_v51, %v14383_v51  ;;  %v14407_v13 = vrot.slane %v4524_v31, %v12910_v63  ;;  %v14410_v57 = vrot.slane %v4525_v1, %v12910_v63 }
 0x698   : > { %18408 = vst [vmem:[#allocation58_spill] sm:$0xff] %v14393_v35  ;;  %v3484_v7 = vsel %vm3468_vm3, %v3454_v17, %v3476_v52  ;;  %v4554_v20 = vcombine.high %v14388_v33, %v14388_v33  ;;  %v4555_v29 = vcombine.high %v14253_v6, %v14253_v6  ;;  %v4467_v31 = vrot.slane %v14257_v59, %v12910_v63 }
 0x699   : > { %18409 = vst [vmem:[#allocation59_spill] sm:$0xff] %v14410_v57  ;;  %v4621_v17 = vrot.slane %v4607_v5, %v12910_v63  ;;  %v4558_v52 = vcombine.high %v3484_v7, %v3484_v7  ;;  %v4159_v1 = vcombine.high %v4157_v28, %v4157_v28  ;;  %v4173_v11 = vrot.slane %v4157_v28, %v12910_v63 }
 0x69a   : > { %v4108_v49 = vrot.slane %v4094_v56, %v12910_v63  ;;  %v4557_v43 = vcombine.high %v14410_v57, %v14410_v57  ;;  %v14434_v59 = vrot.slane %v4554_v20, %v12915_v61  ;;  %v4475_v0 = vcombine.high %v4467_v31, %v4467_v31 }
 0x69b   : > { %v4623_v25 = vcombine.high %v4621_v17, %v4621_v17  ;;  %v4637_v6 = vrot.slane %v4621_v17, %v12910_v63  ;;  %v4572_v35 = vrot.slane %v4558_v52, %v12910_v63  ;;  %v14442_v5 = vrot.slane %v4159_v1, %v12910_v63 }
 0x69c   : > { %18410 = vst [vmem:[#allocation60_spill] sm:$0xff] %v14434_v59  ;;  %v4189_v55 = vcombine.high %v4173_v11, %v4173_v11  ;;  %v4110_v15 = vcombine.high %v4108_v49, %v4108_v49  ;;  %v4124_v28 = vrot.slane %v4108_v49, %v12910_v63  ;;  %v14459_v59 = vrot.slane %v4467_v31, %v12910_v63 }
 0x69d   : > { %v14439_v56 = vrot.slane %v4623_v25, %v12910_v63  ;;  %v4653_v17 = vcombine.high %v4637_v6, %v4637_v6  ;;  %18411 = vst [vmem:[#allocation61_spill] sm:$0xff] %v14442_v5  ;;  %v4899_v38 = vrot.slane %v4637_v6, %v12915_v61  ;;  %v4574_v50 = vcombine.high %v4572_v35, %v4572_v35 }
 0x69e   : > { %v4588_v57 = vrot.slane %v4572_v35, %v12910_v63  ;;  %v4476_v6 = vcombine.high %v14303_v62, %v14303_v62  ;;  %v3582_v62 = vadd.f32 %v14027_v24, %v13985_v58  ;;  %v4150_v31 = vrot.slane %v14351_v12, %v12910_v63 }
 0x69f   : > { %v4903_v20 = vrot.slane %v14439_v56, %v12915_v61  ;;  %v4907_v52 = vrot.slane %v4653_v17, %v12915_v61  ;;  %v14450_v25 = vsel %vm636_vm2, %v4173_v11, %v4899_v38  ;;  %v14454_v1 = vrot.slane %v4574_v50, %v12910_v63 }
 0x6a0   : > { %18412 = vst [vmem:[#allocation62_spill] sm:$0xff] %v14450_v25  ;;  %v14469_v38 = vrot.slane %v4555_v29, %v12915_v61  ;;  %v4604_v50 = vcombine.high %v4588_v57, %v4588_v57  ;;  %v14476_v11 = vrot.slane %v4475_v0, %v12910_v63  ;;  %v4614_v17 = vrot.slane %v3485_v9, %v12910_v63 }
 0x6a1   : > { %v14463_v34 = vsel %vm636_vm2, %v14442_v5, %v4903_v20  ;;  %v14466_v49 = vsel %vm636_vm2, %v4189_v55, %v4907_v52  ;;  %v4867_v55 = vrot.slane %v4588_v57, %v12915_v61  ;;  %v14483_v29 = vrot.slane %v4110_v15, %v12910_v63 }
 0x6a2   : > { %18413 = vst [vmem:[#allocation63_spill] sm:$0xff] %v14463_v34  ;;  %18414 = vst [vmem:[#allocation64_spill] sm:$0xff] %v14466_v49  ;;  %v4140_v20 = vcombine.high %v4124_v28, %v4124_v28  ;;  %v4871_v52 = vrot.slane %v14454_v1, %v12915_v61  ;;  %v4875_v35 = vrot.slane %v4604_v50, %v12915_v61  ;;  %vm3616_vm7 = vcmp.ge.f32.partialorder %v3582_v62, 0.0 }
 0x6a3   : > { %18415 = vst [vmem:[#allocation65_spill] sm:$0xff] %v14483_v29  ;;  %v14489_v24 = vrot.slane %v4476_v6, %v12910_v63  ;;  %v4505_v0 = vcombine.high %v14459_v59, %v14459_v59  ;;  %v4101_v9 = vrot.slane %v14383_v51, %v12910_v63  ;;  %v14496_v12 = vsel %vm636_vm2, %v4124_v28, %v4867_v55 }
 0x6a4   : > { %18417 = vst [vmem:[#allocation67_spill] sm:$0xff] %v14496_v12  ;;  %v4565_v15 = vrot.slane %v3484_v7, %v12910_v63  ;;  %v14501_v57 = vsel %vm636_vm2, %v14483_v29, %v4871_v52  ;;  %v14504_v50 = vsel %vm636_vm2, %v4140_v20, %v4875_v35  ;;  %v3624_v6 = vmul.f32 0.05, %v3582_v62 }
 0x6a5   : > { %18416 = vst [vmem:[#allocation66_spill] sm:$0xff] %v14489_v24  ;;  %18418 = vst [vmem:[#allocation68_spill] sm:$0xff] %v14501_v57  ;;  %v4158_v34 = vcombine.high %v4150_v31, %v4150_v31  ;;  %v3577_v51 = vadd.f32 %v13985_v58, %v14034_v45  ;;  %v14511_v28 = vrot.slane %v4557_v43, %v12915_v61 }
 0x6a6   : > { %18419 = vst [vmem:[#allocation69_spill] sm:$0xff] %v14504_v50  ;;  %v4506_v7 = vcombine.high %v14320_v48, %v14320_v48  ;;  %v4622_v35 = vcombine.high %v4614_v17, %v4614_v17  ;;  %v4507_v20 = vcombine.high %v14476_v11, %v14476_v11  ;;  %v14522_v25 = vrot.slane %v4505_v0, %v12915_v61 }
 0x6a7   : > { %18420 = vst [vmem:[#allocation70_spill] sm:$0xff] %v14511_v28  ;;  %v4109_v45 = vcombine.high %v4101_v9, %v4101_v9  ;;  %v4508_v43 = vcombine.high %v14489_v24, %v14489_v24  ;;  %v14527_v57 = vrot.slane %v4150_v31, %v12910_v63  ;;  %v4573_v48 = vcombine.high %v4565_v15, %v4565_v15 }
 0x6a8   : > { %v3632_v12 = vsel %vm3616_vm7, %v3582_v62, %v3624_v6  ;;  %v14532_v50 = vrot.slane %v4158_v34, %v12910_v63  ;;  %v14535_v52 = vrot.slane %v4101_v9, %v12910_v63  ;;  %v3623_v0 = vmul.f32 0.05, %v3577_v51 }
 0x6a9   : > { %v14538_v49 = vrot.slane %v4506_v7, %v12915_v61  ;;  %v14541_v28 = vrot.slane %v4614_v17, %v12910_v63  ;;  %v14544_v31 = vrot.slane %v4622_v35, %v12910_v63  ;;  %vm3615_vm8 = vcmp.ge.f32.partialorder %v3577_v51, 0.0 }
 0x6aa   : > { %18421 = vst [vmem:[#allocation71_spill] sm:$0xff] %v14535_v52  ;;  %v14547_v62 = vrot.slane %v4507_v20, %v12915_v61  ;;  %v14550_v34 = vrot.slane %v4109_v45, %v12910_v63  ;;  %v5097_v6 = vcombine.high %v3632_v12, %v3632_v12  ;;  %v3735_v9 = vadd.f32 %v14049_v30, %v13985_v58 }
 0x6ab   : > { %18422 = vst [vmem:[#allocation72_spill] sm:$0xff] %v14538_v49  ;;  %v14555_v7 = vrot.slane %v4508_v43, %v12915_v61  ;;  %v14560_v35 = vrot.slane %v4565_v15, %v12910_v63  ;;  %v14563_v55 = vrot.slane %v4573_v48, %v12910_v63  ;;  %v3631_v43 = vsel %vm3615_vm8, %v3577_v51, %v3623_v0 }
 0x6ac   : > { %18423 = vst [vmem:[#allocation73_spill] sm:$0xff] %v14550_v34  ;;  %v4654_v15 = vcombine.high %v14544_v31, %v14544_v31  ;;  %v4655_v48 = vcombine.high %v14439_v56, %v14439_v56  ;;  %v5104_v17 = vrot.slane %v3632_v12, %v12910_v63  ;;  %v5111_v30 = vrot.slane %v5097_v6, %v12910_v63 }
 0x6ad   : > { %18424 = vst [vmem:[#allocation74_spill] sm:$0xff] %v14555_v7  ;;  %18425 = vst [vmem:[#allocation75_spill] sm:$0xff] %v14563_v55  ;;  %v4652_v7 = vcombine.high %v14541_v28, %v14541_v28  ;;  %v3777_v51 = vmul.f32 0.05, %v3735_v9  ;;  %v4603_v0 = vcombine.high %v14560_v35, %v14560_v35  ;;  %v4605_v52 = vcombine.high %v14563_v55, %v14563_v55 }
 0x6ae   : > { %v5048_v49 = vcombine.high %v3631_v43, %v3631_v43  ;;  %vm3769_vm9 = vcmp.ge.f32.partialorder %v3735_v9, 0.0  ;;  %v4606_v45 = vcombine.high %v14454_v1, %v14454_v1  ;;  %v3592_v6 = vadd.f32 %v14059_v23, %v13985_v58 }
 0x6af   : > { %v14596_v20 = vrot.slane %v4652_v7, %v12915_v61  ;;  %v14599_v29 = vrot.slane %v4654_v15, %v12915_v61  ;;  %v14602_v34 = vrot.slane %v4655_v48, %v12915_v61  ;;  %v5112_v24 = vcombine.high %v5104_v17, %v5104_v17 }
 0x6b0   : > { %v5113_v12 = vcombine.high %v5111_v30, %v5111_v30  ;;  %v5055_v5 = vrot.slane %v3631_v43, %v12910_v63  ;;  %v3785_v1 = vsel %vm3769_vm9, %v3735_v9, %v3777_v51  ;;  %v14610_v7 = vrot.slane %v4603_v0, %v12915_v61 }
 0x6b1   : > { %18426 = vst [vmem:[#allocation76_spill] sm:$0xff] %v14602_v34  ;;  %v14613_v15 = vrot.slane %v4605_v52, %v12915_v61  ;;  %v5062_v48 = vrot.slane %v5048_v49, %v12910_v63  ;;  %v14617_v34 = vrot.slane %v4606_v45, %v12915_v61  ;;  %v14620_v56 = vrot.slane %v5104_v17, %v12910_v63 }
 0x6b2   : > { %18427 = vst [vmem:[#allocation77_spill] sm:$0xff] %v14610_v7  ;;  %v14623_v43 = vrot.slane %v5111_v30, %v12910_v63  ;;  %vm3618_vm10 = vcmp.ge.f32.partialorder %v3592_v6, 0.0  ;;  %v14626_v9 = vrot.slane %v5112_v24, %v12910_v63  ;;  %v5561_v51 = vcombine.high %v3785_v1, %v3785_v1 }
 0x6b3   : > { %18428 = vst [vmem:[#allocation78_spill] sm:$0xff] %v14613_v15  ;;  %18429 = vst [vmem:[#allocation79_spill] sm:$0xff] %v14617_v34  ;;  %v18431_v52 = vcombine.high %v14074_v36, %v14074_v36  ;;  %v18432_v49 = vrot.slane %v14056_v32, %v12915_v61  ;;  %v14638_v45 = vrot.slane %v5113_v12, %v12910_v63  ;;  %v3626_v7 = vmul.f32 0.05, %v3592_v6 }
 0x6b4   : > { %18430 = vst [vmem:[#allocation80_spill] sm:$0xff] %v14620_v56  ;;  %v5063_v30 = vcombine.high %v5055_v5, %v5055_v5  ;;  %v14641_v23 = vrot.slane %v5055_v5, %v12910_v63  ;;  %v3730_v24 = vadd.f32 %v13985_v58, %v14061_v46  ;;  %v5064_v34 = vcombine.high %v5062_v48, %v5062_v48 }
 0x6b5   : > { %v4703_v0 = vrot.slane %v18431_v52, %v12915_v61  ;;  %v4984_v17 = vsel %vm636_vm2, %v14010_v18, %v18432_v49  ;;  %v14646_v15 = vrot.slane %v5062_v48, %v12910_v63  ;;  %v18435_v32 = vrot.slane %v14074_v36, %v12915_v61 }
 0x6b6   : > { %18433 = vst [vmem:[#allocation81_spill] sm:$0xff] %v14641_v23  ;;  %v18436_v12 = vcombine.high %v14010_v18, %v14010_v18  ;;  %v5568_v46 = vrot.slane %v3785_v1, %v12910_v63  ;;  %v18437_v48 = vcombine.high %v14030_v4, %v14030_v4  ;;  %v5575_v18 = vrot.slane %v5561_v51, %v12910_v63 }
 0x6b7   : > { %18434 = vst [vmem:[#allocation82_spill] sm:$0xff] %v14646_v15  ;;  %v4985_v52 = vsel %vm636_vm2, %v14030_v4, %v18435_v32  ;;  %v3776_v49 = vmul.f32 0.05, %v3730_v24  ;;  %vm3768_vm11 = vcmp.ge.f32.partialorder %v3730_v24, 0.0  ;;  %v3745_v55 = vadd.f32 %v14087_v21, %v13985_v58 }
 0x6b8   : > { %v4986_v5 = vsel %vm636_vm2, %v18436_v12, %v14122_v19  ;;  %v4987_v36 = vsel %vm636_vm2, %v18437_v48, %v4703_v0  ;;  %v6484_v19 = vcombine.low %v4984_v17, %v4985_v52  ;;  %v14671_v12 = vrot.slane %v5063_v30, %v12910_v63 }
 0x6b9   : > { %v6485_v56 = vcombine.low %v4986_v5, %v4987_v36  ;;  %v14678_v0 = vrot.slane %v5064_v34, %v12910_v63  ;;  %v5576_v51 = vcombine.high %v5568_v46, %v5568_v46  ;;  %v3634_v17 = vsel %vm3618_vm10, %v3592_v6, %v3626_v7 }
 0x6ba   : > { %18438 = vst [vmem:[#allocation83_spill] sm:$0xff] %v14671_v12  ;;  %v6492_v30 = vrot.slane %v6484_v19, %v12703_v40  ;;  %v5577_v1 = vcombine.high %v5575_v18, %v5575_v18  ;;  %v3587_v5 = vadd.f32 %v13985_v58, %v14069_v27  ;;  %v18440_v34 = vcombine.high %v14114_v16, %v14114_v16 }
 0x6bb   : > { %18439 = vst [vmem:[#allocation84_spill] sm:$0xff] %v14678_v0  ;;  %v6499_v52 = vrot.slane %v6485_v56, %v12703_v40  ;;  %v18441_v48 = vrot.slane %v14102_v53, %v12915_v61  ;;  %v3784_v6 = vsel %vm3768_vm11, %v3730_v24, %v3776_v49  ;;  %v18442_v56 = vrot.slane %v14114_v16, %v12915_v61 }
 0x6bc   : > { %v4671_v36 = vrot.slane %v18440_v34, %v12915_v61  ;;  %v18443_v27 = vcombine.high %v14023_v37, %v14023_v37  ;;  %v14707_v32 = vrot.slane %v5568_v46, %v12910_v63  ;;  %v5195_v53 = vcombine.high %v3634_v17, %v3634_v17 }
 0x6bd   : > { %v4976_v4 = vsel %vm636_vm2, %v14023_v37, %v18441_v48  ;;  %v6500_v7 = vcombine.low %v6492_v30, %v6499_v52  ;;  %v4977_v19 = vsel %vm636_vm2, %v14043_v41, %v18442_v56  ;;  %v18444_v24 = vcombine.high %v14043_v41, %v14043_v41 }
 0x6be   : > { %v4978_v34 = vsel %vm636_vm2, %v18443_v27, %v14159_v8  ;;  %v6416_v48 = vcombine.low %v4976_v4, %v4977_v19  ;;  %v14714_v16 = vrot.slane %v5575_v18, %v12910_v63  ;;  %v14717_v30 = vrot.slane %v5576_v51, %v12910_v63 }
 0x6bf   : > { %v4979_v49 = vsel %vm636_vm2, %v18444_v24, %v4671_v36  ;;  %v14719_v52 = vrot.slane %v6500_v7, 7  ;;  %v14722_v8 = vrot.slane %v5577_v1, %v12910_v63  ;;  %v5202_v46 = vrot.slane %v3634_v17, %v12910_v63 }
 0x6c0   : > { %v6417_v37 = vcombine.low %v4978_v34, %v4979_v49  ;;  %v5512_v56 = vcombine.high %v3784_v6, %v3784_v6  ;;  %v3625_v27 = vmul.f32 0.05, %v3587_v5  ;;  %vm3617_vm12 = vcmp.ge.f32.partialorder %v3587_v5, 0.0 }
 0x6c1   : > { %v14727_v41 = vsel %vm636_vm2, 0.0, %v14719_v52  ;;  %v6424_v18 = vrot.slane %v6416_v48, %v12703_v40  ;;  %v5606_v1 = vcombine.high %v14707_v32, %v14707_v32  ;;  %v5209_v36 = vrot.slane %v5195_v53, %v12910_v63 }
 0x6c2   : > { %18445 = vst [vmem:[#allocation85_spill] sm:$0xff] %v14727_v41  ;;  %v6431_v4 = vrot.slane %v6417_v37, %v12703_v40  ;;  %v5519_v17 = vrot.slane %v3784_v6, %v12910_v63  ;;  %7296 = vrot.lane.b32.xlu1 %v14727_v41, %s12136_s22  ;;  %v5607_v19 = vcombine.high %v14714_v16, %v14714_v16  ;;  %vm3771_vm14 = vcmp.ge.f32.partialorder %v3745_v55, 0.0 }
 0x6c3   : > { %v5608_v49 = vcombine.high %v14717_v30, %v14717_v30  ;;  %v5526_v6 = vrot.slane %v5512_v56, %v12910_v63  ;;  %v3633_v48 = vsel %vm3617_vm12, %v3587_v5, %v3625_v27  ;;  %v5609_v37 = vcombine.high %v14722_v8, %v14722_v8 }
 0x6c4   : > { %v6432_v24 = vcombine.low %v6424_v18, %v6431_v4  ;;  %v5210_v51 = vcombine.high %v5202_v46, %v5202_v46  ;;  %v14757_v18 = vrot.slane %v5606_v1, %v12915_v61  ;;  %v5211_v4 = vcombine.high %v5209_v36, %v5209_v36 }
 0x6c5   : > { %v5527_v34 = vcombine.high %v5519_v17, %v5519_v17  ;;  %v14764_v56 = vrot.slane %v5607_v19, %v12915_v61  ;;  %v5146_v27 = vcombine.high %v3633_v48, %v3633_v48  ;;  %v3602_v53 = vadd.f32 %v14093_v3, %v13985_v58 }
 0x6c6   : > { %v14759_v0 = vrot.slane %v6432_v24, 7  ;;  %v14769_v7 = vrot.slane %v5202_v46, %v12910_v63  ;;  %v5528_v21 = vcombine.high %v5526_v6, %v5526_v6  ;;  %v14772_v1 = vrot.slane %v5519_v17, %v12910_v63 }
 0x6c7   : > { %v14779_v5 = vrot.slane %v5209_v36, %v12910_v63  ;;  %v14782_v19 = vrot.slane %v5210_v51, %v12910_v63  ;;  %v14785_v15 = vrot.slane %v5526_v6, %v12910_v63  ;;  %v3779_v58 = vmul.f32 0.05, %v3745_v55 }
 0x6c8   : > { %18446 = vst [vmem:[#allocation86_spill] sm:$0xff] %v14769_v7  ;;  %18447 = vst [vmem:[#allocation87_spill] sm:$0xff] %v14772_v1  ;;  %v14776_v24 = vsel %vm636_vm2, 0.0, %v14759_v0  ;;  %v14790_v3 = vrot.slane %v5608_v49, %v12915_v61  ;;  %v14793_v46 = vrot.slane %v5211_v4, %v12910_v63  ;;  %v14796_v17 = vrot.slane %v5527_v34, %v12910_v63 }
 0x6c9   : > { %18448 = vst [vmem:[#allocation88_spill] sm:$0xff] %v14776_v24  ;;  %18449 = vst [vmem:[#allocation89_spill] sm:$0xff] %v14779_v5  ;;  %7288 = vrot.lane.b32.xlu0 %v14776_v24, %s12136_s22  ;;  %v14799_v51 = vrot.slane %v5609_v37, %v12915_v61  ;;  %v5153_v36 = vrot.slane %v3633_v48, %v12910_v63  ;;  %v5160_v6 = vrot.slane %v5146_v27, %v12910_v63  ;;  %vm7486_vm11 = vcmask 64512  }
 0x6ca   : > { %18450 = vst [vmem:[#allocation90_spill] sm:$0xff] %v14782_v19  ;;  %18451 = vst [vmem:[#allocation91_spill] sm:$0xff] %v14785_v15  ;;  %v3628_v12 = vmul.f32 0.05, %v3602_v53  ;;  %v14806_v49 = vrot.slane %v5528_v21, %v12910_v63  ;;  %v5557_v4 = vcombine.high %v14772_v1, %v14772_v1  ;;  %vm3620_vm0 = vcmp.ge.f32.partialorder %v3602_v53, 0.0 }
 0x6cb   : > { %18452 = vst [vmem:[#allocation92_spill] sm:$0xff] %v14793_v46  ;;  %18453 = vst [vmem:[#allocation93_spill] sm:$0xff] %v14796_v17  ;;  %v5558_v48 = vcombine.high %v14785_v15, %v14785_v15  ;;  %v3787_v27 = vsel %vm3771_vm14, %v3745_v55, %v3779_v58  ;;  %v5559_v21 = vcombine.high %v14796_v17, %v14796_v17  ;;  %v14837_v15 = vld [vmem:[#allocation10] ss:$0 sm:$0xff]  ;;  %vm7550_vm12 = vcmask 195584  }
 0x6cc   : > { %18454 = vst [vmem:[#allocation94_spill] sm:$0xff] %v14799_v51  ;;  %18455 = vst [vmem:[#allocation95_spill] sm:$0xff] %v14806_v49  ;;  %v5161_v37 = vcombine.high %v5153_v36, %v5153_v36  ;;  %v5162_v5 = vcombine.high %v5160_v6, %v5160_v6  ;;  %v3636_v19 = vsel %vm3620_vm0, %v3602_v53, %v3628_v12 }
 0x6cd   : > { %v5560_v55 = vcombine.high %v14806_v49, %v14806_v49  ;;  %v14829_v58 = vrot.slane %v5557_v4, %v12915_v61  ;;  %v5659_v46 = vcombine.high %v3787_v27, %v3787_v27  ;;  %v14834_v7 = vrot.slane %v5558_v48, %v12915_v61 }
 0x6ce   : > { %v5666_v51 = vrot.slane %v3787_v27, %v12910_v63  ;;  %v3740_v12 = vadd.f32 %v14837_v15, %v14095_v42  ;;  %v18458_v53 = vrot.slane %v14111_v26, %v12915_v61  ;;  %v5293_v34 = vcombine.high %v3636_v19, %v3636_v19 }
 0x6cf   : > { %18456 = vst [vmem:[#allocation96_spill] sm:$0xff] %v14829_v58  ;;  %18457 = vst [vmem:[#allocation97_spill] sm:$0xff] %v14834_v7  ;;  %v18459_v23 = vrot.slane %v14125_v39, %v12915_v61  ;;  %v18460_v27 = vcombine.high %v14037_v10, %v14037_v10  ;;  %v18461_v42 = vcombine.high %v14046_v44, %v14046_v44 }
 0x6d0   : > { %v4980_v4 = vsel %vm636_vm2, %v14037_v10, %v18458_v53  ;;  %v14862_v53 = vrot.slane %v5153_v36, %v12910_v63  ;;  %v14865_v39 = vrot.slane %v5160_v6, %v12910_v63  ;;  %v14871_v49 = vrot.slane %v5162_v5, %v12910_v63 }
 0x6d1   : > { %v4981_v48 = vsel %vm636_vm2, %v14046_v44, %v18459_v23  ;;  %v4982_v7 = vsel %vm636_vm2, %v18460_v27, %v14178_v60  ;;  %v4983_v26 = vsel %vm636_vm2, %v18461_v42, %v14185_v14  ;;  %v14868_v23 = vrot.slane %v5161_v37, %v12910_v63 }
 0x6d2   : > { %18462 = vst [vmem:[#allocation98_spill] sm:$0xff] %v14862_v53  ;;  %18463 = vst [vmem:[#allocation99_spill] sm:$0xff] %v14865_v39  ;;  %v5673_v10 = vrot.slane %v5659_v46, %v12910_v63  ;;  %v6433_v60 = vcombine.low %v4980_v4, %v4981_v48  ;;  %v6434_v27 = vcombine.low %v4982_v7, %v4983_v26  ;;  %v3778_v42 = vmul.f32 0.05, %v3740_v12  ;;  %v18475_v39 = vld [vmem:[#allocation18_spill] sm:$0xff]  ;;  %v18476_v53 = vld [vmem:[#allocation23_spill] sm:$0xff] }
 0x6d3   : > { %18464 = vst [vmem:[#allocation100_spill] sm:$0xff] %v14868_v23  ;;  %18465 = vst [vmem:[#allocation101_spill] sm:$0xff] %v14871_v49  ;;  %v18466_v44 = vrot.slane %v14066_v22, %v12915_v61  ;;  %v14880_v36 = vrot.slane %v5559_v21, %v12915_v61  ;;  %v5674_v6 = vcombine.high %v5666_v51, %v5666_v51  ;;  %vm3770_vm4 = vcmp.ge.f32.partialorder %v3740_v12, 0.0  ;;  %v18473_v49 = vld [vmem:[#allocation19_spill] sm:$0xff] }
 0x6d4   : > { %v14883_v37 = vrot.slane %v5666_v51, %v12910_v63  ;;  %v14886_v5 = vrot.slane %v5560_v55, %v12915_v61  ;;  %v5300_v46 = vrot.slane %v3636_v19, %v12910_v63  ;;  %v5307_v7 = vrot.slane %v5293_v34, %v12910_v63 }
 0x6d5   : > { %v4988_v14 = vsel %vm636_vm2, %v14020_v47, %v18466_v44  ;;  %18467 = vst [vmem:[#allocation102_spill] sm:$0xff] %v14880_v36  ;;  %v3597_v51 = vadd.f32 %v14837_v15, %v14104_v2  ;;  %v5675_v48 = vcombine.high %v5673_v10, %v5673_v10  ;;  %v14903_v26 = vrot.slane %v5673_v10, %v12910_v63 }
 0x6d6   : > { %18468 = vst [vmem:[#allocation103_spill] sm:$0xff] %v14883_v37  ;;  %18469 = vst [vmem:[#allocation104_spill] sm:$0xff] %v14886_v5  ;;  %v14906_v44 = vrot.slane %v5674_v6, %v12910_v63  ;;  %v5704_v21 = vcombine.high %v14883_v37, %v14883_v37  ;;  %v3786_v4 = vsel %vm3770_vm4, %v3740_v12, %v3778_v42  ;;  %v18478_v37 = vld [vmem:[#allocation24_spill] sm:$0xff] }
 0x6d7   : > { %18470 = vst [vmem:[#allocation105_spill] sm:$0xff] %v14903_v26  ;;  %v5308_v55 = vcombine.high %v5300_v46, %v5300_v46  ;;  %v5309_v22 = vcombine.high %v5307_v7, %v5307_v7  ;;  %v14913_v19 = vrot.slane %v5300_v46, %v12910_v63  ;;  %vm3619_vm5 = vcmp.ge.f32.partialorder %v3597_v51, 0.0 }
 0x6d8   : > { %18471 = vst [vmem:[#allocation106_spill] sm:$0xff] %v14906_v44  ;;  %v6441_v34 = vrot.slane %v6433_v60, %v12703_v40  ;;  %v6448_v10 = vrot.slane %v6434_v27, %v12703_v40  ;;  %v18474_v6 = vrot.slane %v18473_v49, %v12915_v61  ;;  %v5610_v12 = vcombine.high %v3786_v4, %v3786_v4 }
 0x6d9   : > { %18472 = vst [vmem:[#allocation107_spill] sm:$0xff] %v14913_v19  ;;  %v3627_v42 = vmul.f32 0.05, %v3597_v51  ;;  %v18477_v2 = vcombine.high %v14020_v47, %v14020_v47  ;;  %v18479_v60 = vcombine.high %v18475_v39, %v18475_v39  ;;  %v5617_v5 = vrot.slane %v3786_v4, %v12910_v63 }
 0x6da   : > { %v4989_v23 = vsel %vm636_vm2, %v18475_v39, %v18474_v6  ;;  %v6449_v49 = vcombine.low %v6441_v34, %v6448_v10  ;;  %v14934_v6 = vrot.slane %v5675_v48, %v12910_v63  ;;  %v5705_v17 = vcombine.high %v14903_v26, %v14903_v26  ;;  %v18519_v26 = vld [vmem:[#allocation28_spill] sm:$0xff] }
 0x6db   : > { %v4990_v46 = vsel %vm636_vm2, %v18477_v2, %v18476_v53  ;;  %v4991_v27 = vsel %vm636_vm2, %v18479_v60, %v18478_v37  ;;  %v6501_v36 = vcombine.low %v4988_v14, %v4989_v23  ;;  %v5706_v47 = vcombine.high %v14906_v44, %v14906_v44  ;;  %v18481_v23 = vld [vmem:[#allocation20_spill] sm:$0xff]  ;;  %v18494_v53 = vld [vmem:[#allocation22_spill] sm:$0xff] }
 0x6dc   : > { %v6502_v58 = vcombine.low %v4990_v46, %v4991_v27  ;;  %18480 = vst [vmem:[#allocation19_spill] sm:$0xff] %v14934_v6  ;;  %v14942_v39 = vrot.slane %v6449_v49, 7  ;;  %v3755_v14 = vadd.f32 %v14837_v15, %v18481_v23  ;;  %v14949_v34 = vrot.slane %v5704_v21, %v12915_v61  ;;  %v18488_v49 = vld [vmem:[#allocation21_spill] sm:$0xff] }
 0x6dd   : > { %v6509_v37 = vrot.slane %v6501_v36, %v12703_v40  ;;  %v14954_v2 = vrot.slane %v5307_v7, %v12910_v63  ;;  %v3635_v10 = vsel %vm3619_vm5, %v3597_v51, %v3627_v42  ;;  %v5624_v46 = vrot.slane %v5610_v12, %v12910_v63 }
 0x6de   : > { %v6516_v4 = vrot.slane %v6502_v58, %v12703_v40  ;;  %18482 = vst [vmem:[#allocation18_spill] sm:$0xff] %v14949_v34  ;;  %v5625_v60 = vcombine.high %v5617_v5, %v5617_v5  ;;  %v14961_v58 = vsel %vm636_vm2, %v14759_v0, %v14942_v39  ;;  %v5707_v21 = vcombine.high %v14934_v6, %v14934_v6  ;;  %v18515_v6 = vld [vmem:[#allocation35_spill] sm:$0xff] }
 0x6df   : > { %18483 = vst [vmem:[#allocation23_spill] sm:$0xff] %v14954_v2  ;;  %18484 = vst [vmem:[#allocation24_spill] sm:$0xff] %v14961_v58  ;;  %v14966_v27 = vrot.slane %v5706_v47, %v12915_v61  ;;  %v14969_v7 = vrot.slane %v5308_v55, %v12910_v63  ;;  %v14972_v51 = vrot.slane %v5617_v5, %v12910_v63  ;;  %7290 = vrot.lane.b32.xlu1 %v14961_v58, %s12136_s22 }
 0x6e0   : > { %v6517_v36 = vcombine.low %v6509_v37, %v6516_v4  ;;  %v5244_v12 = vcombine.high %v3635_v10, %v3635_v10  ;;  %v3781_v0 = vmul.f32 0.05, %v3755_v14  ;;  %v3612_v37 = vadd.f32 %v14837_v15, %v18488_v49 }
 0x6e1   : > { %18485 = vst [vmem:[#allocation20_spill] sm:$0xff] %v14966_v27  ;;  %18486 = vst [vmem:[#allocation108_spill] sm:$0xff] %v14969_v7  ;;  %v14981_v47 = vrot.slane %v5705_v17, %v12915_v61  ;;  %v14984_v55 = vrot.slane %v5309_v22, %v12910_v63  ;;  %vm3773_vm6 = vcmp.ge.f32.partialorder %v3755_v14, 0.0  ;;  %v5626_v5 = vcombine.high %v5624_v46, %v5624_v46  ;;  %v18520_v27 = vld [vmem:[#allocation43_spill] sm:$0xff] }
 0x6e2   : > { %18487 = vst [vmem:[#allocation109_spill] sm:$0xff] %v14972_v51  ;;  %v6967_v42 = vrot.slane %v6517_v36, 7  ;;  %v14987_v23 = vrot.slane %v5625_v60, %v12910_v63  ;;  %v5251_v36 = vrot.slane %v3635_v10, %v12910_v63  ;;  %v14999_v22 = vrot.slane %v5624_v46, %v12910_v63 }
 0x6e3   : > { %18489 = vst [vmem:[#allocation21_spill] sm:$0xff] %v14981_v47  ;;  %18490 = vst [vmem:[#allocation110_spill] sm:$0xff] %v14984_v55  ;;  %v5655_v4 = vcombine.high %v14972_v51, %v14972_v51  ;;  %v5258_v10 = vrot.slane %v5244_v12, %v12910_v63  ;;  %v3789_v60 = vsel %vm3773_vm6, %v3755_v14, %v3781_v0  ;;  %vm3622_vm3 = vcmp.ge.f32.partialorder %v3612_v37, 0.0 }
 0x6e4   : > { %18491 = vst [vmem:[#allocation111_spill] sm:$0xff] %v14987_v23  ;;  %v14992_v48 = vsel %vm636_vm2, %v14719_v52, %v6967_v42  ;;  %18493 = vst [vmem:[#allocation113_spill] sm:$0xff] %v14999_v22  ;;  %v3630_v52 = vmul.f32 0.05, %v3612_v37  ;;  %v3750_v47 = vadd.f32 %v14837_v15, %v18494_v53  ;;  %v15009_v49 = vrot.slane %v5707_v21, %v12915_v61 }
 0x6e5   : > { %18492 = vst [vmem:[#allocation112_spill] sm:$0xff] %v14992_v48  ;;  %7298 = vrot.lane.b32.xlu0 %v14992_v48, %s12136_s22  ;;  %v15016_v2 = vrot.slane %v5626_v5, %v12910_v63  ;;  %v5657_v14 = vcombine.high %v14987_v23, %v14987_v23  ;;  %v5259_v53 = vcombine.high %v5251_v36, %v5251_v36 }
 0x6e6   : > { %18495 = vst [vmem:[#allocation22_spill] sm:$0xff] %v15009_v49  ;;  %v5656_v21 = vcombine.high %v14999_v22, %v14999_v22  ;;  %v15027_v46 = vrot.slane %v5251_v36, %v12910_v63  ;;  %v5757_v17 = vcombine.high %v3789_v60, %v3789_v60  ;;  %v15030_v5 = vrot.slane %v5655_v4, %v12915_v61  ;;  %v18500_v49 = vld [vmem:[#allocation25_spill] sm:$0xff] }
 0x6e7   : > { %18496 = vst [vmem:[#allocation114_spill] sm:$0xff] %v15016_v2  ;;  %v5260_v55 = vcombine.high %v5258_v10, %v5258_v10  ;;  %v3638_v7 = vsel %vm3622_vm3, %v3612_v37, %v3630_v52  ;;  %v3780_v19 = vmul.f32 0.05, %v3750_v47  ;;  %v15035_v51 = vrot.slane %v5258_v10, %v12910_v63 }
 0x6e8   : > { %18497 = vst [vmem:[#allocation115_spill] sm:$0xff] %v15027_v46  ;;  %18498 = vst [vmem:[#allocation116_spill] sm:$0xff] %v15030_v5  ;;  %vm3772_vm7 = vcmp.ge.f32.partialorder %v3750_v47, 0.0  ;;  %v3607_v0 = vadd.f32 %v14837_v15, %v18500_v49  ;;  %v5658_v36 = vcombine.high %v15016_v2, %v15016_v2  ;;  %v15042_v23 = vrot.slane %v5657_v14, %v12915_v61 }
 0x6e9   : > { %18499 = vst [vmem:[#allocation117_spill] sm:$0xff] %v15035_v51  ;;  %v5764_v4 = vrot.slane %v3789_v60, %v12910_v63  ;;  %v15048_v52 = vrot.slane %v5259_v53, %v12910_v63  ;;  %v5771_v10 = vrot.slane %v5757_v17, %v12910_v63  ;;  %v5391_v12 = vcombine.high %v3638_v7, %v3638_v7 }
 0x6ea   : > { %18501 = vst [vmem:[#allocation25_spill] sm:$0xff] %v15042_v23  ;;  %v15052_v22 = vsel %vm636_vm2, %v6967_v42, 0.0  ;;  %v15055_v49 = vrot.slane %v5656_v21, %v12915_v61  ;;  %v15058_v14 = vrot.slane %v5260_v55, %v12910_v63  ;;  %v3788_v2 = vsel %vm3772_vm7, %v3750_v47, %v3780_v19 }
 0x6eb   : > { %18502 = vst [vmem:[#allocation118_spill] sm:$0xff] %v15048_v52  ;;  %18503 = vst [vmem:[#allocation119_spill] sm:$0xff] %v15052_v22  ;;  %7998 = vrot.lane.b32.xlu0 %v15052_v22, %s12136_s22  ;;  %v5398_v60 = vrot.slane %v3638_v7, %v12910_v63  ;;  %v3629_v42 = vmul.f32 0.05, %v3607_v0  ;;  %v15068_v53 = vrot.slane %v15052_v22, 1  ;;  %v15071_v21 = vrot.slane %v5658_v36, %v12915_v61  ;;  %v18508_v22 = vld [vmem:[#allocation30_spill] sm:$0xff] }
 0x6ec   : > { %18504 = vst [vmem:[#allocation120_spill] sm:$0xff] %v15055_v49  ;;  %18505 = vst [vmem:[#allocation121_spill] sm:$0xff] %v15058_v14  ;;  %v5772_v55 = vcombine.high %v5764_v4, %v5764_v4  ;;  %v15074_v49 = vrot.slane %v5764_v4, %v12910_v63  ;;  %vm3621_vm8 = vcmp.ge.f32.partialorder %v3607_v0, 0.0  ;;  %v5773_v47 = vcombine.high %v5771_v10, %v5771_v10  ;;  %v18513_v14 = vld [vmem:[#allocation39_spill] sm:$0xff] }
 0x6ed   : > { %18506 = vst [vmem:[#allocation122_spill] sm:$0xff] %v15071_v21  ;;  %v5405_v17 = vrot.slane %v5391_v12, %v12910_v63  ;;  %v5708_v37 = vcombine.high %v3788_v2, %v3788_v2  ;;  %8046 = vrot.lane.b32.xlu1 %v15068_v53, %s12139_s20  ;;  %v5715_v4 = vrot.slane %v3788_v2, %v12910_v63 }
 0x6ee   : > { %18507 = vst [vmem:[#allocation123_spill] sm:$0xff] %v15074_v49  ;;  %v15087_v51 = vadd.f32 %v14837_v15, %v18508_v22  ;;  %v5406_v52 = vcombine.high %v5398_v60, %v5398_v60  ;;  %v15091_v12 = vrot.slane %v5398_v60, %v12910_v63  ;;  %v3637_v46 = vsel %vm3621_vm8, %v3607_v0, %v3629_v42 }
 0x6ef   : > { %v15094_v21 = vrot.slane %v5771_v10, %v12910_v63  ;;  %v15097_v7 = vrot.slane %v5772_v55, %v12910_v63  ;;  %v5802_v2 = vcombine.high %v15074_v49, %v15074_v49  ;;  %v15104_v36 = vrot.slane %v5773_v47, %v12910_v63  ;;  %v18517_v47 = vld [vmem:[#allocation26_spill] sm:$0xff] }
 0x6f0   : > { %18509 = vst [vmem:[#allocation30_spill] sm:$0xff] %v15091_v12  ;;  %v5407_v19 = vcombine.high %v5405_v17, %v5405_v17  ;;  %v15107_v60 = vrot.slane %v5405_v17, %v12910_v63  ;;  %v5722_v0 = vrot.slane %v5708_v37, %v12910_v63  ;;  %v5723_v10 = vcombine.high %v5715_v4, %v5715_v4 }
 0x6f1   : > { %18510 = vst [vmem:[#allocation124_spill] sm:$0xff] %v15097_v7  ;;  %18511 = vst [vmem:[#allocation125_spill] sm:$0xff] %v15104_v36  ;;  %v5342_v42 = vcombine.high %v3637_v46, %v3637_v46  ;;  %v5349_v55 = vrot.slane %v3637_v46, %v12910_v63  ;;  %v18514_v23 = vcombine.high %v18513_v14, %v18513_v14  ;;  %vm3775_vm9 = vcmp.ge.f32.partialorder %v15087_v51, 0.0 }
 0x6f2   : > { %18512 = vst [vmem:[#allocation126_spill] sm:$0xff] %v15107_v60  ;;  %v18516_v22 = vrot.slane %v18515_v6, %v12915_v61  ;;  %v18518_v17 = vrot.slane %v18513_v14, %v12915_v61  ;;  %v18521_v46 = vcombine.high %v18517_v47, %v18517_v47  ;;  %v5803_v6 = vcombine.high %v15094_v21, %v15094_v21 }
 0x6f3   : > { %v4767_v5 = vrot.slane %v18514_v23, %v12915_v61  ;;  %v15132_v23 = vsel %vm636_vm2, %v14942_v39, 0.0  ;;  %v18525_v39 = vcombine.high %v18519_v26, %v18519_v26  ;;  %v5805_v1 = vcombine.high %v15104_v36, %v15104_v36  ;;  %v18575_v36 = vld [vmem:[#allocation37_spill] sm:$0xff] }
 0x6f4   : > { %v5000_v49 = vsel %vm636_vm2, %v18517_v47, %v18516_v22  ;;  %v5001_v37 = vsel %vm636_vm2, %v18519_v26, %v18518_v17  ;;  %v5002_v34 = vsel %vm636_vm2, %v18521_v46, %v18520_v27  ;;  %18522 = vst [vmem:[#allocation39_spill] sm:$0xff] %v15132_v23  ;;  %v5804_v22 = vcombine.high %v15097_v7, %v15097_v7 }
 0x6f5   : > { %v15141_v17 = vrot.slane %v5406_v52, %v12910_v63  ;;  %7994 = vrot.lane.b32.xlu0 %v15132_v23, %s12136_s22  ;;  %v5724_v27 = vcombine.high %v5722_v0, %v5722_v0  ;;  %v15146_v47 = vrot.slane %v5715_v4, %v12910_v63  ;;  %v5003_v46 = vsel %vm636_vm2, %v18525_v39, %v4767_v5 }
 0x6f6   : > { %v6620_v44 = vcombine.low %v5000_v49, %v5001_v37  ;;  %v15155_v14 = vrot.slane %v5407_v19, %v12910_v63  ;;  %v15158_v52 = vrot.slane %v5722_v0, %v12910_v63  ;;  %v5356_v7 = vrot.slane %v5342_v42, %v12910_v63 }
 0x6f7   : > { %18523 = vst [vmem:[#allocation35_spill] sm:$0xff] %v15141_v17  ;;  %18524 = vst [vmem:[#allocation26_spill] sm:$0xff] %v15146_v47  ;;  %v15162_v4 = vrot.slane %v5802_v2, %v12915_v61  ;;  %v15167_v5 = vrot.slane %v5723_v10, %v12910_v63  ;;  %v5357_v49 = vcombine.high %v5349_v55, %v5349_v55 }
 0x6f8   : > { %18526 = vst [vmem:[#allocation28_spill] sm:$0xff] %v15155_v14  ;;  %18527 = vst [vmem:[#allocation43_spill] sm:$0xff] %v15158_v52  ;;  %v15170_v37 = vrot.slane %v5804_v22, %v12915_v61  ;;  %v15175_v0 = vrot.slane %v5803_v6, %v12915_v61  ;;  %v15186_v22 = vrot.slane %v5724_v27, %v12910_v63  ;;  %v18535_v14 = vld [vmem:[#allocation34_spill] sm:$0xff] }
 0x6f9   : > { %18528 = vst [vmem:[#allocation127_spill] sm:$0xff] %v15167_v5  ;;  %7952 = vrot.lane.b32.xlu0 %v15068_v53, %s12138_s25  ;;  %v5753_v39 = vcombine.high %v15146_v47, %v15146_v47  ;;  %v15191_v6 = vrot.slane %v5805_v1, %v12915_v61  ;;  %v5754_v19 = vcombine.high %v15158_v52, %v15158_v52  ;;  %v18554_v52 = vld [vmem:[#allocation38_spill] sm:$0xff] }
 0x6fa   : > { %18529 = vst [vmem:[#allocation128_spill] sm:$0xff] %v15175_v0  ;;  %18530 = vst [vmem:[#allocation129_spill] sm:$0xff] %v15186_v22  ;;  %v5358_v26 = vcombine.high %v5356_v7, %v5356_v7  ;;  %v5755_v10 = vcombine.high %v15167_v5, %v15167_v5  ;;  %v15200_v42 = vrot.slane %v5349_v55, %v12910_v63  ;;  %v18573_v0 = vld [vmem:[#allocation45_spill] sm:$0xff] }
 0x6fb   : > { %18531 = vst [vmem:[#allocation130_spill] sm:$0xff] %v15191_v6  ;;  %v15203_v27 = vrot.slane %v5356_v7, %v12910_v63  ;;  %v15206_v60 = vrot.slane %v5357_v49, %v12910_v63  ;;  %v15214_v17 = vadd.f32 %v14837_v15, %v18535_v14  ;;  %v6621_v12 = vcombine.low %v5002_v34, %v5003_v46 }
 0x6fc   : > { %18532 = vst [vmem:[#allocation131_spill] sm:$0xff] %v15200_v42  ;;  %v5756_v55 = vcombine.high %v15186_v22, %v15186_v22  ;;  %v15221_v49 = vrot.slane %v5753_v39, %v12915_v61  ;;  %v15226_v47 = vrot.slane %v5754_v19, %v12915_v61  ;;  %v15229_v2 = vrot.slane %v5358_v26, %v12910_v63  ;;  %v18543_v22 = vld [vmem:[#allocation40_spill] sm:$0xff]  ;;  %v18545_v42 = vld [vmem:[#allocation31_spill] sm:$0xff] }
 0x6fd   : > { %18533 = vst [vmem:[#allocation132_spill] sm:$0xff] %v15203_v27  ;;  %18534 = vst [vmem:[#allocation133_spill] sm:$0xff] %v15206_v60  ;;  %v6628_v15 = vrot.slane %v6620_v44, %v12703_v40  ;;  %v6635_v34 = vrot.slane %v6621_v12, %v12703_v40  ;;  %v15234_v14 = vrot.slane %v5755_v10, %v12915_v61  ;;  %v18539_v26 = vrot.slane %v14992_v48, 1  ;;  %v18541_v12 = vld [vmem:[#allocation44_spill] sm:$0xff] }
 0x6fe   : > { %18536 = vst [vmem:[#allocation34_spill] sm:$0xff] %v15221_v49  ;;  %18537 = vst [vmem:[#allocation134_spill] sm:$0xff] %v15226_v47  ;;  %v18540_v7 = vrot.slane %v14727_v41, 1  ;;  %v18542_v10 = vcombine.high %v18541_v12, %v18541_v12  ;;  %v18544_v46 = vrot.slane %v18543_v22, %v12915_v61  ;;  %v15263_v19 = vrot.slane %v15132_v23, 1  ;;  %v18551_v23 = vld [vmem:[#allocation36_spill] sm:$0xff] }
 0x6ff   : > { %18538 = vst [vmem:[#allocation135_spill] sm:$0xff] %v15234_v14  ;;  %v6636_v1 = vcombine.low %v6628_v15, %v6635_v34  ;;  %v18546_v15 = vmov %v18539_v26  ;;  %v18552_v27 = vrot.slane %v18551_v23, %v12915_v61  ;;  %v18555_v14 = vrot.slane %v18554_v52, %v12915_v61 }
 0x700   : > { %v7131_v44 = vsel %vm2911_vm13, %v18540_v7, %v18539_v26  ;;  %v4735_v47 = vrot.slane %v18542_v10, %v12915_v61  ;;  %v4992_v39 = vsel %vm636_vm2, %v18545_v42, %v18544_v46  ;;  %v15260_v34 = vsel %vm2911_vm13, %v18546_v15, %v15068_v53  ;;  %v18548_v26 = vld [vmem:[#allocation33_spill] sm:$0xff] }
 0x701   : > { %7204 = vrot.lane.b32.xlu0 %v7131_v44, %s12138_s25  ;;  %v18547_v7 = vrot.slane %v18541_v12, %v12915_v61  ;;  %v18549_v46 = vcombine.high %v18545_v42, %v18545_v42  ;;  %v6978_v41 = vrot.slane %v6636_v1, 7  ;;  %v18550_v53 = vcombine.high %v18548_v26, %v18548_v26  ;;  %v18553_v12 = vld [vmem:[#allocation27_spill] sm:$0xff]  ;;  %v18556_v42 = vld [vmem:[#allocation29_spill] sm:$0xff] }
 0x702   : > { %v5004_v60 = vsel %vm636_vm2, %v18553_v12, %v18552_v27  ;;  %v18557_v1 = vld [vmem:[#allocation47_spill] sm:$0xff]  ;;  %v18560_v23 = vcombine.high %v18556_v42, %v18556_v42  ;;  %vm3774_vm10 = vcmp.ge.f32.partialorder %v15214_v17, 0.0 }
 0x703   : > { %v4993_v22 = vsel %vm636_vm2, %v18548_v26, %v18547_v7  ;;  %v4994_v10 = vsel %vm636_vm2, %v18549_v46, %v14336_v54  ;;  %v4995_v15 = vsel %vm636_vm2, %v18550_v53, %v4735_v47  ;;  %v5005_v54 = vsel %vm636_vm2, %v18556_v42, %v18555_v14 }
 0x704   : > { %v6552_v48 = vcombine.low %v4992_v39, %v4993_v22  ;;  %v6553_v7 = vcombine.low %v4994_v10, %v4995_v15  ;;  %v18558_v26 = vcombine.high %v18553_v12, %v18553_v12  ;;  %v18559_v39 = vld [vmem:[#allocation48_spill] sm:$0xff]  ;;  %v15301_v27 = vsel %vm636_vm2, 0.0, %v6978_v41 }
 0x705   : > { %v5007_v22 = vsel %vm636_vm2, %v18560_v23, %v18559_v39  ;;  %18561 = vst [vmem:[#allocation44_spill] sm:$0xff] %v15301_v27  ;;  %v6637_v46 = vcombine.low %v5004_v60, %v5005_v54  ;;  %v3783_v14 = vmul.f32 0.05, %v15087_v51  ;;  %7312 = vrot.lane.b32.xlu1 %v15301_v27, %s12136_s22  ;;  %7948 = vrot.lane.b32.xlu0 %v15263_v19, %s12138_s25  ;;  %v18564_v60 = vld [vmem:[#allocation50_spill] sm:$0xff]  ;;  %v18567_v39 = vld [vmem:[#allocation60_spill] sm:$0xff] }
 0x706   : > { %v5006_v47 = vsel %vm636_vm2, %v18558_v26, %v18557_v1  ;;  %v6560_v52 = vrot.slane %v6552_v48, %v12703_v40  ;;  %v6567_v53 = vrot.slane %v6553_v7, %v12703_v40  ;;  %v18562_v15 = vcombine.high %v14407_v13, %v14407_v13 }
 0x707   : > { %v6638_v10 = vcombine.low %v5006_v47, %v5007_v22  ;;  %v18563_v48 = vrot.slane %v14388_v33, %v12915_v61  ;;  %v6645_v54 = vrot.slane %v6637_v46, %v12703_v40  ;;  %v18565_v26 = vrot.slane %v14407_v13, %v12915_v61  ;;  %v18566_v47 = vld [vmem:[#allocation54_spill] sm:$0xff]  ;;  %v18572_v13 = vld [vmem:[#allocation32_spill] sm:$0xff] }
 0x708   : > { %v4831_v12 = vrot.slane %v18562_v15, %v12915_v61  ;;  %v18568_v23 = vcombine.high %v18564_v60, %v18564_v60  ;;  %v6568_v33 = vcombine.low %v6560_v52, %v6567_v53  ;;  %v18569_v15 = vcombine.high %v18566_v47, %v18566_v47  ;;  %v18576_v53 = vld [vmem:[#allocation52_spill] sm:$0xff] }
 0x709   : > { %v5016_v42 = vsel %vm636_vm2, %v18564_v60, %v18563_v48  ;;  %v6652_v1 = vrot.slane %v6638_v10, %v12703_v40  ;;  %v5017_v7 = vsel %vm636_vm2, %v18566_v47, %v18565_v26  ;;  %v18570_v10 = vld [vmem:[#allocation42_spill] sm:$0xff]  ;;  %v18574_v60 = vrot.slane %v18573_v0, %v12915_v61  ;;  %7206 = vrot.lane.b32.xlu1 %v15260_v34, %s12138_s25 }
 0x70a   : > { %v5018_v22 = vsel %vm636_vm2, %v18568_v23, %v18567_v39  ;;  %v5019_v46 = vsel %vm636_vm2, %v18569_v15, %v4831_v12  ;;  %v6756_v48 = vcombine.low %v5016_v42, %v5017_v7  ;;  %v18571_v49 = vrot.slane %v18570_v10, %v12915_v61  ;;  %7398 = vrot.lane.b32.xlu0 %v7131_v44, %s12139_s20  ;;  %v18578_v42 = vld [vmem:[#allocation53_spill] sm:$0xff]  ;;  %v18581_v15 = vld [vmem:[#allocation56_spill] sm:$0xff] }
 0x70b   : > { %v6653_v26 = vcombine.low %v6645_v54, %v6652_v1  ;;  %v6757_v6 = vcombine.low %v5018_v22, %v5019_v46  ;;  %v4997_v52 = vsel %vm636_vm2, %v18575_v36, %v18574_v60  ;;  %v18577_v47 = vcombine.high %v18572_v13, %v18572_v13 }
 0x70c   : > { %v4996_v5 = vsel %vm636_vm2, %v18572_v13, %v18571_v49  ;;  %v6764_v49 = vrot.slane %v6756_v48, %v12703_v40  ;;  %v18579_v0 = vcombine.high %v18575_v36, %v18575_v36  ;;  %v18580_v22 = vrot.slane %v14459_v59, %v12915_v61  ;;  %v18665_v48 = vld [vmem:[#allocation82_spill] sm:$0xff] }
 0x70d   : > { %v4998_v12 = vsel %vm636_vm2, %v18577_v47, %v18576_v53  ;;  %v6569_v1 = vcombine.low %v4996_v5, %v4997_v52  ;;  %v6979_v7 = vrot.slane %v6653_v26, 7  ;;  %v6771_v39 = vrot.slane %v6757_v6, %v12703_v40  ;;  %v18583_v5 = vld [vmem:[#allocation57_spill] sm:$0xff]  ;;  %8042 = vrot.lane.b32.xlu1 %v15263_v19, %s12139_s20 }
 0x70e   : > { %v4999_v54 = vsel %vm636_vm2, %v18579_v0, %v18578_v42  ;;  %v5008_v46 = vsel %vm636_vm2, %v18581_v15, %v18580_v22  ;;  %v15367_v44 = vrot.slane %v5756_v55, %v12915_v61  ;;  %v18582_v36 = vrot.slane %v14476_v11, %v12915_v61  ;;  %v18591_v42 = vld [vmem:[#allocation55_spill] sm:$0xff] }
 0x70f   : > { %v6570_v23 = vcombine.low %v4998_v12, %v4999_v54  ;;  %v18584_v6 = vcombine.high %v18581_v15, %v18581_v15  ;;  %v3791_v13 = vsel %vm3775_vm9, %v15087_v51, %v3783_v14  ;;  %v18585_v55 = vrot.slane %v14961_v58, 1  ;;  %v18589_v12 = vld [vmem:[#allocation59_spill] sm:$0xff] }
 0x710   : > { %v5009_v10 = vsel %vm636_vm2, %v18583_v5, %v18582_v36  ;;  %v18586_v26 = vrot.slane %v14776_v24, 1  ;;  %v15388_v52 = vsel %vm636_vm2, %v6978_v41, %v6979_v7  ;;  %v6772_v11 = vcombine.low %v6764_v49, %v6771_v39 }
 0x711   : > { %v5010_v59 = vsel %vm636_vm2, %v18584_v6, %v14522_v25  ;;  %18587 = vst [vmem:[#allocation40_spill] sm:$0xff] %v15388_v52  ;;  %v6577_v53 = vrot.slane %v6569_v1, %v12703_v40  ;;  %v6584_v25 = vrot.slane %v6570_v23, %v12703_v40  ;;  %v18588_v51 = vcombine.high %v18583_v5, %v18583_v5  ;;  %v18592_v23 = vld [vmem:[#allocation41_spill] sm:$0xff]  ;;  %v18594_v5 = vld [vmem:[#allocation70_spill] sm:$0xff] }
 0x712   : > { %v7121_v60 = vsel %vm2911_vm13, %v18586_v26, %v18585_v55  ;;  %v6688_v41 = vcombine.low %v5008_v46, %v5009_v10  ;;  %v18590_v49 = vrot.slane %v18589_v12, %v12915_v61  ;;  %v5855_v54 = vcombine.high %v3791_v13, %v3791_v13  ;;  %7400 = vrot.lane.b32.xlu1 %v15260_v34, %s12139_s20 }
 0x713   : > { %7196 = vrot.lane.b32.xlu0 %v7121_v60, %s12138_s25  ;;  %v5011_v14 = vsel %vm636_vm2, %v18588_v51, %v14547_v62  ;;  %v15407_v1 = vrot.slane %v3791_v13, %v12910_v63  ;;  %v6585_v39 = vcombine.low %v6577_v53, %v6584_v25  ;;  %v18593_v22 = vcombine.high %v18592_v23, %v18592_v23 }
 0x714   : > { %v6689_v47 = vcombine.low %v5010_v59, %v5011_v14  ;;  %v5021_v0 = vsel %vm636_vm2, %v18591_v42, %v18590_v49  ;;  %v6972_v15 = vrot.slane %v6568_v33, 7  ;;  %v15415_v46 = vrot.slane %v6688_v41, %v12703_v40  ;;  %v18596_v33 = vld [vmem:[#allocation46_spill] sm:$0xff] }
 0x715   : > { %v5022_v62 = vsel %vm636_vm2, %v18593_v22, %v14469_v38  ;;  %v18595_v10 = vcombine.high %v18591_v42, %v18591_v42  ;;  %v3782_v59 = vmul.f32 0.05, %v15214_v17  ;;  %v6973_v38 = vrot.slane %v6585_v39, 7  ;;  %v18604_v39 = vld [vmem:[#allocation61_spill] sm:$0xff] }
 0x716   : > { %v15418_v36 = vrot.slane %v6689_v47, %v12703_v40  ;;  %v6773_v13 = vcombine.low %v18596_v33, %v5021_v0  ;;  %v18597_v53 = vrot.slane %v14541_v28, %v12915_v61  ;;  %v18598_v51 = vrot.slane %v14544_v31, %v12915_v61 }
 0x717   : > { %v5023_v6 = vsel %vm636_vm2, %v18595_v10, %v18594_v5  ;;  %7390 = vrot.lane.b32.xlu0 %v7121_v60, %s12139_s20  ;;  %v18599_v60 = vcombine.high %v14527_v57, %v14527_v57  ;;  %v15448_v41 = vrot.slane %v5855_v54, %v12910_v63  ;;  %v15451_v28 = vsel %vm636_vm2, %v6972_v15, %v6973_v38  ;;  %v18603_v54 = vld [vmem:[#allocation76_spill] sm:$0xff] }
 0x718   : > { %v6774_v55 = vcombine.low %v5022_v62, %v5023_v6  ;;  %v6704_v26 = vcombine.low %v15415_v46, %v15418_v36  ;;  %v5032_v25 = vsel %vm636_vm2, %v14527_v57, %v18597_v53  ;;  %v5033_v34 = vsel %vm636_vm2, %v14532_v50, %v18598_v51  ;;  %18600 = vst [vmem:[#allocation31_spill] sm:$0xff] %v15451_v28  ;;  %v18608_v6 = vld [vmem:[#allocation64_spill] sm:$0xff] }
 0x719   : > { %v5034_v14 = vsel %vm636_vm2, %v18599_v60, %v14596_v20  ;;  %v6781_v47 = vrot.slane %v6773_v13, %v12703_v40  ;;  %v5870_v31 = vcombine.high %v15407_v1, %v15407_v1  ;;  %v15459_v49 = vrot.slane %v15407_v1, %v12910_v63 }
 0x71a   : > { %v6788_v12 = vrot.slane %v6774_v55, %v12703_v40  ;;  %v15462_v57 = vsel %vm636_vm2, 0.0, %v6972_v15  ;;  %v18602_v20 = vcombine.high %v14532_v50, %v14532_v50  ;;  %v18605_v1 = vcombine.high %v18604_v39, %v18604_v39 }
 0x71b   : > { %18601 = vst [vmem:[#allocation33_spill] sm:$0xff] %v15462_v57  ;;  %7304 = vrot.lane.b32.xlu1 %v15462_v57, %s12136_s22  ;;  %7314 = vrot.lane.b32.xlu0 %v15388_v52, %s12136_s22  ;;  %v6892_v22 = vcombine.low %v5032_v25, %v5033_v34  ;;  %v3790_v50 = vsel %vm3774_vm10, %v15214_v17, %v3782_v59  ;;  %v15486_v15 = vsel %vm636_vm2, %v6979_v7, 0.0  ;;  %v6990_v36 = vrot.slane %v6772_v11, 7  ;;  %v18609_v17 = vld [vmem:[#allocation62_spill] sm:$0xff]  ;;  %v18610_v59 = vld [vmem:[#allocation63_spill] sm:$0xff]  ;;  %v18615_v11 = vld [vmem:[#allocation72_spill] sm:$0xff] }
 0x71c   : > { %v5035_v42 = vsel %vm636_vm2, %v18602_v20, %v14599_v29  ;;  %v6789_v0 = vcombine.low %v6781_v47, %v6788_v12  ;;  %v5039_v23 = vsel %vm636_vm2, %v18605_v1, %v18603_v54  ;;  %v18606_v29 = vrot.slane %v14961_v58, 1  ;;  %18607 = vst [vmem:[#allocation36_spill] sm:$0xff] %v15486_v15  ;;  %v18612_v25 = vld [vmem:[#allocation66_spill] sm:$0xff]  ;;  %v18616_v34 = vld [vmem:[#allocation49_spill] sm:$0xff]  ;;  %v18722_v58 = vld [vmem:[#allocation124_spill] sm:$0xff] }
 0x71d   : > { %v6893_v46 = vcombine.low %v5034_v14, %v5035_v42  ;;  %v6900_v10 = vrot.slane %v6892_v22, %v12703_v40  ;;  %v6910_v33 = vcombine.low %v18608_v6, %v5039_v23  ;;  %v18611_v55 = vcombine.low %v18609_v17, %v18610_v59  ;;  %v18614_v7 = vld [vmem:[#allocation58_spill] sm:$0xff]  ;;  %v18623_v17 = vld [vmem:[#allocation71_spill] sm:$0xff] }
 0x71e   : > { %v7123_v62 = vsel %vm2911_vm13, %v18606_v29, %v15263_v19  ;;  %v15488_v5 = vrot.slane %v6789_v0, 7  ;;  %v18613_v19 = vrot.slane %v18612_v25, %v12915_v61  ;;  %v18617_v60 = vcombine.high %v18616_v34, %v18616_v34  ;;  %v18618_v12 = vld [vmem:[#allocation74_spill] sm:$0xff]  ;;  %v18620_v0 = vld [vmem:[#allocation51_spill] sm:$0xff] }
 0x71f   : > { %v6907_v13 = vrot.slane %v6893_v46, %v12703_v40  ;;  %v6917_v53 = vrot.slane %v18611_v55, %v12703_v40  ;;  %7198 = vrot.lane.b32.xlu1 %v7123_v62, %s12138_s25  ;;  %8006 = vrot.lane.b32.xlu0 %v15486_v15, %s12136_s22  ;;  %v6924_v47 = vrot.slane %v6910_v33, %v12703_v40  ;;  %v18624_v55 = vld [vmem:[#allocation75_spill] sm:$0xff]  ;;  %v18629_v34 = vld [vmem:[#allocation78_spill] sm:$0xff] }
 0x720   : > { %v5013_v51 = vsel %vm636_vm2, %v18614_v7, %v18613_v19  ;;  %v5014_v14 = vsel %vm636_vm2, %v18617_v60, %v18615_v11  ;;  %v18619_v20 = vcombine.high %v18614_v7, %v18614_v7  ;;  %v5806_v39 = vcombine.high %v3790_v50, %v3790_v50  ;;  %v18626_v19 = vld [vmem:[#allocation73_spill] sm:$0xff] }
 0x721   : > { %v6705_v54 = vcombine.low %v18620_v0, %v5013_v51  ;;  %v6908_v1 = vcombine.low %v6900_v10, %v6907_v13  ;;  %v15519_v22 = vsel %vm636_vm2, %v6990_v36, %v15488_v5  ;;  %v5871_v29 = vcombine.high %v15448_v41, %v15448_v41  ;;  %v18627_v51 = vld [vmem:[#allocation77_spill] sm:$0xff] }
 0x722   : > { %v5015_v42 = vsel %vm636_vm2, %v18619_v20, %v18618_v12  ;;  %18621 = vst [vmem:[#allocation27_spill] sm:$0xff] %v15519_v22  ;;  %v15524_v46 = vrot.slane %v3790_v50, %v12910_v63  ;;  %v6925_v6 = vcombine.low %v6917_v53, %v6924_v47  ;;  %v18622_v33 = vrot.slane %v14560_v35, %v12915_v61  ;;  %v18631_v47 = vld [vmem:[#allocation79_spill] sm:$0xff]  ;;  %v18632_v12 = vld [vmem:[#allocation65_spill] sm:$0xff] }
 0x723   : > { %v6706_v23 = vcombine.low %v5014_v14, %v5015_v42  ;;  %v6713_v10 = vrot.slane %v6705_v54, %v12703_v40  ;;  %v18625_v25 = vrot.slane %v18624_v55, %v12915_v61  ;;  %v18628_v50 = vcombine.high %v18623_v17, %v18623_v17  ;;  %7392 = vrot.lane.b32.xlu1 %v7123_v62, %s12139_s20 }
 0x724   : > { %v5024_v59 = vsel %vm636_vm2, %v18623_v17, %v18622_v33  ;;  %7306 = vrot.lane.b32.xlu0 %v15451_v28, %s12136_s22  ;;  %v15546_v35 = vrot.slane %v6908_v1, 7  ;;  %v15548_v11 = vrot.slane %v6925_v6, 7  ;;  %v18630_v60 = vcombine.high %v18626_v19, %v18626_v19  ;;  %v18636_v17 = vld [vmem:[#allocation69_spill] sm:$0xff] }
 0x725   : > { %v6720_v13 = vrot.slane %v6706_v23, %v12703_v40  ;;  %v5025_v7 = vsel %vm636_vm2, %v18626_v19, %v18625_v25  ;;  %v5026_v53 = vsel %vm636_vm2, %v18628_v50, %v18627_v51  ;;  %v18633_v20 = vcombine.high %v18632_v12, %v18632_v12 }
 0x726   : > { %v5027_v14 = vsel %vm636_vm2, %v18630_v60, %v18629_v34  ;;  %v15562_v62 = vrot.slane %v15448_v41, %v12910_v63  ;;  %v6824_v54 = vcombine.low %v5024_v59, %v5025_v7  ;;  %v7152_v23 = vrot.slane %v15486_v15, 1 }
 0x727   : > { %v5031_v42 = vsel %vm636_vm2, %v18633_v20, %v18631_v47  ;;  %v6721_v0 = vcombine.low %v6713_v10, %v6720_v13  ;;  %v6825_v1 = vcombine.low %v5026_v53, %v5027_v14  ;;  %v15566_v6 = vsel %vm636_vm2, %v6973_v38, 0.0  ;;  %v18637_v38 = vld [vmem:[#allocation67_spill] sm:$0xff]  ;;  %v18638_v13 = vld [vmem:[#allocation68_spill] sm:$0xff]  ;;  %v18670_v53 = vld [vmem:[#allocation97_spill] sm:$0xff] }
 0x728   : > { %18634 = vst [vmem:[#allocation38_spill] sm:$0xff] %v15566_v6  ;;  %v15571_v33 = vsel %vm636_vm2, %v15546_v35, %v15548_v11  ;;  %v6842_v55 = vcombine.low %v18636_v17, %v5031_v42  ;;  %v15574_v25 = vrot.slane %v6704_v26, 7  ;;  %v6832_v41 = vrot.slane %v6824_v54, %v12703_v40  ;;  %8054 = vrot.lane.b32.xlu1 %v7152_v23, %s12139_s20  ;;  %v18643_v54 = vld [vmem:[#allocation80_spill] sm:$0xff] }
 0x729   : > { %18635 = vst [vmem:[#allocation29_spill] sm:$0xff] %v15571_v33  ;;  %v15576_v19 = vrot.slane %v6721_v0, 7  ;;  %v6839_v59 = vrot.slane %v6825_v1, %v12703_v40  ;;  %v15581_v10 = vrot.slane %v5870_v31, %v12910_v63  ;;  %8002 = vrot.lane.b32.xlu0 %v15566_v6, %s12136_s22  ;;  %v18639_v7 = vcombine.low %v18637_v38, %v18638_v13 }
 0x72a   : > { %v6856_v51 = vrot.slane %v6842_v55, %v12703_v40  ;;  %v5900_v50 = vcombine.high %v15459_v49, %v15459_v49  ;;  %v15601_v60 = vrot.slane %v5806_v39, %v12910_v63  ;;  %v15607_v47 = vrot.slane %v15524_v46, %v12910_v63 }
 0x72b   : > { %v6849_v26 = vrot.slane %v18639_v7, %v12703_v40  ;;  %v15598_v31 = vsel %vm636_vm2, %v15574_v25, %v15576_v19  ;;  %v6840_v34 = vcombine.low %v6832_v41, %v6839_v59  ;;  %v15610_v20 = vrot.slane %v5871_v29, %v12910_v63 }
 0x72c   : > { %18640 = vst [vmem:[#allocation47_spill] sm:$0xff] %v15598_v31  ;;  %v15615_v0 = vsel %vm636_vm2, 0.0, %v6990_v36  ;;  %v18642_v39 = vrot.slane %v14707_v32, %v12915_v61  ;;  %v18644_v36 = vrot.slane %v14717_v30, %v12915_v61  ;;  %v7150_v41 = vrot.slane %v15388_v52, 1 }
 0x72d   : > { %v6857_v12 = vcombine.low %v6849_v26, %v6856_v51  ;;  %18641 = vst [vmem:[#allocation48_spill] sm:$0xff] %v15615_v0  ;;  %7328 = vrot.lane.b32.xlu1 %v15615_v0, %s12136_s22  ;;  %7960 = vrot.lane.b32.xlu0 %v7152_v23, %s12138_s25  ;;  %v15627_v29 = vrot.slane %v6840_v34, 7  ;;  %v18645_v59 = vcombine.high %v18643_v54, %v18643_v54  ;;  %v15655_v34 = vrot.slane %v15566_v6, 1  ;;  %v10032_v51 = vld [vmem:[%s18666_s27 + $0x28] sm:$0xff] }
 0x72e   : > { %v6232_v1 = vsel %vm636_vm2, %v18643_v54, %v18642_v39  ;;  %v6233_v32 = vsel %vm636_vm2, %v14626_v9, %v18644_v36  ;;  %v18646_v13 = vcombine.high %v14626_v9, %v14626_v9  ;;  %v18647_v30 = vrot.slane %v14714_v16, %v12915_v61  ;;  %v18651_v54 = vld [vmem:[#allocation94_spill] sm:$0xff] }
 0x72f   : > { %v15629_v55 = vrot.slane %v6857_v12, 7  ;;  %v6234_v38 = vsel %vm636_vm2, %v18645_v59, %v14757_v18  ;;  %v18649_v9 = vrot.slane %v14722_v8, %v12915_v61  ;;  %v18650_v12 = vcombine.high %v14623_v43, %v14623_v43 }
 0x730   : > { %v6235_v7 = vsel %vm636_vm2, %v18646_v13, %v14790_v3  ;;  %v6236_v26 = vsel %vm636_vm2, %v14623_v43, %v18647_v30  ;;  %v15668_v3 = vrot.slane %v5900_v50, %v12915_v61  ;;  %v18652_v36 = vcombine.high %v14638_v45, %v14638_v45 }
 0x731   : > { %v15660_v18 = vsel %vm636_vm2, %v15627_v29, %v15629_v55  ;;  %v6237_v16 = vsel %vm636_vm2, %v14638_v45, %v18649_v9  ;;  %v6238_v39 = vsel %vm636_vm2, %v18650_v12, %v14764_v56  ;;  %v6518_v13 = vcombine.low %v6232_v1, %v6233_v32  ;;  %8050 = vrot.lane.b32.xlu1 %v15655_v34, %s12139_s20  ;;  %v18653_v12 = vld [vmem:[#allocation87_spill] sm:$0xff] }
 0x732   : > { %18648 = vst [vmem:[#allocation50_spill] sm:$0xff] %v15660_v18  ;;  %v6239_v59 = vsel %vm636_vm2, %v18652_v36, %v18651_v54  ;;  %7956 = vrot.lane.b32.xlu0 %v15655_v34, %s12138_s25  ;;  %v6519_v8 = vcombine.low %v6234_v38, %v6235_v7  ;;  %v6535_v50 = vcombine.low %v6236_v26, %v6237_v16  ;;  %v7149_v43 = vrot.slane %v15301_v27, 1  ;;  %v18655_v54 = vld [vmem:[#allocation81_spill] sm:$0xff]  ;;  %v18658_v16 = vld [vmem:[#allocation83_spill] sm:$0xff] }
 0x733   : > { %v6536_v30 = vcombine.low %v6238_v39, %v6239_v59  ;;  %v7153_v56 = vsel %vm2911_vm13, %v7150_v41, %v7152_v23  ;;  %v6526_v9 = vrot.slane %v6518_v13, %v12703_v40  ;;  %v18654_v45 = vrot.slane %v18653_v12, %v12915_v61  ;;  %v18656_v7 = vld [vmem:[#allocation93_spill] sm:$0xff]  ;;  %v18659_v59 = vld [vmem:[#allocation96_spill] sm:$0xff] }
 0x734   : > { %v6533_v32 = vrot.slane %v6519_v8, %v12703_v40  ;;  %v6543_v36 = vrot.slane %v6535_v50, %v12703_v40  ;;  %v18657_v26 = vrot.slane %v18656_v7, %v12915_v61  ;;  %v7151_v39 = vsel %vm2911_vm13, %v7149_v43, %v7150_v41  ;;  %v7583_v41 = vld [vmem:[%s18666_s27] sm:$0xff]  ;;  %v7584_v43 = vld [vmem:[%s18666_s27 + $0x8] sm:$0xff] }
 0x735   : > { %v6224_v1 = vsel %vm636_vm2, %v18655_v54, %v18654_v45  ;;  %v6550_v38 = vrot.slane %v6536_v30, %v12703_v40  ;;  %v18660_v13 = vcombine.high %v18655_v54, %v18655_v54  ;;  %v18661_v45 = vld [vmem:[#allocation102_spill] sm:$0xff]  ;;  %v18662_v8 = vcombine.high %v18658_v16, %v18658_v16  ;;  %v18663_v30 = vld [vmem:[#allocation91_spill] sm:$0xff]  ;;  %7416 = vrot.lane.b32.xlu1 %v7153_v56, %s12139_s20 }
 0x736   : > { %v6225_v23 = vsel %vm636_vm2, %v18658_v16, %v18657_v26  ;;  %v18664_v7 = vrot.slane %v18663_v30, %v12915_v61  ;;  %v7140_v54 = vrot.slane %v15451_v28, 1  ;;  %7414 = vrot.lane.b32.xlu0 %v7151_v39, %s12139_s20  ;;  %v6534_v16 = vcombine.low %v6526_v9, %v6533_v32  ;;  %v18672_v32 = vld [vmem:[#allocation104_spill] sm:$0xff] }
 0x737   : > { %v6226_v12 = vsel %vm636_vm2, %v18660_v13, %v18659_v59  ;;  %v6227_v50 = vsel %vm636_vm2, %v18662_v8, %v18661_v45  ;;  %v6551_v59 = vcombine.low %v6543_v36, %v6550_v38  ;;  %v18667_v13 = vld [vmem:[#allocation95_spill] sm:$0xff]  ;;  %v18669_v8 = vld [vmem:[#allocation84_spill] sm:$0xff]  ;;  %v18671_v14 = vcombine.high %v18665_v48, %v18665_v48 }
 0x738   : > { %v6228_v26 = vsel %vm636_vm2, %v18665_v48, %v18664_v7  ;;  %v18668_v45 = vrot.slane %v18667_v13, %v12915_v61  ;;  %v10031_v7 = vld [vmem:[%s18666_s27 + $0x20] sm:$0xff]  ;;  %v18673_v36 = vcombine.high %v18669_v8, %v18669_v8  ;;  %v6450_v13 = vcombine.low %v6224_v1, %v6225_v23  ;;  %v7586_v1 = vld [vmem:[%s18666_s27 + $0x18] sm:$0xff] }
 0x739   : > { %v6230_v9 = vsel %vm636_vm2, %v18671_v14, %v18670_v53  ;;  %v15746_v42 = vrot.slane %v6534_v16, 7  ;;  %v15748_v17 = vrot.slane %v6551_v59, 7  ;;  %v11446_v28 = vpack.c.bf16 %v7584_v43, %v7583_v41  ;;  %v7585_v14 = vld [vmem:[%s18666_s27 + $0x10] sm:$0xff]  ;;  %7222 = vrot.lane.b32.xlu1 %v7153_v56, %s12138_s25 }
 0x73a   : > { %v6229_v30 = vsel %vm636_vm2, %v18669_v8, %v18668_v45  ;;  %v6231_v38 = vsel %vm636_vm2, %v18673_v36, %v18672_v32  ;;  %v6451_v45 = vcombine.low %v6226_v12, %v6227_v50  ;;  %v6458_v52 = vrot.slane %v6450_v13, %v12703_v40  ;;  %7220 = vrot.lane.b32.xlu0 %v7151_v39, %s12138_s25  ;;  %v10033_v50 = vld [vmem:[%s18666_s27 + $0x30] sm:$0xff] }
 0x73b   : > { %v6467_v15 = vcombine.low %v6228_v26, %v6229_v30  ;;  %v6468_v27 = vcombine.low %v6230_v9, %v6231_v38  ;;  %v11454_v53 = vpack.c.bf16 %v10032_v51, %v10031_v7  ;;  %v15763_v23 = vsel %vm636_vm2, %v15746_v42, %v15748_v17  ;;  %v10034_v26 = vld [vmem:[%s18666_s27 + $0x38] sm:$0xff]  ;;  %11447 = vmatprep.subr.bf16.mxu0 %v11446_v28  ;;  %v18699_v56 = vld [vmem:[#allocation109_spill] sm:$0xff] }
 0x73c   : > { %v6465_v48 = vrot.slane %v6451_v45, %v12703_v40  ;;  %v7139_v41 = vrot.slane %v15462_v57, 1  ;;  %11449 = vmatpush3.bf16.msra.mxu0 %v11446_v28  ;;  %v11450_v16 = vpack.c.bf16 %v7586_v1, %v7585_v14  ;;  %v15786_v8 = vsel %vm636_vm2, 0.0, %v15574_v25  ;;  %v18675_v9 = vld [vmem:[#allocation103_spill] sm:$0xff]  ;;  %v18677_v36 = vld [vmem:[#allocation86_spill] sm:$0xff] }
 0x73d   : > { %v6475_v12 = vrot.slane %v6467_v15, %v12703_v40  ;;  %v6482_v51 = vrot.slane %v6468_v27, %v12703_v40  ;;  %11455 = vmatprep.subr.bf16.mxu1 %v11454_v53  ;;  %v15780_v27 = vrot.slane %v15601_v60, %v12910_v63  ;;  %18674 = vst [vmem:[#allocation54_spill] sm:$0xff] %v15786_v8  ;;  %v18678_v25 = vld [vmem:[#allocation106_spill] sm:$0xff] }
 0x73e   : > { %v6466_v43 = vcombine.low %v6458_v52, %v6465_v48  ;;  %11457 = vmatpush3.bf16.msra.mxu1 %v11454_v53  ;;  %v7141_v30 = vsel %vm2911_vm13, %v7139_v41, %v7140_v54  ;;  %v11458_v52 = vpack.c.bf16 %v10034_v26, %v10033_v50  ;;  %7320 = vrot.lane.b32.xlu1 %v15786_v8, %s12136_s22  ;;  %v18680_v45 = vld [vmem:[#allocation90_spill] sm:$0xff]  ;;  %v18685_v26 = vld [vmem:[#allocation105_spill] sm:$0xff] }
 0x73f   : > { %v6483_v15 = vcombine.low %v6475_v12, %v6482_v51  ;;  %7406 = vrot.lane.b32.xlu0 %v7141_v30, %s12139_s20  ;;  %v18676_v32 = vrot.slane %v18675_v9, %v12915_v61  ;;  %v18679_v13 = vrot.slane %v18678_v25, %v12915_v61  ;;  %11451 = vmatprep.subr.bf16.mxu0 %v11450_v16  ;;  %v18681_v53 = vld [vmem:[#allocation18_spill] sm:$0xff]  ;;  %v18683_v12 = vld [vmem:[#allocation20_spill] sm:$0xff] }
 0x740   : > { %v15792_v7 = vrot.slane %v6466_v43, 7  ;;  %11459 = vmatprep.subr.bf16.mxu1 %v11458_v52  ;;  %v18682_v14 = vcombine.high %v18677_v36, %v18677_v36  ;;  %v18684_v51 = vcombine.high %v18680_v45, %v18680_v45  ;;  %v18686_v41 = vrot.slane %v18685_v26, %v12915_v61  ;;  %v18687_v43 = vld [vmem:[#allocation89_spill] sm:$0xff]  ;;  %11453 = vmatpush3.bf16.msra.mxu0 %v11450_v16 }
 0x741   : > { %v15794_v28 = vrot.slane %v6483_v15, 7  ;;  %v6248_v38 = vsel %vm636_vm2, %v18677_v36, %v18676_v32  ;;  %v6249_v48 = vsel %vm636_vm2, %v18680_v45, %v18679_v13  ;;  %v18688_v9 = vcombine.high %v15581_v10, %v15581_v10 }
 0x742   : > { %v6250_v1 = vsel %vm636_vm2, %v18682_v14, %v18681_v53  ;;  %v6251_v50 = vsel %vm636_vm2, %v18684_v51, %v18683_v12  ;;  %v6252_v15 = vsel %vm636_vm2, %v18687_v43, %v18686_v41  ;;  %11461 = vmatpush3.bf16.msra.mxu1 %v11458_v52  ;;  %v18689_v13 = vcombine.high %v15562_v62, %v15562_v62  ;;  %v18690_v14 = vld [vmem:[#allocation19_spill] sm:$0xff]  ;;  %v18692_v51 = vld [vmem:[#allocation92_spill] sm:$0xff]  ;;  %v18693_v41 = vld [vmem:[#allocation21_spill] sm:$0xff] }
 0x743   : > { %v15825_v32 = vrot.slane %v18688_v9, %v12915_v61  ;;  %v15832_v25 = vsel %vm636_vm2, %v15792_v7, %v15794_v28  ;;  %v7143_v53 = vsel %vm2911_vm13, %v7140_v54, %v15655_v34  ;;  %v18691_v12 = vrot.slane %v18690_v14, %v12915_v61  ;;  %7212 = vrot.lane.b32.xlu0 %v7141_v30, %s12138_s25  ;;  %v18695_v9 = vld [vmem:[#allocation22_spill] sm:$0xff] }
 0x744   : > { %v15838_v45 = vrot.slane %v18689_v13, %v12915_v61  ;;  %v18694_v16 = vcombine.high %v18687_v43, %v18687_v43  ;;  %7408 = vrot.lane.b32.xlu1 %v7143_v53, %s12139_s20  ;;  %v18696_v34 = vcombine.high %v18692_v51, %v18692_v51  ;;  %v6654_v13 = vcombine.low %v6248_v38, %v6249_v48  ;;  %v18701_v48 = vld [vmem:[#allocation98_spill] sm:$0xff] }
 0x745   : > { %v6253_v26 = vsel %vm636_vm2, %v18692_v51, %v18691_v12  ;;  %v6655_v14 = vcombine.low %v6250_v1, %v6251_v50  ;;  %v18697_v12 = vcombine.high %v15524_v46, %v15524_v46  ;;  %v15867_v43 = vsel %vm636_vm2, %v15488_v5, 0.0  ;;  %v18702_v50 = vld [vmem:[#allocation111_spill] sm:$0xff] }
 0x746   : > { %v6254_v52 = vsel %vm636_vm2, %v18694_v16, %v18693_v41  ;;  %v6255_v54 = vsel %vm636_vm2, %v18696_v34, %v18695_v9  ;;  %18698 = vst [vmem:[#allocation60_spill] sm:$0xff] %v15867_v43  ;;  %v6671_v41 = vcombine.low %v6252_v15, %v6253_v26  ;;  %v6662_v16 = vrot.slane %v6654_v13, %v12703_v40  ;;  %v18704_v9 = vld [vmem:[#allocation100_spill] sm:$0xff] }
 0x747   : > { %v15863_v36 = vrot.slane %v18697_v12, %v12910_v63  ;;  %v6672_v30 = vcombine.low %v6254_v52, %v6255_v54  ;;  %v6669_v51 = vrot.slane %v6655_v14, %v12703_v40  ;;  %v18700_v38 = vrot.slane %v18699_v56, %v12915_v61  ;;  %v18705_v26 = vld [vmem:[#allocation116_spill] sm:$0xff]  ;;  %v18707_v56 = vld [vmem:[#allocation25_spill] sm:$0xff]  ;;  %7330 = vrot.lane.b32.xlu0 %v15519_v22, %s12136_s22 }
 0x748   : > { %v18703_v46 = vrot.slane %v18702_v50, %v12915_v61  ;;  %v6679_v5 = vrot.slane %v6671_v41, %v12703_v40  ;;  %v18706_v52 = vcombine.high %v18701_v48, %v18701_v48  ;;  %v18708_v13 = vcombine.high %v18704_v9, %v18704_v9  ;;  %7214 = vrot.lane.b32.xlu1 %v7143_v53, %s12138_s25 }
 0x749   : > { %v6240_v1 = vsel %vm636_vm2, %v18701_v48, %v18700_v38  ;;  %v6686_v15 = vrot.slane %v6672_v30, %v12703_v40  ;;  %v15895_v12 = vrot.slane %v15867_v43, 1  ;;  %v6670_v41 = vcombine.low %v6662_v16, %v6669_v51  ;;  %v18709_v30 = vld [vmem:[#allocation113_spill] sm:$0xff]  ;;  %v18711_v48 = vld [vmem:[#allocation99_spill] sm:$0xff]  ;;  %v18717_v16 = vld [vmem:[#allocation122_spill] sm:$0xff] }
 0x74a   : > { %v6241_v34 = vsel %vm636_vm2, %v18704_v9, %v18703_v46  ;;  %v6242_v54 = vsel %vm636_vm2, %v18706_v52, %v18705_v26  ;;  %v6243_v14 = vsel %vm636_vm2, %v18708_v13, %v18707_v56  ;;  %v18710_v38 = vrot.slane %v18709_v30, %v12915_v61  ;;  %v18712_v46 = vld [vmem:[#allocation114_spill] sm:$0xff]  ;;  %v18714_v26 = vld [vmem:[#allocation101_spill] sm:$0xff]  ;;  %v18715_v56 = vld [vmem:[#allocation120_spill] sm:$0xff] }
 0x74b   : > { %v18713_v9 = vrot.slane %v18712_v46, %v12915_v61  ;;  %v6687_v53 = vcombine.low %v6679_v5, %v6686_v15  ;;  %v18716_v13 = vcombine.high %v18711_v48, %v18711_v48  ;;  %v18718_v51 = vcombine.high %v18714_v26, %v18714_v26  ;;  %v18719_v15 = vld [vmem:[#allocation123_spill] sm:$0xff]  ;;  %8014 = vrot.lane.b32.xlu0 %v15867_v43, %s12136_s22  ;;  %v18753_v43 = vld [vmem:[#allocation117_spill] sm:$0xff] }
 0x74c   : > { %v6244_v50 = vsel %vm636_vm2, %v18711_v48, %v18710_v38  ;;  %v6586_v38 = vcombine.low %v6240_v1, %v6241_v34  ;;  %v15919_v39 = vrot.slane %v6670_v41, 7  ;;  %v6587_v46 = vcombine.low %v6242_v54, %v6243_v14  ;;  %8062 = vrot.lane.b32.xlu1 %v15895_v12, %s12139_s20 }
 0x74d   : > { %v6245_v52 = vsel %vm636_vm2, %v18714_v26, %v18713_v9  ;;  %v6246_v59 = vsel %vm636_vm2, %v18716_v13, %v18715_v56  ;;  %v6247_v30 = vsel %vm636_vm2, %v18718_v51, %v18717_v16  ;;  %v15921_v9 = vrot.slane %v6687_v53, 7  ;;  %v18721_v56 = vld [vmem:[#allocation107_spill] sm:$0xff]  ;;  %v18724_v16 = vld [vmem:[#allocation108_spill] sm:$0xff] }
 0x74e   : > { %v6603_v6 = vcombine.low %v6244_v50, %v6245_v52  ;;  %v6604_v57 = vcombine.low %v6246_v59, %v6247_v30  ;;  %v6594_v5 = vrot.slane %v6586_v38, %v12703_v40  ;;  %v18720_v48 = vrot.slane %v18719_v15, %v12915_v61  ;;  %v18732_v15 = vld [vmem:[#allocation125_spill] sm:$0xff] }
 0x74f   : > { %v18723_v26 = vrot.slane %v18722_v58, %v12915_v61  ;;  %v6601_v59 = vrot.slane %v6587_v46, %v12703_v40  ;;  %v18725_v14 = vcombine.high %v15601_v60, %v15601_v60  ;;  %v5851_v41 = vcombine.high %v15607_v47, %v15607_v47  ;;  %v18731_v46 = vld [vmem:[#allocation23_spill] sm:$0xff]  ;;  %7322 = vrot.lane.b32.xlu0 %v15598_v31, %s12136_s22 }
 0x750   : > { %v6264_v13 = vsel %vm636_vm2, %v18721_v56, %v18720_v48  ;;  %v6611_v34 = vrot.slane %v6603_v6, %v12703_v40  ;;  %v6618_v54 = vrot.slane %v6604_v57, %v12703_v40  ;;  %v15952_v50 = vsel %vm636_vm2, %v15919_v39, %v15921_v9 }
 0x751   : > { %v6265_v1 = vsel %vm636_vm2, %v18724_v16, %v18723_v26  ;;  %v15945_v58 = vrot.slane %v18725_v14, %v12910_v63  ;;  %v18726_v6 = vcombine.high %v18721_v56, %v18721_v56  ;;  %v15961_v52 = vsel %vm636_vm2, 0.0, %v15546_v35  ;;  %v18751_v56 = vld [vmem:[#allocation43_spill] sm:$0xff] }
 0x752   : > { %18727 = vst [vmem:[#allocation42_spill] sm:$0xff] %v15961_v52  ;;  %v15965_v63 = vsel %vm636_vm2, %v15576_v19, 0.0  ;;  %v6602_v60 = vcombine.low %v6594_v5, %v6601_v59  ;;  %v6619_v53 = vcombine.low %v6611_v34, %v6618_v54  ;;  %v18729_v51 = vcombine.high %v18724_v16, %v18724_v16  ;;  %v18734_v19 = vld [vmem:[#allocation110_spill] sm:$0xff]  ;;  %7344 = vrot.lane.b32.xlu1 %v15961_v52, %s12136_s22  ;;  %v18736_v16 = vld [vmem:[#allocation128_spill] sm:$0xff] }
 0x753   : > { %v6266_v57 = vsel %vm636_vm2, %v18726_v6, %v15162_v4  ;;  %18728 = vst [vmem:[#allocation32_spill] sm:$0xff] %v15965_v63  ;;  %v6790_v38 = vcombine.low %v6264_v13, %v6265_v1  ;;  %v18730_v4 = vrot.slane %v15094_v21, %v12915_v61  ;;  %v18733_v48 = vrot.slane %v18732_v15, %v12915_v61  ;;  %v18738_v34 = vld [vmem:[#allocation130_spill] sm:$0xff] }
 0x754   : > { %v6267_v30 = vsel %vm636_vm2, %v18729_v51, %v15170_v37  ;;  %v15988_v37 = vrot.slane %v6602_v60, 7  ;;  %v15990_v21 = vrot.slane %v6619_v53, 7  ;;  %v7170_v26 = vrot.slane %v15519_v22, 1  ;;  %8010 = vrot.lane.b32.xlu0 %v15965_v63, %s12136_s22 }
 0x755   : > { %v6268_v35 = vsel %vm636_vm2, %v18731_v46, %v18730_v4  ;;  %v6269_v5 = vsel %vm636_vm2, %v18734_v19, %v18733_v48  ;;  %v6791_v13 = vcombine.low %v6266_v57, %v6267_v30  ;;  %v18737_v1 = vcombine.high %v18731_v46, %v18731_v46 }
 0x756   : > { %18735 = vst [vmem:[#allocation45_spill] sm:$0xff] %v15990_v21  ;;  %v18739_v54 = vcombine.high %v18734_v19, %v18734_v19  ;;  %v6807_v6 = vcombine.low %v6268_v35, %v6269_v5  ;;  %v16004_v60 = vrot.slane %v15965_v63, 1  ;;  %v16009_v57 = vsel %vm636_vm2, %v15988_v37, %v15990_v21  ;;  %v18754_v63 = vld [vmem:[#allocation129_spill] sm:$0xff] }
 0x757   : > { %v6270_v59 = vsel %vm636_vm2, %v18737_v1, %v18736_v16  ;;  %v6798_v53 = vrot.slane %v6790_v38, %v12703_v40  ;;  %v6805_v51 = vrot.slane %v6791_v13, %v12703_v40  ;;  %v18740_v30 = vcombine.high %v15610_v20, %v15610_v20  ;;  %v18741_v16 = vld [vmem:[#allocation26_spill] sm:$0xff]  ;;  %v18756_v21 = vld [vmem:[#allocation121_spill] sm:$0xff] }
 0x758   : > { %v6271_v14 = vsel %vm636_vm2, %v18739_v54, %v18738_v34  ;;  %v5853_v46 = vcombine.high %v15863_v36, %v15863_v36  ;;  %v5854_v48 = vcombine.high %v15945_v58, %v15945_v58  ;;  %8058 = vrot.lane.b32.xlu1 %v16004_v60, %s12139_s20  ;;  %v6815_v5 = vrot.slane %v6807_v6, %v12703_v40  ;;  %v18744_v54 = vld [vmem:[#allocation127_spill] sm:$0xff] }
 0x759   : > { %v6159_v4 = vrot.slane %v18740_v30, %v12915_v61  ;;  %v6808_v15 = vcombine.low %v6270_v59, %v6271_v14  ;;  %v6806_v19 = vcombine.low %v6798_v53, %v6805_v51  ;;  %v18742_v1 = vrot.slane %v18741_v16, %v12915_v61  ;;  %v18743_v59 = vld [vmem:[#allocation115_spill] sm:$0xff]  ;;  %v18746_v30 = vld [vmem:[#allocation118_spill] sm:$0xff]  ;;  %7968 = vrot.lane.b32.xlu0 %v15895_v12, %s12138_s25 }
 0x75a   : > { %v18745_v14 = vrot.slane %v18744_v54, %v12915_v61  ;;  %v7173_v35 = vsel %vm2911_vm13, %v7170_v26, %v15895_v12  ;;  %v18747_v53 = vld [vmem:[#allocation34_spill] sm:$0xff]  ;;  %v18748_v6 = vcombine.high %v18743_v59, %v18743_v59  ;;  %v18750_v16 = vcombine.high %v18746_v30, %v18746_v30 }
 0x75b   : > { %v6822_v13 = vrot.slane %v6808_v15, %v12703_v40  ;;  %v6256_v34 = vsel %vm636_vm2, %v18743_v59, %v18742_v1  ;;  %v18749_v15 = vld [vmem:[#allocation135_spill] sm:$0xff]  ;;  %v18752_v54 = vrot.slane %v18751_v56, %v12915_v61  ;;  %v18755_v24 = vrot.slane %v18754_v63, %v12915_v61  ;;  %v18761_v12 = vld [vmem:[#allocation30_spill] sm:$0xff] }
 0x75c   : > { %v6257_v38 = vsel %vm636_vm2, %v18746_v30, %v18745_v14  ;;  %v6258_v51 = vsel %vm636_vm2, %v18748_v6, %v18747_v53  ;;  %v6259_v1 = vsel %vm636_vm2, %v18750_v16, %v18749_v15  ;;  %v18757_v53 = vld [vmem:[#allocation134_spill] sm:$0xff]  ;;  %v18758_v6 = vcombine.high %v18753_v43, %v18753_v43  ;;  %7432 = vrot.lane.b32.xlu1 %v7173_v35, %s12139_s20 }
 0x75d   : > { %v6260_v14 = vsel %vm636_vm2, %v18753_v43, %v18752_v54  ;;  %v6823_v22 = vcombine.low %v6815_v5, %v6822_v13  ;;  %v6261_v59 = vsel %vm636_vm2, %v18756_v21, %v18755_v24  ;;  %v18759_v56 = vcombine.high %v18756_v21, %v18756_v21  ;;  %7964 = vrot.lane.b32.xlu0 %v16004_v60, %s12138_s25 }
 0x75e   : > { %v6262_v30 = vsel %vm636_vm2, %v18758_v6, %v18757_v53  ;;  %v6722_v63 = vcombine.low %v6256_v34, %v6257_v38  ;;  %v6723_v5 = vcombine.low %v6258_v51, %v6259_v1  ;;  %v6739_v24 = vcombine.low %v6260_v14, %v6261_v59  ;;  %v18764_v1 = vld [vmem:[#allocation35_spill] sm:$0xff] }
 0x75f   : > { %v6263_v15 = vsel %vm636_vm2, %v18759_v56, %v15367_v44  ;;  %v6107_v13 = vrot.slane %v5851_v41, %v12915_v61  ;;  %v16077_v16 = vrot.slane %v6806_v19, 7  ;;  %v16079_v43 = vrot.slane %v6823_v22, 7 }
 0x760   : > { %v6740_v54 = vcombine.low %v6262_v30, %v6263_v15  ;;  %v7169_v53 = vrot.slane %v15615_v0, 1  ;;  %v6730_v21 = vrot.slane %v6722_v63, %v12703_v40  ;;  %v6737_v44 = vrot.slane %v6723_v5, %v12703_v40  ;;  %7238 = vrot.lane.b32.xlu1 %v7173_v35, %s12138_s25 }
 0x761   : > { %v18760_v6 = vrot.slane %v15459_v49, %v12915_v61  ;;  %v6111_v34 = vrot.slane %v5853_v46, %v12915_v61  ;;  %v16093_v22 = vsel %vm636_vm2, %v16077_v16, %v16079_v43  ;;  %v6747_v41 = vrot.slane %v6739_v24, %v12703_v40 }
 0x762   : > { %18762 = vst [vmem:[#allocation37_spill] sm:$0xff] %v16093_v22  ;;  %v6754_v19 = vrot.slane %v6740_v54, %v12703_v40  ;;  %v7171_v49 = vsel %vm2911_vm13, %v7169_v53, %v7170_v26  ;;  %v6738_v51 = vcombine.low %v6730_v21, %v6737_v44  ;;  %v18763_v46 = vrot.slane %v15581_v10, %v12915_v61  ;;  %v18769_v21 = vld [vmem:[#allocation126_spill] sm:$0xff] }
 0x763   : > { %v6280_v38 = vsel %vm636_vm2, %v18761_v12, %v18760_v6  ;;  %v18765_v30 = vcombine.high %v18761_v12, %v18761_v12  ;;  %v18766_v35 = vcombine.high %v18764_v1, %v18764_v1  ;;  %v7160_v63 = vrot.slane %v15598_v31, 1  ;;  %v18771_v6 = vld [vmem:[#allocation28_spill] sm:$0xff]  ;;  %7430 = vrot.lane.b32.xlu0 %v7171_v49, %s12139_s20  ;;  %v16139_v12 = vpop.permute.xlu0 %7288 }
 0x764   : > { %v6281_v14 = vsel %vm636_vm2, %v18764_v1, %v18763_v46  ;;  %v6755_v59 = vcombine.low %v6747_v41, %v6754_v19  ;;  %v16119_v10 = vsel %vm636_vm2, 0.0, %v15627_v29  ;;  %v16121_v5 = vrot.slane %v6738_v51, 7 }
 0x765   : > { %v6282_v56 = vsel %vm636_vm2, %v18765_v30, %v15668_v3  ;;  %v6283_v26 = vsel %vm636_vm2, %v18766_v35, %v15825_v32  ;;  %v6926_v15 = vcombine.low %v6280_v38, %v6281_v14  ;;  %18767 = vst [vmem:[#allocation52_spill] sm:$0xff] %v16119_v10  ;;  %v18768_v53 = vrot.slane %v15562_v62, %v12915_v61 }
 0x766   : > { %v6927_v24 = vcombine.low %v6282_v56, %v6283_v26  ;;  %v16123_v54 = vrot.slane %v6755_v59, 7  ;;  %v18770_v44 = vrot.slane %v15610_v20, %v12915_v61  ;;  %7336 = vrot.lane.b32.xlu1 %v16119_v10, %s12136_s22  ;;  %v18772_v62 = vcombine.high %v18769_v21, %v18769_v21  ;;  %v18777_v26 = vld [vmem:[#allocation131_spill] sm:$0xff] }
 0x767   : > { %v6934_v3 = vrot.slane %v6926_v15, %v12703_v40  ;;  %v6284_v32 = vsel %vm636_vm2, %v18769_v21, %v18768_v53  ;;  %v18773_v20 = vcombine.high %v18771_v6, %v18771_v6  ;;  %v6115_v51 = vrot.slane %v15780_v27, %v12915_v61  ;;  %v18779_v53 = vld [vmem:[#allocation133_spill] sm:$0xff]  ;;  %7236 = vrot.lane.b32.xlu0 %v7171_v49, %s12138_s25 }
 0x768   : > { %v6285_v29 = vsel %vm636_vm2, %v18771_v6, %v18770_v44  ;;  %v6941_v38 = vrot.slane %v6927_v24, %v12703_v40  ;;  %v6286_v41 = vsel %vm636_vm2, %v18772_v62, %v15838_v45  ;;  %v6119_v46 = vrot.slane %v15945_v58, %v12915_v61  ;;  %v18782_v6 = vld [vmem:[#allocation132_spill] sm:$0xff] }
 0x769   : > { %v6287_v19 = vsel %vm636_vm2, %v18773_v20, %v6159_v4  ;;  %v16158_v1 = vsel %vm636_vm2, %v16121_v5, %v16123_v54  ;;  %v6943_v14 = vcombine.low %v6284_v32, %v6285_v29  ;;  %v18775_v45 = vcombine.high %v15780_v27, %v15780_v27 }
 0x76a   : > { %18774 = vst [vmem:[#allocation53_spill] sm:$0xff] %v16158_v1  ;;  %v6127_v30 = vrot.slane %v5854_v48, %v12915_v61  ;;  %v6942_v4 = vcombine.low %v6934_v3, %v6941_v38  ;;  %v6944_v56 = vcombine.low %v6286_v41, %v6287_v19  ;;  %v7163_v35 = vsel %vm2911_vm13, %v7160_v63, %v16004_v60  ;;  %v16198_v38 = vpop.permute.xlu0 %7298 }
 0x76b   : > { %v6123_v59 = vrot.slane %v18775_v45, %v12915_v61  ;;  %v18776_v58 = vrot.slane %v15607_v47, %v12915_v61  ;;  %v18778_v24 = vrot.slane %v15863_v36, %v12915_v61  ;;  %v18780_v48 = vcombine.high %v18777_v26, %v18777_v26  ;;  %7424 = vrot.lane.b32.xlu1 %v7163_v35, %s12139_s20 }
 0x76c   : > { %v7159_v21 = vrot.slane %v15786_v8, 1  ;;  %v6951_v47 = vrot.slane %v6943_v14, %v12703_v40  ;;  %v6958_v60 = vrot.slane %v6944_v56, %v12703_v40  ;;  %v18781_v61 = vcombine.high %v18779_v53, %v18779_v53 }
 0x76d   : > { %v6272_v15 = vsel %vm636_vm2, %v18777_v26, %v18776_v58  ;;  %v6273_v27 = vsel %vm636_vm2, %v18779_v53, %v18778_v24  ;;  %v6274_v3 = vsel %vm636_vm2, %v18780_v48, %v6107_v13  ;;  %v6276_v13 = vsel %vm636_vm2, %v18782_v6, %v6115_v51 }
 0x76e   : > { %v6275_v36 = vsel %vm636_vm2, %v18781_v61, %v6111_v34  ;;  %v6858_v32 = vcombine.low %v6272_v15, %v6273_v27  ;;  %v6277_v29 = vsel %vm636_vm2, %v15229_v2, %v6119_v46  ;;  %v16196_v49 = vsel %vm636_vm2, %v15548_v11, 0.0  ;;  %v16236_v15 = vpop.permute.xlu0 %7998 }
 0x76f   : > { %v6859_v44 = vcombine.low %v6274_v3, %v6275_v36  ;;  %18783 = vst [vmem:[#allocation56_spill] sm:$0xff] %v16196_v49  ;;  %v6959_v62 = vcombine.low %v6951_v47, %v6958_v60  ;;  %v18784_v41 = vcombine.high %v18782_v6, %v18782_v6  ;;  %v18785_v20 = vcombine.high %v15229_v2, %v15229_v2 }
 0x770   : > { %v7161_v51 = vsel %vm2911_vm13, %v7159_v21, %v7160_v63  ;;  %v6866_v46 = vrot.slane %v6858_v32, %v12703_v40  ;;  %v6875_v14 = vcombine.low %v6276_v13, %v6277_v29  ;;  %7230 = vrot.lane.b32.xlu1 %v7163_v35, %s12138_s25  ;;  %v16213_v45 = vrot.slane %v6942_v4, 7 }
 0x771   : > { %v6278_v34 = vsel %vm636_vm2, %v18784_v41, %v6123_v59  ;;  %v6279_v19 = vsel %vm636_vm2, %v18785_v20, %v6127_v30  ;;  %v6873_v11 = vrot.slane %v6859_v44, %v12703_v40  ;;  %7422 = vrot.lane.b32.xlu0 %v7161_v51, %s12139_s20  ;;  %v16215_v56 = vrot.slane %v6959_v62, 7  ;;  %v16220_v30 = vpop.permute.xlu1 %11606 }
 0x772   : > { %v6876_v59 = vcombine.low %v6278_v34, %v6279_v19  ;;  %v16218_v2 = vrot.slane %v16196_v49, 1  ;;  %v6883_v35 = vrot.slane %v6875_v14, %v12703_v40  ;;  %v16231_v4 = vsel %vm636_vm2, %v15629_v55, 0.0  ;;  %v7995_v21 = vpop.permute.xlu0 %7994 }
 0x773   : > { %v6874_v58 = vcombine.low %v6866_v46, %v6873_v11  ;;  %v16225_v63 = vsel %vm636_vm2, %v16213_v45, %v16215_v56  ;;  %18787 = vst [vmem:[#allocation59_spill] sm:$0xff] %v16231_v4  ;;  %v7182_v53 = vrot.slane %v16231_v4, 1  ;;  %v16274_v44 = vsel %vm636_vm2, %v15748_v17, 0.0 }
 0x774   : > { %18786 = vst [vmem:[#allocation57_spill] sm:$0xff] %v16225_v63  ;;  %v6890_v26 = vrot.slane %v6876_v59, %v12703_v40  ;;  %8070 = vrot.lane.b32.xlu1 %v16218_v2, %s12139_s20  ;;  %v7190_v40 = vrot.slane %v15571_v33, 1  ;;  %v7180_v6 = vrot.slane %v15660_v18, 1  ;;  %v16279_v13 = vsel %vm636_vm2, 0.0, %v15746_v42 }
 0x775   : > { %7228 = vrot.lane.b32.xlu0 %v7161_v51, %s12138_s25  ;;  %v16239_v27 = vrot.slane %v6874_v58, 7  ;;  %v16245_v55 = vpop.permute.xlu1 %7296  ;;  %v16292_v17 = vsel %vm636_vm2, 0.0, %v15792_v7  ;;  %v11608_v20 = vunpack.i.l.bf16 %v16220_v30  ;;  %v7189_v19 = vrot.slane %v15961_v52, 1 }
 0x776   : > { %v6891_v24 = vcombine.low %v6883_v35, %v6890_v26  ;;  %v7193_v47 = vsel %vm2911_vm13, %v7190_v40, %v16218_v2  ;;  %v16262_v61 = vpop.permute.xlu0 %7952  ;;  %v7183_v41 = vsel %vm2911_vm13, %v7180_v6, %v7182_v53  ;;  %v16318_v35 = vsel %vm636_vm2, %v15794_v28, 0.0 }
 0x777   : > { %v7487_v46 = vsel %vm7486_vm11, 0.0, %v11608_v20  ;;  %v7191_v11 = vsel %vm2911_vm13, %v7189_v19, %v7190_v40  ;;  %v7135_v28 = vrot.slane %v15763_v23, 1  ;;  %v7155_v31 = vrot.slane %v15952_v50, 1 }
 0x778   : > { %v16241_v48 = vrot.slane %v6891_v24, 7  ;;  %8066 = vrot.lane.b32.xlu1 %v7182_v53, %s12139_s20  ;;  %v7518_v14 = vsel %vm3011_vm15, %v7487_v46, %v16139_v12  ;;  %v7179_v24 = vrot.slane %v16119_v10, 1  ;;  %v7137_v12 = vrot.slane %v16274_v44, 1 }
 0x779   : > { %7346 = vrot.lane.b32.xlu0 %v15571_v33, %s12136_s22  ;;  %v7291_v60 = vpop.permute.xlu1 %7290 }
 0x77a   : > { %v16252_v3 = vsel %vm636_vm2, %v16239_v27, %v16241_v48  ;;  %v16270_v32 = vpop.permute.xlu0 %7204 }
 0x77b   : > { %18788 = vst [vmem:[#allocation55_spill] sm:$0xff] %v16252_v3 }
 0x77c   : > { %7448 = vrot.lane.b32.xlu1 %v7193_v47, %s12139_s20 }
 0x77d   : > { %8022 = vrot.lane.b32.xlu0 %v16196_v49, %s12136_s22  ;;  %v16266_v36 = vpop.permute.xlu1 %8046 }
 0x77e   : > { %v16287_v62 = vpop.permute.xlu0 %7948 }
 0x780   : > { %7254 = vrot.lane.b32.xlu1 %v7193_v47, %s12138_s25  ;;  %v7181_v47 = vsel %vm2911_vm13, %v7179_v24, %v7180_v6  ;;  %v7127_v24 = vrot.slane %v16318_v35, 1 }
 0x781   : > { %7338 = vrot.lane.b32.xlu0 %v15660_v18, %s12136_s22  ;;  %v16285_v29 = vpop.permute.xlu1 %7312 }
 0x782   : > { %v16299_v34 = vpop.permute.xlu0 %7398 }
 0x784   : > { %7302 = vrot.lane.b32.xlu1 %v15763_v23, %s12136_s22 }
 0x785   : > { %8018 = vrot.lane.b32.xlu0 %v16231_v4, %s12136_s22  ;;  %v16297_v42 = vpop.permute.xlu1 %7206 }
 0x786   : > { %v16305_v51 = vpop.permute.xlu0 %7196 }
 0x788   : > { %8000 = vrot.lane.b32.xlu1 %v16274_v44, %s12136_s22 }
 0x789   : > { %7300 = vrot.lane.b32.xlu0 %v16279_v13, %s12136_s22  ;;  %v8043_v7 = vpop.permute.xlu1 %8042 }
 0x78a   : > { %v7391_v58 = vpop.permute.xlu0 %7390 }
 0x78b   : > { %v7551_v26 = vsel %vm7550_vm12, %v7518_v14, %v7391_v58 }
 0x78c   : > { %7440 = vrot.lane.b32.xlu1 %v7183_v41, %s12139_s20  ;;  %10886 = vmatprep.mubr.msk.f32.mxu0 %vm484_vm1, %v7551_v26  ;;  %v8154_v52 = vrot.slane %v7551_v26, 1  ;;  %v7125_v26 = vrot.slane %v15832_v25, 1 }
 0x78d   : > { %7292 = vrot.lane.b32.xlu0 %v16292_v17, %s12136_s22  ;;  %v16314_v59 = vpop.permute.xlu1 %7400 }
 0x78e   : > { %v16329_v40 = vpop.permute.xlu0 %7314 }
 0x78f   : > { %18789 = vst [vmem:[#allocation41_spill] sm:$0xff] %v16329_v40 }
 0x790   : > { %7246 = vrot.lane.b32.xlu1 %v7183_v41, %s12138_s25  ;;  %v11609_v41 = vunpack.i.h.bf16 %v16220_v30  ;;  %v7519_v30 = vsel %vm3011_vm15, %v7487_v46, %v7291_v60 }
 0x791   : > { %7972 = vrot.lane.b32.xlu0 %v7182_v53, %s12138_s25  ;;  %v16327_v53 = vpop.permute.xlu1 %7304 }
 0x792   : > { %v16338_v19 = vpop.permute.xlu0 %8006  ;;  %v8090_v14 = vsel %vm7486_vm11, 0.0, %v11609_v41 }
 0x793   : > { %v8106_v6 = vsel %vm3011_vm15, %v8090_v14, %v7995_v21  ;;  %v7134_v21 = vrot.slane %v16279_v13, 1 }
 0x794   : > { %7294 = vrot.lane.b32.xlu1 %v15832_v25, %s12136_s22  ;;  %v8122_v58 = vsel %vm7550_vm12, %v8106_v6, %v8043_v7 }
 0x795   : > { %7446 = vrot.lane.b32.xlu0 %v7191_v11, %s12139_s20  ;;  %v16336_v20 = vpop.permute.xlu1 %7198  ;;  %v7136_v41 = vsel %vm2911_vm13, %v7134_v21, %v7135_v28 }
 0x796   : > { %v16348_v33 = vpop.permute.xlu0 %7306 }
 0x798   : > { %7996 = vrot.lane.b32.xlu1 %v16318_v35, %s12136_s22 }
 0x799   : > { %7252 = vrot.lane.b32.xlu0 %v7191_v11, %s12138_s25  ;;  %v7138_v11 = vsel %vm2911_vm13, %v7135_v28, %v7137_v12  ;;  %v7393_v49 = vpop.permute.xlu1 %7392  ;;  %v7124_v28 = vrot.slane %v16292_v17, 1 }
 0x79a   : > { %v7552_v10 = vsel %vm7550_vm12, %v7519_v30, %v7393_v49 }
 0x79b   : > { %v8155_v4 = vrot.slane %v7552_v10, 1  ;;  %10887 = vmatmul.mubr.msk.f32.vlgmr.msra.gmra.mrb[28].mxu0 %vm484_vm1, %v7552_v10  ;;  %v16358_v46 = vpop.permute.xlu0 %8002  ;;  %v16368_v10 = vsel %vm636_vm2, 0.0, %v15919_v39  ;;  %v7126_v39 = vsel %vm2911_vm13, %v7124_v28, %v7125_v26 }
 0x79c   : > { %7954 = vrot.lane.b32.xlu1 %v7137_v12, %s12138_s25 }
 0x79d   : > { %7438 = vrot.lane.b32.xlu0 %v7181_v47, %s12139_s20  ;;  %v16355_v60 = vpop.permute.xlu1 %8054  ;;  %v8156_v7 = vsel %vm2911_vm13, %v8154_v52, %v8155_v4 }
 0x79e   : > { %10942 = vmatprep.mubr.msk.f32.mxu1 %vm484_vm1, %v8156_v7  ;;  %v16400_v7 = vsel %vm636_vm2, %v15921_v9, 0.0 }
 0x79f   : > { %18793 = vst [vmem:[#allocation61_spill] sm:$0xff] %v16400_v7  ;;  %v7157_v28 = vrot.slane %v16400_v7, 1 }
 0x7a0   : > { %7210 = vrot.lane.b32.xlu1 %v7138_v11, %s12138_s25 }
 0x7a1   : > { %7244 = vrot.lane.b32.xlu0 %v7181_v47, %s12138_s25  ;;  %v8157_v47 = vrot.slane %v8122_v58, 1  ;;  %v16372_v52 = vpop.permute.xlu1 %7328 }
 0x7a2   : > { %18790 = vst [vmem:[#allocation70_spill] sm:$0xff] %v16372_v52 }
 0x7a3   : > { %v8158_v49 = vsel %vm2911_vm13, %v8155_v4, %v8157_v47  ;;  %v7128_v4 = vsel %vm2911_vm13, %v7125_v26, %v7127_v24 }
 0x7a4   : > { %7950 = vrot.lane.b32.xlu1 %v7127_v24, %s12138_s25  ;;  %10943 = vmatmul.mubr.msk.f32.vlgmr.msra.gmra.mrb[28].mxu1 %vm484_vm1, %v8158_v49 }
 0x7a5   : > { %8048 = vrot.lane.b32.xlu0 %v7137_v12, %s12139_s20  ;;  %v16374_v12 = vpop.permute.xlu0 %7960  ;;  %v16380_v14 = vpop.permute.xlu1 %8050 }
 0x7a6   : > { %18791 = vst [vmem:[#allocation46_spill] sm:$0xff] %v16374_v12 }
 0x7a8   : > { %7402 = vrot.lane.b32.xlu1 %v7136_v41, %s12139_s20 }
 0x7a9   : > { %7316 = vrot.lane.b32.xlu0 %v16368_v10, %s12136_s22  ;;  %v16382_v6 = vpop.permute.xlu0 %7956  ;;  %v16387_v30 = vpop.permute.xlu1 %7416 }
 0x7aa   : > { %18792 = vst [vmem:[#allocation76_spill] sm:$0xff] %v16387_v30 }
 0x7ac   : > { %7202 = vrot.lane.b32.xlu1 %v7128_v4, %s12138_s25 }
 0x7ad   : > { %7208 = vrot.lane.b32.xlu0 %v7136_v41, %s12138_s25  ;;  %v16389_v58 = vpop.permute.xlu0 %7414  ;;  %v16394_v47 = vpop.permute.xlu1 %7222  ;;  %v18795_v41 = vld [vmem:[#allocation45_spill] sm:$0xff] }
 0x7b0   : > { %7394 = vrot.lane.b32.xlu1 %v7126_v39, %s12139_s20 }
 0x7b1   : > { %8044 = vrot.lane.b32.xlu0 %v7127_v24, %s12139_s20  ;;  %v16396_v21 = vpop.permute.xlu0 %7220  ;;  %v16406_v24 = vsel %vm636_vm2, 0.0, %v15988_v37  ;;  %v16410_v26 = vpop.permute.xlu1 %7320  ;;  %v16423_v37 = vsel %vm636_vm2, %v18795_v41, 0.0 }
 0x7b2   : > { %18794 = vst [vmem:[#allocation64_spill] sm:$0xff] %v16410_v26 }
 0x7b4   : > { %7318 = vrot.lane.b32.xlu1 %v15952_v50, %s12136_s22 }
 0x7b5   : > { %7404 = vrot.lane.b32.xlu0 %v7138_v11, %s12139_s20  ;;  %v16412_v11 = vpop.permute.xlu0 %7406 }
 0x7b6   : > { %v16417_v9 = vpop.permute.xlu1 %7408 }
 0x7b8   : > { %8008 = vrot.lane.b32.xlu1 %v16400_v7, %s12136_s22  ;;  %v7158_v7 = vsel %vm2911_vm13, %v7155_v31, %v7157_v28 }
 0x7b9   : > { %7308 = vrot.lane.b32.xlu0 %v16406_v24, %s12136_s22  ;;  %v16419_v49 = vpop.permute.xlu0 %7212 }
 0x7ba   : > { %v16429_v18 = vpop.permute.xlu1 %7214 }
 0x7bc   : > { %7310 = vrot.lane.b32.xlu1 %v16009_v57, %s12136_s22 }
 0x7bd   : > { %7200 = vrot.lane.b32.xlu0 %v7126_v39, %s12138_s25  ;;  %v16431_v52 = vpop.permute.xlu0 %7330  ;;  %v7147_v39 = vrot.slane %v16423_v37, 1 }
 0x7be   : > { %18796 = vst [vmem:[#allocation62_spill] sm:$0xff] %v16431_v52  ;;  %v16436_v0 = vpop.permute.xlu1 %8062  ;;  %v7154_v52 = vrot.slane %v16368_v10, 1 }
 0x7bf   : > { %18797 = vst [vmem:[#allocation63_spill] sm:$0xff] %v16436_v0 }
 0x7c0   : > { %8004 = vrot.lane.b32.xlu1 %v16423_v37, %s12136_s22  ;;  %v7156_v0 = vsel %vm2911_vm13, %v7154_v52, %v7155_v31  ;;  %v16479_v31 = vsel %vm636_vm2, 0.0, %v16121_v5  ;;  %v16497_v5 = vsel %vm636_vm2, %v16079_v43, 0.0 }
 0x7c1   : > { %7396 = vrot.lane.b32.xlu0 %v7128_v4, %s12139_s20  ;;  %v16438_v41 = vpop.permute.xlu0 %8014  ;;  %v16444_v4 = vsel %vm636_vm2, 0.0, %v16077_v16  ;;  %v7145_v16 = vrot.slane %v16009_v57, 1  ;;  %18808 = vst [vmem:[#allocation78_spill] sm:$0xff] %v16479_v31  ;;  %18813 = vst [vmem:[#allocation68_spill] sm:$0xff] %v16497_v5  ;;  %v7177_v43 = vrot.slane %v16497_v5, 1 }
 0x7c2   : > { %18798 = vst [vmem:[#allocation66_spill] sm:$0xff] %v16438_v41  ;;  %18799 = vst [vmem:[#allocation58_spill] sm:$0xff] %v16444_v4 }
 0x7c4   : > { %7962 = vrot.lane.b32.xlu1 %v7157_v28, %s12138_s25  ;;  %v16449_v8 = vpop.permute.xlu1 %7344 }
 0x7c5   : > { %8056 = vrot.lane.b32.xlu0 %v7157_v28, %s12139_s20  ;;  %18800 = vst [vmem:[#allocation72_spill] sm:$0xff] %v16449_v8  ;;  %v16451_v26 = vpop.permute.xlu0 %7322  ;;  %v7144_v8 = vrot.slane %v16406_v24, 1 }
 0x7c6   : > { %18801 = vst [vmem:[#allocation49_spill] sm:$0xff] %v16451_v26 }
 0x7c7   : > { %v7146_v26 = vsel %vm2911_vm13, %v7144_v8, %v7145_v16 }
 0x7c8   : > { %7958 = vrot.lane.b32.xlu1 %v7147_v39, %s12138_s25 }
 0x7c9   : > { %7332 = vrot.lane.b32.xlu0 %v16444_v4, %s12136_s22  ;;  %v16458_v30 = vpop.permute.xlu0 %8010 }
 0x7ca   : > { %v16456_v41 = vpop.permute.xlu1 %8058  ;;  %18803 = vst [vmem:[#allocation51_spill] sm:$0xff] %v16458_v30 }
 0x7cb   : > { %18802 = vst [vmem:[#allocation74_spill] sm:$0xff] %v16456_v41 }
 0x7cc   : > { %7418 = vrot.lane.b32.xlu1 %v7156_v0, %s12139_s20 }
 0x7cd   : > { %8052 = vrot.lane.b32.xlu0 %v7147_v39, %s12139_s20  ;;  %v16467_v52 = vpop.permute.xlu0 %7968 }
 0x7ce   : > { %v16465_v40 = vpop.permute.xlu1 %7432  ;;  %18805 = vst [vmem:[#allocation75_spill] sm:$0xff] %v16467_v52  ;;  %v10103_v52 = vld [vmem:[%s18666_s27 + $0x60] sm:$0xff] }
 0x7cf   : > { %18804 = vst [vmem:[#allocation71_spill] sm:$0xff] %v16465_v40 }
 0x7d0   : > { %7224 = vrot.lane.b32.xlu1 %v7156_v0, %s12138_s25 }
 0x7d1   : > { %7420 = vrot.lane.b32.xlu0 %v7158_v7, %s12139_s20  ;;  %v16474_v30 = vpop.permute.xlu0 %7964 }
 0x7d2   : > { %v16472_v41 = vpop.permute.xlu1 %7238  ;;  %18807 = vst [vmem:[#allocation77_spill] sm:$0xff] %v16474_v30 }
 0x7d3   : > { %18806 = vst [vmem:[#allocation73_spill] sm:$0xff] %v16472_v41 }
 0x7d4   : > { %7410 = vrot.lane.b32.xlu1 %v7146_v26, %s12139_s20 }
 0x7d5   : > { %7226 = vrot.lane.b32.xlu0 %v7158_v7, %s12138_s25  ;;  %v16485_v8 = vpop.permute.xlu0 %7430  ;;  %v7148_v7 = vsel %vm2911_vm13, %v7145_v16, %v7147_v39  ;;  %v10067_v39 = vld [vmem:[%s18666_s27 + $0x40] sm:$0xff]  ;;  %v10068_v16 = vld [vmem:[%s18666_s27 + $0x48] sm:$0xff] }
 0x7d6   : > { %18810 = vst [vmem:[#allocation65_spill] sm:$0xff] %v16485_v8  ;;  %v11462_v8 = vpack.c.bf16 %v10068_v16, %v10067_v39  ;;  %v16528_v39 = vsel %vm636_vm2, %v16123_v54, 0.0 }
 0x7d7   : > { %18818 = vst [vmem:[#allocation93_spill] sm:$0xff] %v16528_v39  ;;  %v7167_v54 = vrot.slane %v16528_v39, 1 }
 0x7d8   : > { %7216 = vrot.lane.b32.xlu1 %v7146_v26, %s12138_s25  ;;  %v16483_v0 = vpop.permute.xlu1 %7336  ;;  %11463 = vmatprep.subr.bf16.mxu0 %v11462_v8 }
 0x7d9   : > { %7324 = vrot.lane.b32.xlu0 %v16479_v31, %s12136_s22  ;;  %18809 = vst [vmem:[#allocation79_spill] sm:$0xff] %v16483_v0  ;;  %v16493_v26 = vpop.permute.xlu0 %7236  ;;  %11465 = vmatpush3.bf16.msra.mxu0 %v11462_v8 }
 0x7da   : > { %18812 = vst [vmem:[#allocation67_spill] sm:$0xff] %v16493_v26 }
 0x7dc   : > { %7334 = vrot.lane.b32.xlu1 %v16093_v22, %s12136_s22 }
 0x7dd   : > { %7412 = vrot.lane.b32.xlu0 %v7148_v7, %s12139_s20  ;;  %v16491_v28 = vpop.permute.xlu1 %7424 }
 0x7de   : > { %18811 = vst [vmem:[#allocation69_spill] sm:$0xff] %v16491_v28  ;;  %v18839_v28 = vmov 0.0  }
 0x7e0   : > { %8016 = vrot.lane.b32.xlu1 %v16497_v5, %s12136_s22  ;;  %v10104_v5 = vld [vmem:[%s18666_s27 + $0x68] sm:$0xff] }
 0x7e1   : > { %7218 = vrot.lane.b32.xlu0 %v7148_v7, %s12138_s25  ;;  %v11470_v16 = vpack.c.bf16 %v10104_v5, %v10103_v52  ;;  %v7175_v52 = vrot.slane %v16093_v22, 1 }
 0x7e2   : > { %v16502_v0 = vpop.permute.xlu1 %7230 }
 0x7e3   : > { %18814 = vst [vmem:[#allocation80_spill] sm:$0xff] %v16502_v0  ;;  %v16504_v40 = vpop.permute.xlu0 %7422  ;;  %11471 = vmatprep.subr.bf16.mxu1 %v11470_v16  ;;  %v7178_v0 = vsel %vm2911_vm13, %v7175_v52, %v7177_v43 }
 0x7e4   : > { %18815 = vst [vmem:[#allocation94_spill] sm:$0xff] %v16504_v40  ;;  %7326 = vrot.lane.b32.xlu1 %v16158_v1, %s12136_s22  ;;  %11473 = vmatpush3.bf16.msra.mxu1 %v11470_v16 }
 0x7e5   : > { %8064 = vrot.lane.b32.xlu0 %v7177_v43, %s12139_s20 }
 0x7e6   : > { %v16516_v7 = vpop.permute.xlu1 %8070 }
 0x7e7   : > { %18816 = vst [vmem:[#allocation87_spill] sm:$0xff] %v16516_v7  ;;  %v16518_v26 = vpop.permute.xlu0 %7228  ;;  %v16534_v7 = vsel %vm636_vm2, 0.0, %v16213_v45 }
 0x7e8   : > { %18817 = vst [vmem:[#allocation81_spill] sm:$0xff] %v16518_v26  ;;  %8012 = vrot.lane.b32.xlu1 %v16528_v39, %s12136_s22  ;;  %18819 = vst [vmem:[#allocation83_spill] sm:$0xff] %v16534_v7 }
 0x7e9   : > { %7348 = vrot.lane.b32.xlu0 %v16534_v7, %s12136_s22 }
 0x7ea   : > { %v16538_v8 = vpop.permute.xlu1 %8066 }
 0x7eb   : > { %18820 = vst [vmem:[#allocation96_spill] sm:$0xff] %v16538_v8  ;;  %v16540_v41 = vpop.permute.xlu0 %7346  ;;  %v7174_v8 = vrot.slane %v16444_v4, 1  ;;  %v16569_v4 = vsel %vm636_vm2, 0.0, %v16239_v27 }
 0x7ec   : > { %18821 = vst [vmem:[#allocation102_spill] sm:$0xff] %v16540_v41  ;;  %7970 = vrot.lane.b32.xlu1 %v7177_v43, %s12138_s25  ;;  %v7165_v43 = vrot.slane %v16158_v1, 1  ;;  %18827 = vst [vmem:[#allocation104_spill] sm:$0xff] %v16569_v4  ;;  %v10070_v1 = vld [vmem:[%s18666_s27 + $0x58] sm:$0xff] }
 0x7ed   : > { %8060 = vrot.lane.b32.xlu0 %v7167_v54, %s12139_s20  ;;  %v7176_v22 = vsel %vm2911_vm13, %v7174_v8, %v7175_v52 }
 0x7ee   : > { %v16546_v5 = vpop.permute.xlu1 %7448 }
 0x7ef   : > { %18822 = vst [vmem:[#allocation91_spill] sm:$0xff] %v16546_v5  ;;  %v16548_v45 = vpop.permute.xlu0 %8022 }
 0x7f0   : > { %18823 = vst [vmem:[#allocation82_spill] sm:$0xff] %v16548_v45  ;;  %7966 = vrot.lane.b32.xlu1 %v7167_v54, %s12138_s25 }
 0x7f1   : > { %7436 = vrot.lane.b32.xlu0 %v7178_v0, %s12139_s20 }
 0x7f2   : > { %v16554_v16 = vpop.permute.xlu1 %7254 }
 0x7f3   : > { %18824 = vst [vmem:[#allocation95_spill] sm:$0xff] %v16554_v16  ;;  %v16556_v41 = vpop.permute.xlu0 %7338  ;;  %v7164_v16 = vrot.slane %v16479_v31, 1 }
 0x7f4   : > { %18825 = vst [vmem:[#allocation84_spill] sm:$0xff] %v16556_v41  ;;  %7434 = vrot.lane.b32.xlu1 %v7176_v22, %s12139_s20  ;;  %v10069_v41 = vld [vmem:[%s18666_s27 + $0x50] sm:$0xff] }
 0x7f5   : > { %7242 = vrot.lane.b32.xlu0 %v7178_v0, %s12138_s25  ;;  %v7166_v52 = vsel %vm2911_vm13, %v7164_v16, %v7165_v43  ;;  %v11466_v16 = vpack.c.bf16 %v10070_v1, %v10069_v41  ;;  %v10105_v41 = vld [vmem:[%s18666_s27 + $0x70] sm:$0xff] }
 0x7f6   : > { %v16561_v5 = vpop.permute.xlu1 %7302 }
 0x7f7   : > { %v16563_v45 = vpop.permute.xlu0 %8018  ;;  %11467 = vmatprep.subr.bf16.mxu0 %v11466_v16 }
 0x7f8   : > { %18826 = vst [vmem:[#allocation97_spill] sm:$0xff] %v16563_v45  ;;  %7240 = vrot.lane.b32.xlu1 %v7176_v22, %s12138_s25  ;;  %v7168_v45 = vsel %vm2911_vm13, %v7165_v43, %v7167_v54  ;;  %11469 = vmatpush3.bf16.msra.mxu0 %v11466_v16  ;;  %v16600_v43 = vsel %vm636_vm2, %v16241_v48, 0.0  ;;  %v7185_v48 = vrot.slane %v16252_v3, 1 }
 0x7f9   : > { %7340 = vrot.lane.b32.xlu0 %v16569_v4, %s12136_s22  ;;  %18831 = vst [vmem:[#allocation90_spill] sm:$0xff] %v16600_v43  ;;  %v7187_v16 = vrot.slane %v16600_v43, 1 }
 0x7fa   : > { %v16574_v8 = vpop.permute.xlu1 %8000 }
 0x7fb   : > { %v16576_v0 = vpop.permute.xlu0 %7300 }
 0x7fc   : > { %7426 = vrot.lane.b32.xlu1 %v7166_v52, %s12139_s20 }
 0x7fd   : > { %7428 = vrot.lane.b32.xlu0 %v7168_v45, %s12139_s20 }
 0x7fe   : > { %v16582_v22 = vpop.permute.xlu1 %7440 }
 0x7ff   : > { %18828 = vst [vmem:[#allocation103_spill] sm:$0xff] %v16582_v22  ;;  %v7293_v27 = vpop.permute.xlu0 %7292  ;;  %v7386_v22 = vrot.slane %v16225_v63, 1 }
 0x800   : > { %7232 = vrot.lane.b32.xlu1 %v7166_v52, %s12138_s25 }
 0x801   : > { %7234 = vrot.lane.b32.xlu0 %v7168_v45, %s12138_s25  ;;  %v10106_v45 = vld [vmem:[%s18666_s27 + $0x78] sm:$0xff] }
 0x802   : > { %v16592_v31 = vpop.permute.xlu1 %7246 }
 0x803   : > { %18829 = vst [vmem:[#allocation86_spill] sm:$0xff] %v16592_v31  ;;  %v16594_v54 = vpop.permute.xlu0 %7972  ;;  %v7188_v31 = vsel %vm2911_vm13, %v7185_v48, %v7187_v16 }
 0x804   : > { %18830 = vst [vmem:[#allocation106_spill] sm:$0xff] %v16594_v54  ;;  %7350 = vrot.lane.b32.xlu1 %v16225_v63, %s12136_s22  ;;  %v11474_v54 = vpack.c.bf16 %v10106_v45, %v10105_v41  ;;  %v16627_v41 = vsel %vm636_vm2, %v16215_v56, 0.0  ;;  %vm9511_vm2 = vcmask 23552  }
 0x805   : > { %7976 = vrot.lane.b32.xlu0 %v16218_v2, %s12138_s25  ;;  %18834 = vst [vmem:[#allocation105_spill] sm:$0xff] %v16627_v41 }
 0x806   : > { %v16604_v52 = vpop.permute.xlu1 %7294  ;;  %11475 = vmatprep.subr.bf16.mxu1 %v11474_v54 }
 0x807   : > { %v16606_v1 = vpop.permute.xlu0 %7446  ;;  %11477 = vmatpush3.bf16.msra.mxu1 %v11474_v54  ;;  %v7388_v54 = vrot.slane %v16627_v41, 1 }
 0x808   : > { %18832 = vst [vmem:[#allocation18_spill] sm:$0xff] %v16606_v1  ;;  %7342 = vrot.lane.b32.xlu1 %v16252_v3, %s12136_s22 }
 0x809   : > { %8068 = vrot.lane.b32.xlu0 %v7187_v16, %s12139_s20  ;;  %v7389_v26 = vsel %vm2911_vm13, %v7386_v22, %v7388_v54 }
 0x80a   : > { %v7997_v2 = vpop.permute.xlu1 %7996 }
 0x80b   : > { %v16619_v1 = vpop.permute.xlu0 %7252 }
 0x80c   : > { %18833 = vst [vmem:[#allocation20_spill] sm:$0xff] %v16619_v1  ;;  %8020 = vrot.lane.b32.xlu1 %v16600_v43, %s12136_s22  ;;  %v7184_v1 = vrot.slane %v16569_v4, 1 }
 0x80d   : > { %7444 = vrot.lane.b32.xlu0 %v7188_v31, %s12139_s20 }
 0x80e   : > { %v16629_v45 = vpop.permute.xlu1 %7954  ;;  %v7186_v56 = vsel %vm2911_vm13, %v7184_v1, %v7185_v48 }
 0x80f   : > { %v16631_v3 = vpop.permute.xlu0 %7438 }
 0x810   : > { %18835 = vst [vmem:[#allocation89_spill] sm:$0xff] %v16631_v3  ;;  %7974 = vrot.lane.b32.xlu1 %v7187_v16, %s12138_s25  ;;  %v7385_v16 = vrot.slane %v16534_v7, 1 }
 0x811   : > { %7250 = vrot.lane.b32.xlu0 %v7188_v31, %s12138_s25 }
 0x812   : > { %v7211_v43 = vpop.permute.xlu1 %7210  ;;  %v7387_v4 = vsel %vm2911_vm13, %v7385_v16, %v7386_v22 }
 0x813   : > { %v16638_v39 = vpop.permute.xlu0 %7244 }
 0x814   : > { %18836 = vst [vmem:[#allocation19_spill] sm:$0xff] %v16638_v39  ;;  %7442 = vrot.lane.b32.xlu1 %v7186_v56, %s12139_s20 }
 0x815   : > { %7452 = vrot.lane.b32.xlu0 %v7389_v26, %s12139_s20 }
 0x816   : > { %v7951_v63 = vpop.permute.xlu1 %7950 }
 0x817   : > { %v16644_v3 = vpop.permute.xlu0 %8048 }
 0x818   : > { %7248 = vrot.lane.b32.xlu1 %v7186_v56, %s12138_s25  ;;  %v18838_v56 = vld [vmem:[#allocation88_spill] sm:$0xff] }
 0x819   : > { %8072 = vrot.lane.b32.xlu0 %v7388_v54, %s12139_s20  ;;  %v7488_v7 = vsel %vm7486_vm11, %v18838_v56, %v16305_v51  ;;  %v18842_v56 = vld [vmem:[#allocation39_spill] sm:$0xff] }
 0x81a   : > { %v7403_v31 = vpop.permute.xlu1 %7402  ;;  %v7520_v30 = vsel %vm3011_vm15, %v7488_v7, %v7293_v27  ;;  %v18841_v7 = vld [vmem:[#allocation17_spill] sm:$0xff] }
 0x81b   : > { %v16650_v39 = vpop.permute.xlu0 %7316 }
 0x81c   : > { %18837 = vst [vmem:[#allocation92_spill] sm:$0xff] %v16650_v39  ;;  %7450 = vrot.lane.b32.xlu1 %v7387_v4, %s12139_s20 }
 0x81d   : > { %8562 = vrot.lane.b32.xlu0 %v7389_v26, %s12138_s25 }
 0x81e   : > { %v7203_v1 = vpop.permute.xlu1 %7202 }
 0x81f   : > { %v7209_v48 = vpop.permute.xlu0 %7208 }
 0x820   : > { %8024 = vrot.lane.b32.xlu1 %v16627_v41, %s12136_s22 }
 0x821   : > { %8846 = vrot.lane.b32.xlu0 %v7388_v54, %s12138_s25 }
 0x822   : > { %v7395_v22 = vpop.permute.xlu1 %7394 }
 0x823   : > { %v16662_v16 = vsel %vm7550_vm12, %v7520_v30, %v7395_v22  ;;  %v8045_v40 = vpop.permute.xlu0 %8044  ;;  %v7491_v30 = vsel %vm7486_vm11, %v15832_v25, %v7203_v1  ;;  %v8091_v22 = vsel %vm7486_vm11, %v18842_v56, %v16287_v62  ;;  %v18843_v1 = vld [vmem:[#allocation24_spill] sm:$0xff] }
 0x824   : > { %8560 = vrot.lane.b32.xlu1 %v7387_v4, %s12138_s25  ;;  %10889 = vmatprep.mubr.msk.f32.mxu0 %vm484_vm1, %v16662_v16  ;;  %v8107_v39 = vsel %vm3011_vm15, %v8091_v22, %v7997_v2  ;;  %v7489_v12 = vsel %vm7486_vm11, %v18843_v1, %v16336_v20  ;;  %s12141_s25 = smov 6  }
 0x825   : > { %v8123_v62 = vsel %vm7550_vm12, %v8107_v39, %v8045_v40  ;;  %v7521_v2 = vsel %vm3011_vm15, %v7489_v12, %v16604_v52 }
 0x826   : > { %v16667_v26 = vpop.permute.xlu1 %7318  ;;  %v8162_v12 = vrot.slane %v8123_v62, 1 }
 0x827   : > { %v7405_v41 = vpop.permute.xlu0 %7404 }
 0x828   : > { %8566 = vrot.lane.b32.xlu1 %v18839_v28, %s12136_s22  ;;  %v8092_v28 = vsel %vm7486_vm11, %v16318_v35, %v7951_v63  ;;  %s12140_s22 = smov 3  }
 0x829   : > { %v8108_v40 = vsel %vm3011_vm15, %v8092_v28, %v16236_v15 }
 0x82a   : > { %v16671_v51 = vpop.permute.xlu1 %8008 }
 0x82b   : > { %18840 = vst [vmem:[#allocation21_spill] sm:$0xff] %v16671_v51  ;;  %v16673_v54 = vpop.permute.xlu0 %7308 }
 0x82c   : > { %11611 = vrot.lane.b32.xlu1 %v18841_v7, %s12139_s20  ;;  %v7523_v7 = vsel %vm3011_vm15, %v7491_v30, %v16198_v38  ;;  %v18845_v38 = vld [vmem:[#allocation85_spill] sm:$0xff]  ;;  %s12142_s20 = smov 9  }
 0x82e   : > { %v16679_v4 = vpop.permute.xlu1 %7310 }
 0x82f   : > { %v7201_v27 = vpop.permute.xlu0 %7200 }
 0x830   : > { %v7490_v51 = vsel %vm7486_vm11, %v16292_v17, %v7201_v27  ;;  %v18844_v17 = vld [vmem:[#allocation112_spill] sm:$0xff] }
 0x831   : > { %v7522_v25 = vsel %vm3011_vm15, %v7490_v51, %v16245_v55  ;;  %v7493_v35 = vsel %vm7486_vm11, %v18844_v17, %v16297_v42  ;;  %v7492_v55 = vsel %vm7486_vm11, %v18845_v38, %v16270_v32  ;;  %v16722_v42 = vsel %vm7550_vm12, %v7523_v7, %v16314_v59 }
 0x832   : > { %v16697_v56 = vpop.permute.xlu1 %8004  ;;  %v16701_v63 = vsel %vm7550_vm12, %v7522_v25, %v16299_v34  ;;  %v7525_v39 = vsel %vm3011_vm15, %v7493_v35, %v16561_v5  ;;  %v7494_v34 = vsel %vm7486_vm11, %v16279_v13, %v7209_v48  ;;  %v8159_v32 = vrot.slane %v16662_v16, 1 }
 0x833   : > { %v7397_v20 = vpop.permute.xlu0 %7396  ;;  %v8164_v15 = vrot.slane %v16701_v63, 1  ;;  %v7524_v13 = vsel %vm3011_vm15, %v7492_v55, %v16576_v0  ;;  %v7495_v5 = vsel %vm7486_vm11, %v15763_v23, %v7211_v43  ;;  %v8124_v59 = vsel %vm7550_vm12, %v8108_v40, %v16266_v36  ;;  %v18846_v43 = vld [vmem:[#allocation119_spill] sm:$0xff] }
 0x834   : > { %v16718_v51 = vsel %vm7550_vm12, %v7521_v2, %v7397_v20  ;;  %v16736_v48 = vsel %vm7550_vm12, %v7525_v39, %v7405_v41  ;;  %v7526_v27 = vsel %vm3011_vm15, %v7494_v34, %v16327_v53  ;;  %v8165_v23 = vrot.slane %v16722_v42, 1 }
 0x835   : > { %v8160_v52 = vrot.slane %v16718_v51, 1  ;;  %10890 = vmatmul.mubr.msk.f32.gmra.mrb[30].mxu0 %vm484_vm1, %v16718_v51  ;;  %v8093_v41 = vsel %vm7486_vm11, %v18846_v43, %v16262_v61  ;;  %v16757_v28 = vsel %vm7550_vm12, %v7524_v13, %v7403_v31  ;;  %v8094_v53 = vsel %vm7486_vm11, %v16274_v44, %v16629_v45 }
 0x836   : > { %v16738_v30 = vpop.permute.xlu1 %7962  ;;  %10892 = vmatprep.mubr.msk.f32.mxu0 %vm484_vm1, %v16701_v63  ;;  %v7527_v7 = vsel %vm3011_vm15, %v7495_v5, %v16348_v33  ;;  %v8170_v25 = vrot.slane %v16736_v48, 1  ;;  %v16772_v61 = vsel %vm2911_vm13, %v8164_v15, %v8165_v23  ;;  %v8109_v31 = vsel %vm3011_vm15, %v8093_v41, %v16574_v8 }
 0x837   : > { %v16744_v22 = vpop.permute.xlu0 %8056  ;;  %v16747_v0 = vsel %vm2911_vm13, %v8159_v32, %v8160_v52  ;;  %v16751_v36 = vsel %vm2911_vm13, %v8160_v52, %v8162_v12  ;;  %v8167_v1 = vrot.slane %v8124_v59, 1  ;;  %v16782_v33 = vsel %vm7550_vm12, %v7526_v27, %v16412_v11  ;;  %v18847_v52 = vld [vmem:[#allocation33_spill] sm:$0xff] }
 0x838   : > { %10945 = vmatprep.mubr.msk.f32.mxu1 %vm484_vm1, %v16747_v0  ;;  %v8169_v44 = vrot.slane %v16757_v28, 1  ;;  %v8125_v45 = vsel %vm7550_vm12, %v8109_v31, %v16644_v3  ;;  %v8110_v8 = vsel %vm3011_vm15, %v8094_v53, %v16358_v46  ;;  %v16796_v38 = vsel %vm7550_vm12, %v7527_v7, %v16417_v9 }
 0x839   : > { %10893 = vmatmul.mubr.msk.f32.gmra.mrb[32].mxu0 %vm484_vm1, %v16722_v42  ;;  %10946 = vmatmul.mubr.msk.f32.gmra.mrb[30].mxu1 %vm484_vm1, %v16751_v36  ;;  %v16792_v35 = vsel %vm2911_vm13, %v8165_v23, %v8167_v1  ;;  %v8174_v3 = vrot.slane %v16782_v33, 1  ;;  %v8172_v55 = vrot.slane %v8125_v45, 1  ;;  %v8126_v9 = vsel %vm7550_vm12, %v8110_v8, %v16380_v14 }
 0x83a   : > { %v7959_v62 = vpop.permute.xlu1 %7958  ;;  %10895 = vmatprep.mubr.msk.f32.mxu0 %vm484_vm1, %v16757_v28  ;;  %10948 = vmatprep.mubr.msk.f32.mxu1 %vm484_vm1, %v16772_v61  ;;  %v16804_v11 = vsel %vm2911_vm13, %v8169_v44, %v8170_v25  ;;  %v8175_v40 = vrot.slane %v16796_v38, 1  ;;  %v8177_v34 = vrot.slane %v8126_v9, 1  ;;  %v7496_v15 = vsel %vm7486_vm11, %v18847_v52, %v16419_v49  ;;  %v18848_v49 = vld [vmem:[#allocation38_spill] sm:$0xff] }
 0x83b   : > { %v16787_v17 = vpop.permute.xlu0 %7332  ;;  %v16816_v20 = vsel %vm2911_vm13, %v8170_v25, %v8172_v55  ;;  %v7528_v13 = vsel %vm3011_vm15, %v7496_v15, %v16673_v54  ;;  %v8095_v53 = vsel %vm7486_vm11, %v18848_v49, %v16382_v6  ;;  %v8096_v7 = vsel %vm7486_vm11, %v16423_v37, %v7959_v62  ;;  %v18849_v25 = vld [vmem:[#allocation31_spill] sm:$0xff] }
 0x83c   : > { %v16823_v39 = vsel %vm2911_vm13, %v8174_v3, %v8175_v40  ;;  %v16828_v12 = vsel %vm2911_vm13, %v8175_v40, %v8177_v34  ;;  %v8111_v54 = vsel %vm3011_vm15, %v8095_v53, %v16697_v56  ;;  %v7497_v31 = vsel %vm7486_vm11, %v18849_v25, %v16429_v18  ;;  %v18851_v34 = vld [vmem:[#allocation44_spill] sm:$0xff] }
 0x83d   : > { %10896 = vmatmul.mubr.msk.f32.gmra.mrb[34].mxu0 %vm484_vm1, %v16736_v48  ;;  %10949 = vmatmul.mubr.msk.f32.gmra.mrb[32].mxu1 %vm484_vm1, %v16792_v35  ;;  %v7529_v6 = vsel %vm3011_vm15, %v7497_v31, %v16679_v4  ;;  %v8112_v56 = vsel %vm3011_vm15, %v8096_v7, %v16338_v19  ;;  %v18850_v4 = vld [vmem:[#allocation40_spill] sm:$0xff] }
 0x83e   : > { %v16806_v46 = vpop.permute.xlu1 %7418  ;;  %10898 = vmatprep.mubr.msk.f32.mxu0 %vm484_vm1, %v16782_v33  ;;  %10951 = vmatprep.mubr.msk.f32.mxu1 %vm484_vm1, %v16804_v11  ;;  %v7501_v3 = vsel %vm7486_vm11, %v18850_v4, %v16394_v47  ;;  %v18858_v7 = vld [vmem:[#allocation76_spill] sm:$0xff] }
 0x83f   : > { %v8053_v2 = vpop.permute.xlu0 %8052  ;;  %v7533_v9 = vsel %vm3011_vm15, %v7501_v3, %v16667_v26  ;;  %v18852_v26 = vld [vmem:[#allocation46_spill] sm:$0xff]  ;;  %v18859_v31 = vld [vmem:[#allocation64_spill] sm:$0xff] }
 0x841   : > { %10899 = vmatmul.mubr.msk.f32.gmra.mrb[36].mxu0 %vm484_vm1, %v16796_v38  ;;  %10952 = vmatmul.mubr.msk.f32.gmra.mrb[34].mxu1 %vm484_vm1, %v16816_v20 }
 0x842   : > { %v7225_v32 = vpop.permute.xlu1 %7224  ;;  %10954 = vmatprep.mubr.msk.f32.mxu1 %vm484_vm1, %v16823_v39 }
 0x843   : > { %v7421_v14 = vpop.permute.xlu0 %7420  ;;  %v7502_v52 = vsel %vm7486_vm11, %v16368_v10, %v7225_v32  ;;  %v18856_v10 = vld [vmem:[#allocation41_spill] sm:$0xff] }
 0x844   : > { %v16901_v15 = vsel %vm7550_vm12, %v7533_v9, %v7421_v14  ;;  %v18862_v9 = vld [vmem:[#allocation51_spill] sm:$0xff] }
 0x845   : > { %10955 = vmatmul.mubr.msk.f32.gmra.mrb[36].mxu1 %vm484_vm1, %v16828_v12 }
 0x846   : > { %v7411_v5 = vpop.permute.xlu1 %7410 }
 0x847   : > { %v16838_v59 = vsel %vm7550_vm12, %v7528_v13, %v7411_v5  ;;  %v7227_v27 = vpop.permute.xlu0 %7226  ;;  %v18853_v13 = vld [vmem:[#allocation36_spill] sm:$0xff] }
 0x848   : > { %10901 = vmatprep.mubr.msk.f32.mxu0 %vm484_vm1, %v16838_v59  ;;  %v8179_v62 = vrot.slane %v16838_v59, 1  ;;  %v7503_v55 = vsel %vm7486_vm11, %v15952_v50, %v7227_v27  ;;  %v7500_v50 = vsel %vm7486_vm11, %v18851_v34, %v16396_v21  ;;  %v8097_v5 = vsel %vm7486_vm11, %v18853_v13, %v18852_v26  ;;  %v18854_v27 = vld [vmem:[#allocation92_spill] sm:$0xff]  ;;  %v18855_v21 = vld [vmem:[#allocation49_spill] sm:$0xff]  ;;  %v18863_v34 = vld [vmem:[#allocation94_spill] sm:$0xff] }
 0x849   : > { %v18864_v13 = vld [vmem:[#allocation74_spill] sm:$0xff] }
 0x84a   : > { %v7217_v23 = vpop.permute.xlu1 %7216 }
 0x84b   : > { %v7498_v43 = vsel %vm7486_vm11, %v16406_v24, %v7217_v23  ;;  %v16844_v41 = vpop.permute.xlu0 %7324  ;;  %v8127_v24 = vsel %vm7550_vm12, %v8111_v54, %v8053_v2  ;;  %v8128_v2 = vsel %vm7550_vm12, %v8112_v56, %v16355_v60  ;;  %v7532_v23 = vsel %vm3011_vm15, %v7500_v50, %v18854_v27 }
 0x84c   : > { %v7530_v1 = vsel %vm3011_vm15, %v7498_v43, %v16285_v29  ;;  %v8182_v18 = vrot.slane %v8127_v24, 1  ;;  %v7535_v43 = vsel %vm3011_vm15, %v7503_v55, %v18855_v21  ;;  %v8187_v49 = vrot.slane %v8128_v2, 1 }
 0x84d   : > { %v16874_v29 = vsel %vm7550_vm12, %v7530_v1, %v16389_v58  ;;  %v16923_v53 = vsel %vm7550_vm12, %v7532_v23, %v16806_v46  ;;  %v7534_v1 = vsel %vm3011_vm15, %v7502_v52, %v18859_v31  ;;  %v8190_v24 = vrot.slane %v16901_v15, 1  ;;  %v18860_v46 = vld [vmem:[#allocation21_spill] sm:$0xff] }
 0x84e   : > { %v16859_v44 = vpop.permute.xlu1 %7334  ;;  %v8113_v56 = vsel %vm3011_vm15, %v8097_v5, %v18860_v46  ;;  %v16961_v50 = vsel %vm7550_vm12, %v7534_v1, %v18863_v34 }
 0x84f   : > { %v7413_v45 = vpop.permute.xlu0 %7412  ;;  %v8129_v4 = vsel %vm7550_vm12, %v8113_v56, %v16744_v22  ;;  %v8194_v27 = vrot.slane %v16961_v50, 1  ;;  %v18867_v56 = vld [vmem:[#allocation81_spill] sm:$0xff] }
 0x850   : > { %v16866_v37 = vsel %vm7550_vm12, %v7529_v6, %v7413_v45  ;;  %v8184_v6 = vrot.slane %v16874_v29, 1  ;;  %v8192_v26 = vrot.slane %v8129_v4, 1 }
 0x851   : > { %v8180_v8 = vrot.slane %v16866_v37, 1  ;;  %10902 = vmatmul.mubr.msk.f32.gmra.mrb[38].mxu0 %vm484_vm1, %v16866_v37 }
 0x852   : > { %v16879_v19 = vpop.permute.xlu1 %8016  ;;  %10904 = vmatprep.mubr.msk.f32.mxu0 %vm484_vm1, %v16874_v29  ;;  %v16981_v21 = vsel %vm2911_vm13, %v8190_v24, %v8192_v26  ;;  %v18871_v26 = vld [vmem:[#allocation93_spill] sm:$0xff] }
 0x853   : > { %v7219_v58 = vpop.permute.xlu0 %7218  ;;  %v16890_v40 = vsel %vm2911_vm13, %v8179_v62, %v8180_v8  ;;  %v16893_v47 = vsel %vm2911_vm13, %v8180_v8, %v8182_v18  ;;  %v18861_v62 = vld [vmem:[#allocation69_spill] sm:$0xff]  ;;  %v8189_v8 = vrot.slane %v16923_v53, 1 }
 0x854   : > { %v7499_v60 = vsel %vm7486_vm11, %v16009_v57, %v7219_v58  ;;  %10957 = vmatprep.mubr.msk.f32.mxu1 %vm484_vm1, %v16890_v40  ;;  %v18857_v57 = vld [vmem:[#allocation61_spill] sm:$0xff]  ;;  %v16944_v18 = vsel %vm7550_vm12, %v7535_v43, %v18861_v62  ;;  %v18868_v62 = vld [vmem:[#allocation54_spill] sm:$0xff] }
 0x855   : > { %v7531_v32 = vsel %vm3011_vm15, %v7499_v60, %v18856_v10  ;;  %10958 = vmatmul.mubr.msk.f32.gmra.mrb[38].mxu1 %vm484_vm1, %v16893_v47  ;;  %v8098_v14 = vsel %vm7486_vm11, %v18857_v57, %v16738_v30  ;;  %v16970_v52 = vsel %vm2911_vm13, %v8189_v8, %v8190_v24  ;;  %v8195_v60 = vrot.slane %v16944_v18, 1 }
 0x856   : > { %v7327_v54 = vpop.permute.xlu1 %7326  ;;  %v16927_v25 = vsel %vm7550_vm12, %v7531_v32, %v18858_v7  ;;  %v8114_v2 = vsel %vm3011_vm15, %v8098_v14, %v18862_v9  ;;  %v7504_v8 = vsel %vm7486_vm11, %v18868_v62, %v18867_v56  ;;  %v18869_v9 = vld [vmem:[#allocation80_spill] sm:$0xff] }
 0x857   : > { %10905 = vmatmul.mubr.msk.f32.gmra.mrb[40].mxu0 %vm484_vm1, %v16927_v25  ;;  %v8185_v30 = vrot.slane %v16927_v25, 1  ;;  %v16936_v45 = vpop.permute.xlu0 %8064  ;;  %v8130_v5 = vsel %vm7550_vm12, %v8114_v2, %v18864_v13  ;;  %v16988_v10 = vsel %vm2911_vm13, %v8194_v27, %v8195_v60  ;;  %v18870_v2 = vld [vmem:[#allocation47_spill] sm:$0xff] }
 0x858   : > { %10907 = vmatprep.mubr.msk.f32.mxu0 %vm484_vm1, %v16923_v53  ;;  %v8197_v32 = vrot.slane %v8130_v5, 1  ;;  %v7505_v34 = vsel %vm7486_vm11, %v18870_v2, %v18869_v9  ;;  %v18876_v9 = vld [vmem:[#allocation60_spill] sm:$0xff] }
 0x859   : > { %v16950_v3 = vsel %vm2911_vm13, %v8184_v6, %v8185_v30  ;;  %v16953_v55 = vsel %vm2911_vm13, %v8185_v30, %v8187_v49  ;;  %v18865_v6 = vld [vmem:[#allocation77_spill] sm:$0xff]  ;;  %v18866_v30 = vld [vmem:[#allocation32_spill] sm:$0xff] }
 0x85a   : > { %v8013_v58 = vpop.permute.xlu1 %8012  ;;  %10960 = vmatprep.mubr.msk.f32.mxu1 %vm484_vm1, %v16950_v3  ;;  %v16993_v14 = vsel %vm2911_vm13, %v8195_v60, %v8197_v32  ;;  %v8099_v46 = vsel %vm7486_vm11, %v18866_v30, %v18865_v6  ;;  %v7536_v60 = vsel %vm3011_vm15, %v7504_v8, %v16844_v41  ;;  %v7537_v32 = vsel %vm3011_vm15, %v7505_v34, %v7327_v54  ;;  %v18877_v34 = vld [vmem:[#allocation67_spill] sm:$0xff] }
 0x85b   : > { %10908 = vmatmul.mubr.msk.f32.gmra.mrb[42].mxu0 %vm484_vm1, %v16901_v15  ;;  %10961 = vmatmul.mubr.msk.f32.gmra.mrb[40].mxu1 %vm484_vm1, %v16953_v55  ;;  %v16967_v22 = vpop.permute.xlu0 %7348  ;;  %v8115_v4 = vsel %vm3011_vm15, %v8099_v46, %v8013_v58  ;;  %v18872_v58 = vld [vmem:[#allocation73_spill] sm:$0xff]  ;;  %v18873_v46 = vld [vmem:[#allocation27_spill] sm:$0xff] }
 0x85c   : > { %10910 = vmatprep.mubr.msk.f32.mxu0 %vm484_vm1, %v16961_v50  ;;  %10963 = vmatprep.mubr.msk.f32.mxu1 %vm484_vm1, %v16970_v52  ;;  %v7509_v56 = vsel %vm7486_vm11, %v18873_v46, %v18872_v58  ;;  %v18881_v58 = vld [vmem:[#allocation78_spill] sm:$0xff] }
 0x85e   : > { %v7971_v23 = vpop.permute.xlu1 %7970 }
 0x85f   : > { %10911 = vmatmul.mubr.msk.f32.gmra.mrb[44].mxu0 %vm484_vm1, %v16944_v18  ;;  %10964 = vmatmul.mubr.msk.f32.gmra.mrb[42].mxu1 %vm484_vm1, %v16981_v21  ;;  %v8061_v43 = vpop.permute.xlu0 %8060 }
 0x860   : > { %10966 = vmatprep.mubr.msk.f32.mxu1 %vm484_vm1, %v16988_v10  ;;  %v8131_v5 = vsel %vm7550_vm12, %v8115_v4, %v8061_v43  ;;  %v18875_v4 = vld [vmem:[#allocation75_spill] sm:$0xff] }
 0x861   : > { %v8202_v62 = vrot.slane %v8131_v5, 1  ;;  %v8101_v2 = vsel %vm7486_vm11, %v18876_v9, %v18875_v4  ;;  %v18879_v5 = vld [vmem:[#allocation37_spill] sm:$0xff] }
 0x862   : > { %v7967_v57 = vpop.permute.xlu1 %7966 }
 0x863   : > { %10967 = vmatmul.mubr.msk.f32.gmra.mrb[44].mxu1 %vm484_vm1, %v16993_v14  ;;  %v7437_v49 = vpop.permute.xlu0 %7436  ;;  %v8100_v13 = vsel %vm7486_vm11, %v18871_v26, %v7967_v57  ;;  %v18874_v57 = vld [vmem:[#allocation66_spill] sm:$0xff] }
 0x864   : > { %v8116_v43 = vsel %vm3011_vm15, %v8100_v13, %v18874_v57 }
 0x866   : > { %v7435_v7 = vpop.permute.xlu1 %7434 }
 0x867   : > { %v7243_v31 = vpop.permute.xlu0 %7242 }
 0x86a   : > { %v7241_v1 = vpop.permute.xlu1 %7240 }
 0x86b   : > { %v16997_v24 = vpop.permute.xlu0 %7340 }
 0x86e   : > { %v7427_v27 = vpop.permute.xlu1 %7426 }
 0x86f   : > { %v17016_v6 = vsel %vm7550_vm12, %v7536_v60, %v7427_v27  ;;  %v7429_v30 = vpop.permute.xlu0 %7428  ;;  %v18878_v60 = vld [vmem:[#allocation48_spill] sm:$0xff]  ;;  %v7541_v27 = vsel %vm3011_vm15, %v7509_v56, %v16859_v44  ;;  %v18883_v56 = vld [vmem:[#allocation58_spill] sm:$0xff] }
 0x870   : > { %10913 = vmatprep.mubr.msk.f32.mxu0 %vm484_vm1, %v17016_v6  ;;  %v17024_v41 = vsel %vm7550_vm12, %v7537_v32, %v7429_v30  ;;  %v8199_v54 = vrot.slane %v17016_v6, 1  ;;  %v7508_v26 = vsel %vm7486_vm11, %v18878_v60, %v18877_v34  ;;  %v7511_v32 = vsel %vm7486_vm11, %v18879_v5, %v7243_v31  ;;  %v18882_v34 = vld [vmem:[#allocation63_spill] sm:$0xff]  ;;  %v18884_v31 = vld [vmem:[#allocation70_spill] sm:$0xff] }
 0x871   : > { %v8200_v8 = vrot.slane %v17024_v41, 1  ;;  %10914 = vmatmul.mubr.msk.f32.gmra.mrb[46].mxu0 %vm484_vm1, %v17024_v41  ;;  %v17043_v30 = vsel %vm7550_vm12, %v7541_v27, %v7437_v49  ;;  %v8132_v44 = vsel %vm7550_vm12, %v8116_v43, %v18882_v34  ;;  %v7510_v60 = vsel %vm7486_vm11, %v18883_v56, %v7241_v1  ;;  %v18885_v27 = vld [vmem:[#allocation53_spill] sm:$0xff]  ;;  %v18888_v1 = vld [vmem:[#allocation62_spill] sm:$0xff] }
 0x872   : > { %v7233_v13 = vpop.permute.xlu1 %7232  ;;  %18880 = vst [vmem:[#allocation22_spill] sm:$0xff] %v17043_v30 }
 0x873   : > { %v7506_v46 = vsel %vm7486_vm11, %v18881_v58, %v7233_v13  ;;  %v7235_v57 = vpop.permute.xlu0 %7234  ;;  %v17048_v4 = vsel %vm2911_vm13, %v8199_v54, %v8200_v8  ;;  %v17051_v9 = vsel %vm2911_vm13, %v8200_v8, %v8202_v62  ;;  %v7540_v54 = vsel %vm3011_vm15, %v7508_v26, %v16787_v17  ;;  %v18886_v62 = vld [vmem:[#allocation84_spill] sm:$0xff]  ;;  %v18887_v13 = vld [vmem:[#allocation65_spill] sm:$0xff] }
 0x874   : > { %v7538_v49 = vsel %vm3011_vm15, %v7506_v46, %v18884_v31  ;;  %v7507_v5 = vsel %vm7486_vm11, %v18885_v27, %v7235_v57  ;;  %10969 = vmatprep.mubr.msk.f32.mxu1 %vm484_vm1, %v17048_v4  ;;  %v7543_v8 = vsel %vm3011_vm15, %v7511_v32, %v18886_v62  ;;  %v18889_v46 = vld [vmem:[#allocation68_spill] sm:$0xff]  ;;  %v17078_v34 = vsel %vm7550_vm12, %v7540_v54, %v7435_v7  ;;  %v18890_v32 = vld [vmem:[#allocation71_spill] sm:$0xff] }
 0x875   : > { %v17069_v43 = vsel %vm7550_vm12, %v7538_v49, %v18887_v13  ;;  %v7539_v58 = vsel %vm3011_vm15, %v7507_v5, %v18888_v1  ;;  %10970 = vmatmul.mubr.msk.f32.gmra.mrb[46].mxu1 %vm484_vm1, %v17051_v9  ;;  %v8102_v57 = vsel %vm7486_vm11, %v18889_v46, %v7971_v23  ;;  %v8210_v17 = vrot.slane %v17043_v30, 1  ;;  %v18891_v49 = vld [vmem:[#allocation79_spill] sm:$0xff]  ;;  %v17091_v5 = vpop.f32.mrb[28].mxu0 }
 0x876   : > { %v17081_v26 = vpop.permute.xlu1 %7350  ;;  %10916 = vmatprep.mubr.msk.f32.mxu0 %vm484_vm1, %v17069_v43  ;;  %v17087_v56 = vsel %vm7550_vm12, %v7539_v58, %v18890_v32  ;;  %v8207_v31 = vrot.slane %v8132_v44, 1  ;;  %v7542_v27 = vsel %vm3011_vm15, %v7510_v60, %v18891_v49  ;;  %18892 = vst [vmem:[#allocation109_spill] sm:$0xff] %v17091_v5  ;;  %v8204_v23 = vrot.slane %v17069_v43, 1  ;;  %v17101_v13 = vpop.f32.mrb[29].mxu0  ;;  %v18894_v44 = vld [vmem:[#allocation103_spill] sm:$0xff] }
 0x877   : > { %10917 = vmatmul.mubr.msk.f32.gmra.mrb[48].mxu0 %vm484_vm1, %v17087_v56  ;;  %v8205_v7 = vrot.slane %v17087_v56, 1  ;;  %v17097_v54 = vpop.permute.xlu0 %7976  ;;  %v8117_v62 = vsel %vm3011_vm15, %v8101_v2, %v16879_v19  ;;  %18893 = vst [vmem:[#allocation98_spill] sm:$0xff] %v17101_v13  ;;  %v17107_v60 = vsel %vm7550_vm12, %v7543_v8, %v18894_v44  ;;  %v8209_v58 = vrot.slane %v17078_v34, 1  ;;  %v18897_v19 = vld [vmem:[#allocation97_spill] sm:$0xff] }
 0x878   : > { %10919 = vmatprep.mubr.msk.f32.mxu0 %vm484_vm1, %v17078_v34  ;;  %18895 = vst [vmem:[#allocation111_spill] sm:$0xff] %v17107_v60  ;;  %v8133_v1 = vsel %vm7550_vm12, %v8117_v62, %v16936_v45  ;;  %v8118_v2 = vsel %vm3011_vm15, %v8102_v57, %v18897_v19  ;;  %v18898_v8 = vld [vmem:[#allocation89_spill] sm:$0xff]  ;;  %v17126_v45 = vld [vmem:[#allocation12] ss:$0 sm:$0xff]  ;;  %v10944_v62 = vpop.f32.mrb[28].mxu1 }
 0x879   : > { %v17113_v46 = vsel %vm2911_vm13, %v8204_v23, %v8205_v7  ;;  %v17116_v32 = vsel %vm2911_vm13, %v8205_v7, %v8207_v31  ;;  %v17124_v44 = vsel %vm7550_vm12, %v7542_v27, %v18898_v8  ;;  %18900 = vst [vmem:[#allocation25_spill] sm:$0xff] %v17126_v45  ;;  %v17133_v57 = vsel %vm2911_vm13, %v8209_v58, %v8210_v17  ;;  %v8369_v27 = vpop.f32.mrb[29].mxu1  ;;  %v18902_v8 = vld [vmem:[#allocation96_spill] sm:$0xff] }
 0x87a   : > { %18896 = vst [vmem:[#allocation100_spill] sm:$0xff] %v17116_v32  ;;  %v7343_v49 = vpop.permute.xlu1 %7342  ;;  %10972 = vmatprep.mubr.msk.f32.mxu1 %vm484_vm1, %v17113_v46  ;;  %18899 = vst [vmem:[#allocation116_spill] sm:$0xff] %v17124_v44  ;;  %v8215_v23 = vrot.slane %v17107_v60, 1  ;;  %v8212_v7 = vrot.slane %v8133_v1, 1  ;;  %v8375_v19 = vadd.f32 %v10944_v62, %v17126_v45  ;;  %v8134_v13 = vsel %vm7550_vm12, %v8118_v2, %v18902_v8 }
 0x87b   : > { %10920 = vmatmul.mubr.msk.f32.gmra.mrb[50].mxu0 %vm484_vm1, %v17043_v30  ;;  %10973 = vmatmul.mubr.msk.f32.gmra.mrb[48].mxu1 %vm484_vm1, %v17116_v32  ;;  %v8069_v31 = vpop.permute.xlu0 %8068  ;;  %18901 = vst [vmem:[#allocation113_spill] sm:$0xff] %v17133_v57  ;;  %v8370_v5 = vadd.f32 %v17126_v45, %v8369_v27  ;;  %v8214_v58 = vrot.slane %v17124_v44, 1  ;;  %v8217_v2 = vrot.slane %v8134_v13, 1  ;;  %v18906_v27 = vld [vmem:[#allocation50_spill] sm:$0xff] }
 0x87c   : > { %10922 = vmatprep.mubr.msk.f32.mxu0 %vm484_vm1, %v17124_v44  ;;  %10975 = vmatprep.mubr.msk.f32.mxu1 %vm484_vm1, %v17133_v57  ;;  %11615 = vtanh.f32 %v8375_v19  ;;  %v17146_v1 = vsel %vm2911_vm13, %v8210_v17, %v8212_v7  ;;  %v18905_v19 = vld [vmem:[#allocation86_spill] sm:$0xff] }
 0x87d   : > { %18903 = vst [vmem:[#allocation99_spill] sm:$0xff] %v17146_v1  ;;  %11617 = vtanh.f32 %v8370_v5  ;;  %v17153_v57 = vsel %vm2911_vm13, %v8214_v58, %v8215_v23  ;;  %v7513_v17 = vsel %vm7486_vm11, %v18906_v27, %v18905_v19  ;;  %v17162_v8 = vsel %vm2911_vm13, %v8215_v23, %v8217_v2  ;;  %v18908_v58 = vld [vmem:[#allocation106_spill] sm:$0xff]  ;;  %v18911_v27 = vld [vmem:[#allocation55_spill] sm:$0xff]  ;;  %v18913_v23 = vld [vmem:[#allocation52_spill] sm:$0xff] }
 0x87e   : > { %v8021_v32 = vpop.permute.xlu1 %8020  ;;  %18904 = vst [vmem:[#allocation114_spill] sm:$0xff] %v17153_v57  ;;  %v7545_v5 = vsel %vm3011_vm15, %v7513_v17, %v7343_v49  ;;  %18907 = vst [vmem:[#allocation101_spill] sm:$0xff] %v17162_v8  ;;  %v18912_v17 = vld [vmem:[#allocation19_spill] sm:$0xff] }
 0x87f   : > { %10923 = vmatmul.mubr.msk.f32.gmra.mrb[52].mxu0 %vm484_vm1, %v17107_v60  ;;  %10976 = vmatmul.mubr.msk.f32.gmra.mrb[50].mxu1 %vm484_vm1, %v17146_v1  ;;  %v7445_v62 = vpop.permute.xlu0 %7444  ;;  %v18909_v1 = vld [vmem:[#allocation59_spill] sm:$0xff]  ;;  %v18910_v60 = vld [vmem:[#allocation90_spill] sm:$0xff]  ;;  %v7512_v2 = vsel %vm7486_vm11, %v18913_v23, %v18912_v17  ;;  %v18918_v23 = vld [vmem:[#allocation29_spill] sm:$0xff] }
 0x880   : > { %10978 = vmatprep.mubr.msk.f32.mxu1 %vm484_vm1, %v17153_v57  ;;  %v17165_v45 = vsel %vm7550_vm12, %v7545_v5, %v7445_v62  ;;  %v8103_v57 = vsel %vm7486_vm11, %v18909_v1, %v18908_v58  ;;  %v18914_v5 = vld [vmem:[#allocation102_spill] sm:$0xff]  ;;  %v7544_v44 = vsel %vm3011_vm15, %v7512_v2, %v16997_v24  ;;  %v18917_v17 = vld [vmem:[#allocation95_spill] sm:$0xff] }
 0x881   : > { %v8119_v62 = vsel %vm3011_vm15, %v8103_v57, %v8021_v32  ;;  %v18916_v57 = vld [vmem:[#allocation91_spill] sm:$0xff]  ;;  %v7517_v2 = vsel %vm7486_vm11, %v18918_v23, %v18917_v17  ;;  %v18923_v17 = vld [vmem:[#allocation42_spill] sm:$0xff] }
 0x882   : > { %v7975_v7 = vpop.permute.xlu1 %7974  ;;  %v8135_v1 = vsel %vm7550_vm12, %v8119_v62, %v8069_v31 }
 0x883   : > { %10979 = vmatmul.mubr.msk.f32.gmra.mrb[52].mxu1 %vm484_vm1, %v17162_v8  ;;  %v7251_v13 = vpop.permute.xlu0 %7250  ;;  %v8104_v19 = vsel %vm7486_vm11, %v18910_v60, %v7975_v7  ;;  %v8220_v60 = vrot.slane %v17165_v45, 1  ;;  %v18915_v7 = vld [vmem:[#allocation82_spill] sm:$0xff] }
 0x884   : > { %v7515_v49 = vsel %vm7486_vm11, %v18911_v27, %v7251_v13  ;;  %v8120_v13 = vsel %vm3011_vm15, %v8104_v19, %v18915_v7  ;;  %v8222_v19 = vrot.slane %v8135_v1, 1  ;;  %v18920_v7 = vld [vmem:[#allocation104_spill] sm:$0xff] }
 0x885   : > { %v7547_v8 = vsel %vm3011_vm15, %v7515_v49, %v18914_v5 }
 0x886   : > { %v7443_v30 = vpop.permute.xlu1 %7442  ;;  %v11616_v27 = vpop.eup %11615  ;;  %v17196_v24 = vsel %vm7550_vm12, %v7547_v8, %v18916_v57  ;;  %v17218_v57 = vsel %vm2911_vm13, %v8220_v60, %v8222_v19 }
 0x887   : > { %v17189_v58 = vsel %vm7550_vm12, %v7544_v44, %v7443_v30  ;;  %v7453_v49 = vpop.permute.xlu0 %7452  ;;  %v11618_v31 = vpop.eup %11617  ;;  %9161 = vrot.lane.b32.xlu1 %v11616_v27, %s12140_s22  ;;  %v7549_v30 = vsel %vm3011_vm15, %v7517_v2, %v17081_v26  ;;  %v18919_v44 = vld [vmem:[#allocation87_spill] sm:$0xff]  ;;  %v8225_v27 = vrot.slane %v17196_v24, 1 }
 0x888   : > { %v8219_v32 = vrot.slane %v17189_v58, 1  ;;  %10925 = vmatprep.mubr.msk.f32.mxu0 %vm484_vm1, %v17189_v58  ;;  %v8136_v8 = vsel %vm7550_vm12, %v8120_v13, %v18919_v44  ;;  %9159 = vrot.lane.b32.xlu0 %v11618_v31, %s12140_s22  ;;  %v17221_v26 = vsel %vm7550_vm12, %v7549_v30, %v7453_v49  ;;  %v18921_v13 = vld [vmem:[#allocation72_spill] sm:$0xff]  ;;  %v18924_v44 = vld [vmem:[#allocation18_spill] sm:$0xff] }
 0x889   : > { %10926 = vmatmul.mubr.msk.f32.gmra.mrb[54].mxu0 %vm484_vm1, %v17165_v45  ;;  %v8227_v2 = vrot.slane %v8136_v8, 1  ;;  %v8230_v30 = vrot.slane %v17221_v26, 1 }
 0x88a   : > { %v7249_v62 = vpop.permute.xlu1 %7248  ;;  %v17210_v5 = vsel %vm2911_vm13, %v8219_v32, %v8220_v60  ;;  %v18922_v32 = vld [vmem:[#allocation20_spill] sm:$0xff] }
 0x88b   : > { %v7514_v1 = vsel %vm7486_vm11, %v18920_v7, %v7249_v62  ;;  %10981 = vmatprep.mubr.msk.f32.mxu1 %vm484_vm1, %v17210_v5  ;;  %v7516_v23 = vsel %vm7486_vm11, %v18923_v17, %v18922_v32  ;;  %v17246_v8 = vsel %vm2911_vm13, %v8225_v27, %v8227_v2 }
 0x88c   : > { %v7546_v31 = vsel %vm3011_vm15, %v7514_v1, %v18921_v13  ;;  %10982 = vmatmul.mubr.msk.f32.gmra.mrb[54].mxu1 %vm484_vm1, %v17218_v57  ;;  %v7548_v60 = vsel %vm3011_vm15, %v7516_v23, %v16967_v22  ;;  %v8073_v13 = vpop.permute.xlu0 %8072 }
 0x88d   : > { %v17232_v62 = vsel %vm7550_vm12, %v7546_v31, %v18924_v44  ;;  %v18925_v31 = vld [vmem:[#allocation56_spill] sm:$0xff] }
 0x88e   : > { %v7451_v49 = vpop.permute.xlu1 %7450  ;;  %10928 = vmatprep.mubr.msk.f32.mxu0 %vm484_vm1, %v17232_v62  ;;  %v8224_v19 = vrot.slane %v17232_v62, 1  ;;  %v8105_v32 = vsel %vm7486_vm11, %v18925_v31, %v17097_v54 }
 0x88f   : > { %v17241_v7 = vsel %vm7550_vm12, %v7548_v60, %v7451_v49  ;;  %10929 = vmatmul.mubr.msk.f32.gmra.mrb[56].mxu0 %vm484_vm1, %v17196_v24 }
 0x890   : > { %v8229_v1 = vrot.slane %v17241_v7, 1  ;;  %10931 = vmatprep.mubr.msk.f32.mxu0 %vm484_vm1, %v17241_v7  ;;  %v17252_v22 = vsel %vm2911_vm13, %v8224_v19, %v8225_v27 }
 0x891   : > { %10984 = vmatprep.mubr.msk.f32.mxu1 %vm484_vm1, %v17252_v22 }
 0x892   : > { %v8025_v17 = vpop.permute.xlu1 %8024  ;;  %10985 = vmatmul.mubr.msk.f32.gmra.mrb[56].mxu1 %vm484_vm1, %v17246_v8  ;;  %v17262_v23 = vsel %vm2911_vm13, %v8229_v1, %v8230_v30 }
 0x893   : > { %v8121_v2 = vsel %vm3011_vm15, %v8105_v32, %v8025_v17  ;;  %10932 = vmatmul.mubr.msk.f32.gmra.mrb[58].mxu0 %vm484_vm1, %v17221_v26  ;;  %10987 = vmatprep.mubr.msk.f32.mxu1 %vm484_vm1, %v17262_v23 }
 0x894   : > { %v8137_v27 = vsel %vm7550_vm12, %v8121_v2, %v8073_v13  ;;  %10998 = vmatprep.mubr.msk.f32.mxu0 %vm484_vm1, %v16662_v16 }
 0x895   : > { %v8232_v54 = vrot.slane %v8137_v27, 1 }
 0x896   : > { %v8561_v16 = vpop.permute.xlu1 %8560 }
 0x897   : > { %10999 = vmatmul.mubr.msk.f32.vlgmr.msra.gmra.mrb[60].mxu0 %vm484_vm1, %v16718_v51  ;;  %v17275_v44 = vsel %vm2911_vm13, %v8230_v30, %v8232_v54 }
 0x898   : > { %10988 = vmatmul.mubr.msk.f32.gmra.mrb[58].mxu1 %vm484_vm1, %v17275_v44  ;;  %11001 = vmatprep.mubr.msk.f32.mxu0 %vm484_vm1, %v16701_v63  ;;  %v18926_v63 = vld [vmem:[#allocation22_spill] sm:$0xff] }
 0x899   : > { %11054 = vmatprep.mubr.msk.f32.mxu1 %vm484_vm1, %v16747_v0  ;;  %v8563_v0 = vpop.permute.xlu0 %8562 }
 0x89a   : > { %v8567_v51 = vpop.permute.xlu1 %8566 }
 0x89b   : > { %11002 = vmatmul.mubr.msk.f32.gmra.mrb[62].mxu0 %vm484_vm1, %v16722_v42  ;;  %v18927_v42 = vld [vmem:[#allocation116_spill] sm:$0xff] }
 0x89c   : > { %11004 = vmatprep.mubr.msk.f32.mxu0 %vm484_vm1, %v16757_v28  ;;  %11055 = vmatmul.mubr.msk.f32.vlgmr.msra.gmra.mrb[60].mxu1 %vm484_vm1, %v16751_v36  ;;  %v18929_v36 = vld [vmem:[#allocation113_spill] sm:$0xff]  ;;  %v18930_v28 = vld [vmem:[#allocation111_spill] sm:$0xff] }
 0x89d   : > { %11057 = vmatprep.mubr.msk.f32.mxu1 %vm484_vm1, %v16772_v61  ;;  %v18931_v61 = vld [vmem:[#allocation99_spill] sm:$0xff] }
 0x89f   : > { %11005 = vmatmul.mubr.msk.f32.gmra.mrb[64].mxu0 %vm484_vm1, %v16736_v48  ;;  %v18928_v48 = vld [vmem:[#allocation100_spill] sm:$0xff] }
 0x8a0   : > { %11007 = vmatprep.mubr.msk.f32.mxu0 %vm484_vm1, %v16782_v33  ;;  %11058 = vmatmul.mubr.msk.f32.gmra.mrb[62].mxu1 %vm484_vm1, %v16792_v35  ;;  %v18932_v33 = vld [vmem:[#allocation114_spill] sm:$0xff]  ;;  %v11612_v35 = vpop.permute.xlu1 %11611 }
 0x8a1   : > { %11060 = vmatprep.mubr.msk.f32.mxu1 %vm484_vm1, %v16804_v11  ;;  %v18933_v11 = vld [vmem:[#allocation101_spill] sm:$0xff] }
 0x8a3   : > { %11008 = vmatmul.mubr.msk.f32.gmra.mrb[66].mxu0 %vm484_vm1, %v16796_v38  ;;  %v8847_v38 = vpop.permute.xlu0 %8846 }
 0x8a4   : > { %11010 = vmatprep.mubr.msk.f32.mxu0 %vm484_vm1, %v16838_v59  ;;  %11061 = vmatmul.mubr.msk.f32.gmra.mrb[64].mxu1 %vm484_vm1, %v16816_v20  ;;  %v18934_v20 = vld [vmem:[#allocation57_spill] sm:$0xff] }
 0x8a5   : > { %11063 = vmatprep.mubr.msk.f32.mxu1 %vm484_vm1, %v16823_v39  ;;  %v8573_v39 = vsel %vm7486_vm11, %v18934_v20, %v8563_v0  ;;  %v18935_v59 = vld [vmem:[#allocation105_spill] sm:$0xff] }
 0x8a7   : > { %11011 = vmatmul.mubr.msk.f32.gmra.mrb[68].mxu0 %vm484_vm1, %v16866_v37  ;;  %v8852_v37 = vsel %vm7486_vm11, %v18935_v59, %v8847_v38 }
 0x8a8   : > { %11013 = vmatprep.mubr.msk.f32.mxu0 %vm484_vm1, %v16874_v29  ;;  %11064 = vmatmul.mubr.msk.f32.gmra.mrb[66].mxu1 %vm484_vm1, %v16828_v12  ;;  %v11613_v12 = vunpack.i.l.bf16 %v11612_v35  ;;  %v18936_v29 = vld [vmem:[#allocation83_spill] sm:$0xff] }
 0x8a9   : > { %11066 = vmatprep.mubr.msk.f32.mxu1 %vm484_vm1, %v16890_v40  ;;  %v8572_v40 = vsel %vm7486_vm11, %v18936_v29, %v8561_v16 }
 0x8ab   : > { %11014 = vmatmul.mubr.msk.f32.gmra.mrb[70].mxu0 %vm484_vm1, %v16927_v25  ;;  %v8853_v25 = vsel %vm3011_vm15, %v8852_v37, %v8567_v51 }
 0x8ac   : > { %11016 = vmatprep.mubr.msk.f32.mxu0 %vm484_vm1, %v16923_v53  ;;  %11067 = vmatmul.mubr.msk.f32.gmra.mrb[68].mxu1 %vm484_vm1, %v16893_v47  ;;  %v8575_v47 = vsel %vm3011_vm15, %v8573_v39, %v8567_v51  ;;  %v8574_v53 = vsel %vm3011_vm15, %v8572_v40, %v8567_v51  ;;  %vm9610_vm15 = vcmask 97280  }
 0x8ad   : > { %11069 = vmatprep.mubr.msk.f32.mxu1 %vm484_vm1, %v16950_v3  ;;  %v8577_v3 = vsel %vm7550_vm12, %v8575_v47, %v11613_v12 }
 0x8af   : > { %11017 = vmatmul.mubr.msk.f32.gmra.mrb[72].mxu0 %vm484_vm1, %v16901_v15  ;;  %v11614_v15 = vunpack.i.h.bf16 %v11612_v35 }
 0x8b0   : > { %11019 = vmatprep.mubr.msk.f32.mxu0 %vm484_vm1, %v16961_v50  ;;  %11070 = vmatmul.mubr.msk.f32.gmra.mrb[70].mxu1 %vm484_vm1, %v16953_v55 }
 0x8b1   : > { %11072 = vmatprep.mubr.msk.f32.mxu1 %vm484_vm1, %v16970_v52  ;;  %v8854_v55 = vsel %vm7550_vm12, %v8853_v25, %v11614_v15  ;;  %v8857_v52 = vrot.slane %v8577_v3, 1 }
 0x8b3   : > { %11020 = vmatmul.mubr.msk.f32.gmra.mrb[74].mxu0 %vm484_vm1, %v16944_v18  ;;  %v8576_v18 = vsel %vm7550_vm12, %v8574_v53, %v11613_v12 }
 0x8b4   : > { %11022 = vmatprep.mubr.msk.f32.mxu0 %vm484_vm1, %v17016_v6  ;;  %11073 = vmatmul.mubr.msk.f32.gmra.mrb[72].mxu1 %vm484_vm1, %v16981_v21  ;;  %v8856_v50 = vrot.slane %v8576_v18, 1  ;;  %v8859_v21 = vrot.slane %v8854_v55, 1  ;;  %v18937_v6 = vld [vmem:[#allocation25_spill] sm:$0xff] }
 0x8b5   : > { %11075 = vmatprep.mubr.msk.f32.mxu1 %vm484_vm1, %v16988_v10 }
 0x8b6   : > { %v8858_v10 = vsel %vm2911_vm13, %v8856_v50, %v8857_v52 }
 0x8b7   : > { %11023 = vmatmul.mubr.msk.f32.gmra.mrb[76].mxu0 %vm484_vm1, %v17024_v41  ;;  %v18938_v41 = vld [vmem:[#allocation109_spill] sm:$0xff] }
 0x8b8   : > { %11025 = vmatprep.mubr.msk.f32.mxu0 %vm484_vm1, %v17069_v43  ;;  %11076 = vmatmul.mubr.msk.f32.gmra.mrb[74].mxu1 %vm484_vm1, %v16993_v14  ;;  %v8860_v14 = vsel %vm2911_vm13, %v8857_v52, %v8859_v21  ;;  %vm9577_vm13 = vcmask 72704  }
 0x8b9   : > { %11078 = vmatprep.mubr.msk.f32.mxu1 %vm484_vm1, %v17048_v4  ;;  %v7761_v4 = vadd.f32 %v18938_v41, %v18937_v6 }
 0x8bb   : > { %11026 = vmatmul.mubr.msk.f32.gmra.mrb[78].mxu0 %vm484_vm1, %v17087_v56  ;;  %11619 = vtanh.f32 %v7761_v4 }
 0x8bc   : > { %11028 = vmatprep.mubr.msk.f32.mxu0 %vm484_vm1, %v17078_v34  ;;  %11079 = vmatmul.mubr.msk.f32.gmra.mrb[76].mxu1 %vm484_vm1, %v17051_v9  ;;  %v18939_v9 = vld [vmem:[#allocation98_spill] sm:$0xff] }
 0x8bd   : > { %11081 = vmatprep.mubr.msk.f32.mxu1 %vm484_vm1, %v17113_v46  ;;  %v7756_v43 = vadd.f32 %v18937_v6, %v18939_v9 }
 0x8bf   : > { %11029 = vmatmul.mubr.msk.f32.gmra.mrb[80].mxu0 %vm484_vm1, %v18926_v63  ;;  %11621 = vtanh.f32 %v7756_v43 }
 0x8c0   : > { %11031 = vmatprep.mubr.msk.f32.mxu0 %vm484_vm1, %v18927_v42  ;;  %11082 = vmatmul.mubr.msk.f32.gmra.mrb[78].mxu1 %vm484_vm1, %v18928_v48 }
 0x8c1   : > { %11084 = vmatprep.mubr.msk.f32.mxu1 %vm484_vm1, %v18929_v36 }
 0x8c3   : > { %11032 = vmatmul.mubr.msk.f32.gmra.mrb[82].mxu0 %vm484_vm1, %v18930_v28 }
 0x8c4   : > { %11034 = vmatprep.mubr.msk.f32.mxu0 %vm484_vm1, %v17189_v58  ;;  %11085 = vmatmul.mubr.msk.f32.gmra.mrb[80].mxu1 %vm484_vm1, %v18931_v61 }
 0x8c5   : > { %11087 = vmatprep.mubr.msk.f32.mxu1 %vm484_vm1, %v18932_v33  ;;  %v11620_v34 = vpop.eup %11619 }
 0x8c7   : > { %11035 = vmatmul.mubr.msk.f32.gmra.mrb[84].mxu0 %vm484_vm1, %v17165_v45 }
 0x8c8   : > { %11037 = vmatprep.mubr.msk.f32.mxu0 %vm484_vm1, %v17232_v62  ;;  %11088 = vmatmul.mubr.msk.f32.gmra.mrb[82].mxu1 %vm484_vm1, %v18933_v11 }
 0x8c9   : > { %11090 = vmatprep.mubr.msk.f32.mxu1 %vm484_vm1, %v17210_v5  ;;  %v11622_v46 = vpop.eup %11621 }
 0x8cb   : > { %11038 = vmatmul.mubr.msk.f32.gmra.mrb[86].mxu0 %vm484_vm1, %v17196_v24 }
 0x8cc   : > { %11040 = vmatprep.mubr.msk.f32.mxu0 %vm484_vm1, %v17241_v7  ;;  %11091 = vmatmul.mubr.msk.f32.gmra.mrb[84].mxu1 %vm484_vm1, %v17218_v57 }
 0x8cd   : > { %11093 = vmatprep.mubr.msk.f32.mxu1 %vm484_vm1, %v17252_v22 }
 0x8cf   : > { %11041 = vmatmul.mubr.msk.f32.gmra.mrb[88].mxu0 %vm484_vm1, %v17221_v26 }
 0x8d0   : > { %11043 = vmatprep.mubr.msk.f32.mxu0 %vm484_vm1, %v8576_v18  ;;  %11094 = vmatmul.mubr.msk.f32.gmra.mrb[86].mxu1 %vm484_vm1, %v17246_v8 }
 0x8d1   : > { %11096 = vmatprep.mubr.msk.f32.mxu1 %vm484_vm1, %v17262_v23 }
 0x8d3   : > { %11044 = vmatmul.mubr.msk.f32.gmra.mrb[90].mxu0 %vm484_vm1, %v8577_v3 }
 0x8d4   : > { %11097 = vmatmul.mubr.msk.f32.gmra.mrb[88].mxu1 %vm484_vm1, %v17275_v44 }
 0x8d5   : > { %11099 = vmatprep.mubr.msk.f32.mxu1 %vm484_vm1, %v8858_v10 }
 0x8d8   : > { %11100 = vmatmul.mubr.msk.f32.gmra.mrb[90].mxu1 %vm484_vm1, %v8860_v14  ;;  %vm9544_vm1 = vcmask 48128  }
 0x8f9   : > { %v9162_v56 = vpop.permute.xlu1 %9161 }
 0x8fa   : > { %v17418_v45 = vsel %vm9511_vm2, %v11620_v34, %v9162_v56  ;;  %v9160_v58 = vpop.permute.xlu0 %9159 }
 0x8fb   : > { %v17421_v24 = vsel %vm9511_vm2, %v11622_v46, %v9160_v58 }
 0x8fc   : > { %18940 = vst [vmem:[#allocation120_spill] sm:$0xff] %v17421_v24 }
 0x908   : > { %v17423_v5 = vpop.f32.mrb[30].mxu0 }
 0x909   : > { %v17425_v57 = vpop.f32.mrb[31].mxu0 }
 0x90c   : > { %v17427_v26 = vpop.f32.mrb[32].mxu0  ;;  %v10947_v62 = vpop.f32.mrb[30].mxu1 }
 0x90d   : > { %v8385_v60 = vadd.f32 %v10947_v62, %v18937_v6  ;;  %v17430_v49 = vpop.f32.mrb[33].mxu0  ;;  %v8379_v19 = vpop.f32.mrb[31].mxu1 }
 0x90e   : > { %v8380_v30 = vadd.f32 %v18937_v6, %v8379_v19 }
 0x90f   : > { %11623 = vtanh.f32 %v8385_v60 }
 0x910   : > { %v17433_v7 = vpop.f32.mrb[34].mxu0  ;;  %v10950_v8 = vpop.f32.mrb[32].mxu1  ;;  %11625 = vtanh.f32 %v8380_v30 }
 0x911   : > { %v8395_v1 = vadd.f32 %v10950_v8, %v18937_v6  ;;  %v17436_v22 = vpop.f32.mrb[35].mxu0  ;;  %v8389_v13 = vpop.f32.mrb[33].mxu1 }
 0x912   : > { %v8390_v31 = vadd.f32 %v18937_v6, %v8389_v13 }
 0x913   : > { %11627 = vtanh.f32 %v8395_v1 }
 0x914   : > { %v17439_v32 = vpop.f32.mrb[36].mxu0  ;;  %v10953_v17 = vpop.f32.mrb[34].mxu1  ;;  %11629 = vtanh.f32 %v8390_v31 }
 0x915   : > { %v8405_v23 = vadd.f32 %v10953_v17, %v18937_v6  ;;  %v17442_v2 = vpop.f32.mrb[37].mxu0  ;;  %v8399_v27 = vpop.f32.mrb[35].mxu1 }
 0x916   : > { %v8400_v54 = vadd.f32 %v18937_v6, %v8399_v27 }
 0x917   : > { %11631 = vtanh.f32 %v8405_v23 }
 0x918   : > { %v10956_v44 = vpop.f32.mrb[36].mxu1  ;;  %11633 = vtanh.f32 %v8400_v54 }
 0x919   : > { %v8415_v16 = vadd.f32 %v10956_v44, %v18937_v6  ;;  %v8409_v63 = vpop.f32.mrb[37].mxu1  ;;  %v11624_v51 = vpop.eup %11623 }
 0x91a   : > { %v8410_v42 = vadd.f32 %v18937_v6, %v8409_v63  ;;  %9165 = vrot.lane.b32.xlu1 %v11624_v51, %s12140_s22  ;;  %v11626_v48 = vpop.eup %11625 }
 0x91b   : > { %11635 = vtanh.f32 %v8415_v16  ;;  %9163 = vrot.lane.b32.xlu0 %v11626_v48, %s12140_s22 }
 0x91c   : > { %11637 = vtanh.f32 %v8410_v42 }
 0x91d   : > { %v11628_v0 = vpop.eup %11627 }
 0x91e   : > { %9169 = vrot.lane.b32.xlu1 %v11628_v0, %s12140_s22  ;;  %v11630_v36 = vpop.eup %11629 }
 0x91f   : > { %9167 = vrot.lane.b32.xlu0 %v11630_v36, %s12140_s22 }
 0x921   : > { %v11632_v28 = vpop.eup %11631 }
 0x922   : > { %9173 = vrot.lane.b32.xlu1 %v11632_v28, %s12140_s22  ;;  %v11634_v61 = vpop.eup %11633 }
 0x923   : > { %9171 = vrot.lane.b32.xlu0 %v11634_v61, %s12140_s22 }
 0x924   : > { %v17452_v33 = vpop.f32.mrb[38].mxu0 }
 0x925   : > { %v11636_v35 = vpop.eup %11635  ;;  %v17455_v38 = vpop.f32.mrb[39].mxu0 }
 0x926   : > { %v11638_v11 = vpop.eup %11637  ;;  %9177 = vrot.lane.b32.xlu1 %v11636_v35, %s12140_s22 }
 0x927   : > { %9175 = vrot.lane.b32.xlu0 %v11638_v11, %s12140_s22 }
 0x928   : > { %v10959_v20 = vpop.f32.mrb[38].mxu1 }
 0x929   : > { %v8425_v39 = vadd.f32 %v10959_v20, %v18937_v6  ;;  %v8419_v12 = vpop.f32.mrb[39].mxu1 }
 0x92a   : > { %v8420_v59 = vadd.f32 %v18937_v6, %v8419_v12  ;;  %v17461_v37 = vpop.f32.mrb[40].mxu0 }
 0x92b   : > { %11639 = vtanh.f32 %v8425_v39  ;;  %v17463_v29 = vpop.f32.mrb[41].mxu0 }
 0x92c   : > { %11641 = vtanh.f32 %v8420_v59 }
 0x92e   : > { %v17465_v40 = vpop.f32.mrb[42].mxu0  ;;  %v10962_v47 = vpop.f32.mrb[40].mxu1 }
 0x92f   : > { %v8435_v15 = vadd.f32 %v10962_v47, %v18937_v6  ;;  %v17468_v53 = vpop.f32.mrb[43].mxu0  ;;  %v8429_v25 = vpop.f32.mrb[41].mxu1 }
 0x930   : > { %v8430_v18 = vadd.f32 %v18937_v6, %v8429_v25 }
 0x931   : > { %11643 = vtanh.f32 %v8435_v15 }
 0x932   : > { %v17471_v3 = vpop.f32.mrb[44].mxu0  ;;  %v10965_v55 = vpop.f32.mrb[42].mxu1  ;;  %11645 = vtanh.f32 %v8430_v18 }
 0x933   : > { %v8445_v50 = vadd.f32 %v10965_v55, %v18937_v6  ;;  %v17474_v52 = vpop.f32.mrb[45].mxu0  ;;  %v8439_v21 = vpop.f32.mrb[43].mxu1 }
 0x934   : > { %v8440_v10 = vadd.f32 %v18937_v6, %v8439_v21 }
 0x935   : > { %v11640_v14 = vpop.eup %11639  ;;  %11647 = vtanh.f32 %v8445_v50 }
 0x936   : > { %v11642_v41 = vpop.eup %11641  ;;  %9181 = vrot.lane.b32.xlu1 %v11640_v14, %s12140_s22  ;;  %v10968_v4 = vpop.f32.mrb[44].mxu1  ;;  %11649 = vtanh.f32 %v8440_v10 }
 0x937   : > { %v8455_v9 = vadd.f32 %v10968_v4, %v18937_v6  ;;  %9179 = vrot.lane.b32.xlu0 %v11642_v41, %s12140_s22  ;;  %v8449_v43 = vpop.f32.mrb[45].mxu1 }
 0x938   : > { %v8450_v34 = vadd.f32 %v18937_v6, %v8449_v43 }
 0x939   : > { %11651 = vtanh.f32 %v8455_v9 }
 0x93a   : > { %11653 = vtanh.f32 %v8450_v34 }
 0x93b   : > { %v11644_v56 = vpop.eup %11643 }
 0x93c   : > { %9185 = vrot.lane.b32.xlu1 %v11644_v56, %s12140_s22  ;;  %v11646_v46 = vpop.eup %11645 }
 0x93d   : > { %9183 = vrot.lane.b32.xlu0 %v11646_v46, %s12140_s22 }
 0x93f   : > { %v11648_v58 = vpop.eup %11647 }
 0x940   : > { %9189 = vrot.lane.b32.xlu1 %v11648_v58, %s12140_s22  ;;  %v11650_v62 = vpop.eup %11649 }
 0x941   : > { %9187 = vrot.lane.b32.xlu0 %v11650_v62, %s12140_s22 }
 0x943   : > { %v11652_v60 = vpop.eup %11651 }
 0x944   : > { %v11654_v19 = vpop.eup %11653  ;;  %v17485_v30 = vpop.f32.mrb[46].mxu0  ;;  %9193 = vrot.lane.b32.xlu1 %v11652_v60, %s12140_s22 }
 0x945   : > { %v17488_v8 = vpop.f32.mrb[47].mxu0  ;;  %9191 = vrot.lane.b32.xlu0 %v11654_v19, %s12140_s22 }
 0x948   : > { %v10971_v1 = vpop.f32.mrb[46].mxu1 }
 0x949   : > { %v8465_v13 = vadd.f32 %v10971_v1, %v18937_v6  ;;  %v8459_v31 = vpop.f32.mrb[47].mxu1 }
 0x94a   : > { %v8460_v17 = vadd.f32 %v18937_v6, %v8459_v31  ;;  %v17493_v23 = vpop.f32.mrb[48].mxu0 }
 0x94b   : > { %11655 = vtanh.f32 %v8465_v13  ;;  %v17495_v27 = vpop.f32.mrb[49].mxu0 }
 0x94c   : > { %11657 = vtanh.f32 %v8460_v17 }
 0x94e   : > { %v17497_v54 = vpop.f32.mrb[50].mxu0  ;;  %v10974_v44 = vpop.f32.mrb[48].mxu1 }
 0x94f   : > { %v8475_v16 = vadd.f32 %v10974_v44, %v18937_v6  ;;  %v17500_v63 = vpop.f32.mrb[51].mxu0  ;;  %v8469_v51 = vpop.f32.mrb[49].mxu1 }
 0x950   : > { %v8470_v42 = vadd.f32 %v18937_v6, %v8469_v51 }
 0x951   : > { %11659 = vtanh.f32 %v8475_v16 }
 0x952   : > { %v17503_v48 = vpop.f32.mrb[52].mxu0  ;;  %v10977_v0 = vpop.f32.mrb[50].mxu1  ;;  %11661 = vtanh.f32 %v8470_v42 }
 0x953   : > { %v8485_v36 = vadd.f32 %v10977_v0, %v18937_v6  ;;  %v17506_v28 = vpop.f32.mrb[53].mxu0  ;;  %v8479_v61 = vpop.f32.mrb[51].mxu1 }
 0x954   : > { %v8480_v35 = vadd.f32 %v18937_v6, %v8479_v61 }
 0x955   : > { %v11656_v11 = vpop.eup %11655  ;;  %11663 = vtanh.f32 %v8485_v36 }
 0x956   : > { %v11658_v20 = vpop.eup %11657  ;;  %9197 = vrot.lane.b32.xlu1 %v11656_v11, %s12140_s22  ;;  %v10980_v39 = vpop.f32.mrb[52].mxu1  ;;  %11665 = vtanh.f32 %v8480_v35 }
 0x957   : > { %v8495_v12 = vadd.f32 %v10980_v39, %v18937_v6  ;;  %9195 = vrot.lane.b32.xlu0 %v11658_v20, %s12140_s22  ;;  %v8489_v59 = vpop.f32.mrb[53].mxu1 }
 0x958   : > { %v8490_v47 = vadd.f32 %v18937_v6, %v8489_v59 }
 0x959   : > { %11667 = vtanh.f32 %v8495_v12 }
 0x95a   : > { %11669 = vtanh.f32 %v8490_v47 }
 0x95b   : > { %v11660_v15 = vpop.eup %11659 }
 0x95c   : > { %v17513_v25 = vpop.f32.mrb[54].mxu0  ;;  %9201 = vrot.lane.b32.xlu1 %v11660_v15, %s12140_s22  ;;  %v11662_v55 = vpop.eup %11661 }
 0x95d   : > { %v17515_v18 = vpop.f32.mrb[55].mxu0  ;;  %9199 = vrot.lane.b32.xlu0 %v11662_v55, %s12140_s22 }
 0x95f   : > { %v10983_v50 = vpop.f32.mrb[54].mxu1  ;;  %v11664_v21 = vpop.eup %11663 }
 0x960   : > { %v8505_v10 = vadd.f32 %v10983_v50, %v18937_v6  ;;  %v8499_v14 = vpop.f32.mrb[55].mxu1  ;;  %9205 = vrot.lane.b32.xlu1 %v11664_v21, %s12140_s22  ;;  %v11666_v4 = vpop.eup %11665 }
 0x961   : > { %v8500_v41 = vadd.f32 %v18937_v6, %v8499_v14  ;;  %9203 = vrot.lane.b32.xlu0 %v11666_v4, %s12140_s22 }
 0x962   : > { %v17522_v9 = vpop.f32.mrb[56].mxu0  ;;  %11671 = vtanh.f32 %v8505_v10 }
 0x963   : > { %v11668_v43 = vpop.eup %11667  ;;  %v17524_v34 = vpop.f32.mrb[57].mxu0  ;;  %11673 = vtanh.f32 %v8500_v41 }
 0x964   : > { %v11670_v56 = vpop.eup %11669  ;;  %9209 = vrot.lane.b32.xlu1 %v11668_v43, %s12140_s22 }
 0x965   : > { %v10986_v46 = vpop.f32.mrb[56].mxu1  ;;  %9207 = vrot.lane.b32.xlu0 %v11670_v56, %s12140_s22 }
 0x966   : > { %v17528_v58 = vpop.f32.mrb[58].mxu0  ;;  %v8515_v62 = vadd.f32 %v10986_v46, %v18937_v6  ;;  %v8509_v60 = vpop.f32.mrb[57].mxu1 }
 0x967   : > { %v17531_v19 = vpop.f32.mrb[59].mxu0  ;;  %v8510_v1 = vadd.f32 %v18937_v6, %v8509_v60 }
 0x968   : > { %11675 = vtanh.f32 %v8515_v62 }
 0x969   : > { %11677 = vtanh.f32 %v8510_v1 }
 0x96a   : > { %v11000_v13 = vpop.f32.mrb[60].mxu0 }
 0x96b   : > { %v10989_v31 = vpop.f32.mrb[58].mxu1  ;;  %v8655_v17 = vpop.f32.mrb[61].mxu0  ;;  %v8661_v36 = vadd.f32 %v11000_v13, %v18937_v6 }
 0x96c   : > { %v11672_v44 = vpop.eup %11671  ;;  %v8525_v16 = vadd.f32 %v10989_v31, %v18937_v6  ;;  %v8519_v51 = vpop.f32.mrb[59].mxu1  ;;  %v8656_v20 = vadd.f32 %v18937_v6, %v8655_v17 }
 0x96d   : > { %v11674_v42 = vpop.eup %11673  ;;  %v8520_v0 = vadd.f32 %v18937_v6, %v8519_v51  ;;  %9213 = vrot.lane.b32.xlu1 %v11672_v44, %s12140_s22 }
 0x96e   : > { %11679 = vtanh.f32 %v8525_v16  ;;  %v11003_v61 = vpop.f32.mrb[62].mxu0  ;;  %9211 = vrot.lane.b32.xlu0 %v11674_v42, %s12140_s22 }
 0x96f   : > { %v8665_v35 = vpop.f32.mrb[63].mxu0  ;;  %v11056_v11 = vpop.f32.mrb[60].mxu1  ;;  %11681 = vtanh.f32 %v8520_v0  ;;  %v8671_v14 = vadd.f32 %v11003_v61, %v18937_v6  ;;  %v7771_v61 = vadd.f32 %v17423_v5, %v18937_v6 }
 0x970   : > { %v8936_v39 = vpop.f32.mrb[61].mxu1  ;;  %11683 = vtanh.f32 %v8661_v36  ;;  %v8942_v59 = vadd.f32 %v11056_v11, %v18937_v6  ;;  %v8666_v46 = vadd.f32 %v18937_v6, %v8665_v35 }
 0x971   : > { %11685 = vtanh.f32 %v8656_v20  ;;  %v8937_v50 = vadd.f32 %v18937_v6, %v8936_v39 }
 0x972   : > { %v11676_v12 = vpop.eup %11675  ;;  %v11006_v47 = vpop.f32.mrb[64].mxu0  ;;  %11687 = vtanh.f32 %v8942_v59  ;;  %v7766_v59 = vadd.f32 %v18937_v6, %v17425_v57 }
 0x973   : > { %v8675_v15 = vpop.f32.mrb[65].mxu0  ;;  %v11059_v55 = vpop.f32.mrb[62].mxu1  ;;  %9217 = vrot.lane.b32.xlu1 %v11676_v12, %s12140_s22  ;;  %11689 = vtanh.f32 %v8937_v50  ;;  %v8681_v0 = vadd.f32 %v11006_v47, %v18937_v6  ;;  %v7781_v50 = vadd.f32 %v17427_v26, %v18937_v6 }
 0x974   : > { %v8946_v21 = vpop.f32.mrb[63].mxu1  ;;  %v11678_v10 = vpop.eup %11677  ;;  %11691 = vtanh.f32 %v8671_v14  ;;  %v8952_v1 = vadd.f32 %v11059_v55, %v18937_v6  ;;  %v8676_v39 = vadd.f32 %v18937_v6, %v8675_v15 }
 0x975   : > { %9215 = vrot.lane.b32.xlu0 %v11678_v10, %s12140_s22  ;;  %11693 = vtanh.f32 %v8666_v46  ;;  %v8947_v16 = vadd.f32 %v18937_v6, %v8946_v21 }
 0x976   : > { %v11009_v41 = vpop.f32.mrb[66].mxu0  ;;  %11695 = vtanh.f32 %v8952_v1 }
 0x977   : > { %v8685_v4 = vpop.f32.mrb[67].mxu0  ;;  %v11062_v43 = vpop.f32.mrb[64].mxu1  ;;  %11697 = vtanh.f32 %v8947_v16  ;;  %v8691_v26 = vadd.f32 %v11009_v41, %v18937_v6  ;;  %v7786_v41 = vadd.f32 %v18937_v6, %v17436_v22 }
 0x978   : > { %v11680_v56 = vpop.eup %11679  ;;  %v8956_v62 = vpop.f32.mrb[65].mxu1  ;;  %11699 = vtanh.f32 %v8681_v0  ;;  %v8962_v5 = vadd.f32 %v11062_v43, %v18937_v6  ;;  %v7776_v43 = vadd.f32 %v18937_v6, %v17430_v49  ;;  %v8686_v49 = vadd.f32 %v18937_v6, %v8685_v4 }
 0x979   : > { %9221 = vrot.lane.b32.xlu1 %v11680_v56, %s12140_s22  ;;  %v11682_v60 = vpop.eup %11681  ;;  %11701 = vtanh.f32 %v7771_v61  ;;  %v8957_v10 = vadd.f32 %v18937_v6, %v8956_v62  ;;  %v7801_v61 = vadd.f32 %v17439_v32, %v18937_v6 }
 0x97a   : > { %v17549_v13 = vpop.f32.mrb[68].mxu0  ;;  %9219 = vrot.lane.b32.xlu0 %v11682_v60, %s12140_s22  ;;  %v11684_v44 = vpop.eup %11683  ;;  %11703 = vtanh.f32 %v8676_v39  ;;  %v7791_v60 = vadd.f32 %v17433_v7, %v18937_v6 }
 0x97b   : > { %v17552_v31 = vpop.f32.mrb[69].mxu0  ;;  %v11065_v17 = vpop.f32.mrb[66].mxu1  ;;  %11705 = vtanh.f32 %v7766_v59 }
 0x97c   : > { %v8966_v51 = vpop.f32.mrb[67].mxu1  ;;  %v11686_v42 = vpop.eup %11685  ;;  %11707 = vtanh.f32 %v8962_v5  ;;  %v8972_v7 = vadd.f32 %v11065_v17, %v18937_v6  ;;  %v7796_v17 = vadd.f32 %v18937_v6, %v17442_v2 }
 0x97d   : > { %9289 = vrot.lane.b32.xlu1 %v11684_v44, %s12141_s25  ;;  %v11688_v20 = vpop.eup %11687  ;;  %11709 = vtanh.f32 %v7781_v50  ;;  %v8967_v22 = vadd.f32 %v18937_v6, %v8966_v51  ;;  %v8701_v50 = vadd.f32 %v17549_v13, %v18937_v6 }
 0x97e   : > { %v17557_v36 = vpop.f32.mrb[70].mxu0  ;;  %9287 = vrot.lane.b32.xlu0 %v11686_v42, %s12141_s25  ;;  %v11690_v47 = vpop.eup %11689  ;;  %11711 = vtanh.f32 %v8957_v10 }
 0x97f   : > { %v17562_v35 = vpop.f32.mrb[71].mxu0  ;;  %v17564_v11 = vpop.f32.mrb[68].mxu1  ;;  %11713 = vtanh.f32 %v7776_v43 }
 0x980   : > { %v17567_v12 = vpop.f32.mrb[69].mxu1  ;;  %v11692_v57 = vpop.eup %11691  ;;  %11715 = vtanh.f32 %v8691_v26  ;;  %v8696_v26 = vadd.f32 %v18937_v6, %v17552_v31 }
 0x981   : > { %9417 = vrot.lane.b32.xlu1 %v11688_v20, %s12142_s20  ;;  %v11694_v56 = vpop.eup %11693  ;;  %11717 = vtanh.f32 %v7791_v60 }
 0x982   : > { %v17573_v55 = vpop.f32.mrb[72].mxu0  ;;  %9415 = vrot.lane.b32.xlu0 %v11690_v47, %s12142_s20  ;;  %v11696_v44 = vpop.eup %11695  ;;  %11719 = vtanh.f32 %v8686_v49 }
 0x983   : > { %v17578_v15 = vpop.f32.mrb[73].mxu0  ;;  %v17580_v21 = vpop.f32.mrb[70].mxu1  ;;  %11721 = vtanh.f32 %v7786_v41 }
 0x984   : > { %v17583_v14 = vpop.f32.mrb[71].mxu1  ;;  %v11698_v42 = vpop.eup %11697  ;;  %11723 = vtanh.f32 %v8972_v7  ;;  %v8982_v7 = vadd.f32 %v17564_v11, %v18937_v6 }
 0x985   : > { %9293 = vrot.lane.b32.xlu1 %v11692_v57, %s12141_s25  ;;  %v11700_v39 = vpop.eup %11699  ;;  %11725 = vtanh.f32 %v7801_v61 }
 0x986   : > { %v17589_v46 = vpop.f32.mrb[74].mxu0  ;;  %9291 = vrot.lane.b32.xlu0 %v11694_v56, %s12141_s25  ;;  %v11702_v47 = vpop.eup %11701  ;;  %11727 = vtanh.f32 %v8967_v22 }
 0x987   : > { %v17594_v62 = vpop.f32.mrb[75].mxu0  ;;  %v17596_v1 = vpop.f32.mrb[72].mxu1  ;;  %11729 = vtanh.f32 %v7796_v17 }
 0x988   : > { %v17599_v16 = vpop.f32.mrb[73].mxu1  ;;  %v11704_v5 = vpop.eup %11703  ;;  %11731 = vtanh.f32 %v8701_v50 }
 0x989   : > { %9421 = vrot.lane.b32.xlu1 %v11696_v44, %s12142_s20  ;;  %v11706_v51 = vpop.eup %11705  ;;  %11733 = vtanh.f32 %v8696_v26 }
 0x98a   : > { %v17605_v0 = vpop.f32.mrb[76].mxu0  ;;  %9419 = vrot.lane.b32.xlu0 %v11698_v42, %s12142_s20  ;;  %v11708_v56 = vpop.eup %11707  ;;  %11735 = vtanh.f32 %v8982_v7 }
 0x98b   : > { %v17610_v4 = vpop.f32.mrb[77].mxu0  ;;  %v17612_v20 = vpop.f32.mrb[74].mxu1 }
 0x98c   : > { %v17615_v59 = vpop.f32.mrb[75].mxu1  ;;  %v9166_v32 = vpop.permute.xlu1 %9165 }
 0x98d   : > { %9297 = vrot.lane.b32.xlu1 %v11700_v39, %s12141_s25  ;;  %v17625_v10 = vsel %vm9511_vm2, %v11702_v47, %v9166_v32  ;;  %v9164_v60 = vpop.permute.xlu0 %9163  ;;  %v11710_v44 = vpop.eup %11709  ;;  %v8977_v32 = vadd.f32 %v18937_v6, %v17567_v12 }
 0x98e   : > { %v17622_v57 = vpop.f32.mrb[78].mxu0  ;;  %18941 = vst [vmem:[#allocation122_spill] sm:$0xff] %v17625_v10  ;;  %9295 = vrot.lane.b32.xlu0 %v11704_v5, %s12141_s25  ;;  %v17638_v49 = vsel %vm9511_vm2, %v11706_v51, %v9164_v60  ;;  %v11712_v42 = vpop.eup %11711 }
 0x98f   : > { %v17628_v43 = vpop.f32.mrb[79].mxu0  ;;  %v17630_v2 = vpop.f32.mrb[76].mxu1  ;;  %18942 = vst [vmem:[#allocation123_spill] sm:$0xff] %v17638_v49  ;;  %11737 = vtanh.f32 %v8977_v32 }
 0x990   : > { %v17634_v13 = vpop.f32.mrb[77].mxu1  ;;  %v9170_v41 = vpop.permute.xlu1 %9169 }
 0x991   : > { %9425 = vrot.lane.b32.xlu1 %v11708_v56, %s12142_s20  ;;  %v17645_v31 = vsel %vm9511_vm2, %v11710_v44, %v9170_v41  ;;  %v11714_v39 = vpop.eup %11713  ;;  %v9168_v11 = vpop.permute.xlu0 %9167  ;;  %v8711_v44 = vadd.f32 %v17557_v36, %v18937_v6 }
 0x992   : > { %v17642_v61 = vpop.f32.mrb[80].mxu0  ;;  %18943 = vst [vmem:[#allocation107_spill] sm:$0xff] %v17645_v31  ;;  %9423 = vrot.lane.b32.xlu0 %v11712_v42, %s12142_s20  ;;  %v11716_v17 = vpop.eup %11715  ;;  %v17658_v51 = vsel %vm9511_vm2, %v11714_v39, %v9168_v11  ;;  %v17672_v11 = vld [vmem:[#allocation12] ss:$0 sm:$0xff] }
 0x993   : > { %v17648_v22 = vpop.f32.mrb[81].mxu0  ;;  %v17650_v47 = vpop.f32.mrb[78].mxu1  ;;  %18944 = vst [vmem:[#allocation124_spill] sm:$0xff] %v17658_v51  ;;  %v8706_v51 = vadd.f32 %v17672_v11, %v17562_v35  ;;  %11739 = vtanh.f32 %v8711_v44  ;;  %v8992_v31 = vadd.f32 %v17672_v11, %v17580_v21  ;;  %v8987_v21 = vadd.f32 %v17672_v11, %v17583_v14 }
 0x994   : > { %v17654_v5 = vpop.f32.mrb[79].mxu1  ;;  %v11718_v50 = vpop.eup %11717 }
 0x995   : > { %9301 = vrot.lane.b32.xlu1 %v11716_v17, %s12141_s25  ;;  %v9174_v56 = vpop.permute.xlu1 %9173  ;;  %v11720_v60 = vpop.eup %11719  ;;  %11741 = vtanh.f32 %v8706_v51 }
 0x996   : > { %v17662_v41 = vpop.f32.mrb[82].mxu0  ;;  %v17665_v26 = vsel %vm9511_vm2, %v11718_v50, %v9174_v56  ;;  %v11722_v12 = vpop.eup %11721  ;;  %9299 = vrot.lane.b32.xlu0 %v11720_v60, %s12141_s25  ;;  %v7811_v50 = vadd.f32 %v17672_v11, %v17452_v33  ;;  %v7806_v33 = vadd.f32 %v17672_v11, %v17455_v38 }
 0x997   : > { %18945 = vst [vmem:[#allocation108_spill] sm:$0xff] %v17665_v26  ;;  %v17668_v42 = vpop.f32.mrb[83].mxu0  ;;  %v17670_v17 = vpop.f32.mrb[80].mxu1 }
 0x998   : > { %v11724_v39 = vpop.eup %11723  ;;  %v17676_v6 = vpop.f32.mrb[81].mxu1  ;;  %11743 = vtanh.f32 %v7811_v50 }
 0x999   : > { %v9172_v36 = vpop.permute.xlu0 %9171  ;;  %v11726_v7 = vpop.eup %11725  ;;  %9429 = vrot.lane.b32.xlu1 %v11724_v39, %s12142_s20  ;;  %11745 = vtanh.f32 %v8992_v31 }
 0x99a   : > { %v17682_v56 = vsel %vm9511_vm2, %v11722_v12, %v9172_v36  ;;  %v9178_v60 = vpop.permute.xlu1 %9177  ;;  %v11728_v26 = vpop.eup %11727  ;;  %11747 = vtanh.f32 %v7806_v33 }
 0x99b   : > { %18946 = vst [vmem:[#allocation23_spill] sm:$0xff] %v17682_v56  ;;  %v17686_v35 = vpop.f32.mrb[84].mxu0  ;;  %v17689_v32 = vsel %vm9511_vm2, %v11726_v7, %v9178_v60  ;;  %v11730_v49 = vpop.eup %11729  ;;  %9427 = vrot.lane.b32.xlu0 %v11728_v26, %s12142_s20  ;;  %v8721_v26 = vadd.f32 %v17672_v11, %v17573_v55  ;;  %11749 = vtanh.f32 %v8987_v21  ;;  %v7821_v55 = vadd.f32 %v17672_v11, %v17461_v37 }
 0x99c   : > { %18947 = vst [vmem:[#allocation125_spill] sm:$0xff] %v17689_v32  ;;  %v17694_v39 = vpop.f32.mrb[85].mxu0  ;;  %v17696_v12 = vpop.f32.mrb[82].mxu1  ;;  %v8997_v37 = vadd.f32 %v17672_v11, %v17599_v16  ;;  %v7826_v16 = vadd.f32 %v17672_v11, %v17468_v53 }
 0x99d   : > { %v11732_v36 = vpop.eup %11731  ;;  %v17700_v44 = vpop.f32.mrb[83].mxu1  ;;  %11751 = vtanh.f32 %v8721_v26 }
 0x99e   : > { %v9176_v56 = vpop.permute.xlu0 %9175  ;;  %9305 = vrot.lane.b32.xlu1 %v11732_v36, %s12141_s25  ;;  %v11734_v38 = vpop.eup %11733  ;;  %v8716_v36 = vadd.f32 %v17672_v11, %v17578_v15 }
 0x99f   : > { %v17704_v7 = vsel %vm9511_vm2, %v11730_v49, %v9176_v56  ;;  %v17708_v60 = vpop.f32.mrb[86].mxu0  ;;  %9303 = vrot.lane.b32.xlu0 %v11734_v38, %s12141_s25  ;;  %v17713_v51 = vpop.f32.mrb[84].mxu1  ;;  %v9002_v56 = vadd.f32 %v17672_v11, %v17596_v1  ;;  %v7816_v38 = vadd.f32 %v17672_v11, %v17463_v29  ;;  %v7831_v1 = vadd.f32 %v17672_v11, %v17465_v40 }
 0x9a0   : > { %18948 = vst [vmem:[#allocation110_spill] sm:$0xff] %v17704_v7  ;;  %v17711_v14 = vpop.f32.mrb[87].mxu0  ;;  %v11736_v50 = vpop.eup %11735  ;;  %11753 = vtanh.f32 %v8716_v36 }
 0x9a1   : > { %v17717_v49 = vpop.f32.mrb[85].mxu1  ;;  %v11738_v31 = vpop.eup %11737  ;;  %11755 = vtanh.f32 %v7821_v55 }
 0x9a2   : > { %9433 = vrot.lane.b32.xlu1 %v11736_v50, %s12142_s20  ;;  %v17724_v33 = vpop.f32.mrb[88].mxu0  ;;  %v11740_v7 = vpop.eup %11739  ;;  %v8731_v50 = vadd.f32 %v17672_v11, %v17589_v46  ;;  %11757 = vtanh.f32 %v9002_v56 }
 0x9a3   : > { %9431 = vrot.lane.b32.xlu0 %v11738_v31, %s12142_s20  ;;  %v17729_v15 = vpop.f32.mrb[89].mxu0  ;;  %v17731_v21 = vpop.f32.mrb[86].mxu1  ;;  %11759 = vtanh.f32 %v7816_v38  ;;  %v7841_v38 = vadd.f32 %v17672_v11, %v17471_v3 }
 0x9a4   : > { %v17735_v26 = vpop.f32.mrb[87].mxu1  ;;  %v11742_v29 = vpop.eup %11741  ;;  %11761 = vtanh.f32 %v8997_v37 }
 0x9a5   : > { %v11744_v32 = vpop.eup %11743  ;;  %11763 = vtanh.f32 %v7831_v1  ;;  %v7836_v1 = vadd.f32 %v17672_v11, %v17474_v52 }
 0x9a6   : > { %9309 = vrot.lane.b32.xlu1 %v11740_v7, %s12141_s25  ;;  %v17742_v31 = vpop.f32.mrb[90].mxu0  ;;  %v11746_v40 = vpop.eup %11745  ;;  %v8726_v7 = vadd.f32 %v17672_v11, %v17594_v62  ;;  %11765 = vtanh.f32 %v8731_v50  ;;  %v9012_v62 = vadd.f32 %v17672_v11, %v17612_v20 }
 0x9a7   : > { %9307 = vrot.lane.b32.xlu0 %v11742_v29, %s12141_s25  ;;  %v17747_v36 = vpop.f32.mrb[91].mxu0  ;;  %v17749_v55 = vpop.f32.mrb[88].mxu1  ;;  %11767 = vtanh.f32 %v7826_v16 }
 0x9a8   : > { %v17753_v46 = vpop.f32.mrb[89].mxu1  ;;  %v9182_v56 = vpop.permute.xlu1 %9181  ;;  %11769 = vtanh.f32 %v8726_v7  ;;  %v8736_v7 = vadd.f32 %v17672_v11, %v17610_v4 }
 0x9a9   : > { %v11748_v10 = vpop.eup %11747  ;;  %v17759_v53 = vsel %vm9511_vm2, %v11744_v32, %v9182_v56  ;;  %v9180_v29 = vpop.permute.xlu0 %9179  ;;  %v9007_v32 = vadd.f32 %v17672_v11, %v17615_v59  ;;  %11771 = vtanh.f32 %v7841_v38 }
 0x9aa   : > { %9437 = vrot.lane.b32.xlu1 %v11746_v40, %s12142_s20  ;;  %v11750_v24 = vpop.eup %11749  ;;  %v17764_v37 = vsel %vm9511_vm2, %v11748_v10, %v9180_v29  ;;  %v8741_v10 = vadd.f32 %v17672_v11, %v17605_v0  ;;  %11773 = vtanh.f32 %v9012_v62  ;;  %v9022_v0 = vadd.f32 %v17672_v11, %v17630_v2 }
 0x9ab   : > { %9435 = vrot.lane.b32.xlu0 %v11750_v24, %s12142_s20  ;;  %v17769_v3 = vpop.f32.mrb[90].mxu1  ;;  %v11752_v40 = vpop.eup %11751  ;;  %11775 = vtanh.f32 %v7836_v1 }
 0x9ac   : > { %v17773_v50 = vpop.f32.mrb[91].mxu1  ;;  %v11754_v20 = vpop.eup %11753  ;;  %11777 = vtanh.f32 %v9007_v32  ;;  %v9017_v32 = vadd.f32 %v17672_v11, %v17634_v13 }
 0x9ad   : > { %v11756_v52 = vpop.eup %11755  ;;  %11779 = vtanh.f32 %v8741_v10 }
 0x9ae   : > { %9313 = vrot.lane.b32.xlu1 %v11752_v40, %s12141_s25  ;;  %v9186_v24 = vpop.permute.xlu1 %9185  ;;  %v11758_v16 = vpop.eup %11757  ;;  %11781 = vtanh.f32 %v8736_v7 }
 0x9af   : > { %9311 = vrot.lane.b32.xlu0 %v11754_v20, %s12141_s25  ;;  %v17782_v59 = vsel %vm9511_vm2, %v11756_v52, %v9186_v24  ;;  %v11760_v56 = vpop.eup %11759  ;;  %v9184_v38 = vpop.permute.xlu0 %9183  ;;  %v8751_v24 = vadd.f32 %v17672_v11, %v17622_v57  ;;  %11783 = vtanh.f32 %v9022_v0  ;;  %v7851_v57 = vadd.f32 %v17672_v11, %v17485_v30 }
 0x9b0   : > { %v11762_v29 = vpop.eup %11761  ;;  %v17788_v62 = vsel %vm9511_vm2, %v11760_v56, %v9184_v38  ;;  %v8746_v38 = vadd.f32 %v17672_v11, %v17628_v43  ;;  %11785 = vtanh.f32 %v9017_v32  ;;  %v7846_v43 = vadd.f32 %v17672_v11, %v17488_v8 }
 0x9b1   : > { %v11764_v1 = vpop.eup %11763  ;;  %11787 = vtanh.f32 %v8751_v24  ;;  %v9027_v30 = vadd.f32 %v17672_v11, %v17654_v5  ;;  %v8756_v8 = vadd.f32 %v17672_v11, %v17648_v22  ;;  %v7861_v24 = vadd.f32 %v17672_v11, %v17493_v23 }
 0x9b2   : > { %9441 = vrot.lane.b32.xlu1 %v11758_v16, %s12142_s20  ;;  %v9190_v4 = vpop.permute.xlu1 %9189  ;;  %v11766_v40 = vpop.eup %11765  ;;  %11789 = vtanh.f32 %v8746_v38  ;;  %v9037_v22 = vadd.f32 %v17672_v11, %v17676_v6  ;;  %v7871_v23 = vadd.f32 %v17672_v11, %v17497_v54  ;;  %v8766_v6 = vadd.f32 %v17672_v11, %v17668_v42 }
 0x9b3   : > { %9439 = vrot.lane.b32.xlu0 %v11762_v29, %s12142_s20  ;;  %v17794_v20 = vsel %vm9511_vm2, %v11764_v1, %v9190_v4  ;;  %v11768_v52 = vpop.eup %11767  ;;  %v9188_v10 = vpop.permute.xlu0 %9187  ;;  %11791 = vtanh.f32 %v7851_v57 }
 0x9b4   : > { %v11770_v2 = vpop.eup %11769  ;;  %v17800_v16 = vsel %vm9511_vm2, %v11768_v52, %v9188_v10 }
 0x9b5   : > { %v11772_v56 = vpop.eup %11771 }
 0x9b6   : > { %9317 = vrot.lane.b32.xlu1 %v11766_v40, %s12141_s25  ;;  %v9194_v7 = vpop.permute.xlu1 %9193  ;;  %v11774_v13 = vpop.eup %11773  ;;  %v9032_v40 = vadd.f32 %v17672_v11, %v17650_v47  ;;  %v8761_v47 = vadd.f32 %v17672_v11, %v17642_v61  ;;  %v7856_v61 = vadd.f32 %v17672_v11, %v17495_v27  ;;  %v7866_v27 = vadd.f32 %v17672_v11, %v17500_v63 }
 0x9b7   : > { %9315 = vrot.lane.b32.xlu0 %v11770_v2, %s12141_s25  ;;  %v17806_v29 = vsel %vm9511_vm2, %v11772_v56, %v9194_v7  ;;  %v11776_v1 = vpop.eup %11775  ;;  %v9192_v0 = vpop.permute.xlu0 %9191  ;;  %v9042_v56 = vadd.f32 %v17672_v11, %v17670_v17  ;;  %v8771_v17 = vadd.f32 %v17672_v11, %v17662_v41 }
 0x9b8   : > { %v11778_v4 = vpop.eup %11777  ;;  %v17814_v52 = vsel %vm9511_vm2, %v11776_v1, %v9192_v0  ;;  %11793 = vtanh.f32 %v9032_v40  ;;  %v7881_v0 = vadd.f32 %v17672_v11, %v17503_v48  ;;  %v9052_v40 = vadd.f32 %v17672_v11, %v17696_v12 }
 0x9b9   : > { %v11780_v32 = vpop.eup %11779  ;;  %11795 = vtanh.f32 %v7846_v43  ;;  %v7876_v43 = vadd.f32 %v17672_v11, %v17506_v28  ;;  %v8781_v12 = vadd.f32 %v17672_v11, %v17686_v35  ;;  %v7891_v28 = vadd.f32 %v17672_v11, %v17513_v25 }
 0x9ba   : > { %9445 = vrot.lane.b32.xlu1 %v11774_v13, %s12142_s20  ;;  %v11782_v10 = vpop.eup %11781  ;;  %11797 = vtanh.f32 %v9027_v30  ;;  %v7886_v35 = vadd.f32 %v17672_v11, %v17515_v18  ;;  %v9062_v25 = vadd.f32 %v17672_v11, %v17713_v51  ;;  %v9057_v18 = vadd.f32 %v17672_v11, %v17717_v49 }
 0x9bb   : > { %9443 = vrot.lane.b32.xlu0 %v11778_v4, %s12142_s20  ;;  %v11784_v2 = vpop.eup %11783  ;;  %11799 = vtanh.f32 %v8761_v47  ;;  %v7901_v49 = vadd.f32 %v17672_v11, %v17522_v9  ;;  %v9072_v9 = vadd.f32 %v17672_v11, %v17731_v21  ;;  %v8801_v21 = vadd.f32 %v17672_v11, %v17724_v33 }
 0x9bc   : > { %v11786_v5 = vpop.eup %11785  ;;  %11801 = vtanh.f32 %v8756_v8 }
 0x9bd   : > { %v11788_v7 = vpop.eup %11787  ;;  %11803 = vtanh.f32 %v7861_v24 }
 0x9be   : > { %9321 = vrot.lane.b32.xlu1 %v11780_v32, %s12141_s25  ;;  %v11790_v13 = vpop.eup %11789  ;;  %11805 = vtanh.f32 %v9042_v56  ;;  %v9047_v32 = vadd.f32 %v17672_v11, %v17700_v44  ;;  %v8776_v44 = vadd.f32 %v17672_v11, %v17694_v39 }
 0x9bf   : > { %9319 = vrot.lane.b32.xlu0 %v11782_v10, %s12141_s25  ;;  %v11792_v38 = vpop.eup %11791  ;;  %11807 = vtanh.f32 %v7856_v61 }
 0x9c0   : > { %11809 = vtanh.f32 %v9037_v22 }
 0x9c1   : > { %11811 = vtanh.f32 %v7871_v23 }
 0x9c2   : > { %9449 = vrot.lane.b32.xlu1 %v11784_v2, %s12142_s20  ;;  %v11794_v1 = vpop.eup %11793  ;;  %11813 = vtanh.f32 %v8771_v17 }
 0x9c3   : > { %9447 = vrot.lane.b32.xlu0 %v11786_v5, %s12142_s20  ;;  %v11796_v57 = vpop.eup %11795  ;;  %11815 = vtanh.f32 %v7866_v27 }
 0x9c4   : > { %v11798_v63 = vpop.eup %11797  ;;  %11817 = vtanh.f32 %v8766_v6 }
 0x9c5   : > { %v11800_v48 = vpop.eup %11799  ;;  %11819 = vtanh.f32 %v7881_v0 }
 0x9c6   : > { %9325 = vrot.lane.b32.xlu1 %v11788_v7, %s12141_s25  ;;  %v11802_v30 = vpop.eup %11801  ;;  %11821 = vtanh.f32 %v9052_v40 }
 0x9c7   : > { %9323 = vrot.lane.b32.xlu0 %v11790_v13, %s12141_s25  ;;  %v11804_v10 = vpop.eup %11803  ;;  %11823 = vtanh.f32 %v7876_v43 }
 0x9c8   : > { %v9198_v54 = vpop.permute.xlu1 %9197  ;;  %v11806_v2 = vpop.eup %11805  ;;  %11825 = vtanh.f32 %v9047_v32  ;;  %v7911_v32 = vadd.f32 %v17672_v11, %v17528_v58 }
 0x9c9   : > { %v17851_v41 = vsel %vm9511_vm2, %v11792_v38, %v9198_v54  ;;  %v9196_v4 = vpop.permute.xlu0 %9195  ;;  %v11808_v24 = vpop.eup %11807  ;;  %11827 = vtanh.f32 %v8781_v12  ;;  %v8791_v38 = vadd.f32 %v17672_v11, %v17708_v60 }
 0x9ca   : > { %9453 = vrot.lane.b32.xlu1 %v11794_v1, %s12142_s20  ;;  %v17856_v42 = vsel %vm9511_vm2, %v11796_v57, %v9196_v4  ;;  %v11810_v56 = vpop.eup %11809  ;;  %11829 = vtanh.f32 %v7891_v28  ;;  %v8786_v57 = vadd.f32 %v17672_v11, %v17711_v14  ;;  %v7896_v4 = vadd.f32 %v17672_v11, %v17524_v34 }
 0x9cb   : > { %9451 = vrot.lane.b32.xlu0 %v11798_v63, %s12142_s20  ;;  %v11812_v39 = vpop.eup %11811  ;;  %11831 = vtanh.f32 %v8776_v44 }
 0x9cc   : > { %v11814_v22 = vpop.eup %11813  ;;  %11833 = vtanh.f32 %v7886_v35 }
 0x9cd   : > { %v11816_v13 = vpop.eup %11815  ;;  %11835 = vtanh.f32 %v9062_v25  ;;  %v8811_v25 = vadd.f32 %v17672_v11, %v17742_v31 }
 0x9ce   : > { %9329 = vrot.lane.b32.xlu1 %v11800_v48, %s12141_s25  ;;  %v9202_v47 = vpop.permute.xlu1 %9201  ;;  %v11818_v17 = vpop.eup %11817  ;;  %11837 = vtanh.f32 %v9057_v18  ;;  %v9067_v48 = vadd.f32 %v17672_v11, %v17735_v26 }
 0x9cf   : > { %9327 = vrot.lane.b32.xlu0 %v11802_v30, %s12141_s25  ;;  %v17872_v8 = vsel %vm9511_vm2, %v11804_v10, %v9202_v47  ;;  %v9200_v5 = vpop.permute.xlu0 %9199  ;;  %v11820_v1 = vpop.eup %11819  ;;  %11839 = vtanh.f32 %v8791_v38  ;;  %v7906_v10 = vadd.f32 %v17672_v11, %v17531_v19  ;;  %v8796_v47 = vadd.f32 %v17672_v11, %v17729_v15 }
 0x9d0   : > { %v17880_v61 = vsel %vm9511_vm2, %v11808_v24, %v9200_v5  ;;  %v11822_v54 = vpop.eup %11821  ;;  %11841 = vtanh.f32 %v7901_v49  ;;  %v9082_v19 = vadd.f32 %v17672_v11, %v17749_v55  ;;  %v9077_v24 = vadd.f32 %v17672_v11, %v17753_v46 }
 0x9d1   : > { %v11824_v60 = vpop.eup %11823  ;;  %11843 = vtanh.f32 %v8786_v57  ;;  %v8806_v46 = vadd.f32 %v17672_v11, %v17747_v36  ;;  %v9087_v36 = vadd.f32 %v17672_v11, %v17773_v50 }
 0x9d2   : > { %9457 = vrot.lane.b32.xlu1 %v11806_v2, %s12142_s20  ;;  %v9206_v7 = vpop.permute.xlu1 %9205  ;;  %v11826_v40 = vpop.eup %11825  ;;  %11845 = vtanh.f32 %v7896_v4 }
 0x9d3   : > { %9455 = vrot.lane.b32.xlu0 %v11810_v56, %s12142_s20  ;;  %v17886_v23 = vsel %vm9511_vm2, %v11812_v39, %v9206_v7  ;;  %v9204_v51 = vpop.permute.xlu0 %9203  ;;  %v11828_v14 = vpop.eup %11827  ;;  %11847 = vtanh.f32 %v9072_v9 }
 0x9d4   : > { %v17892_v27 = vsel %vm9511_vm2, %v11816_v13, %v9204_v51  ;;  %v11830_v34 = vpop.eup %11829  ;;  %11849 = vtanh.f32 %v9067_v48  ;;  %v9092_v13 = vadd.f32 %v17672_v11, %v17769_v3 }
 0x9d5   : > { %v11832_v30 = vpop.eup %11831  ;;  %11851 = vtanh.f32 %v7911_v32 }
 0x9d6   : > { %9333 = vrot.lane.b32.xlu1 %v11814_v22, %s12141_s25  ;;  %v9210_v6 = vpop.permute.xlu1 %9209  ;;  %v11834_v12 = vpop.eup %11833  ;;  %11853 = vtanh.f32 %v8801_v21 }
 0x9d7   : > { %9331 = vrot.lane.b32.xlu0 %v11818_v17, %s12141_s25  ;;  %v17900_v0 = vsel %vm9511_vm2, %v11820_v1, %v9210_v6  ;;  %v9208_v63 = vpop.permute.xlu0 %9207  ;;  %v11836_v26 = vpop.eup %11835  ;;  %11855 = vtanh.f32 %v7906_v10 }
 0x9d8   : > { %v17908_v43 = vsel %vm9511_vm2, %v11824_v60, %v9208_v63  ;;  %v11838_v44 = vpop.eup %11837  ;;  %11857 = vtanh.f32 %v8796_v47 }
 0x9d9   : > { %v11840_v15 = vpop.eup %11839  ;;  %11859 = vtanh.f32 %v9082_v19 }
 0x9da   : > { %9461 = vrot.lane.b32.xlu1 %v11822_v54, %s12142_s20  ;;  %v11842_v35 = vpop.eup %11841  ;;  %11861 = vtanh.f32 %v9077_v24 }
 0x9db   : > { %9459 = vrot.lane.b32.xlu0 %v11826_v40, %s12142_s20  ;;  %v11844_v56 = vpop.eup %11843  ;;  %11863 = vtanh.f32 %v8811_v25 }
 0x9dc   : > { %v11846_v55 = vpop.eup %11845  ;;  %11865 = vtanh.f32 %v8806_v46  ;;  %v18954_v46 = vld [vmem:[#allocation124_spill] sm:$0xff] }
 0x9dd   : > { %v11848_v7 = vpop.eup %11847  ;;  %11867 = vtanh.f32 %v9092_v13 }
 0x9de   : > { %9337 = vrot.lane.b32.xlu1 %v11828_v14, %s12141_s25  ;;  %v11850_v31 = vpop.eup %11849  ;;  %11869 = vtanh.f32 %v9087_v36  ;;  %v18950_v14 = vld [vmem:[#allocation120_spill] sm:$0xff] }
 0x9df   : > { %9335 = vrot.lane.b32.xlu0 %v11832_v30, %s12141_s25  ;;  %v9214_v28 = vpop.permute.xlu1 %9213  ;;  %v11852_v51 = vpop.eup %11851 }
 0x9e0   : > { %v17924_v58 = vsel %vm9511_vm2, %v11830_v34, %v9214_v28  ;;  %v9212_v2 = vpop.permute.xlu0 %9211  ;;  %v11854_v38 = vpop.eup %11853  ;;  %v18951_v28 = vld [vmem:[#allocation122_spill] sm:$0xff] }
 0x9e1   : > { %v17928_v33 = vsel %vm9511_vm2, %v11834_v12, %v9212_v2  ;;  %v11856_v49 = vpop.eup %11855 }
 0x9e2   : > { %9465 = vrot.lane.b32.xlu1 %v11836_v26, %s12142_s20  ;;  %v11858_v54 = vpop.eup %11857 }
 0x9e3   : > { %9463 = vrot.lane.b32.xlu0 %v11838_v44, %s12142_s20  ;;  %v11860_v60 = vpop.eup %11859  ;;  %v18952_v44 = vld [vmem:[#allocation123_spill] sm:$0xff] }
 0x9e4   : > { %v11862_v50 = vpop.eup %11861 }
 0x9e5   : > { %v9218_v5 = vpop.permute.xlu1 %9217  ;;  %v11864_v40 = vpop.eup %11863 }
 0x9e6   : > { %9341 = vrot.lane.b32.xlu1 %v11840_v15, %s12141_s25  ;;  %v17939_v39 = vsel %vm9511_vm2, %v11842_v35, %v9218_v5  ;;  %v11866_v32 = vpop.eup %11865 }
 0x9e7   : > { %9339 = vrot.lane.b32.xlu0 %v11844_v56, %s12141_s25  ;;  %v9216_v22 = vpop.permute.xlu0 %9215  ;;  %v11868_v21 = vpop.eup %11867  ;;  %v18953_v56 = vld [vmem:[#allocation107_spill] sm:$0xff] }
 0x9e8   : > { %v17946_v18 = vsel %vm9511_vm2, %v11846_v55, %v9216_v22  ;;  %v11870_v10 = vpop.eup %11869 }
 0x9ea   : > { %9469 = vrot.lane.b32.xlu1 %v11848_v7, %s12142_s20 }
 0x9eb   : > { %9467 = vrot.lane.b32.xlu0 %v11850_v31, %s12142_s20  ;;  %v9222_v17 = vpop.permute.xlu1 %9221 }
 0x9ec   : > { %v17956_v1 = vsel %vm9511_vm2, %v11852_v51, %v9222_v17  ;;  %v9220_v6 = vpop.permute.xlu0 %9219 }
 0x9ed   : > { %v17960_v3 = vsel %vm9511_vm2, %v11856_v49, %v9220_v6 }
 0x9ee   : > { %9345 = vrot.lane.b32.xlu1 %v11854_v38, %s12141_s25  ;;  %v18955_v38 = vld [vmem:[#allocation108_spill] sm:$0xff] }
 0x9ef   : > { %9343 = vrot.lane.b32.xlu0 %v11858_v54, %s12141_s25  ;;  %v9290_v57 = vpop.permute.xlu1 %9289  ;;  %v18956_v54 = vld [vmem:[#allocation23_spill] sm:$0xff] }
 0x9f0   : > { %v9288_v11 = vpop.permute.xlu0 %9287  ;;  %v9546_v4 = vsel %vm9544_vm1, %v17418_v45, %v9290_v57 }
 0x9f1   : > { %v9545_v48 = vsel %vm9544_vm1, %v18950_v14, %v9288_v11 }
 0x9f2   : > { %9473 = vrot.lane.b32.xlu1 %v11860_v60, %s12142_s20 }
 0x9f3   : > { %9471 = vrot.lane.b32.xlu0 %v11862_v50, %s12142_s20  ;;  %v9418_v63 = vpop.permute.xlu1 %9417 }
 0x9f4   : > { %v9579_v9 = vsel %vm9577_vm13, %v9546_v4, %v9418_v63  ;;  %v9416_v34 = vpop.permute.xlu0 %9415  ;;  %v18957_v63 = vld [vmem:[#allocation125_spill] sm:$0xff] }
 0x9f5   : > { %9612 = vst.msk [vmem:[%s17967_s11 + $0x8] sm:$0xff] %vm9610_vm15, %v9579_v9  ;;  %v9578_v30 = vsel %vm9577_vm13, %v9545_v48, %v9416_v34  ;;  %v18958_v48 = vld [vmem:[#allocation110_spill] sm:$0xff] }
 0x9f6   : > { %9349 = vrot.lane.b32.xlu1 %v11864_v40, %s12141_s25  ;;  %9611 = vst.msk [vmem:[%s17967_s11] sm:$0xff] %vm9610_vm15, %v9578_v30 }
 0x9f7   : > { %9347 = vrot.lane.b32.xlu0 %v11866_v32, %s12141_s25  ;;  %v9294_v45 = vpop.permute.xlu1 %9293 }
 0x9f8   : > { %v9292_v12 = vpop.permute.xlu0 %9291  ;;  %v9548_v26 = vsel %vm9544_vm1, %v18951_v28, %v9294_v45 }
 0x9f9   : > { %v9547_v19 = vsel %vm9544_vm1, %v18952_v44, %v9292_v12 }
 0x9fa   : > { %9477 = vrot.lane.b32.xlu1 %v11868_v21, %s12142_s20 }
 0x9fb   : > { %9475 = vrot.lane.b32.xlu0 %v11870_v10, %s12142_s20  ;;  %v9422_v47 = vpop.permute.xlu1 %9421 }
 0x9fc   : > { %v9581_v2 = vsel %vm9577_vm13, %v9548_v26, %v9422_v47  ;;  %v9420_v15 = vpop.permute.xlu0 %9419 }
 0x9fd   : > { %9614 = vst.msk [vmem:[%s17967_s11 + $0x18] sm:$0xff] %vm9610_vm15, %v9581_v2  ;;  %v9580_v24 = vsel %vm9577_vm13, %v9547_v19, %v9420_v15 }
 0x9fe   : > { %9613 = vst.msk [vmem:[%s17967_s11 + $0x10] sm:$0xff] %vm9610_vm15, %v9580_v24 }
 0x9ff   : > { %v9298_v35 = vpop.permute.xlu1 %9297 }
 0xa00   : > { %v9296_v5 = vpop.permute.xlu0 %9295  ;;  %v9550_v25 = vsel %vm9544_vm1, %v18953_v56, %v9298_v35 }
 0xa01   : > { %v9549_v22 = vsel %vm9544_vm1, %v18954_v46, %v9296_v5 }
 0xa03   : > { %v9426_v55 = vpop.permute.xlu1 %9425 }
 0xa04   : > { %v9583_v7 = vsel %vm9577_vm13, %v9550_v25, %v9426_v55  ;;  %v9424_v31 = vpop.permute.xlu0 %9423 }
 0xa05   : > { %9616 = vst.msk [vmem:[%s17967_s11 + $0x28] sm:$0xff] %vm9610_vm15, %v9583_v7  ;;  %v9582_v13 = vsel %vm9577_vm13, %v9549_v22, %v9424_v31 }
 0xa06   : > { %9615 = vst.msk [vmem:[%s17967_s11 + $0x20] sm:$0xff] %vm9610_vm15, %v9582_v13 }
 0xa07   : > { %v9302_v51 = vpop.permute.xlu1 %9301 }
 0xa08   : > { %v9300_v17 = vpop.permute.xlu0 %9299  ;;  %v9552_v36 = vsel %vm9544_vm1, %v18955_v38, %v9302_v51 }
 0xa09   : > { %v9551_v57 = vsel %vm9544_vm1, %v18956_v54, %v9300_v17 }
 0xa0b   : > { %v9430_v49 = vpop.permute.xlu1 %9429 }
 0xa0c   : > { %v9585_v6 = vsel %vm9577_vm13, %v9552_v36, %v9430_v49 }
 0xa0d   : > { %9618 = vst.msk [vmem:[%s17967_s11 + $0x38] sm:$0xff] %vm9610_vm15, %v9585_v6  ;;  %v9428_v60 = vpop.permute.xlu0 %9427 }
 0xa0e   : > { %v9584_v11 = vsel %vm9577_vm13, %v9551_v57, %v9428_v60 }
 0xa0f   : > { %9617 = vst.msk [vmem:[%s17967_s11 + $0x30] sm:$0xff] %vm9610_vm15, %v9584_v11 }
 0xa10   : > { %v9306_v50 = vpop.permute.xlu1 %9305 }
 0xa11   : > { %v9304_v4 = vpop.permute.xlu0 %9303  ;;  %v9554_v40 = vsel %vm9544_vm1, %v18957_v63, %v9306_v50 }
 0xa12   : > { %v9553_v34 = vsel %vm9544_vm1, %v18958_v48, %v9304_v4 }
 0xa14   : > { %v9434_v9 = vpop.permute.xlu1 %9433 }
 0xa15   : > { %v9587_v14 = vsel %vm9577_vm13, %v9554_v40, %v9434_v9  ;;  %v9432_v32 = vpop.permute.xlu0 %9431 }
 0xa16   : > { %9620 = vst.msk [vmem:[%s17967_s11 + $0x48] sm:$0xff] %vm9610_vm15, %v9587_v14  ;;  %v9586_v30 = vsel %vm9577_vm13, %v9553_v34, %v9432_v32 }
 0xa17   : > { %9619 = vst.msk [vmem:[%s17967_s11 + $0x40] sm:$0xff] %vm9610_vm15, %v9586_v30 }
 0xa18   : > { %v9310_v45 = vpop.permute.xlu1 %9309 }
 0xa19   : > { %v9308_v21 = vpop.permute.xlu0 %9307  ;;  %v9556_v12 = vsel %vm9544_vm1, %v17759_v53, %v9310_v45 }
 0xa1a   : > { %v9555_v26 = vsel %vm9544_vm1, %v17764_v37, %v9308_v21 }
 0xa1c   : > { %v9438_v10 = vpop.permute.xlu1 %9437 }
 0xa1d   : > { %v9589_v28 = vsel %vm9577_vm13, %v9556_v12, %v9438_v10  ;;  %v9436_v47 = vpop.permute.xlu0 %9435 }
 0xa1e   : > { %9622 = vst.msk [vmem:[%s17967_s11 + $0x58] sm:$0xff] %vm9610_vm15, %v9589_v28  ;;  %v9588_v2 = vsel %vm9577_vm13, %v9555_v26, %v9436_v47 }
 0xa1f   : > { %9621 = vst.msk [vmem:[%s17967_s11 + $0x50] sm:$0xff] %vm9610_vm15, %v9588_v2 }
 0xa20   : > { %v9314_v44 = vpop.permute.xlu1 %9313 }
 0xa21   : > { %v9312_v19 = vpop.permute.xlu0 %9311  ;;  %v9558_v53 = vsel %vm9544_vm1, %v17782_v59, %v9314_v44 }
 0xa22   : > { %v9557_v37 = vsel %vm9544_vm1, %v17788_v62, %v9312_v19 }
 0xa24   : > { %v9442_v15 = vpop.permute.xlu1 %9441 }
 0xa25   : > { %v9591_v24 = vsel %vm9577_vm13, %v9558_v53, %v9442_v15  ;;  %v9440_v35 = vpop.permute.xlu0 %9439 }
 0xa26   : > { %9624 = vst.msk [vmem:[%s17967_s11 + $0x68] sm:$0xff] %vm9610_vm15, %v9591_v24  ;;  %v9590_v5 = vsel %vm9577_vm13, %v9557_v37, %v9440_v35 }
 0xa27   : > { %9623 = vst.msk [vmem:[%s17967_s11 + $0x60] sm:$0xff] %vm9610_vm15, %v9590_v5 }
 0xa28   : > { %v9318_v56 = vpop.permute.xlu1 %9317 }
 0xa29   : > { %v9316_v25 = vpop.permute.xlu0 %9315  ;;  %v9560_v59 = vsel %vm9544_vm1, %v17794_v20, %v9318_v56 }
 0xa2a   : > { %v9559_v62 = vsel %vm9544_vm1, %v17800_v16, %v9316_v25 }
 0xa2c   : > { %v9446_v55 = vpop.permute.xlu1 %9445 }
 0xa2d   : > { %v9593_v7 = vsel %vm9577_vm13, %v9560_v59, %v9446_v55  ;;  %v9444_v46 = vpop.permute.xlu0 %9443 }
 0xa2e   : > { %9626 = vst.msk [vmem:[%s17967_s11 + $0x78] sm:$0xff] %vm9610_vm15, %v9593_v7  ;;  %v9592_v22 = vsel %vm9577_vm13, %v9559_v62, %v9444_v46 }
 0xa2f   : > { %9625 = vst.msk [vmem:[%s17967_s11 + $0x70] sm:$0xff] %vm9610_vm15, %v9592_v22 }
 0xa30   : > { %v9322_v31 = vpop.permute.xlu1 %9321 }
 0xa31   : > { %v9320_v13 = vpop.permute.xlu0 %9319  ;;  %v9562_v20 = vsel %vm9544_vm1, %v17806_v29, %v9322_v31 }
 0xa32   : > { %v9561_v16 = vsel %vm9544_vm1, %v17814_v52, %v9320_v13 }
 0xa34   : > { %v9450_v51 = vpop.permute.xlu1 %9449 }
 0xa35   : > { %v9595_v17 = vsel %vm9577_vm13, %v9562_v20, %v9450_v51  ;;  %v9448_v38 = vpop.permute.xlu0 %9447 }
 0xa36   : > { %9628 = vst.msk [vmem:[%s17967_s11 + $0x88] sm:$0xff] %vm9610_vm15, %v9595_v17  ;;  %v9594_v36 = vsel %vm9577_vm13, %v9561_v16, %v9448_v38 }
 0xa37   : > { %9627 = vst.msk [vmem:[%s17967_s11 + $0x80] sm:$0xff] %vm9610_vm15, %v9594_v36 }
 0xa38   : > { %v9326_v49 = vpop.permute.xlu1 %9325 }
 0xa39   : > { %v9324_v6 = vpop.permute.xlu0 %9323  ;;  %v9564_v29 = vsel %vm9544_vm1, %v17851_v41, %v9326_v49 }
 0xa3a   : > { %v9563_v52 = vsel %vm9544_vm1, %v17856_v42, %v9324_v6 }
 0xa3c   : > { %v9454_v54 = vpop.permute.xlu1 %9453 }
 0xa3d   : > { %v9597_v57 = vsel %vm9577_vm13, %v9564_v29, %v9454_v54  ;;  %v9452_v60 = vpop.permute.xlu0 %9451 }
 0xa3e   : > { %9630 = vst.msk [vmem:[%s17967_s11 + $0x98] sm:$0xff] %vm9610_vm15, %v9597_v57  ;;  %v9596_v11 = vsel %vm9577_vm13, %v9563_v52, %v9452_v60 }
 0xa3f   : > { %9629 = vst.msk [vmem:[%s17967_s11 + $0x90] sm:$0xff] %vm9610_vm15, %v9596_v11 }
 0xa40   : > { %v9330_v50 = vpop.permute.xlu1 %9329 }
 0xa41   : > { %v9328_v4 = vpop.permute.xlu0 %9327  ;;  %v9566_v41 = vsel %vm9544_vm1, %v17872_v8, %v9330_v50 }
 0xa42   : > { %v9565_v42 = vsel %vm9544_vm1, %v17880_v61, %v9328_v4 }
 0xa44   : > { %v9458_v63 = vpop.permute.xlu1 %9457 }
 0xa45   : > { %v9599_v40 = vsel %vm9577_vm13, %v9566_v41, %v9458_v63  ;;  %v9456_v9 = vpop.permute.xlu0 %9455 }
 0xa46   : > { %9632 = vst.msk [vmem:[%s17967_s11 + $0xa8] sm:$0xff] %vm9610_vm15, %v9599_v40  ;;  %v9598_v14 = vsel %vm9577_vm13, %v9565_v42, %v9456_v9 }
 0xa47   : > { %9631 = vst.msk [vmem:[%s17967_s11 + $0xa0] sm:$0xff] %vm9610_vm15, %v9598_v14 }
 0xa48   : > { %v9334_v48 = vpop.permute.xlu1 %9333 }
 0xa49   : > { %v9332_v34 = vpop.permute.xlu0 %9331  ;;  %v9568_v8 = vsel %vm9544_vm1, %v17886_v23, %v9334_v48 }
 0xa4a   : > { %v9567_v61 = vsel %vm9544_vm1, %v17892_v27, %v9332_v34 }
 0xa4c   : > { %v9462_v32 = vpop.permute.xlu1 %9461 }
 0xa4d   : > { %v9601_v30 = vsel %vm9577_vm13, %v9568_v8, %v9462_v32  ;;  %v9460_v45 = vpop.permute.xlu0 %9459 }
 0xa4e   : > { %9634 = vst.msk [vmem:[%s17967_s11 + $0xb8] sm:$0xff] %vm9610_vm15, %v9601_v30  ;;  %v9600_v21 = vsel %vm9577_vm13, %v9567_v61, %v9460_v45 }
 0xa4f   : > { %9633 = vst.msk [vmem:[%s17967_s11 + $0xb0] sm:$0xff] %vm9610_vm15, %v9600_v21 }
 0xa50   : > { %v9338_v12 = vpop.permute.xlu1 %9337 }
 0xa51   : > { %v9336_v10 = vpop.permute.xlu0 %9335  ;;  %v9570_v23 = vsel %vm9544_vm1, %v17900_v0, %v9338_v12 }
 0xa52   : > { %v9569_v27 = vsel %vm9544_vm1, %v17908_v43, %v9336_v10 }
 0xa54   : > { %v9466_v28 = vpop.permute.xlu1 %9465 }
 0xa55   : > { %v9603_v26 = vsel %vm9577_vm13, %v9570_v23, %v9466_v28  ;;  %v9464_v47 = vpop.permute.xlu0 %9463 }
 0xa56   : > { %9636 = vst.msk [vmem:[%s17967_s11 + $0xc8] sm:$0xff] %vm9610_vm15, %v9603_v26  ;;  %v9602_v2 = vsel %vm9577_vm13, %v9569_v27, %v9464_v47 }
 0xa57   : > { %9635 = vst.msk [vmem:[%s17967_s11 + $0xc0] sm:$0xff] %vm9610_vm15, %v9602_v2 }
 0xa58   : > { %v9342_v44 = vpop.permute.xlu1 %9341 }
 0xa59   : > { %v9340_v19 = vpop.permute.xlu0 %9339  ;;  %v9572_v0 = vsel %vm9544_vm1, %v17924_v58, %v9342_v44 }
 0xa5a   : > { %v9571_v43 = vsel %vm9544_vm1, %v17928_v33, %v9340_v19 }
 0xa5c   : > { %v9470_v53 = vpop.permute.xlu1 %9469 }
 0xa5d   : > { %v9605_v15 = vsel %vm9577_vm13, %v9572_v0, %v9470_v53  ;;  %v9468_v24 = vpop.permute.xlu0 %9467 }
 0xa5e   : > { %9638 = vst.msk [vmem:[%s17967_s11 + $0xd8] sm:$0xff] %vm9610_vm15, %v9605_v15  ;;  %v9604_v37 = vsel %vm9577_vm13, %v9571_v43, %v9468_v24 }
 0xa5f   : > { %9637 = vst.msk [vmem:[%s17967_s11 + $0xd0] sm:$0xff] %vm9610_vm15, %v9604_v37 }
 0xa60   : > { %v9346_v35 = vpop.permute.xlu1 %9345 }
 0xa61   : > { %v9344_v5 = vpop.permute.xlu0 %9343  ;;  %v9574_v58 = vsel %vm9544_vm1, %v17939_v39, %v9346_v35 }
 0xa62   : > { %v9573_v33 = vsel %vm9544_vm1, %v17946_v18, %v9344_v5 }
 0xa64   : > { %v9474_v56 = vpop.permute.xlu1 %9473 }
 0xa65   : > { %v9607_v25 = vsel %vm9577_vm13, %v9574_v58, %v9474_v56  ;;  %v9472_v59 = vpop.permute.xlu0 %9471 }
 0xa66   : > { %9640 = vst.msk [vmem:[%s17967_s11 + $0xe8] sm:$0xff] %vm9610_vm15, %v9607_v25  ;;  %v9606_v55 = vsel %vm9577_vm13, %v9573_v33, %v9472_v59 }
 0xa67   : > { %9639 = vst.msk [vmem:[%s17967_s11 + $0xe0] sm:$0xff] %vm9610_vm15, %v9606_v55 }
 0xa68   : > { %v9350_v7 = vpop.permute.xlu1 %9349 }
 0xa69   : > { %v9348_v62 = vpop.permute.xlu0 %9347  ;;  %v9576_v46 = vsel %vm9544_vm1, %v17956_v1, %v9350_v7 }
 0xa6a   : > { %v9575_v31 = vsel %vm9544_vm1, %v17960_v3, %v9348_v62 }
 0xa6c   : > { %v9478_v39 = vpop.permute.xlu1 %9477 }
 0xa6d   : > { %v9609_v22 = vsel %vm9577_vm13, %v9576_v46, %v9478_v39  ;;  %v9476_v18 = vpop.permute.xlu0 %9475 }
 0xa6e   : > { %9642 = vst.msk [vmem:[%s17967_s11 + $0xf8] sm:$0xff] %vm9610_vm15, %v9609_v22  ;;  %v9608_v13 = vsel %vm9577_vm13, %v9575_v31, %v9476_v18 }
 0xa6f   : > { %9641 = vst.msk [vmem:[%s17967_s11 + $0xf0] sm:$0xff] %vm9610_vm15, %v9608_v13 }
 0xa70 PF: > { %p24_p4 = scmp.ge.s32.totalorder %s12379_s16, 4   ;;  %s18959_s17 = smov %s12109_s18 }
 0xa71   : > { %s18960_s18 = smov %s12113_s19  ;;  %s18961_s19 = smov %s12391_s9 }
 0xa72   : > { %s18962_s20 = smov %s12379_s16  ;;  %26 = sbr.rel (!%p24_p4) target bundleno = 10 (0xa), region = 143 }
 0xa79   :  { %9664 = vsyncpa [#allocation3], 1 }
 0xa7a   :  { %9666 = vsyncpa [#allocation3 + $0x1], 1 }
 0xa7b   :  { %9667 = vsyncpa [#allocation5], 1 }
 0xa7c   :  { %9668 = vsyncpa [#allocation8], 1 }
 0xa7d   :  { %9669 = vsyncpa [#allocation11], 1 }

</bundles_post_ra>
